<compile_context>
chip_gen: v7x
topology: tpu7x:2x2x1
jax: 0.10.0
libtpu: 0.0.40
codegen_flags: <defaults>
</compile_context>

<pallas_src>
import jax
import jax.numpy as jnp
import numpy as np
from jax.experimental import pallas as pl
from jax.experimental.pallas import tpu as pltpu


# ------------------------------ fused kernel --------------------------------

def _fused_forward_kernel(x_ref, w1_ref, b1_ref, w2_ref, b2_ref,
                          we1_ref, bf1_ref, wf2_ref, bf2_ref,
                          o_ref,
                          xp_ref, col1_ref, h1_ref, p1_ref, col2_ref, h2_ref,
                          f2_ref):
    """One grid step == one batch block. All intermediates live in VMEM scratch."""
    NB, H, W, Cin = x_ref.shape
    C1 = b1_ref.shape[1]
    C2 = b2_ref.shape[1]
    Ho, Wo = H // 2, W // 2             # after maxpool1
    H2, W2 = Ho // 2, Wo // 2           # after maxpool2
    M1 = NB * H * W
    M2 = NB * Ho * Wo

    # ---- pad input ('same' conv): zero ONLY the 1-wide halo ------------------
    xp_ref[:, 0:1, :, :] = jnp.zeros((NB, 1, W + 2, Cin), jnp.float32)
    xp_ref[:, H + 1:H + 2, :, :] = jnp.zeros((NB, 1, W + 2, Cin), jnp.float32)
    xp_ref[:, :, 0:1, :] = jnp.zeros((NB, H + 2, 1, Cin), jnp.float32)
    xp_ref[:, :, W + 1:W + 2, :] = jnp.zeros((NB, H + 2, 1, Cin), jnp.float32)
    xp_ref[:, 1:H + 1, 1:W + 1, :] = x_ref[...]

    # ---- conv1 3x3/same: explicit im2col in VMEM, then ONE matmul ------------
    for t in range(9):
        ky, kx = t // 3, t % 3
        col1_ref[:, t * Cin:(t + 1) * Cin] = (
            xp_ref[:, ky:ky + H, kx:kx + W, :].reshape(M1, Cin))
    a1 = jnp.dot(col1_ref[...], w1_ref[...], preferred_element_type=jnp.float32)
    a1 = jnp.maximum(a1 + b1_ref[...], 0.0)                      # (M1, C1)

    # ---- maxpool 2x2/2: H-step via split+max, W-step via strided reads -------
    h1_ref[...] = jnp.max(a1.reshape(NB, Ho, 2, W, C1), axis=2)
    pool1 = jnp.maximum(h1_ref[:, :, pl.ds(0, Wo, stride=2), :],
                        h1_ref[:, :, pl.ds(1, Wo, stride=2), :])  # (NB, Ho, Wo, C1)

    # ---- pad pooled map for conv2 (halo-only zero) ----------------------------
    p1_ref[:, 0:1, :, :] = jnp.zeros((NB, 1, Wo + 2, C1), jnp.float32)
    p1_ref[:, Ho + 1:Ho + 2, :, :] = jnp.zeros((NB, 1, Wo + 2, C1), jnp.float32)
    p1_ref[:, :, 0:1, :] = jnp.zeros((NB, Ho + 2, 1, C1), jnp.float32)
    p1_ref[:, :, Wo + 1:Wo + 2, :] = jnp.zeros((NB, Ho + 2, 1, C1), jnp.float32)
    p1_ref[:, 1:Ho + 1, 1:Wo + 1, :] = pool1

    # ---- conv2 3x3/same: im2col + ONE matmul ----------------------------------
    for t in range(9):
        ky, kx = t // 3, t % 3
        col2_ref[:, t * C1:(t + 1) * C1] = (
            p1_ref[:, ky:ky + Ho, kx:kx + Wo, :].reshape(M2, C1))
    a2 = jnp.dot(col2_ref[...], w2_ref[...], preferred_element_type=jnp.float32)
    a2 = jnp.maximum(a2 + b2_ref[...], 0.0)                      # (M2, C2)

    # ---- maxpool 2x2/2 ---------------------------------------------------------
    h2_ref[...] = jnp.max(a2.reshape(NB, H2, 2, Wo, C2), axis=2)
    pool2 = jnp.maximum(h2_ref[:, :, pl.ds(0, W2, stride=2), :],
                        h2_ref[:, :, pl.ds(1, W2, stride=2), :])  # (NB, H2, W2, C2)

    # ---- flatten (h, w, c) into a lane-contiguous row buffer ------------------
    # (Small masked stores instead of a lane-dim-changing value reshape.)
    for hh in range(H2):
        for ww in range(W2):
            j = hh * W2 + ww
            f2_ref[:, j * C2:(j + 1) * C2] = pool2[:, hh, ww, :]

    # ---- fc1: avgpool(2x2) + NCHW flatten folded into we1; ONE matmul ---------
    fc1 = jnp.dot(f2_ref[...], we1_ref[...], preferred_element_type=jnp.float32)
    fc1 = jnp.maximum(fc1 + bf1_ref[...], 0.0)
    # TODO(synk): nn.Dropout is identity in eval mode; training-mode stochastic dropout not implemented.

    # ---- fc2 -------------------------------------------------------------------
    out = jnp.dot(fc1, wf2_ref[...], preferred_element_type=jnp.float32) + bf2_ref[...]
    o_ref[0] = out


# ------------------------------ wrapper --------------------------------------

def feature_extractor_forward(x_nchw, params, num_blocks=1):
    """num_blocks=1 (default): whole batch folded into matmul M (best on v5e/v6e).
    num_blocks=2 on v7x shards the batch across the two TensorCores."""
    N, Cin, H, W = x_nchw.shape
    assert H % 8 == 0 and W % 8 == 0, "kernel assumes spatial dims divisible by 8"
    assert N % num_blocks == 0
    NB = N // num_blocks

    C1 = params["conv1_b"].shape[0]
    C2 = params["conv2_b"].shape[0]
    NH1 = params["fc1_b"].shape[0]
    NO = params["fc2_b"].shape[0]
    Ho, Wo = H // 2, W // 2
    H2, W2 = Ho // 2, Wo // 2

    # input to channels-last (one-time boundary layout conversion)
    x_nhwc = jnp.transpose(x_nchw, (0, 2, 3, 1))

    # conv weights: OIHW -> (9*Cin, Cout), rows ordered (ky, kx, cin) = im2col order
    w1 = jnp.transpose(params["conv1_w"], (2, 3, 1, 0)).reshape(9 * Cin, C1)
    w2 = jnp.transpose(params["conv2_w"], (2, 3, 1, 0)).reshape(9 * C1, C2)
    b1 = params["conv1_b"].reshape(1, C1)
    b2 = params["conv2_b"].reshape(1, C2)

    # Fold AdaptiveAvgPool2d((2,2)) + PyTorch NCHW flatten into fc1 weights:
    #   we1[(h*W2+w)*C2 + c, :] = (1/cell) * fc1_w[:, c*4 + (h//cell_h)*2 + (w//cell_w)]
    wt = params["fc1_w"].T.reshape(C2, 2, 2, NH1)                      # (c, ho, wo, out)
    wt = jnp.repeat(jnp.repeat(wt, H2 // 2, axis=1), W2 // 2, axis=2)  # (c, H2, W2, out)
    scale = 1.0 / ((H2 // 2) * (W2 // 2))
    we1 = scale * jnp.transpose(wt, (1, 2, 0, 3)).reshape(H2 * W2 * C2, NH1)
    bf1 = params["fc1_b"].reshape(1, NH1)
    wf2 = params["fc2_w"].T                                            # (NH1, NO)
    bf2 = params["fc2_b"].reshape(1, NO)

    out = pl.pallas_call(
        _fused_forward_kernel,
        out_shape=jax.ShapeDtypeStruct((num_blocks, NB, NO), jnp.float32),
        grid=(num_blocks,),
        in_specs=[
            pl.BlockSpec((NB, H, W, Cin), lambda i: (i, 0, 0, 0)),   # batch block
            pl.BlockSpec((9 * Cin, C1), lambda i: (0, 0)),           # weights stay resident
            pl.BlockSpec((1, C1), lambda i: (0, 0)),
            pl.BlockSpec((9 * C1, C2), lambda i: (0, 0)),
            pl.BlockSpec((1, C2), lambda i: (0, 0)),
            pl.BlockSpec((H2 * W2 * C2, NH1), lambda i: (0, 0)),
            pl.BlockSpec((1, NH1), lambda i: (0, 0)),
            pl.BlockSpec((NH1, NO), lambda i: (0, 0)),
            pl.BlockSpec((1, NO), lambda i: (0, 0)),
        ],
        out_specs=pl.BlockSpec((1, NB, NO), lambda i: (i, 0, 0)),
        scratch_shapes=[
            pltpu.VMEM((NB, H + 2, W + 2, Cin), jnp.float32),     # padded input
            pltpu.VMEM((NB * H * W, 9 * Cin), jnp.float32),       # im2col for conv1
            pltpu.VMEM((NB, Ho, W, C1), jnp.float32),             # H-pooled conv1
            pltpu.VMEM((NB, Ho + 2, Wo + 2, C1), jnp.float32),    # padded pool1
            pltpu.VMEM((NB * Ho * Wo, 9 * C1), jnp.float32),      # im2col for conv2
            pltpu.VMEM((NB, H2, Wo, C2), jnp.float32),            # H-pooled conv2
            pltpu.VMEM((NB, H2 * W2 * C2), jnp.float32),          # flattened pre-FC features
        ],
        compiler_params=pltpu.CompilerParams(
            dimension_semantics=("parallel",)),
    )(x_nhwc, w1, b1, w2, b2, we1, bf1, wf2, bf2)
    return out.reshape(N, NO)


def init_params(key):
    ks = jax.random.split(key, 8)

    def rnd(k, shape, scale=0.1):
        return jax.random.normal(k, shape, jnp.float32) * scale

    return {
        # PyTorch layouts: conv weights OIHW, linear weights (out, in)
        "conv1_w": rnd(ks[0], (8, 3, 3, 3)),
        "conv1_b": rnd(ks[1], (8,)),
        "conv2_w": rnd(ks[2], (16, 8, 3, 3)),
        "conv2_b": rnd(ks[3], (16,)),
        "fc1_w": rnd(ks[4], (32, 64)),
        "fc1_b": rnd(ks[5], (32,)),
        "fc2_w": rnd(ks[6], (32, 32)),
        "fc2_b": rnd(ks[7], (32,)),
    }


# ------------------------------ pure-JAX ref ---------------------------------

def reference_forward(x_nchw, params):
    def conv(x, w, b):
        y = jax.lax.conv_general_dilated(
            x, w, (1, 1), ((1, 1), (1, 1)),
            dimension_numbers=("NCHW", "OIHW", "NCHW"))
        return jax.nn.relu(y + b[None, :, None, None])

    def pool(x, op):
        N, C, H, W = x.shape
        xr = x.reshape(N, C, H // 2, 2, W // 2, 2)
        return xr.max(axis=(3, 5)) if op == "max" else xr.mean(axis=(3, 5))

    x = conv(x_nchw, params["conv1_w"], params["conv1_b"])
    x = pool(x, "max")
    x = conv(x, params["conv2_w"], params["conv2_b"])
    x = pool(x, "max")
    x = pool(x, "avg")          # AdaptiveAvgPool2d((2,2)) on a 4x4 map
    x = x.reshape(x.shape[0], -1)
    h = jax.nn.relu(x @ params["fc1_w"].T + params["fc1_b"])
    return h @ params["fc2_w"].T + params["fc2_b"]


# ---------------------------------- main --------------------------------------

if __name__ == "__main__":
    key = jax.random.PRNGKey(0)
    k_x, k_p = jax.random.split(key)

    # PyTorch-style NCHW input (batch=2, channels=3, 16x16 spatial)
    x = jax.random.normal(k_x, (2, 3, 16, 16), jnp.float32)
    params = init_params(k_p)

    fwd = jax.jit(feature_extractor_forward)
    out = jax.block_until_ready(fwd(x, params))

    ref = jax.block_until_ready(reference_forward(x, params))
    assert out.shape == (2, 32), out.shape
    np.testing.assert_allclose(np.asarray(out), np.asarray(ref), rtol=1e-4, atol=1e-4)

    print("KERNEL_OK")
</pallas_src>

<mosaic_0001>
module attributes {stable_mosaic.version = 11 : i64} {
  func.func @_fused_forward_kernel(%arg0: i32, %arg1: memref<2x16x16x3xf32, #tpu.memory_space<vmem>>, %arg2: memref<27x8xf32, #tpu.memory_space<vmem>>, %arg3: memref<1x8xf32, #tpu.memory_space<vmem>>, %arg4: memref<72x16xf32, #tpu.memory_space<vmem>>, %arg5: memref<1x16xf32, #tpu.memory_space<vmem>>, %arg6: memref<256x32xf32, #tpu.memory_space<vmem>>, %arg7: memref<1x32xf32, #tpu.memory_space<vmem>>, %arg8: memref<32x32xf32, #tpu.memory_space<vmem>>, %arg9: memref<1x32xf32, #tpu.memory_space<vmem>>, %arg10: memref<1x2x32xf32, #tpu.memory_space<vmem>>, %arg11: memref<2x18x18x3xf32, #tpu.memory_space<vmem>>, %arg12: memref<512x27xf32, #tpu.memory_space<vmem>>, %arg13: memref<2x8x16x8xf32, #tpu.memory_space<vmem>>, %arg14: memref<2x10x10x8xf32, #tpu.memory_space<vmem>>, %arg15: memref<128x72xf32, #tpu.memory_space<vmem>>, %arg16: memref<2x4x8x16xf32, #tpu.memory_space<vmem>>, %arg17: memref<2x256xf32, #tpu.memory_space<vmem>>) attributes {dimension_semantics = [#tpu.dimension_semantics<parallel>], iteration_bounds = array<i64: 1>, scalar_prefetch = 0 : i64, scratch_operands = 7 : i64, tpu.core_type = #tpu.core_type<tc>, window_params = [{transform_indices = @transform_0, window_bounds = array<i64: 2, 16, 16, 3>}, {pipeline_mode = #tpu.pipeline_mode<synchronous>, transform_indices = @transform_1, window_bounds = array<i64: 27, 8>}, {pipeline_mode = #tpu.pipeline_mode<synchronous>, transform_indices = @transform_2, window_bounds = array<i64: 1, 8>}, {pipeline_mode = #tpu.pipeline_mode<synchronous>, transform_indices = @transform_3, window_bounds = array<i64: 72, 16>}, {pipeline_mode = #tpu.pipeline_mode<synchronous>, transform_indices = @transform_4, window_bounds = array<i64: 1, 16>}, {pipeline_mode = #tpu.pipeline_mode<synchronous>, transform_indices = @transform_5, window_bounds = array<i64: 256, 32>}, {pipeline_mode = #tpu.pipeline_mode<synchronous>, transform_indices = @transform_6, window_bounds = array<i64: 1, 32>}, {pipeline_mode = #tpu.pipeline_mode<synchronous>, transform_indices = @transform_7, window_bounds = array<i64: 32, 32>}, {pipeline_mode = #tpu.pipeline_mode<synchronous>, transform_indices = @transform_8, window_bounds = array<i64: 1, 32>}, {transform_indices = @transform_9, window_bounds = array<i64: 1, 2, 32>}]} {
    %cst = arith.constant 0.000000e+00 : f32
    %0 = vector.broadcast %cst : f32 to vector<2x1x18x3xf32>
    %c0 = arith.constant 0 : index
    %c0_0 = arith.constant 0 : index
    %c0_1 = arith.constant 0 : index
    %c0_2 = arith.constant 0 : index
    %1 = vector.load %arg11[%c0, %c0_0, %c0_1, %c0_2] : memref<2x18x18x3xf32, #tpu.memory_space<vmem>>, vector<2x1x18x3xf32>
    tpu.vector_store %arg11[%c0, %c0_0, %c0_1, %c0_2], %0 {strides = array<i32>} : memref<2x18x18x3xf32, #tpu.memory_space<vmem>>, vector<2x1x18x3xf32>,
    %cst_3 = arith.constant 0.000000e+00 : f32
    %2 = vector.broadcast %cst_3 : f32 to vector<2x1x18x3xf32>
    %c0_4 = arith.constant 0 : index
    %c17 = arith.constant 17 : index
    %c0_5 = arith.constant 0 : index
    %c0_6 = arith.constant 0 : index
    %3 = vector.load %arg11[%c0_4, %c17, %c0_5, %c0_6] : memref<2x18x18x3xf32, #tpu.memory_space<vmem>>, vector<2x1x18x3xf32>
    tpu.vector_store %arg11[%c0_4, %c17, %c0_5, %c0_6], %2 {strides = array<i32>} : memref<2x18x18x3xf32, #tpu.memory_space<vmem>>, vector<2x1x18x3xf32>,
    %cst_7 = arith.constant 0.000000e+00 : f32
    %4 = vector.broadcast %cst_7 : f32 to vector<2x18x1x3xf32>
    %c0_8 = arith.constant 0 : index
    %c0_9 = arith.constant 0 : index
    %c0_10 = arith.constant 0 : index
    %c0_11 = arith.constant 0 : index
    %5 = vector.load %arg11[%c0_8, %c0_9, %c0_10, %c0_11] : memref<2x18x18x3xf32, #tpu.memory_space<vmem>>, vector<2x18x1x3xf32>
    tpu.vector_store %arg11[%c0_8, %c0_9, %c0_10, %c0_11], %4 {strides = array<i32>} : memref<2x18x18x3xf32, #tpu.memory_space<vmem>>, vector<2x18x1x3xf32>,
    %cst_12 = arith.constant 0.000000e+00 : f32
    %6 = vector.broadcast %cst_12 : f32 to vector<2x18x1x3xf32>
    %c0_13 = arith.constant 0 : index
    %c0_14 = arith.constant 0 : index
    %c17_15 = arith.constant 17 : index
    %c0_16 = arith.constant 0 : index
    %7 = vector.load %arg11[%c0_13, %c0_14, %c17_15, %c0_16] : memref<2x18x18x3xf32, #tpu.memory_space<vmem>>, vector<2x18x1x3xf32>
    tpu.vector_store %arg11[%c0_13, %c0_14, %c17_15, %c0_16], %6 {strides = array<i32>} : memref<2x18x18x3xf32, #tpu.memory_space<vmem>>, vector<2x18x1x3xf32>,
    %c0_17 = arith.constant 0 : index
    %c0_18 = arith.constant 0 : index
    %c0_19 = arith.constant 0 : index
    %c0_20 = arith.constant 0 : index
    %8 = vector.load %arg1[%c0_17, %c0_18, %c0_19, %c0_20] : memref<2x16x16x3xf32, #tpu.memory_space<vmem>>, vector<2x16x16x3xf32>
    %c0_21 = arith.constant 0 : index
    %c1 = arith.constant 1 : index
    %c1_22 = arith.constant 1 : index
    %c0_23 = arith.constant 0 : index
    %9 = vector.load %arg11[%c0_21, %c1, %c1_22, %c0_23] : memref<2x18x18x3xf32, #tpu.memory_space<vmem>>, vector<2x16x16x3xf32>
    tpu.vector_store %arg11[%c0_21, %c1, %c1_22, %c0_23], %8 {strides = array<i32>} : memref<2x18x18x3xf32, #tpu.memory_space<vmem>>, vector<2x16x16x3xf32>,
    %c0_24 = arith.constant 0 : index
    %c0_25 = arith.constant 0 : index
    %c0_26 = arith.constant 0 : index
    %c0_27 = arith.constant 0 : index
    %10 = vector.load %arg11[%c0_24, %c0_25, %c0_26, %c0_27] : memref<2x18x18x3xf32, #tpu.memory_space<vmem>>, vector<2x16x16x3xf32>
    %11 = vector.shape_cast %10 : vector<2x16x16x3xf32> to vector<512x3xf32>
    %c0_28 = arith.constant 0 : index
    %c0_29 = arith.constant 0 : index
    %12 = vector.load %arg12[%c0_28, %c0_29] : memref<512x27xf32, #tpu.memory_space<vmem>>, vector<512x3xf32>
    tpu.vector_store %arg12[%c0_28, %c0_29], %11 {strides = array<i32>} : memref<512x27xf32, #tpu.memory_space<vmem>>, vector<512x3xf32>,
    %c0_30 = arith.constant 0 : index
    %c0_31 = arith.constant 0 : index
    %c1_32 = arith.constant 1 : index
    %c0_33 = arith.constant 0 : index
    %13 = vector.load %arg11[%c0_30, %c0_31, %c1_32, %c0_33] : memref<2x18x18x3xf32, #tpu.memory_space<vmem>>, vector<2x16x16x3xf32>
    %14 = vector.shape_cast %13 : vector<2x16x16x3xf32> to vector<512x3xf32>
    %c0_34 = arith.constant 0 : index
    %c3 = arith.constant 3 : index
    %15 = vector.load %arg12[%c0_34, %c3] : memref<512x27xf32, #tpu.memory_space<vmem>>, vector<512x3xf32>
    tpu.vector_store %arg12[%c0_34, %c3], %14 {strides = array<i32>} : memref<512x27xf32, #tpu.memory_space<vmem>>, vector<512x3xf32>,
    %c0_35 = arith.constant 0 : index
    %c0_36 = arith.constant 0 : index
    %c2 = arith.constant 2 : index
    %c0_37 = arith.constant 0 : index
    %16 = vector.load %arg11[%c0_35, %c0_36, %c2, %c0_37] : memref<2x18x18x3xf32, #tpu.memory_space<vmem>>, vector<2x16x16x3xf32>
    %17 = vector.shape_cast %16 : vector<2x16x16x3xf32> to vector<512x3xf32>
    %c0_38 = arith.constant 0 : index
    %c6 = arith.constant 6 : index
    %18 = vector.load %arg12[%c0_38, %c6] : memref<512x27xf32, #tpu.memory_space<vmem>>, vector<512x3xf32>
    tpu.vector_store %arg12[%c0_38, %c6], %17 {strides = array<i32>} : memref<512x27xf32, #tpu.memory_space<vmem>>, vector<512x3xf32>,
    %c0_39 = arith.constant 0 : index
    %c1_40 = arith.constant 1 : index
    %c0_41 = arith.constant 0 : index
    %c0_42 = arith.constant 0 : index
    %19 = vector.load %arg11[%c0_39, %c1_40, %c0_41, %c0_42] : memref<2x18x18x3xf32, #tpu.memory_space<vmem>>, vector<2x16x16x3xf32>
    %20 = vector.shape_cast %19 : vector<2x16x16x3xf32> to vector<512x3xf32>
    %c0_43 = arith.constant 0 : index
    %c9 = arith.constant 9 : index
    %21 = vector.load %arg12[%c0_43, %c9] : memref<512x27xf32, #tpu.memory_space<vmem>>, vector<512x3xf32>
    tpu.vector_store %arg12[%c0_43, %c9], %20 {strides = array<i32>} : memref<512x27xf32, #tpu.memory_space<vmem>>, vector<512x3xf32>,
    %c0_44 = arith.constant 0 : index
    %c1_45 = arith.constant 1 : index
    %c1_46 = arith.constant 1 : index
    %c0_47 = arith.constant 0 : index
    %22 = vector.load %arg11[%c0_44, %c1_45, %c1_46, %c0_47] : memref<2x18x18x3xf32, #tpu.memory_space<vmem>>, vector<2x16x16x3xf32>
    %23 = vector.shape_cast %22 : vector<2x16x16x3xf32> to vector<512x3xf32>
    %c0_48 = arith.constant 0 : index
    %c12 = arith.constant 12 : index
    %24 = vector.load %arg12[%c0_48, %c12] : memref<512x27xf32, #tpu.memory_space<vmem>>, vector<512x3xf32>
    tpu.vector_store %arg12[%c0_48, %c12], %23 {strides = array<i32>} : memref<512x27xf32, #tpu.memory_space<vmem>>, vector<512x3xf32>,
    %c0_49 = arith.constant 0 : index
    %c1_50 = arith.constant 1 : index
    %c2_51 = arith.constant 2 : index
    %c0_52 = arith.constant 0 : index
    %25 = vector.load %arg11[%c0_49, %c1_50, %c2_51, %c0_52] : memref<2x18x18x3xf32, #tpu.memory_space<vmem>>, vector<2x16x16x3xf32>
    %26 = vector.shape_cast %25 : vector<2x16x16x3xf32> to vector<512x3xf32>
    %c0_53 = arith.constant 0 : index
    %c15 = arith.constant 15 : index
    %27 = vector.load %arg12[%c0_53, %c15] : memref<512x27xf32, #tpu.memory_space<vmem>>, vector<512x3xf32>
    tpu.vector_store %arg12[%c0_53, %c15], %26 {strides = array<i32>} : memref<512x27xf32, #tpu.memory_space<vmem>>, vector<512x3xf32>,
    %c0_54 = arith.constant 0 : index
    %c2_55 = arith.constant 2 : index
    %c0_56 = arith.constant 0 : index
    %c0_57 = arith.constant 0 : index
    %28 = vector.load %arg11[%c0_54, %c2_55, %c0_56, %c0_57] : memref<2x18x18x3xf32, #tpu.memory_space<vmem>>, vector<2x16x16x3xf32>
    %29 = vector.shape_cast %28 : vector<2x16x16x3xf32> to vector<512x3xf32>
    %c0_58 = arith.constant 0 : index
    %c18 = arith.constant 18 : index
    %30 = vector.load %arg12[%c0_58, %c18] : memref<512x27xf32, #tpu.memory_space<vmem>>, vector<512x3xf32>
    tpu.vector_store %arg12[%c0_58, %c18], %29 {strides = array<i32>} : memref<512x27xf32, #tpu.memory_space<vmem>>, vector<512x3xf32>,
    %c0_59 = arith.constant 0 : index
    %c2_60 = arith.constant 2 : index
    %c1_61 = arith.constant 1 : index
    %c0_62 = arith.constant 0 : index
    %31 = vector.load %arg11[%c0_59, %c2_60, %c1_61, %c0_62] : memref<2x18x18x3xf32, #tpu.memory_space<vmem>>, vector<2x16x16x3xf32>
    %32 = vector.shape_cast %31 : vector<2x16x16x3xf32> to vector<512x3xf32>
    %c0_63 = arith.constant 0 : index
    %c21 = arith.constant 21 : index
    %33 = vector.load %arg12[%c0_63, %c21] : memref<512x27xf32, #tpu.memory_space<vmem>>, vector<512x3xf32>
    tpu.vector_store %arg12[%c0_63, %c21], %32 {strides = array<i32>} : memref<512x27xf32, #tpu.memory_space<vmem>>, vector<512x3xf32>,
    %c0_64 = arith.constant 0 : index
    %c2_65 = arith.constant 2 : index
    %c2_66 = arith.constant 2 : index
    %c0_67 = arith.constant 0 : index
    %34 = vector.load %arg11[%c0_64, %c2_65, %c2_66, %c0_67] : memref<2x18x18x3xf32, #tpu.memory_space<vmem>>, vector<2x16x16x3xf32>
    %35 = vector.shape_cast %34 : vector<2x16x16x3xf32> to vector<512x3xf32>
    %c0_68 = arith.constant 0 : index
    %c24 = arith.constant 24 : index
    %36 = vector.load %arg12[%c0_68, %c24] : memref<512x27xf32, #tpu.memory_space<vmem>>, vector<512x3xf32>
    tpu.vector_store %arg12[%c0_68, %c24], %35 {strides = array<i32>} : memref<512x27xf32, #tpu.memory_space<vmem>>, vector<512x3xf32>,
    %c0_69 = arith.constant 0 : index
    %c0_70 = arith.constant 0 : index
    %37 = vector.load %arg12[%c0_69, %c0_70] : memref<512x27xf32, #tpu.memory_space<vmem>>, vector<512x27xf32>
    %c0_71 = arith.constant 0 : index
    %c0_72 = arith.constant 0 : index
    %38 = vector.load %arg2[%c0_71, %c0_72] : memref<27x8xf32, #tpu.memory_space<vmem>>, vector<27x8xf32>
    %cst_73 = arith.constant dense<0.000000e+00> : vector<512x8xf32>
    %39 = tpu.matmul %37, %38, %cst_73 {dimension_numbers = #tpu.dot_dimension_numbers<[1], [0], [0], [1], [0, 0, 1, 1], [], []>} : vector<512x27xf32>, vector<27x8xf32>, vector<512x8xf32> -> vector<512x8xf32>
    %c0_74 = arith.constant 0 : index
    %c0_75 = arith.constant 0 : index
    %40 = vector.load %arg3[%c0_74, %c0_75] : memref<1x8xf32, #tpu.memory_space<vmem>>, vector<1x8xf32>
    %41 = vector.broadcast %40 : vector<1x8xf32> to vector<512x8xf32>
    %42 = arith.addf %39, %41 : vector<512x8xf32>
    %cst_76 = arith.constant 0.000000e+00 : f32
    %43 = vector.broadcast %cst_76 : f32 to vector<512x8xf32>
    %44 = arith.maximumf %42, %43 : vector<512x8xf32>
    %45 = vector.shape_cast %44 : vector<512x8xf32> to vector<2x8x2x16x8xf32>
    %cst_77 = arith.constant dense<0xFF800000> : vector<2x8x16x8xf32>
    %46 = vector.multi_reduction <maximumf>, %45, %cst_77 [2] : vector<2x8x2x16x8xf32> to vector<2x8x16x8xf32>
    %c0_78 = arith.constant 0 : index
    %c0_79 = arith.constant 0 : index
    %c0_80 = arith.constant 0 : index
    %c0_81 = arith.constant 0 : index
    %47 = vector.load %arg13[%c0_78, %c0_79, %c0_80, %c0_81] : memref<2x8x16x8xf32, #tpu.memory_space<vmem>>, vector<2x8x16x8xf32>
    tpu.vector_store %arg13[%c0_78, %c0_79, %c0_80, %c0_81], %46 {strides = array<i32>} : memref<2x8x16x8xf32, #tpu.memory_space<vmem>>, vector<2x8x16x8xf32>,
    %c0_82 = arith.constant 0 : index
    %c0_83 = arith.constant 0 : index
    %c0_84 = arith.constant 0 : index
    %c0_85 = arith.constant 0 : index
    %48 = tpu.strided_load %arg13[%c0_82, %c0_83, %c0_84, %c0_85] {strides = array<i32: 1, 1, 2, 1>} : memref<2x8x16x8xf32, #tpu.memory_space<vmem>>, vector<2x8x8x8xf32>
    %c0_86 = arith.constant 0 : index
    %c0_87 = arith.constant 0 : index
    %c1_88 = arith.constant 1 : index
    %c0_89 = arith.constant 0 : index
    %49 = tpu.strided_load %arg13[%c0_86, %c0_87, %c1_88, %c0_89] {strides = array<i32: 1, 1, 2, 1>} : memref<2x8x16x8xf32, #tpu.memory_space<vmem>>, vector<2x8x8x8xf32>
    %50 = arith.maximumf %48, %49 : vector<2x8x8x8xf32>
    %cst_90 = arith.constant 0.000000e+00 : f32
    %51 = vector.broadcast %cst_90 : f32 to vector<2x1x10x8xf32>
    %c0_91 = arith.constant 0 : index
    %c0_92 = arith.constant 0 : index
    %c0_93 = arith.constant 0 : index
    %c0_94 = arith.constant 0 : index
    %52 = vector.load %arg14[%c0_91, %c0_92, %c0_93, %c0_94] : memref<2x10x10x8xf32, #tpu.memory_space<vmem>>, vector<2x1x10x8xf32>
    tpu.vector_store %arg14[%c0_91, %c0_92, %c0_93, %c0_94], %51 {strides = array<i32>} : memref<2x10x10x8xf32, #tpu.memory_space<vmem>>, vector<2x1x10x8xf32>,
    %cst_95 = arith.constant 0.000000e+00 : f32
    %53 = vector.broadcast %cst_95 : f32 to vector<2x1x10x8xf32>
    %c0_96 = arith.constant 0 : index
    %c9_97 = arith.constant 9 : index
    %c0_98 = arith.constant 0 : index
    %c0_99 = arith.constant 0 : index
    %54 = vector.load %arg14[%c0_96, %c9_97, %c0_98, %c0_99] : memref<2x10x10x8xf32, #tpu.memory_space<vmem>>, vector<2x1x10x8xf32>
    tpu.vector_store %arg14[%c0_96, %c9_97, %c0_98, %c0_99], %53 {strides = array<i32>} : memref<2x10x10x8xf32, #tpu.memory_space<vmem>>, vector<2x1x10x8xf32>,
    %cst_100 = arith.constant 0.000000e+00 : f32
    %55 = vector.broadcast %cst_100 : f32 to vector<2x10x1x8xf32>
    %c0_101 = arith.constant 0 : index
    %c0_102 = arith.constant 0 : index
    %c0_103 = arith.constant 0 : index
    %c0_104 = arith.constant 0 : index
    %56 = vector.load %arg14[%c0_101, %c0_102, %c0_103, %c0_104] : memref<2x10x10x8xf32, #tpu.memory_space<vmem>>, vector<2x10x1x8xf32>
    tpu.vector_store %arg14[%c0_101, %c0_102, %c0_103, %c0_104], %55 {strides = array<i32>} : memref<2x10x10x8xf32, #tpu.memory_space<vmem>>, vector<2x10x1x8xf32>,
    %cst_105 = arith.constant 0.000000e+00 : f32
    %57 = vector.broadcast %cst_105 : f32 to vector<2x10x1x8xf32>
    %c0_106 = arith.constant 0 : index
    %c0_107 = arith.constant 0 : index
    %c9_108 = arith.constant 9 : index
    %c0_109 = arith.constant 0 : index
    %58 = vector.load %arg14[%c0_106, %c0_107, %c9_108, %c0_109] : memref<2x10x10x8xf32, #tpu.memory_space<vmem>>, vector<2x10x1x8xf32>
    tpu.vector_store %arg14[%c0_106, %c0_107, %c9_108, %c0_109], %57 {strides = array<i32>} : memref<2x10x10x8xf32, #tpu.memory_space<vmem>>, vector<2x10x1x8xf32>,
    %c0_110 = arith.constant 0 : index
    %c1_111 = arith.constant 1 : index
    %c1_112 = arith.constant 1 : index
    %c0_113 = arith.constant 0 : index
    %59 = vector.load %arg14[%c0_110, %c1_111, %c1_112, %c0_113] : memref<2x10x10x8xf32, #tpu.memory_space<vmem>>, vector<2x8x8x8xf32>
    tpu.vector_store %arg14[%c0_110, %c1_111, %c1_112, %c0_113], %50 {strides = array<i32>} : memref<2x10x10x8xf32, #tpu.memory_space<vmem>>, vector<2x8x8x8xf32>,
    %c0_114 = arith.constant 0 : index
    %c0_115 = arith.constant 0 : index
    %c0_116 = arith.constant 0 : index
    %c0_117 = arith.constant 0 : index
    %60 = vector.load %arg14[%c0_114, %c0_115, %c0_116, %c0_117] : memref<2x10x10x8xf32, #tpu.memory_space<vmem>>, vector<2x8x8x8xf32>
    %61 = vector.shape_cast %60 : vector<2x8x8x8xf32> to vector<128x8xf32>
    %c0_118 = arith.constant 0 : index
    %c0_119 = arith.constant 0 : index
    %62 = vector.load %arg15[%c0_118, %c0_119] : memref<128x72xf32, #tpu.memory_space<vmem>>, vector<128x8xf32>
    tpu.vector_store %arg15[%c0_118, %c0_119], %61 {strides = array<i32>} : memref<128x72xf32, #tpu.memory_space<vmem>>, vector<128x8xf32>,
    %c0_120 = arith.constant 0 : index
    %c0_121 = arith.constant 0 : index
    %c1_122 = arith.constant 1 : index
    %c0_123 = arith.constant 0 : index
    %63 = vector.load %arg14[%c0_120, %c0_121, %c1_122, %c0_123] : memref<2x10x10x8xf32, #tpu.memory_space<vmem>>, vector<2x8x8x8xf32>
    %64 = vector.shape_cast %63 : vector<2x8x8x8xf32> to vector<128x8xf32>
    %c0_124 = arith.constant 0 : index
    %c8 = arith.constant 8 : index
    %65 = vector.load %arg15[%c0_124, %c8] : memref<128x72xf32, #tpu.memory_space<vmem>>, vector<128x8xf32>
    tpu.vector_store %arg15[%c0_124, %c8], %64 {strides = array<i32>} : memref<128x72xf32, #tpu.memory_space<vmem>>, vector<128x8xf32>,
    %c0_125 = arith.constant 0 : index
    %c0_126 = arith.constant 0 : index
    %c2_127 = arith.constant 2 : index
    %c0_128 = arith.constant 0 : index
    %66 = vector.load %arg14[%c0_125, %c0_126, %c2_127, %c0_128] : memref<2x10x10x8xf32, #tpu.memory_space<vmem>>, vector<2x8x8x8xf32>
    %67 = vector.shape_cast %66 : vector<2x8x8x8xf32> to vector<128x8xf32>
    %c0_129 = arith.constant 0 : index
    %c16 = arith.constant 16 : index
    %68 = vector.load %arg15[%c0_129, %c16] : memref<128x72xf32, #tpu.memory_space<vmem>>, vector<128x8xf32>
    tpu.vector_store %arg15[%c0_129, %c16], %67 {strides = array<i32>} : memref<128x72xf32, #tpu.memory_space<vmem>>, vector<128x8xf32>,
    %c0_130 = arith.constant 0 : index
    %c1_131 = arith.constant 1 : index
    %c0_132 = arith.constant 0 : index
    %c0_133 = arith.constant 0 : index
    %69 = vector.load %arg14[%c0_130, %c1_131, %c0_132, %c0_133] : memref<2x10x10x8xf32, #tpu.memory_space<vmem>>, vector<2x8x8x8xf32>
    %70 = vector.shape_cast %69 : vector<2x8x8x8xf32> to vector<128x8xf32>
    %c0_134 = arith.constant 0 : index
    %c24_135 = arith.constant 24 : index
    %71 = vector.load %arg15[%c0_134, %c24_135] : memref<128x72xf32, #tpu.memory_space<vmem>>, vector<128x8xf32>
    tpu.vector_store %arg15[%c0_134, %c24_135], %70 {strides = array<i32>} : memref<128x72xf32, #tpu.memory_space<vmem>>, vector<128x8xf32>,
    %c0_136 = arith.constant 0 : index
    %c1_137 = arith.constant 1 : index
    %c1_138 = arith.constant 1 : index
    %c0_139 = arith.constant 0 : index
    %72 = vector.load %arg14[%c0_136, %c1_137, %c1_138, %c0_139] : memref<2x10x10x8xf32, #tpu.memory_space<vmem>>, vector<2x8x8x8xf32>
    %73 = vector.shape_cast %72 : vector<2x8x8x8xf32> to vector<128x8xf32>
    %c0_140 = arith.constant 0 : index
    %c32 = arith.constant 32 : index
    %74 = vector.load %arg15[%c0_140, %c32] : memref<128x72xf32, #tpu.memory_space<vmem>>, vector<128x8xf32>
    tpu.vector_store %arg15[%c0_140, %c32], %73 {strides = array<i32>} : memref<128x72xf32, #tpu.memory_space<vmem>>, vector<128x8xf32>,
    %c0_141 = arith.constant 0 : index
    %c1_142 = arith.constant 1 : index
    %c2_143 = arith.constant 2 : index
    %c0_144 = arith.constant 0 : index
    %75 = vector.load %arg14[%c0_141, %c1_142, %c2_143, %c0_144] : memref<2x10x10x8xf32, #tpu.memory_space<vmem>>, vector<2x8x8x8xf32>
    %76 = vector.shape_cast %75 : vector<2x8x8x8xf32> to vector<128x8xf32>
    %c0_145 = arith.constant 0 : index
    %c40 = arith.constant 40 : index
    %77 = vector.load %arg15[%c0_145, %c40] : memref<128x72xf32, #tpu.memory_space<vmem>>, vector<128x8xf32>
    tpu.vector_store %arg15[%c0_145, %c40], %76 {strides = array<i32>} : memref<128x72xf32, #tpu.memory_space<vmem>>, vector<128x8xf32>,
    %c0_146 = arith.constant 0 : index
    %c2_147 = arith.constant 2 : index
    %c0_148 = arith.constant 0 : index
    %c0_149 = arith.constant 0 : index
    %78 = vector.load %arg14[%c0_146, %c2_147, %c0_148, %c0_149] : memref<2x10x10x8xf32, #tpu.memory_space<vmem>>, vector<2x8x8x8xf32>
    %79 = vector.shape_cast %78 : vector<2x8x8x8xf32> to vector<128x8xf32>
    %c0_150 = arith.constant 0 : index
    %c48 = arith.constant 48 : index
    %80 = vector.load %arg15[%c0_150, %c48] : memref<128x72xf32, #tpu.memory_space<vmem>>, vector<128x8xf32>
    tpu.vector_store %arg15[%c0_150, %c48], %79 {strides = array<i32>} : memref<128x72xf32, #tpu.memory_space<vmem>>, vector<128x8xf32>,
    %c0_151 = arith.constant 0 : index
    %c2_152 = arith.constant 2 : index
    %c1_153 = arith.constant 1 : index
    %c0_154 = arith.constant 0 : index
    %81 = vector.load %arg14[%c0_151, %c2_152, %c1_153, %c0_154] : memref<2x10x10x8xf32, #tpu.memory_space<vmem>>, vector<2x8x8x8xf32>
    %82 = vector.shape_cast %81 : vector<2x8x8x8xf32> to vector<128x8xf32>
    %c0_155 = arith.constant 0 : index
    %c56 = arith.constant 56 : index
    %83 = vector.load %arg15[%c0_155, %c56] : memref<128x72xf32, #tpu.memory_space<vmem>>, vector<128x8xf32>
    tpu.vector_store %arg15[%c0_155, %c56], %82 {strides = array<i32>} : memref<128x72xf32, #tpu.memory_space<vmem>>, vector<128x8xf32>,
    %c0_156 = arith.constant 0 : index
    %c2_157 = arith.constant 2 : index
    %c2_158 = arith.constant 2 : index
    %c0_159 = arith.constant 0 : index
    %84 = vector.load %arg14[%c0_156, %c2_157, %c2_158, %c0_159] : memref<2x10x10x8xf32, #tpu.memory_space<vmem>>, vector<2x8x8x8xf32>
    %85 = vector.shape_cast %84 : vector<2x8x8x8xf32> to vector<128x8xf32>
    %c0_160 = arith.constant 0 : index
    %c64 = arith.constant 64 : index
    %86 = vector.load %arg15[%c0_160, %c64] : memref<128x72xf32, #tpu.memory_space<vmem>>, vector<128x8xf32>
    tpu.vector_store %arg15[%c0_160, %c64], %85 {strides = array<i32>} : memref<128x72xf32, #tpu.memory_space<vmem>>, vector<128x8xf32>,
    %c0_161 = arith.constant 0 : index
    %c0_162 = arith.constant 0 : index
    %87 = vector.load %arg15[%c0_161, %c0_162] : memref<128x72xf32, #tpu.memory_space<vmem>>, vector<128x72xf32>
    %c0_163 = arith.constant 0 : index
    %c0_164 = arith.constant 0 : index
    %88 = vector.load %arg4[%c0_163, %c0_164] : memref<72x16xf32, #tpu.memory_space<vmem>>, vector<72x16xf32>
    %cst_165 = arith.constant dense<0.000000e+00> : vector<128x16xf32>
    %89 = tpu.matmul %87, %88, %cst_165 {dimension_numbers = #tpu.dot_dimension_numbers<[1], [0], [0], [1], [0, 0, 1, 1], [], []>} : vector<128x72xf32>, vector<72x16xf32>, vector<128x16xf32> -> vector<128x16xf32>
    %c0_166 = arith.constant 0 : index
    %c0_167 = arith.constant 0 : index
    %90 = vector.load %arg5[%c0_166, %c0_167] : memref<1x16xf32, #tpu.memory_space<vmem>>, vector<1x16xf32>
    %91 = vector.broadcast %90 : vector<1x16xf32> to vector<128x16xf32>
    %92 = arith.addf %89, %91 : vector<128x16xf32>
    %cst_168 = arith.constant 0.000000e+00 : f32
    %93 = vector.broadcast %cst_168 : f32 to vector<128x16xf32>
    %94 = arith.maximumf %92, %93 : vector<128x16xf32>
    %95 = vector.shape_cast %94 : vector<128x16xf32> to vector<2x4x2x8x16xf32>
    %cst_169 = arith.constant dense<0xFF800000> : vector<2x4x8x16xf32>
    %96 = vector.multi_reduction <maximumf>, %95, %cst_169 [2] : vector<2x4x2x8x16xf32> to vector<2x4x8x16xf32>
    %c0_170 = arith.constant 0 : index
    %c0_171 = arith.constant 0 : index
    %c0_172 = arith.constant 0 : index
    %c0_173 = arith.constant 0 : index
    %97 = vector.load %arg16[%c0_170, %c0_171, %c0_172, %c0_173] : memref<2x4x8x16xf32, #tpu.memory_space<vmem>>, vector<2x4x8x16xf32>
    tpu.vector_store %arg16[%c0_170, %c0_171, %c0_172, %c0_173], %96 {strides = array<i32>} : memref<2x4x8x16xf32, #tpu.memory_space<vmem>>, vector<2x4x8x16xf32>,
    %c0_174 = arith.constant 0 : index
    %c0_175 = arith.constant 0 : index
    %c0_176 = arith.constant 0 : index
    %c0_177 = arith.constant 0 : index
    %98 = tpu.strided_load %arg16[%c0_174, %c0_175, %c0_176, %c0_177] {strides = array<i32: 1, 1, 2, 1>} : memref<2x4x8x16xf32, #tpu.memory_space<vmem>>, vector<2x4x4x16xf32>
    %c0_178 = arith.constant 0 : index
    %c0_179 = arith.constant 0 : index
    %c1_180 = arith.constant 1 : index
    %c0_181 = arith.constant 0 : index
    %99 = tpu.strided_load %arg16[%c0_178, %c0_179, %c1_180, %c0_181] {strides = array<i32: 1, 1, 2, 1>} : memref<2x4x8x16xf32, #tpu.memory_space<vmem>>, vector<2x4x4x16xf32>
    %100 = arith.maximumf %98, %99 : vector<2x4x4x16xf32>
    %101 = vector.extract_strided_slice %100 {offsets = [0, 0, 0, 0], sizes = [2, 1, 1, 16], strides = [1, 1, 1, 1]} : vector<2x4x4x16xf32> to vector<2x1x1x16xf32>
    %102 = vector.shape_cast %101 : vector<2x1x1x16xf32> to vector<2x16xf32>
    %c0_182 = arith.constant 0 : index
    %c0_183 = arith.constant 0 : index
    %103 = vector.load %arg17[%c0_182, %c0_183] : memref<2x256xf32, #tpu.memory_space<vmem>>, vector<2x16xf32>
    tpu.vector_store %arg17[%c0_182, %c0_183], %102 {strides = array<i32>} : memref<2x256xf32, #tpu.memory_space<vmem>>, vector<2x16xf32>,
    %104 = vector.extract_strided_slice %100 {offsets = [0, 0, 1, 0], sizes = [2, 1, 1, 16], strides = [1, 1, 1, 1]} : vector<2x4x4x16xf32> to vector<2x1x1x16xf32>
    %105 = vector.shape_cast %104 : vector<2x1x1x16xf32> to vector<2x16xf32>
    %c0_184 = arith.constant 0 : index
    %c16_185 = arith.constant 16 : index
    %106 = vector.load %arg17[%c0_184, %c16_185] : memref<2x256xf32, #tpu.memory_space<vmem>>, vector<2x16xf32>
    tpu.vector_store %arg17[%c0_184, %c16_185], %105 {strides = array<i32>} : memref<2x256xf32, #tpu.memory_space<vmem>>, vector<2x16xf32>,
    %107 = vector.extract_strided_slice %100 {offsets = [0, 0, 2, 0], sizes = [2, 1, 1, 16], strides = [1, 1, 1, 1]} : vector<2x4x4x16xf32> to vector<2x1x1x16xf32>
    %108 = vector.shape_cast %107 : vector<2x1x1x16xf32> to vector<2x16xf32>
    %c0_186 = arith.constant 0 : index
    %c32_187 = arith.constant 32 : index
    %109 = vector.load %arg17[%c0_186, %c32_187] : memref<2x256xf32, #tpu.memory_space<vmem>>, vector<2x16xf32>
    tpu.vector_store %arg17[%c0_186, %c32_187], %108 {strides = array<i32>} : memref<2x256xf32, #tpu.memory_space<vmem>>, vector<2x16xf32>,
    %110 = vector.extract_strided_slice %100 {offsets = [0, 0, 3, 0], sizes = [2, 1, 1, 16], strides = [1, 1, 1, 1]} : vector<2x4x4x16xf32> to vector<2x1x1x16xf32>
    %111 = vector.shape_cast %110 : vector<2x1x1x16xf32> to vector<2x16xf32>
    %c0_188 = arith.constant 0 : index
    %c48_189 = arith.constant 48 : index
    %112 = vector.load %arg17[%c0_188, %c48_189] : memref<2x256xf32, #tpu.memory_space<vmem>>, vector<2x16xf32>
    tpu.vector_store %arg17[%c0_188, %c48_189], %111 {strides = array<i32>} : memref<2x256xf32, #tpu.memory_space<vmem>>, vector<2x16xf32>,
    %113 = vector.extract_strided_slice %100 {offsets = [0, 1, 0, 0], sizes = [2, 1, 1, 16], strides = [1, 1, 1, 1]} : vector<2x4x4x16xf32> to vector<2x1x1x16xf32>
    %114 = vector.shape_cast %113 : vector<2x1x1x16xf32> to vector<2x16xf32>
    %c0_190 = arith.constant 0 : index
    %c64_191 = arith.constant 64 : index
    %115 = vector.load %arg17[%c0_190, %c64_191] : memref<2x256xf32, #tpu.memory_space<vmem>>, vector<2x16xf32>
    tpu.vector_store %arg17[%c0_190, %c64_191], %114 {strides = array<i32>} : memref<2x256xf32, #tpu.memory_space<vmem>>, vector<2x16xf32>,
    %116 = vector.extract_strided_slice %100 {offsets = [0, 1, 1, 0], sizes = [2, 1, 1, 16], strides = [1, 1, 1, 1]} : vector<2x4x4x16xf32> to vector<2x1x1x16xf32>
    %117 = vector.shape_cast %116 : vector<2x1x1x16xf32> to vector<2x16xf32>
    %c0_192 = arith.constant 0 : index
    %c80 = arith.constant 80 : index
    %118 = vector.load %arg17[%c0_192, %c80] : memref<2x256xf32, #tpu.memory_space<vmem>>, vector<2x16xf32>
    tpu.vector_store %arg17[%c0_192, %c80], %117 {strides = array<i32>} : memref<2x256xf32, #tpu.memory_space<vmem>>, vector<2x16xf32>,
    %119 = vector.extract_strided_slice %100 {offsets = [0, 1, 2, 0], sizes = [2, 1, 1, 16], strides = [1, 1, 1, 1]} : vector<2x4x4x16xf32> to vector<2x1x1x16xf32>
    %120 = vector.shape_cast %119 : vector<2x1x1x16xf32> to vector<2x16xf32>
    %c0_193 = arith.constant 0 : index
    %c96 = arith.constant 96 : index
    %121 = vector.load %arg17[%c0_193, %c96] : memref<2x256xf32, #tpu.memory_space<vmem>>, vector<2x16xf32>
    tpu.vector_store %arg17[%c0_193, %c96], %120 {strides = array<i32>} : memref<2x256xf32, #tpu.memory_space<vmem>>, vector<2x16xf32>,
    %122 = vector.extract_strided_slice %100 {offsets = [0, 1, 3, 0], sizes = [2, 1, 1, 16], strides = [1, 1, 1, 1]} : vector<2x4x4x16xf32> to vector<2x1x1x16xf32>
    %123 = vector.shape_cast %122 : vector<2x1x1x16xf32> to vector<2x16xf32>
    %c0_194 = arith.constant 0 : index
    %c112 = arith.constant 112 : index
    %124 = vector.load %arg17[%c0_194, %c112] : memref<2x256xf32, #tpu.memory_space<vmem>>, vector<2x16xf32>
    tpu.vector_store %arg17[%c0_194, %c112], %123 {strides = array<i32>} : memref<2x256xf32, #tpu.memory_space<vmem>>, vector<2x16xf32>,
    %125 = vector.extract_strided_slice %100 {offsets = [0, 2, 0, 0], sizes = [2, 1, 1, 16], strides = [1, 1, 1, 1]} : vector<2x4x4x16xf32> to vector<2x1x1x16xf32>
    %126 = vector.shape_cast %125 : vector<2x1x1x16xf32> to vector<2x16xf32>
    %c0_195 = arith.constant 0 : index
    %c128 = arith.constant 128 : index
    %127 = vector.load %arg17[%c0_195, %c128] : memref<2x256xf32, #tpu.memory_space<vmem>>, vector<2x16xf32>
    tpu.vector_store %arg17[%c0_195, %c128], %126 {strides = array<i32>} : memref<2x256xf32, #tpu.memory_space<vmem>>, vector<2x16xf32>,
    %128 = vector.extract_strided_slice %100 {offsets = [0, 2, 1, 0], sizes = [2, 1, 1, 16], strides = [1, 1, 1, 1]} : vector<2x4x4x16xf32> to vector<2x1x1x16xf32>
    %129 = vector.shape_cast %128 : vector<2x1x1x16xf32> to vector<2x16xf32>
    %c0_196 = arith.constant 0 : index
    %c144 = arith.constant 144 : index
    %130 = vector.load %arg17[%c0_196, %c144] : memref<2x256xf32, #tpu.memory_space<vmem>>, vector<2x16xf32>
    tpu.vector_store %arg17[%c0_196, %c144], %129 {strides = array<i32>} : memref<2x256xf32, #tpu.memory_space<vmem>>, vector<2x16xf32>,
    %131 = vector.extract_strided_slice %100 {offsets = [0, 2, 2, 0], sizes = [2, 1, 1, 16], strides = [1, 1, 1, 1]} : vector<2x4x4x16xf32> to vector<2x1x1x16xf32>
    %132 = vector.shape_cast %131 : vector<2x1x1x16xf32> to vector<2x16xf32>
    %c0_197 = arith.constant 0 : index
    %c160 = arith.constant 160 : index
    %133 = vector.load %arg17[%c0_197, %c160] : memref<2x256xf32, #tpu.memory_space<vmem>>, vector<2x16xf32>
    tpu.vector_store %arg17[%c0_197, %c160], %132 {strides = array<i32>} : memref<2x256xf32, #tpu.memory_space<vmem>>, vector<2x16xf32>,
    %134 = vector.extract_strided_slice %100 {offsets = [0, 2, 3, 0], sizes = [2, 1, 1, 16], strides = [1, 1, 1, 1]} : vector<2x4x4x16xf32> to vector<2x1x1x16xf32>
    %135 = vector.shape_cast %134 : vector<2x1x1x16xf32> to vector<2x16xf32>
    %c0_198 = arith.constant 0 : index
    %c176 = arith.constant 176 : index
    %136 = vector.load %arg17[%c0_198, %c176] : memref<2x256xf32, #tpu.memory_space<vmem>>, vector<2x16xf32>
    tpu.vector_store %arg17[%c0_198, %c176], %135 {strides = array<i32>} : memref<2x256xf32, #tpu.memory_space<vmem>>, vector<2x16xf32>,
    %137 = vector.extract_strided_slice %100 {offsets = [0, 3, 0, 0], sizes = [2, 1, 1, 16], strides = [1, 1, 1, 1]} : vector<2x4x4x16xf32> to vector<2x1x1x16xf32>
    %138 = vector.shape_cast %137 : vector<2x1x1x16xf32> to vector<2x16xf32>
    %c0_199 = arith.constant 0 : index
    %c192 = arith.constant 192 : index
    %139 = vector.load %arg17[%c0_199, %c192] : memref<2x256xf32, #tpu.memory_space<vmem>>, vector<2x16xf32>
    tpu.vector_store %arg17[%c0_199, %c192], %138 {strides = array<i32>} : memref<2x256xf32, #tpu.memory_space<vmem>>, vector<2x16xf32>,
    %140 = vector.extract_strided_slice %100 {offsets = [0, 3, 1, 0], sizes = [2, 1, 1, 16], strides = [1, 1, 1, 1]} : vector<2x4x4x16xf32> to vector<2x1x1x16xf32>
    %141 = vector.shape_cast %140 : vector<2x1x1x16xf32> to vector<2x16xf32>
    %c0_200 = arith.constant 0 : index
    %c208 = arith.constant 208 : index
    %142 = vector.load %arg17[%c0_200, %c208] : memref<2x256xf32, #tpu.memory_space<vmem>>, vector<2x16xf32>
    tpu.vector_store %arg17[%c0_200, %c208], %141 {strides = array<i32>} : memref<2x256xf32, #tpu.memory_space<vmem>>, vector<2x16xf32>,
    %143 = vector.extract_strided_slice %100 {offsets = [0, 3, 2, 0], sizes = [2, 1, 1, 16], strides = [1, 1, 1, 1]} : vector<2x4x4x16xf32> to vector<2x1x1x16xf32>
    %144 = vector.shape_cast %143 : vector<2x1x1x16xf32> to vector<2x16xf32>
    %c0_201 = arith.constant 0 : index
    %c224 = arith.constant 224 : index
    %145 = vector.load %arg17[%c0_201, %c224] : memref<2x256xf32, #tpu.memory_space<vmem>>, vector<2x16xf32>
    tpu.vector_store %arg17[%c0_201, %c224], %144 {strides = array<i32>} : memref<2x256xf32, #tpu.memory_space<vmem>>, vector<2x16xf32>,
    %146 = vector.extract_strided_slice %100 {offsets = [0, 3, 3, 0], sizes = [2, 1, 1, 16], strides = [1, 1, 1, 1]} : vector<2x4x4x16xf32> to vector<2x1x1x16xf32>
    %147 = vector.shape_cast %146 : vector<2x1x1x16xf32> to vector<2x16xf32>
    %c0_202 = arith.constant 0 : index
    %c240 = arith.constant 240 : index
    %148 = vector.load %arg17[%c0_202, %c240] : memref<2x256xf32, #tpu.memory_space<vmem>>, vector<2x16xf32>
    tpu.vector_store %arg17[%c0_202, %c240], %147 {strides = array<i32>} : memref<2x256xf32, #tpu.memory_space<vmem>>, vector<2x16xf32>,
    %c0_203 = arith.constant 0 : index
    %c0_204 = arith.constant 0 : index
    %149 = vector.load %arg17[%c0_203, %c0_204] : memref<2x256xf32, #tpu.memory_space<vmem>>, vector<2x256xf32>
    %c0_205 = arith.constant 0 : index
    %c0_206 = arith.constant 0 : index
    %150 = vector.load %arg6[%c0_205, %c0_206] : memref<256x32xf32, #tpu.memory_space<vmem>>, vector<256x32xf32>
    %cst_207 = arith.constant dense<0.000000e+00> : vector<2x32xf32>
    %151 = tpu.matmul %149, %150, %cst_207 {dimension_numbers = #tpu.dot_dimension_numbers<[1], [0], [0], [1], [0, 0, 1, 1], [], []>} : vector<2x256xf32>, vector<256x32xf32>, vector<2x32xf32> -> vector<2x32xf32>
    %c0_208 = arith.constant 0 : index
    %c0_209 = arith.constant 0 : index
    %152 = vector.load %arg7[%c0_208, %c0_209] : memref<1x32xf32, #tpu.memory_space<vmem>>, vector<1x32xf32>
    %153 = vector.broadcast %152 : vector<1x32xf32> to vector<2x32xf32>
    %154 = arith.addf %151, %153 : vector<2x32xf32>
    %cst_210 = arith.constant 0.000000e+00 : f32
    %155 = vector.broadcast %cst_210 : f32 to vector<2x32xf32>
    %156 = arith.maximumf %154, %155 : vector<2x32xf32>
    %c0_211 = arith.constant 0 : index
    %c0_212 = arith.constant 0 : index
    %157 = vector.load %arg8[%c0_211, %c0_212] : memref<32x32xf32, #tpu.memory_space<vmem>>, vector<32x32xf32>
    %cst_213 = arith.constant dense<0.000000e+00> : vector<2x32xf32>
    %158 = tpu.matmul %156, %157, %cst_213 {dimension_numbers = #tpu.dot_dimension_numbers<[1], [0], [0], [1], [0, 0, 1, 1], [], []>} : vector<2x32xf32>, vector<32x32xf32>, vector<2x32xf32> -> vector<2x32xf32>
    %c0_214 = arith.constant 0 : index
    %c0_215 = arith.constant 0 : index
    %159 = vector.load %arg9[%c0_214, %c0_215] : memref<1x32xf32, #tpu.memory_space<vmem>>, vector<1x32xf32>
    %160 = vector.broadcast %159 : vector<1x32xf32> to vector<2x32xf32>
    %161 = arith.addf %158, %160 : vector<2x32xf32>
    %c0_216 = arith.constant 0 : index
    %c0_217 = arith.constant 0 : index
    %c0_218 = arith.constant 0 : index
    %162 = vector.load %arg10[%c0_216, %c0_217, %c0_218] : memref<1x2x32xf32, #tpu.memory_space<vmem>>, vector<1x2x32xf32>
    %163 = vector.shape_cast %162 : vector<1x2x32xf32> to vector<2x32xf32>
    %164 = vector.shape_cast %161 : vector<2x32xf32> to vector<1x2x32xf32>
    tpu.vector_store %arg10[%c0_216, %c0_217, %c0_218], %164 {strides = array<i32>} : memref<1x2x32xf32, #tpu.memory_space<vmem>>, vector<1x2x32xf32>,
    return
  }
  func.func @transform_0(%arg0: i32) -> (i32, i32, i32, i32) {
    %c0_i32 = arith.constant 0 : i32
    %c0_i32_0 = arith.constant 0 : i32
    %c0_i32_1 = arith.constant 0 : i32
    %c0_i32_2 = arith.constant 0 : i32
    return %arg0, %c0_i32, %c0_i32_0, %c0_i32_1 : i32, i32, i32, i32
  }
  func.func @transform_1(%arg0: i32) -> (i32, i32) {
    %c0_i32 = arith.constant 0 : i32
    %c0_i32_0 = arith.constant 0 : i32
    %c0_i32_1 = arith.constant 0 : i32
    return %c0_i32, %c0_i32_0 : i32, i32
  }
  func.func @transform_2(%arg0: i32) -> (i32, i32) {
    %c0_i32 = arith.constant 0 : i32
    %c0_i32_0 = arith.constant 0 : i32
    %c0_i32_1 = arith.constant 0 : i32
    return %c0_i32, %c0_i32_0 : i32, i32
  }
  func.func @transform_3(%arg0: i32) -> (i32, i32) {
    %c0_i32 = arith.constant 0 : i32
    %c0_i32_0 = arith.constant 0 : i32
    %c0_i32_1 = arith.constant 0 : i32
    return %c0_i32, %c0_i32_0 : i32, i32
  }
  func.func @transform_4(%arg0: i32) -> (i32, i32) {
    %c0_i32 = arith.constant 0 : i32
    %c0_i32_0 = arith.constant 0 : i32
    %c0_i32_1 = arith.constant 0 : i32
    return %c0_i32, %c0_i32_0 : i32, i32
  }
  func.func @transform_5(%arg0: i32) -> (i32, i32) {
    %c0_i32 = arith.constant 0 : i32
    %c0_i32_0 = arith.constant 0 : i32
    %c0_i32_1 = arith.constant 0 : i32
    return %c0_i32, %c0_i32_0 : i32, i32
  }
  func.func @transform_6(%arg0: i32) -> (i32, i32) {
    %c0_i32 = arith.constant 0 : i32
    %c0_i32_0 = arith.constant 0 : i32
    %c0_i32_1 = arith.constant 0 : i32
    return %c0_i32, %c0_i32_0 : i32, i32
  }
  func.func @transform_7(%arg0: i32) -> (i32, i32) {
    %c0_i32 = arith.constant 0 : i32
    %c0_i32_0 = arith.constant 0 : i32
    %c0_i32_1 = arith.constant 0 : i32
    return %c0_i32, %c0_i32_0 : i32, i32
  }
  func.func @transform_8(%arg0: i32) -> (i32, i32) {
    %c0_i32 = arith.constant 0 : i32
    %c0_i32_0 = arith.constant 0 : i32
    %c0_i32_1 = arith.constant 0 : i32
    return %c0_i32, %c0_i32_0 : i32, i32
  }
  func.func @transform_9(%arg0: i32) -> (i32, i32, i32) {
    %c0_i32 = arith.constant 0 : i32
    %c0_i32_0 = arith.constant 0 : i32
    %c0_i32_1 = arith.constant 0 : i32
    return %arg0, %c0_i32, %c0_i32_0 : i32, i32, i32
  }
}

</mosaic_0001>

<bundles_post_ra>
// kernel: feature_extractor_forward.1
= control target key start
LH: loop header
LB: loop body
LE: loop exit
PB: predicated region body
PF: predicated region fallthrough
CT: control target
= control target key end

     0   :  { %vm33_vm0 = vcmask 23552   ;;  %vm48_vm1 = vcmask 16384   ;;  %v6556_v2 = vmov 0.0   ;;  %vm36_vm2 = vcmask 17408   ;;  %s6557_s13 = smov 3   ;;  %s9479_s0 = inlined_call_operand.vmem [shape: f32[2,16,16,3], index: 0, kind: input, shape index: {}]   ;;  %s9480_s1 = inlined_call_operand.vmem [shape: f32[27,8], index: 1, kind: input, shape index: {}]   ;;  %s9481_s2 = inlined_call_operand.vmem [shape: f32[1,8], index: 2, kind: input, shape index: {}]   ;;  %s9482_s3 = inlined_call_operand.vmem [shape: f32[72,16], index: 3, kind: input, shape index: {}]   ;;  %s9483_s4 = inlined_call_operand.vmem [shape: f32[1,16], index: 4, kind: input, shape index: {}]   ;;  %s9484_s5 = inlined_call_operand.vmem [shape: f32[256,32], index: 5, kind: input, shape index: {}]   ;;  %s9485_s6 = inlined_call_operand.vmem [shape: f32[1,32], index: 6, kind: input, shape index: {}]   ;;  %s9486_s7 = inlined_call_operand.vmem [shape: f32[32,32], index: 7, kind: input, shape index: {}]   ;;  %s9487_s8 = inlined_call_operand.vmem [shape: f32[1,32], index: 8, kind: input, shape index: {}]   ;;  %s9488_s9 = inlined_call_operand.hbm [shape: f32[1,2,32], index: 9, kind: output, shape index: {}]  }
   0x1   :  { %v121_v0 = vld [vmem:[%s9479_s0] sm:$0xff]  ;;  %v6636_v1 = vld [vmem:[%s9479_s0 + $0x8] sm:$0xff]  ;;  %34 = vst.msk [vmem:[#allocation2] sm:$0xff] %vm33_vm0, %v6556_v2  ;;  %35 = vst.msk [vmem:[#allocation2 + $0x8] sm:$0xff] %vm33_vm0, %v6556_v2 }
   0x2   :  { %186 = vst.msk [vmem:[#allocation2 + $0x19] sm:$0xff] %vm33_vm0, %v121_v0  ;;  %38 = vst.msk [vmem:[#allocation2 + $0x1b0] sm:$0xff] %vm33_vm0, %v6556_v2  ;;  %v124_v3 = vld [vmem:[%s9479_s0 + $0x18] sm:$0xff]  ;;  %v123_v4 = vld [vmem:[%s9479_s0 + $0x10] sm:$0xff] }
   0x3   :  { %39 = vst.msk [vmem:[#allocation2 + $0x1b8] sm:$0xff] %vm33_vm0, %v6556_v2  ;;  %42 = vst.msk [vmem:[#allocation2 + $0x198] sm:$0xff] %vm33_vm0, %v6556_v2  ;;  %v126_v5 = vld [vmem:[%s9479_s0 + $0x28] sm:$0xff]  ;;  %v125_v6 = vld [vmem:[%s9479_s0 + $0x20] sm:$0xff] }
   0x4   :  { %43 = vst.msk [vmem:[#allocation2 + $0x1a0] sm:$0xff] %vm33_vm0, %v6556_v2  ;;  %45 = vst.msk [vmem:[#allocation2 + $0x348] sm:$0xff] %vm33_vm0, %v6556_v2  ;;  %v128_v7 = vld [vmem:[%s9479_s0 + $0x38] sm:$0xff]  ;;  %v127_v8 = vld [vmem:[%s9479_s0 + $0x30] sm:$0xff] }
   0x5   :  { %46 = vst.msk [vmem:[#allocation2 + $0x350] sm:$0xff] %vm33_vm0, %v6556_v2  ;;  %187 = vst.msk [vmem:[#allocation2 + $0x21] sm:$0xff] %vm33_vm0, %v6636_v1  ;;  %v130_v9 = vld [vmem:[%s9479_s0 + $0x48] sm:$0xff]  ;;  %v129_v10 = vld [vmem:[%s9479_s0 + $0x40] sm:$0xff] }
   0x6   :  { %50 = vst.msk [vmem:[#allocation2 + $0x18] sm:$0x1] %vm48_vm1, %v6556_v2  ;;  %51 = vst.msk [vmem:[#allocation2 + $0x30] sm:$0x1] %vm48_vm1, %v6556_v2  ;;  %v132_v11 = vld [vmem:[%s9479_s0 + $0x58] sm:$0xff]  ;;  %v131_v12 = vld [vmem:[%s9479_s0 + $0x50] sm:$0xff] }
   0x7   :  { %52 = vst.msk [vmem:[#allocation2 + $0x48] sm:$0x1] %vm48_vm1, %v6556_v2  ;;  %53 = vst.msk [vmem:[#allocation2 + $0x60] sm:$0x1] %vm48_vm1, %v6556_v2  ;;  %v134_v13 = vld [vmem:[%s9479_s0 + $0x68] sm:$0xff]  ;;  %v133_v14 = vld [vmem:[%s9479_s0 + $0x60] sm:$0xff] }
   0x8   :  { %54 = vst.msk [vmem:[#allocation2 + $0x78] sm:$0x1] %vm48_vm1, %v6556_v2  ;;  %55 = vst.msk [vmem:[#allocation2 + $0x90] sm:$0x1] %vm48_vm1, %v6556_v2  ;;  %v136_v15 = vld [vmem:[%s9479_s0 + $0x78] sm:$0xff]  ;;  %v135_v16 = vld [vmem:[%s9479_s0 + $0x70] sm:$0xff] }
   0x9   :  { %56 = vst.msk [vmem:[#allocation2 + $0xa8] sm:$0x1] %vm48_vm1, %v6556_v2  ;;  %57 = vst.msk [vmem:[#allocation2 + $0xc0] sm:$0x1] %vm48_vm1, %v6556_v2  ;;  %v138_v17 = vld [vmem:[%s9479_s0 + $0x88] sm:$0xff]  ;;  %v137_v18 = vld [vmem:[%s9479_s0 + $0x80] sm:$0xff] }
   0xa   :  { %58 = vst.msk [vmem:[#allocation2 + $0xd8] sm:$0x1] %vm48_vm1, %v6556_v2  ;;  %59 = vst.msk [vmem:[#allocation2 + $0xf0] sm:$0x1] %vm48_vm1, %v6556_v2  ;;  %v140_v19 = vld [vmem:[%s9479_s0 + $0x98] sm:$0xff]  ;;  %v139_v20 = vld [vmem:[%s9479_s0 + $0x90] sm:$0xff] }
   0xb   :  { %60 = vst.msk [vmem:[#allocation2 + $0x108] sm:$0x1] %vm48_vm1, %v6556_v2  ;;  %61 = vst.msk [vmem:[#allocation2 + $0x120] sm:$0x1] %vm48_vm1, %v6556_v2  ;;  %v142_v21 = vld [vmem:[%s9479_s0 + $0xa8] sm:$0xff]  ;;  %v141_v22 = vld [vmem:[%s9479_s0 + $0xa0] sm:$0xff] }
   0xc   :  { %62 = vst.msk [vmem:[#allocation2 + $0x138] sm:$0x1] %vm48_vm1, %v6556_v2  ;;  %63 = vst.msk [vmem:[#allocation2 + $0x150] sm:$0x1] %vm48_vm1, %v6556_v2  ;;  %v144_v23 = vld [vmem:[%s9479_s0 + $0xb8] sm:$0xff]  ;;  %v378_v25 = vld [vmem:[#allocation2 + $0x1] sm:$0xff] }
   0xd   :  { %64 = vst.msk [vmem:[#allocation2 + $0x168] sm:$0x1] %vm48_vm1, %v6556_v2  ;;  %65 = vst.msk [vmem:[#allocation2 + $0x180] sm:$0x1] %vm48_vm1, %v6556_v2  ;;  %v6886_v24 = vld [vmem:[#allocation2 + $0x19] sm:$0xff]  ;;  %506 = vrot.lane.b32.xlu0 %v378_v25, %s6557_s13  ;;  %v6894_v26 = vld [vmem:[#allocation2 + $0x21] sm:$0xff] }
   0xe   :  { %68 = vst.msk [vmem:[#allocation2 + $0x1c8] sm:$0x1] %vm48_vm1, %v6556_v2  ;;  %69 = vst.msk [vmem:[#allocation2 + $0x1e0] sm:$0x1] %vm48_vm1, %v6556_v2  ;;  %510 = vrot.lane.b32.xlu1 %v6886_v24, %s6557_s13  ;;  %v143_v31 = vld [vmem:[%s9479_s0 + $0xb0] sm:$0xff]  ;;  %v146_v32 = vld [vmem:[%s9479_s0 + $0xc8] sm:$0xff] }
   0xf   :  { %70 = vst.msk [vmem:[#allocation2 + $0x1f8] sm:$0x1] %vm48_vm1, %v6556_v2  ;;  %71 = vst.msk [vmem:[#allocation2 + $0x210] sm:$0x1] %vm48_vm1, %v6556_v2  ;;  %v145_v34 = vld [vmem:[%s9479_s0 + $0xc0] sm:$0xff]  ;;  %v148_v35 = vld [vmem:[%s9479_s0 + $0xd8] sm:$0xff] }
  0x10   :  { %72 = vst.msk [vmem:[#allocation2 + $0x228] sm:$0x1] %vm48_vm1, %v6556_v2  ;;  %73 = vst.msk [vmem:[#allocation2 + $0x240] sm:$0x1] %vm48_vm1, %v6556_v2  ;;  %v147_v36 = vld [vmem:[%s9479_s0 + $0xd0] sm:$0xff]  ;;  %v150_v37 = vld [vmem:[%s9479_s0 + $0xe8] sm:$0xff] }
  0x11   :  { %74 = vst.msk [vmem:[#allocation2 + $0x258] sm:$0x1] %vm48_vm1, %v6556_v2  ;;  %75 = vst.msk [vmem:[#allocation2 + $0x270] sm:$0x1] %vm48_vm1, %v6556_v2  ;;  %v149_v38 = vld [vmem:[%s9479_s0 + $0xe0] sm:$0xff]  ;;  %v154_v39 = vld [vmem:[%s9479_s0 + $0x108] sm:$0xff] }
  0x12   :  { %76 = vst.msk [vmem:[#allocation2 + $0x288] sm:$0x1] %vm48_vm1, %v6556_v2  ;;  %77 = vst.msk [vmem:[#allocation2 + $0x2a0] sm:$0x1] %vm48_vm1, %v6556_v2  ;;  %512 = vrot.lane.b32.xlu1 %v6894_v26, %s6557_s13  ;;  %v153_v40 = vld [vmem:[%s9479_s0 + $0x100] sm:$0xff]  ;;  %v156_v42 = vld [vmem:[%s9479_s0 + $0x118] sm:$0xff] }
  0x13   :  { %78 = vst.msk [vmem:[#allocation2 + $0x2b8] sm:$0x1] %vm48_vm1, %v6556_v2  ;;  %79 = vst.msk [vmem:[#allocation2 + $0x2d0] sm:$0x1] %vm48_vm1, %v6556_v2  ;;  %v155_v43 = vld [vmem:[%s9479_s0 + $0x110] sm:$0xff]  ;;  %v158_v44 = vld [vmem:[%s9479_s0 + $0x128] sm:$0xff] }
  0x14   :  { %80 = vst.msk [vmem:[#allocation2 + $0x2e8] sm:$0x1] %vm48_vm1, %v6556_v2  ;;  %81 = vst.msk [vmem:[#allocation2 + $0x300] sm:$0x1] %vm48_vm1, %v6556_v2  ;;  %v157_v46 = vld [vmem:[%s9479_s0 + $0x120] sm:$0xff]  ;;  %v160_v47 = vld [vmem:[%s9479_s0 + $0x138] sm:$0xff] }
  0x15   :  { %82 = vst.msk [vmem:[#allocation2 + $0x318] sm:$0x1] %vm48_vm1, %v6556_v2  ;;  %83 = vst.msk [vmem:[#allocation2 + $0x330] sm:$0x1] %vm48_vm1, %v6556_v2  ;;  %v159_v48 = vld [vmem:[%s9479_s0 + $0x130] sm:$0xff]  ;;  %v162_v49 = vld [vmem:[%s9479_s0 + $0x148] sm:$0xff] }
  0x16   :  { %86 = vst.msk [vmem:[#allocation2 + $0x29] sm:$0x1] %vm48_vm1, %v6556_v2  ;;  %87 = vst.msk [vmem:[#allocation2 + $0x41] sm:$0x1] %vm48_vm1, %v6556_v2  ;;  %v161_v50 = vld [vmem:[%s9479_s0 + $0x140] sm:$0xff]  ;;  %v6989_v52 = vld [vmem:[#allocation2 + $0x18] sm:$0xff] }
  0x17   :  { %88 = vst.msk [vmem:[#allocation2 + $0x59] sm:$0x1] %vm48_vm1, %v6556_v2  ;;  %89 = vst.msk [vmem:[#allocation2 + $0x71] sm:$0x1] %vm48_vm1, %v6556_v2  ;;  %v6987_v51 = vld [vmem:[#allocation2 + $0x20] sm:$0xff]  ;;  %v251_v60 = vld [vmem:[#allocation2 + $0x8] sm:$0xff] }
  0x18   :  { %90 = vst.msk [vmem:[#allocation2 + $0x89] sm:$0x1] %vm48_vm1, %v6556_v2  ;;  %91 = vst.msk [vmem:[#allocation2 + $0xa1] sm:$0x1] %vm48_vm1, %v6556_v2 }
  0x19   :  { %92 = vst.msk [vmem:[#allocation2 + $0xb9] sm:$0x1] %vm48_vm1, %v6556_v2  ;;  %93 = vst.msk [vmem:[#allocation2 + $0xd1] sm:$0x1] %vm48_vm1, %v6556_v2 }
  0x1a   :  { %94 = vst.msk [vmem:[#allocation2 + $0xe9] sm:$0x1] %vm48_vm1, %v6556_v2  ;;  %95 = vst.msk [vmem:[#allocation2 + $0x101] sm:$0x1] %vm48_vm1, %v6556_v2 }
  0x1b   :  { %96 = vst.msk [vmem:[#allocation2 + $0x119] sm:$0x1] %vm48_vm1, %v6556_v2  ;;  %97 = vst.msk [vmem:[#allocation2 + $0x131] sm:$0x1] %vm48_vm1, %v6556_v2 }
  0x1c   :  { %98 = vst.msk [vmem:[#allocation2 + $0x149] sm:$0x1] %vm48_vm1, %v6556_v2  ;;  %99 = vst.msk [vmem:[#allocation2 + $0x161] sm:$0x1] %vm48_vm1, %v6556_v2 }
  0x1d   :  { %100 = vst.msk [vmem:[#allocation2 + $0x179] sm:$0x1] %vm48_vm1, %v6556_v2  ;;  %101 = vst.msk [vmem:[#allocation2 + $0x191] sm:$0x1] %vm48_vm1, %v6556_v2 }
  0x1e   :  { %104 = vst.msk [vmem:[#allocation2 + $0x1d9] sm:$0x1] %vm48_vm1, %v6556_v2  ;;  %105 = vst.msk [vmem:[#allocation2 + $0x1f1] sm:$0x1] %vm48_vm1, %v6556_v2 }
  0x1f   :  { %106 = vst.msk [vmem:[#allocation2 + $0x209] sm:$0x1] %vm48_vm1, %v6556_v2  ;;  %107 = vst.msk [vmem:[#allocation2 + $0x221] sm:$0x1] %vm48_vm1, %v6556_v2 }
  0x20   :  { %108 = vst.msk [vmem:[#allocation2 + $0x239] sm:$0x1] %vm48_vm1, %v6556_v2  ;;  %109 = vst.msk [vmem:[#allocation2 + $0x251] sm:$0x1] %vm48_vm1, %v6556_v2 }
  0x21   :  { %110 = vst.msk [vmem:[#allocation2 + $0x269] sm:$0x1] %vm48_vm1, %v6556_v2  ;;  %111 = vst.msk [vmem:[#allocation2 + $0x281] sm:$0x1] %vm48_vm1, %v6556_v2 }
  0x22   :  { %112 = vst.msk [vmem:[#allocation2 + $0x299] sm:$0x1] %vm48_vm1, %v6556_v2  ;;  %113 = vst.msk [vmem:[#allocation2 + $0x2b1] sm:$0x1] %vm48_vm1, %v6556_v2 }
  0x23   :  { %114 = vst.msk [vmem:[#allocation2 + $0x2c9] sm:$0x1] %vm48_vm1, %v6556_v2  ;;  %115 = vst.msk [vmem:[#allocation2 + $0x2e1] sm:$0x1] %vm48_vm1, %v6556_v2 }
  0x24   :  { %116 = vst.msk [vmem:[#allocation2 + $0x2f9] sm:$0x1] %vm48_vm1, %v6556_v2  ;;  %117 = vst.msk [vmem:[#allocation2 + $0x311] sm:$0x1] %vm48_vm1, %v6556_v2 }
  0x25   :  { %118 = vst.msk [vmem:[#allocation2 + $0x329] sm:$0x1] %vm48_vm1, %v6556_v2  ;;  %119 = vst.msk [vmem:[#allocation2 + $0x341] sm:$0x1] %vm48_vm1, %v6556_v2 }
  0x26   :  { %49 = vst.msk [vmem:[#allocation2] sm:$0x1] %vm48_vm1, %v6556_v2  ;;  %66 = vst.msk [vmem:[#allocation2 + $0x198] sm:$0x1] %vm48_vm1, %v6556_v2 }
  0x27   :  { %67 = vst.msk [vmem:[#allocation2 + $0x1b0] sm:$0x1] %vm48_vm1, %v6556_v2  ;;  %84 = vst.msk [vmem:[#allocation2 + $0x348] sm:$0x1] %vm48_vm1, %v6556_v2 }
  0x28   :  { %37 = vst.msk [vmem:[#allocation2 + $0x10] sm:$0x3] %vm36_vm2, %v6556_v2  ;;  %40 = vst.msk [vmem:[#allocation2 + $0x1c0] sm:$0x3] %vm36_vm2, %v6556_v2 }
  0x29   :  { %44 = vst.msk [vmem:[#allocation2 + $0x1a8] sm:$0x3] %vm36_vm2, %v6556_v2  ;;  %47 = vst.msk [vmem:[#allocation2 + $0x358] sm:$0x3] %vm36_vm2, %v6556_v2 }
  0x2a   :  { %189 = vst.msk [vmem:[#allocation2 + $0x39] sm:$0xff] %vm33_vm0, %v124_v3  ;;  %188 = vst.msk [vmem:[#allocation2 + $0x31] sm:$0xff] %vm33_vm0, %v123_v4 }
  0x2b   :  { %191 = vst.msk [vmem:[#allocation2 + $0x51] sm:$0xff] %vm33_vm0, %v126_v5  ;;  %190 = vst.msk [vmem:[#allocation2 + $0x49] sm:$0xff] %vm33_vm0, %v125_v6 }
  0x2c   :  { %85 = vst.msk [vmem:[#allocation2 + $0x11] sm:$0x1] %vm48_vm1, %v6556_v2  ;;  %102 = vst.msk [vmem:[#allocation2 + $0x1a9] sm:$0x1] %vm48_vm1, %v6556_v2 }
  0x2d   :  { %103 = vst.msk [vmem:[#allocation2 + $0x1c1] sm:$0x1] %vm48_vm1, %v6556_v2  ;;  %120 = vst.msk [vmem:[#allocation2 + $0x359] sm:$0x1] %vm48_vm1, %v6556_v2  ;;  %v250_v59 = vld [vmem:[#allocation2] sm:$0xff] }
  0x2e   :  { %193 = vst.msk [vmem:[#allocation2 + $0x69] sm:$0xff] %vm33_vm0, %v128_v7  ;;  %192 = vst.msk [vmem:[#allocation2 + $0x61] sm:$0xff] %vm33_vm0, %v127_v8 }
  0x2f   :  { %195 = vst.msk [vmem:[#allocation2 + $0x81] sm:$0xff] %vm33_vm0, %v130_v9  ;;  %194 = vst.msk [vmem:[#allocation2 + $0x79] sm:$0xff] %vm33_vm0, %v129_v10  ;;  %v379_v27 = vld [vmem:[#allocation2 + $0x9] sm:$0xff] }
  0x30   :  { %197 = vst.msk [vmem:[#allocation2 + $0x99] sm:$0xff] %vm33_vm0, %v132_v11  ;;  %196 = vst.msk [vmem:[#allocation2 + $0x91] sm:$0xff] %vm33_vm0, %v131_v12  ;;  %508 = vrot.lane.b32.xlu0 %v379_v27, %s6557_s13 }
  0x31   :  { %199 = vst.msk [vmem:[#allocation2 + $0xb1] sm:$0xff] %vm33_vm0, %v134_v13  ;;  %198 = vst.msk [vmem:[#allocation2 + $0xa9] sm:$0xff] %vm33_vm0, %v133_v14  ;;  %v6899_v28 = vld [vmem:[#allocation2 + $0x39] sm:$0xff]  ;;  %v6901_v29 = vld [vmem:[#allocation2 + $0x31] sm:$0xff] }
  0x32   :  { %201 = vst.msk [vmem:[#allocation2 + $0xc9] sm:$0xff] %vm33_vm0, %v136_v15  ;;  %200 = vst.msk [vmem:[#allocation2 + $0xc1] sm:$0xff] %vm33_vm0, %v135_v16  ;;  %v6903_v30 = vld [vmem:[#allocation2 + $0x51] sm:$0xff]  ;;  %516 = vrot.lane.b32.xlu1 %v6899_v28, %s6557_s13  ;;  %v6915_v33 = vld [vmem:[#allocation2 + $0x49] sm:$0xff] }
  0x33   :  { %203 = vst.msk [vmem:[#allocation2 + $0xe1] sm:$0xff] %vm33_vm0, %v138_v17  ;;  %202 = vst.msk [vmem:[#allocation2 + $0xd9] sm:$0xff] %vm33_vm0, %v137_v18  ;;  %v6999_v53 = vld [vmem:[#allocation2 + $0x30] sm:$0xff]  ;;  %v7011_v56 = vld [vmem:[#allocation2 + $0x38] sm:$0xff] }
  0x34   :  { %205 = vst.msk [vmem:[#allocation2 + $0xf9] sm:$0xff] %vm33_vm0, %v140_v19  ;;  %204 = vst.msk [vmem:[#allocation2 + $0xf1] sm:$0xff] %vm33_vm0, %v139_v20  ;;  %514 = vrot.lane.b32.xlu0 %v6901_v29, %s6557_s13  ;;  %v7021_v63 = vld [vmem:[#allocation2 + $0x50] sm:$0xff]  ;;  %v7023_v0 = vld [vmem:[#allocation2 + $0x48] sm:$0xff] }
  0x35   :  { %207 = vst.msk [vmem:[#allocation2 + $0x111] sm:$0xff] %vm33_vm0, %v142_v21  ;;  %206 = vst.msk [vmem:[#allocation2 + $0x109] sm:$0xff] %vm33_vm0, %v141_v22  ;;  %v6945_v41 = vld [vmem:[#allocation2 + $0x69] sm:$0xff]  ;;  %v6962_v45 = vld [vmem:[#allocation2 + $0x61] sm:$0xff] }
  0x36   :  { %209 = vst.msk [vmem:[#allocation2 + $0x129] sm:$0xff] %vm33_vm0, %v144_v23  ;;  %208 = vst.msk [vmem:[#allocation2 + $0x121] sm:$0xff] %vm33_vm0, %v143_v31  ;;  %520 = vrot.lane.b32.xlu1 %v6903_v30, %s6557_s13  ;;  %v7001_v54 = vld [vmem:[#allocation2 + $0x81] sm:$0xff]  ;;  %v7003_v55 = vld [vmem:[#allocation2 + $0x79] sm:$0xff] }
  0x37   :  { %211 = vst.msk [vmem:[#allocation2 + $0x141] sm:$0xff] %vm33_vm0, %v146_v32  ;;  %210 = vst.msk [vmem:[#allocation2 + $0x139] sm:$0xff] %vm33_vm0, %v145_v34  ;;  %v7013_v57 = vld [vmem:[#allocation2 + $0x99] sm:$0xff]  ;;  %v7015_v58 = vld [vmem:[#allocation2 + $0x91] sm:$0xff] }
  0x38   :  { %213 = vst.msk [vmem:[#allocation2 + $0x159] sm:$0xff] %vm33_vm0, %v148_v35  ;;  %212 = vst.msk [vmem:[#allocation2 + $0x151] sm:$0xff] %vm33_vm0, %v147_v36  ;;  %518 = vrot.lane.b32.xlu0 %v6915_v33, %s6557_s13  ;;  %v393_v61 = vld [vmem:[#allocation2 + $0xb1] sm:$0xff]  ;;  %v392_v62 = vld [vmem:[#allocation2 + $0xa9] sm:$0xff] }
  0x39   :  { %215 = vst.msk [vmem:[#allocation2 + $0x171] sm:$0xff] %vm33_vm0, %v150_v37  ;;  %214 = vst.msk [vmem:[#allocation2 + $0x169] sm:$0xff] %vm33_vm0, %v149_v38  ;;  %v7033_v1 = vld [vmem:[#allocation2 + $0x68] sm:$0xff]  ;;  %v7035_v3 = vld [vmem:[#allocation2 + $0x60] sm:$0xff] }
  0x3a   :  { %219 = vst.msk [vmem:[#allocation2 + $0x1d1] sm:$0xff] %vm33_vm0, %v154_v39  ;;  %218 = vst.msk [vmem:[#allocation2 + $0x1c9] sm:$0xff] %vm33_vm0, %v153_v40  ;;  %524 = vrot.lane.b32.xlu1 %v6945_v41, %s6557_s13  ;;  %v7037_v4 = vld [vmem:[#allocation2 + $0x80] sm:$0xff]  ;;  %v7045_v5 = vld [vmem:[#allocation2 + $0x78] sm:$0xff] }
  0x3b   :  { %221 = vst.msk [vmem:[#allocation2 + $0x1e9] sm:$0xff] %vm33_vm0, %v156_v42  ;;  %220 = vst.msk [vmem:[#allocation2 + $0x1e1] sm:$0xff] %vm33_vm0, %v155_v43  ;;  %v7047_v6 = vld [vmem:[#allocation2 + $0x98] sm:$0xff]  ;;  %v7049_v7 = vld [vmem:[#allocation2 + $0x90] sm:$0xff] }
  0x3c   :  { %223 = vst.msk [vmem:[#allocation2 + $0x201] sm:$0xff] %vm33_vm0, %v158_v44  ;;  %222 = vst.msk [vmem:[#allocation2 + $0x1f9] sm:$0xff] %vm33_vm0, %v157_v46  ;;  %522 = vrot.lane.b32.xlu0 %v6962_v45, %s6557_s13  ;;  %v7057_v8 = vld [vmem:[#allocation2 + $0xb0] sm:$0xff]  ;;  %v7059_v9 = vld [vmem:[#allocation2 + $0xa8] sm:$0xff] }
  0x3d   :  { %225 = vst.msk [vmem:[#allocation2 + $0x219] sm:$0xff] %vm33_vm0, %v160_v47  ;;  %224 = vst.msk [vmem:[#allocation2 + $0x211] sm:$0xff] %vm33_vm0, %v159_v48  ;;  %v7061_v10 = vld [vmem:[#allocation2 + $0xc8] sm:$0xff]  ;;  %v7069_v12 = vld [vmem:[#allocation2 + $0xc0] sm:$0xff] }
  0x3e   :  { %227 = vst.msk [vmem:[#allocation2 + $0x231] sm:$0xff] %vm33_vm0, %v162_v49  ;;  %226 = vst.msk [vmem:[#allocation2 + $0x229] sm:$0xff] %vm33_vm0, %v161_v50  ;;  %528 = vrot.lane.b32.xlu1 %v7001_v54, %s6557_s13  ;;  %v395_v11 = vld [vmem:[#allocation2 + $0xc9] sm:$0xff]  ;;  %v7071_v13 = vld [vmem:[#allocation2 + $0xe0] sm:$0xff] }
  0x3f   :  { %316 = vst.msk [vmem:[#allocation3 + $0x10] sm:$0xff] %vm33_vm0, %v6989_v52  ;;  %317 = vst.msk [vmem:[#allocation3 + $0x18] sm:$0xff] %vm33_vm0, %v6987_v51  ;;  %v7079_v14 = vld [vmem:[#allocation2 + $0xd8] sm:$0xff]  ;;  %v7083_v16 = vld [vmem:[#allocation2 + $0xf0] sm:$0xff] }
  0x40   :  { %318 = vst.msk [vmem:[#allocation3 + $0x20] sm:$0xff] %vm33_vm0, %v6999_v53  ;;  %526 = vrot.lane.b32.xlu0 %v7003_v55, %s6557_s13  ;;  %319 = vst.msk [vmem:[#allocation3 + $0x28] sm:$0xff] %vm33_vm0, %v7011_v56  ;;  %v7081_v15 = vld [vmem:[#allocation2 + $0xf8] sm:$0xff]  ;;  %v394_v17 = vld [vmem:[#allocation2 + $0xc1] sm:$0xff] }
  0x41   :  { %314 = vst.msk [vmem:[#allocation3] sm:$0xff] %vm33_vm0, %v250_v59  ;;  %315 = vst.msk [vmem:[#allocation3 + $0x8] sm:$0xff] %vm33_vm0, %v251_v60  ;;  %v7091_v18 = vld [vmem:[#allocation2 + $0x110] sm:$0xff] }
  0x42   :  { %532 = vrot.lane.b32.xlu1 %v7013_v57, %s6557_s13  ;;  %321 = vst.msk [vmem:[#allocation3 + $0x38] sm:$0xff] %vm33_vm0, %v7021_v63  ;;  %320 = vst.msk [vmem:[#allocation3 + $0x30] sm:$0xff] %vm33_vm0, %v7023_v0 }
  0x43   :  { %323 = vst.msk [vmem:[#allocation3 + $0x48] sm:$0xff] %vm33_vm0, %v7033_v1  ;;  %322 = vst.msk [vmem:[#allocation3 + $0x40] sm:$0xff] %vm33_vm0, %v7035_v3 }
  0x44   :  { %530 = vrot.lane.b32.xlu0 %v7015_v58, %s6557_s13  ;;  %325 = vst.msk [vmem:[#allocation3 + $0x58] sm:$0xff] %vm33_vm0, %v7037_v4  ;;  %324 = vst.msk [vmem:[#allocation3 + $0x50] sm:$0xff] %vm33_vm0, %v7045_v5 }
  0x45   :  { %327 = vst.msk [vmem:[#allocation3 + $0x68] sm:$0xff] %vm33_vm0, %v7047_v6  ;;  %326 = vst.msk [vmem:[#allocation3 + $0x60] sm:$0xff] %vm33_vm0, %v7049_v7 }
  0x46   :  { %329 = vst.msk [vmem:[#allocation3 + $0x78] sm:$0xff] %vm33_vm0, %v7057_v8  ;;  %328 = vst.msk [vmem:[#allocation3 + $0x70] sm:$0xff] %vm33_vm0, %v7059_v9  ;;  %536 = vrot.lane.b32.xlu1 %v393_v61, %s6557_s13 }
  0x47   :  { %331 = vst.msk [vmem:[#allocation3 + $0x88] sm:$0xff] %vm33_vm0, %v7061_v10  ;;  %330 = vst.msk [vmem:[#allocation3 + $0x80] sm:$0xff] %vm33_vm0, %v7069_v12 }
  0x48   :  { %534 = vrot.lane.b32.xlu0 %v392_v62, %s6557_s13  ;;  %333 = vst.msk [vmem:[#allocation3 + $0x98] sm:$0xff] %vm33_vm0, %v7071_v13  ;;  %332 = vst.msk [vmem:[#allocation3 + $0x90] sm:$0xff] %vm33_vm0, %v7079_v14 }
  0x49   :  { %335 = vst.msk [vmem:[#allocation3 + $0xa8] sm:$0xff] %vm33_vm0, %v7081_v15  ;;  %334 = vst.msk [vmem:[#allocation3 + $0xa0] sm:$0xff] %vm33_vm0, %v7083_v16 }
  0x4a   :  { %14 = vsyncpa [#allocation10], 0  ;;  %337 = vst.msk [vmem:[#allocation3 + $0xb8] sm:$0xff] %vm33_vm0, %v7091_v18  ;;  %v7095_v19 = vld [vmem:[#allocation2 + $0x108] sm:$0xff]  ;;  %540 = vrot.lane.b32.xlu1 %v395_v11, %s6557_s13  ;;  %v396_v22 = vld [vmem:[#allocation2 + $0xd9] sm:$0xff]  ;;  %s6558_s28 = smov 6  }
  0x4b   :  { %336 = vst.msk [vmem:[#allocation3 + $0xb0] sm:$0xff] %vm33_vm0, %v7095_v19  ;;  %v275_v20 = vld [vmem:[#allocation2 + $0x128] sm:$0xff]  ;;  %v274_v23 = vld [vmem:[#allocation2 + $0x120] sm:$0xff]  ;;  %v398_v31 = vld [vmem:[#allocation2 + $0xf1] sm:$0xff]  ;;  %s6559_s29 = smov 9   ;;  %s6560_s30 = smov 12  }
  0x4c   :  { %538 = vrot.lane.b32.xlu0 %v394_v17, %s6557_s13  ;;  %v397_v21 = vld [vmem:[#allocation2 + $0xe1] sm:$0xff]  ;;  %339 = vst.msk [vmem:[#allocation3 + $0xc8] sm:$0xff] %vm33_vm0, %v275_v20  ;;  %338 = vst.msk [vmem:[#allocation3 + $0xc0] sm:$0xff] %vm33_vm0, %v274_v23  ;;  %v399_v27 = vld [vmem:[#allocation2 + $0xf9] sm:$0xff]  ;;  %s6561_s10 = smov 15   ;;  %s6562_s11 = smov 18  }
  0x4d   :  { %v277_v25 = vld [vmem:[#allocation2 + $0x140] sm:$0xff]  ;;  %v276_v32 = vld [vmem:[#allocation2 + $0x138] sm:$0xff]  ;;  %v400_v36 = vld [vmem:[#allocation2 + $0x109] sm:$0xff]  ;;  %s6563_s12 = smov 21   ;;  %vm698_vm3 = vcmask 48152   ;;  %s6564_s18 = smov 24  }
  0x4e   :  { %544 = vrot.lane.b32.xlu1 %v397_v21, %s6557_s13  ;;  %341 = vst.msk [vmem:[#allocation3 + $0xd8] sm:$0xff] %vm33_vm0, %v277_v25  ;;  %340 = vst.msk [vmem:[#allocation3 + $0xd0] sm:$0xff] %vm33_vm0, %v276_v32  ;;  %v279_v34 = vld [vmem:[#allocation2 + $0x158] sm:$0xff]  ;;  %v278_v37 = vld [vmem:[#allocation2 + $0x150] sm:$0xff]  ;;  %vm3727_vm4 = vcmask 1042432   ;;  %vm6565_vm5 = vmmov 1  }
  0x4f   :  { %v401_v35 = vld [vmem:[#allocation2 + $0x111] sm:$0xff]  ;;  %343 = vst.msk [vmem:[#allocation3 + $0xe8] sm:$0xff] %vm33_vm0, %v279_v34  ;;  %342 = vst.msk [vmem:[#allocation3 + $0xe0] sm:$0xff] %vm33_vm0, %v278_v37  ;;  %v403_v39 = vld [vmem:[#allocation2 + $0x129] sm:$0xff]  ;;  %vm1083_vm7 = vcmask 72752   ;;  %vm1468_vm8 = vcmask 97352  }
  0x50   :  { %542 = vrot.lane.b32.xlu0 %v396_v22, %s6557_s13  ;;  %v281_v38 = vld [vmem:[#allocation2 + $0x170] sm:$0xff]  ;;  %v402_v40 = vld [vmem:[#allocation2 + $0x121] sm:$0xff]  ;;  %v404_v44 = vld [vmem:[#allocation2 + $0x139] sm:$0xff]  ;;  %vm1853_vm9 = vcmask 121952   ;;  %vm2238_vm10 = vcmask 146552   ;;  %vm2624_vm11 = vcmask 171152  }
  0x51   :  { %345 = vst.msk [vmem:[#allocation3 + $0xf8] sm:$0xff] %vm33_vm0, %v281_v38  ;;  %v280_v42 = vld [vmem:[#allocation2 + $0x168] sm:$0xff]  ;;  %v283_v46 = vld [vmem:[#allocation2 + $0x1b8] sm:$0xff]  ;;  %v282_v47 = vld [vmem:[#allocation2 + $0x1b0] sm:$0xff]  ;;  %vm3009_vm12 = vcmask 195752   ;;  %vm3394_vm13 = vcmask 220352  }
  0x52   :  { %548 = vrot.lane.b32.xlu1 %v399_v27, %s6557_s13  ;;  %344 = vst.msk [vmem:[#allocation3 + $0xf0] sm:$0xff] %vm33_vm0, %v280_v42  ;;  %v405_v43 = vld [vmem:[#allocation2 + $0x141] sm:$0xff]  ;;  %347 = vst.msk [vmem:[#allocation3 + $0x108] sm:$0xff] %vm33_vm0, %v283_v46  ;;  %v285_v48 = vld [vmem:[#allocation2 + $0x1d0] sm:$0xff]  ;;  %vm3534_vm14 = vcmask 220160   ;;  %vm4180_vm15 = vcmask 64512  }
  0x53   :  { %346 = vst.msk [vmem:[#allocation3 + $0x100] sm:$0xff] %vm33_vm0, %v282_v47  ;;  %v407_v49 = vld [vmem:[#allocation2 + $0x159] sm:$0xff]  ;;  %v406_v50 = vld [vmem:[#allocation2 + $0x151] sm:$0xff]  ;;  %349 = vst.msk [vmem:[#allocation3 + $0x118] sm:$0xff] %vm33_vm0, %v285_v48  ;;  %vm4398_vm1 = vcmask 57344   ;;  %s6570_s21 = smov 48  }
  0x54   :  { %546 = vrot.lane.b32.xlu0 %v398_v31, %s6557_s13  ;;  %v284_v59 = vld [vmem:[#allocation2 + $0x1c8] sm:$0xff]  ;;  %v409_v61 = vld [vmem:[#allocation2 + $0x171] sm:$0xff]  ;;  %v286_v11 = vld [vmem:[#allocation2 + $0x1e0] sm:$0xff]  ;;  %4388 = vst.msk [vmem:[#allocation5] sm:$0xff] %vm4180_vm15, %v6556_v2  ;;  %s6571_s15 = smov 56   ;;  %vm4568_vm2 = vcmask 130112  }
  0x55   :  { %348 = vst.msk [vmem:[#allocation3 + $0x110] sm:$0xff] %vm33_vm0, %v284_v59  ;;  %v287_v60 = vld [vmem:[#allocation2 + $0x1e8] sm:$0xff]  ;;  %350 = vst.msk [vmem:[#allocation3 + $0x120] sm:$0xff] %vm33_vm0, %v286_v11  ;;  %v289_v17 = vld [vmem:[#allocation2 + $0x200] sm:$0xff] }
  0x56   :  { %552 = vrot.lane.b32.xlu1 %v401_v35, %s6557_s13  ;;  %v408_v62 = vld [vmem:[#allocation2 + $0x169] sm:$0xff]  ;;  %351 = vst.msk [vmem:[#allocation3 + $0x128] sm:$0xff] %vm33_vm0, %v287_v60  ;;  %v411_v20 = vld [vmem:[#allocation2 + $0x1b9] sm:$0xff]  ;;  %v410_v21 = vld [vmem:[#allocation2 + $0x1b1] sm:$0xff] }
  0x57   :  { %353 = vst.msk [vmem:[#allocation3 + $0x138] sm:$0xff] %vm33_vm0, %v289_v17  ;;  %v288_v22 = vld [vmem:[#allocation2 + $0x1f8] sm:$0xff]  ;;  %v412_v27 = vld [vmem:[#allocation2 + $0x1c9] sm:$0xff]  ;;  %v414_v35 = vld [vmem:[#allocation2 + $0x1e1] sm:$0xff] }
  0x58   :  { %550 = vrot.lane.b32.xlu0 %v400_v36, %s6557_s13  ;;  %352 = vst.msk [vmem:[#allocation3 + $0x130] sm:$0xff] %vm33_vm0, %v288_v22  ;;  %v291_v23 = vld [vmem:[#allocation2 + $0x218] sm:$0xff]  ;;  %v290_v31 = vld [vmem:[#allocation2 + $0x210] sm:$0xff]  ;;  %v292_v36 = vld [vmem:[#allocation2 + $0x228] sm:$0xff] }
  0x59   :  { %v413_v25 = vld [vmem:[#allocation2 + $0x1d1] sm:$0xff]  ;;  %355 = vst.msk [vmem:[#allocation3 + $0x148] sm:$0xff] %vm33_vm0, %v291_v23  ;;  %354 = vst.msk [vmem:[#allocation3 + $0x140] sm:$0xff] %vm33_vm0, %v290_v31  ;;  %v415_v34 = vld [vmem:[#allocation2 + $0x1e9] sm:$0xff] }
  0x5a   :  { %556 = vrot.lane.b32.xlu1 %v403_v39, %s6557_s13  ;;  %v293_v32 = vld [vmem:[#allocation2 + $0x230] sm:$0xff]  ;;  %356 = vst.msk [vmem:[#allocation3 + $0x150] sm:$0xff] %vm33_vm0, %v292_v36  ;;  %v417_v37 = vld [vmem:[#allocation2 + $0x201] sm:$0xff]  ;;  %v416_v38 = vld [vmem:[#allocation2 + $0x1f9] sm:$0xff] }
  0x5b   :  { %357 = vst.msk [vmem:[#allocation3 + $0x158] sm:$0xff] %vm33_vm0, %v293_v32  ;;  %v419_v39 = vld [vmem:[#allocation2 + $0x219] sm:$0xff]  ;;  %v421_v42 = vld [vmem:[#allocation2 + $0x231] sm:$0xff]  ;;  %v763_v46 = vld [vmem:[#allocation2 + $0x2] sm:$0xff] }
  0x5c   :  { %554 = vrot.lane.b32.xlu0 %v402_v40, %s6557_s13  ;;  %v418_v40 = vld [vmem:[#allocation2 + $0x211] sm:$0xff]  ;;  %v765_v47 = vld [vmem:[#allocation2 + $0x1a] sm:$0xff]  ;;  %v1919_v48 = vld [vmem:[#allocation2 + $0x22] sm:$0xff]  ;;  %4391 = vst.msk [vmem:[#allocation5 + $0xa0] sm:$0xff] %vm4180_vm15, %v6556_v2 }
  0x5d   :  { %v3525_v60 = vld [vmem:[%s9480_s1 + $0x10] sm:$0xff]  ;;  %vm6442_vm6 = vmpackc.low %vm3727_vm4, %vm6565_vm5  ;;  %v3075_v11 = vld [vmem:[#allocation2 + $0x3a] sm:$0xff]  ;;  %4394 = vst.msk [vmem:[#allocation5 + $0x90] sm:$0xff] %vm4180_vm15, %v6556_v2  ;;  %vm4762_vm4 = vcmask 261312   ;;  %vm4859_vm5 = vcmask 326912  }
  0x5e   :  { %560 = vrot.lane.b32.xlu1 %v405_v43, %s6557_s13  ;;  %v420_v43 = vld [vmem:[#allocation2 + $0x229] sm:$0xff]  ;;  %4396 = vst.msk [vmem:[#allocation5 + $0x130] sm:$0xff] %vm4180_vm15, %v6556_v2 }
  0x5f   :  { %4399 = vst.msk [vmem:[#allocation5] sm:$0x1] %vm4398_vm1, %v6556_v2  ;;  %4400 = vst.msk [vmem:[#allocation5 + $0x10] sm:$0x1] %vm4398_vm1, %v6556_v2 }
  0x60   :  { %558 = vrot.lane.b32.xlu0 %v404_v44, %s6557_s13  ;;  %v764_v44 = vld [vmem:[#allocation2 + $0xa] sm:$0xff]  ;;  %4401 = vst.msk [vmem:[#allocation5 + $0x20] sm:$0x1] %vm4398_vm1, %v6556_v2  ;;  %4402 = vst.msk [vmem:[#allocation5 + $0x30] sm:$0x1] %vm4398_vm1, %v6556_v2 }
  0x61   :  { %4403 = vst.msk [vmem:[#allocation5 + $0x40] sm:$0x1] %vm4398_vm1, %v6556_v2  ;;  %4404 = vst.msk [vmem:[#allocation5 + $0x50] sm:$0x1] %vm4398_vm1, %v6556_v2 }
  0x62   :  { %564 = vrot.lane.b32.xlu1 %v407_v49, %s6557_s13  ;;  %v3523_v49 = vld [vmem:[%s9480_s1] sm:$0xff]  ;;  %4405 = vst.msk [vmem:[#allocation5 + $0x60] sm:$0x1] %vm4398_vm1, %v6556_v2  ;;  %4406 = vst.msk [vmem:[#allocation5 + $0x70] sm:$0x1] %vm4398_vm1, %v6556_v2 }
  0x63   :  { %4407 = vst.msk [vmem:[#allocation5 + $0x80] sm:$0x1] %vm4398_vm1, %v6556_v2  ;;  %4408 = vst.msk [vmem:[#allocation5 + $0x90] sm:$0x1] %vm4398_vm1, %v6556_v2 }
  0x64   :  { %562 = vrot.lane.b32.xlu0 %v406_v50, %s6557_s13  ;;  %v3524_v50 = vld [vmem:[%s9480_s1 + $0x8] sm:$0xff]  ;;  %4409 = vst.msk [vmem:[#allocation5 + $0xa0] sm:$0x1] %vm4398_vm1, %v6556_v2  ;;  %4410 = vst.msk [vmem:[#allocation5 + $0xb0] sm:$0x1] %vm4398_vm1, %v6556_v2 }
  0x65   :  { %v6437_v59 = vpack.c.bf16 %v3524_v50, %v3523_v49  ;;  %4411 = vst.msk [vmem:[#allocation5 + $0xc0] sm:$0x1] %vm4398_vm1, %v6556_v2  ;;  %4412 = vst.msk [vmem:[#allocation5 + $0xd0] sm:$0x1] %vm4398_vm1, %v6556_v2 }
  0x66   :  { %568 = vrot.lane.b32.xlu1 %v409_v61, %s6557_s13  ;;  %v3526_v61 = vld [vmem:[%s9480_s1 + $0x18] sm:$0x7]  ;;  %4413 = vst.msk [vmem:[#allocation5 + $0xe0] sm:$0x1] %vm4398_vm1, %v6556_v2  ;;  %4414 = vst.msk [vmem:[#allocation5 + $0xf0] sm:$0x1] %vm4398_vm1, %v6556_v2 }
  0x67   :  { %6438 = vmatprep.subr.bf16.mxu0 %v6437_v59  ;;  %6501 = vmatprep.subr.bf16.mxu1 %v6437_v59  ;;  %4415 = vst.msk [vmem:[#allocation5 + $0x100] sm:$0x1] %vm4398_vm1, %v6556_v2  ;;  %4416 = vst.msk [vmem:[#allocation5 + $0x110] sm:$0x1] %vm4398_vm1, %v6556_v2 }
  0x68   :  { %566 = vrot.lane.b32.xlu0 %v408_v62, %s6557_s13  ;;  %6440 = vmatpush3.bf16.msra.mxu0 %v6437_v59  ;;  %v6441_v62 = vpack.c.bf16 %v3526_v61, %v3525_v60  ;;  %4417 = vst.msk [vmem:[#allocation5 + $0x120] sm:$0x1] %vm4398_vm1, %v6556_v2  ;;  %4418 = vst.msk [vmem:[#allocation5 + $0x130] sm:$0x1] %vm4398_vm1, %v6556_v2 }
  0x69   :  { %6503 = vmatpush3.bf16.msra.mxu1 %v6437_v59  ;;  %4420 = vst.msk [vmem:[#allocation5 + $0x19] sm:$0x1] %vm4398_vm1, %v6556_v2  ;;  %4421 = vst.msk [vmem:[#allocation5 + $0x29] sm:$0x1] %vm4398_vm1, %v6556_v2 }
  0x6a   :  { %572 = vrot.lane.b32.xlu1 %v411_v20, %s6557_s13  ;;  %6443 = vmatprep.subr.msk.bf16.mxu0 %vm6442_vm6, %v6441_v62  ;;  %4422 = vst.msk [vmem:[#allocation5 + $0x39] sm:$0x1] %vm4398_vm1, %v6556_v2  ;;  %4423 = vst.msk [vmem:[#allocation5 + $0x49] sm:$0x1] %vm4398_vm1, %v6556_v2 }
  0x6b   :  { %6502 = vmatprep.subr.msk.bf16.mxu1 %vm6442_vm6, %v6441_v62  ;;  %4424 = vst.msk [vmem:[#allocation5 + $0x59] sm:$0x1] %vm4398_vm1, %v6556_v2  ;;  %4425 = vst.msk [vmem:[#allocation5 + $0x69] sm:$0x1] %vm4398_vm1, %v6556_v2 }
  0x6c   :  { %570 = vrot.lane.b32.xlu0 %v410_v21, %s6557_s13  ;;  %6446 = vmatpush3.bf16.msk.msra.mxu0 %vm6442_vm6, %v6441_v62  ;;  %4426 = vst.msk [vmem:[#allocation5 + $0x79] sm:$0x1] %vm4398_vm1, %v6556_v2  ;;  %4427 = vst.msk [vmem:[#allocation5 + $0x89] sm:$0x1] %vm4398_vm1, %v6556_v2 }
  0x6d   :  { %6504 = vmatpush3.bf16.msk.msra.mxu1 %vm6442_vm6, %v6441_v62  ;;  %4430 = vst.msk [vmem:[#allocation5 + $0xb9] sm:$0x1] %vm4398_vm1, %v6556_v2  ;;  %4431 = vst.msk [vmem:[#allocation5 + $0xc9] sm:$0x1] %vm4398_vm1, %v6556_v2  ;;  %vm4956_vm6 = vcmask 392512  }
  0x6e   :  { %576 = vrot.lane.b32.xlu1 %v413_v25, %s6557_s13  ;;  %4432 = vst.msk [vmem:[#allocation5 + $0xd9] sm:$0x1] %vm4398_vm1, %v6556_v2  ;;  %4433 = vst.msk [vmem:[#allocation5 + $0xe9] sm:$0x1] %vm4398_vm1, %v6556_v2 }
  0x6f   :  { %4434 = vst.msk [vmem:[#allocation5 + $0xf9] sm:$0x1] %vm4398_vm1, %v6556_v2  ;;  %4435 = vst.msk [vmem:[#allocation5 + $0x109] sm:$0x1] %vm4398_vm1, %v6556_v2 }
  0x70   :  { %574 = vrot.lane.b32.xlu0 %v412_v27, %s6557_s13  ;;  %4436 = vst.msk [vmem:[#allocation5 + $0x119] sm:$0x1] %vm4398_vm1, %v6556_v2  ;;  %4437 = vst.msk [vmem:[#allocation5 + $0x129] sm:$0x1] %vm4398_vm1, %v6556_v2 }
  0x72   :  { %580 = vrot.lane.b32.xlu1 %v415_v34, %s6557_s13 }
  0x74   :  { %578 = vrot.lane.b32.xlu0 %v414_v35, %s6557_s13 }
  0x76   :  { %584 = vrot.lane.b32.xlu1 %v417_v37, %s6557_s13 }
  0x78   :  { %582 = vrot.lane.b32.xlu0 %v416_v38, %s6557_s13 }
  0x7a   :  { %588 = vrot.lane.b32.xlu1 %v419_v39, %s6557_s13 }
  0x7c   :  { %586 = vrot.lane.b32.xlu0 %v418_v40, %s6557_s13 }
  0x7e   :  { %592 = vrot.lane.b32.xlu1 %v421_v42, %s6557_s13 }
  0x80   :  { %590 = vrot.lane.b32.xlu0 %v420_v43, %s6557_s13 }
  0x82   :  { %893 = vrot.lane.b32.xlu1 %v764_v44, %s6558_s28 }
  0x84   :  { %891 = vrot.lane.b32.xlu0 %v763_v46, %s6558_s28 }
  0x86   :  { %1278 = vrot.lane.b32.xlu1 %v6987_v51, %s6559_s29  ;;  %v3074_v51 = vld [vmem:[#allocation2 + $0x32] sm:$0xff] }
  0x88   :  { %1276 = vrot.lane.b32.xlu0 %v6989_v52, %s6559_s29 }
  0x8a   :  { %1663 = vrot.lane.b32.xlu1 %v6894_v26, %s6560_s30  ;;  %v507_v26 = vpop.permute.xlu0 %506 }
  0x8b   :  { %699 = vst.msk [vmem:[#allocation3] sm:$0xff] %vm698_vm3, %v507_v26 }
  0x8c   :  { %1661 = vrot.lane.b32.xlu0 %v6886_v24, %s6560_s30  ;;  %v511_v24 = vpop.permute.xlu1 %510 }
  0x8d   :  { %701 = vst.msk [vmem:[#allocation3 + $0x10] sm:$0xff] %vm698_vm3, %v511_v24 }
  0x8e   :  { %895 = vrot.lane.b32.xlu1 %v765_v47, %s6558_s28 }
  0x90   :  { %2046 = vrot.lane.b32.xlu0 %v765_v47, %s6561_s10  ;;  %v513_v52 = vpop.permute.xlu1 %512 }
  0x91   :  { %702 = vst.msk [vmem:[#allocation3 + $0x18] sm:$0xff] %vm698_vm3, %v513_v52 }
  0x92   :  { %2432 = vrot.lane.b32.xlu1 %v6999_v53, %s6562_s11 }
  0x94   :  { %2048 = vrot.lane.b32.xlu0 %v1919_v48, %s6561_s10 }
  0x96   :  { %1280 = vrot.lane.b32.xlu1 %v6999_v53, %s6559_s29 }
  0x98   :  { %897 = vrot.lane.b32.xlu0 %v1919_v48, %s6558_s28 }
  0x9a   :  { %2817 = vrot.lane.b32.xlu1 %v6901_v29, %s6563_s12 }
  0x9c   :  { %2434 = vrot.lane.b32.xlu0 %v7011_v56, %s6562_s11 }
  0x9e   :  { %1665 = vrot.lane.b32.xlu1 %v6901_v29, %s6560_s30 }
  0xa0   :  { %1282 = vrot.lane.b32.xlu0 %v7011_v56, %s6559_s29 }
  0xa2   :  { %v509_v53 = vpop.permute.xlu0 %508  ;;  %3202 = vrot.lane.b32.xlu1 %v3074_v51, %s6564_s18 }
  0xa3   :  { %700 = vst.msk [vmem:[#allocation3 + $0x8] sm:$0xff] %vm698_vm3, %v509_v53 }
  0xa4   :  { %2819 = vrot.lane.b32.xlu0 %v6899_v28, %s6563_s12  ;;  %v517_v29 = vpop.permute.xlu1 %516 }
  0xa5   :  { %704 = vst.msk [vmem:[#allocation3 + $0x28] sm:$0xff] %vm698_vm3, %v517_v29 }
  0xa6   :  { %v515_v56 = vpop.permute.xlu0 %514  ;;  %2050 = vrot.lane.b32.xlu1 %v3074_v51, %s6561_s10 }
  0xa7   :  { %703 = vst.msk [vmem:[#allocation3 + $0x20] sm:$0xff] %vm698_vm3, %v515_v56 }
  0xa8   :  { %1667 = vrot.lane.b32.xlu0 %v6899_v28, %s6560_s30  ;;  %v521_v17 = vpop.permute.xlu1 %520 }
  0xa9   :  { %706 = vst.msk [vmem:[#allocation3 + $0x38] sm:$0xff] %vm698_vm3, %v521_v17 }
  0xaa   :  { %v519_v20 = vpop.permute.xlu0 %518  ;;  %899 = vrot.lane.b32.xlu1 %v3074_v51, %s6558_s28 }
  0xab   :  { %705 = vst.msk [vmem:[#allocation3 + $0x30] sm:$0xff] %vm698_vm3, %v519_v20 }
  0xac   :  { %3204 = vrot.lane.b32.xlu0 %v3075_v11, %s6564_s18  ;;  %v525_v21 = vpop.permute.xlu1 %524 }
  0xad   :  { %708 = vst.msk [vmem:[#allocation3 + $0x48] sm:$0xff] %vm698_vm3, %v525_v21 }
  0xae   :  { %v523_v22 = vpop.permute.xlu0 %522  ;;  %2436 = vrot.lane.b32.xlu1 %v7023_v0, %s6562_s11 }
  0xaf   :  { %707 = vst.msk [vmem:[#allocation3 + $0x40] sm:$0xff] %vm698_vm3, %v523_v22 }
  0xb0   :  { %2052 = vrot.lane.b32.xlu0 %v3075_v11, %s6561_s10  ;;  %v529_v28 = vpop.permute.xlu1 %528 }
  0xb1   :  { %710 = vst.msk [vmem:[#allocation3 + $0x58] sm:$0xff] %vm698_vm3, %v529_v28 }
  0xb2   :  { %v527_v23 = vpop.permute.xlu0 %526  ;;  %1284 = vrot.lane.b32.xlu1 %v7023_v0, %s6559_s29  ;;  %v3076_v0 = vld [vmem:[#allocation2 + $0x4a] sm:$0xff] }
  0xb3   :  { %709 = vst.msk [vmem:[#allocation3 + $0x50] sm:$0xff] %vm698_vm3, %v527_v23 }
  0xb4   :  { %901 = vrot.lane.b32.xlu0 %v3075_v11, %s6558_s28  ;;  %v533_v25 = vpop.permute.xlu1 %532 }
  0xb5   :  { %712 = vst.msk [vmem:[#allocation3 + $0x68] sm:$0xff] %vm698_vm3, %v533_v25 }
  0xb6   :  { %v531_v27 = vpop.permute.xlu0 %530  ;;  %2821 = vrot.lane.b32.xlu1 %v6915_v33, %s6563_s12 }
  0xb7   :  { %711 = vst.msk [vmem:[#allocation3 + $0x60] sm:$0xff] %vm698_vm3, %v531_v27 }
  0xb8   :  { %2438 = vrot.lane.b32.xlu0 %v7021_v63, %s6562_s11  ;;  %v537_v31 = vpop.permute.xlu1 %536 }
  0xb9   :  { %714 = vst.msk [vmem:[#allocation3 + $0x78] sm:$0xff] %vm698_vm3, %v537_v31 }
  0xba   :  { %v535_v32 = vpop.permute.xlu0 %534  ;;  %1669 = vrot.lane.b32.xlu1 %v6915_v33, %s6560_s30  ;;  %v3077_v33 = vld [vmem:[#allocation2 + $0x52] sm:$0xff] }
  0xbb   :  { %713 = vst.msk [vmem:[#allocation3 + $0x70] sm:$0xff] %vm698_vm3, %v535_v32 }
  0xbc   :  { %1286 = vrot.lane.b32.xlu0 %v7021_v63, %s6559_s29  ;;  %v541_v34 = vpop.permute.xlu1 %540 }
  0xbd   :  { %716 = vst.msk [vmem:[#allocation3 + $0x88] sm:$0xff] %vm698_vm3, %v541_v34 }
  0xbe   :  { %v539_v35 = vpop.permute.xlu0 %538  ;;  %3206 = vrot.lane.b32.xlu1 %v3076_v0, %s6564_s18 }
  0xbf   :  { %715 = vst.msk [vmem:[#allocation3 + $0x80] sm:$0xff] %vm698_vm3, %v539_v35 }
  0xc0   :  { %2823 = vrot.lane.b32.xlu0 %v6903_v30, %s6563_s12  ;;  %v545_v36 = vpop.permute.xlu1 %544 }
  0xc1   :  { %718 = vst.msk [vmem:[#allocation3 + $0x98] sm:$0xff] %vm698_vm3, %v545_v36 }
  0xc2   :  { %v543_v37 = vpop.permute.xlu0 %542  ;;  %2054 = vrot.lane.b32.xlu1 %v3076_v0, %s6561_s10 }
  0xc3   :  { %717 = vst.msk [vmem:[#allocation3 + $0x90] sm:$0xff] %vm698_vm3, %v543_v37 }
  0xc4   :  { %1671 = vrot.lane.b32.xlu0 %v6903_v30, %s6560_s30  ;;  %v549_v63 = vpop.permute.xlu1 %548 }
  0xc5   :  { %720 = vst.msk [vmem:[#allocation3 + $0xa8] sm:$0xff] %vm698_vm3, %v549_v63 }
  0xc6   :  { %v547_v38 = vpop.permute.xlu0 %546  ;;  %903 = vrot.lane.b32.xlu1 %v3076_v0, %s6558_s28 }
  0xc7   :  { %719 = vst.msk [vmem:[#allocation3 + $0xa0] sm:$0xff] %vm698_vm3, %v547_v38 }
  0xc8   :  { %3208 = vrot.lane.b32.xlu0 %v3077_v33, %s6564_s18  ;;  %v553_v39 = vpop.permute.xlu1 %552 }
  0xc9   :  { %722 = vst.msk [vmem:[#allocation3 + $0xb8] sm:$0xff] %vm698_vm3, %v553_v39  ;;  %v2699_v39 = vld [vmem:[#allocation2 + $0xa9] sm:$0xff] }
  0xca   :  { %v551_v40 = vpop.permute.xlu0 %550  ;;  %2440 = vrot.lane.b32.xlu1 %v7035_v3, %s6562_s11 }
  0xcb   :  { %721 = vst.msk [vmem:[#allocation3 + $0xb0] sm:$0xff] %vm698_vm3, %v551_v40 }
  0xcc   :  { %2056 = vrot.lane.b32.xlu0 %v3077_v33, %s6561_s10  ;;  %v557_v30 = vpop.permute.xlu1 %556 }
  0xcd   :  { %724 = vst.msk [vmem:[#allocation3 + $0xc8] sm:$0xff] %vm698_vm3, %v557_v30 }
  0xce   :  { %v555_v42 = vpop.permute.xlu0 %554  ;;  %1288 = vrot.lane.b32.xlu1 %v7035_v3, %s6559_s29  ;;  %v3078_v3 = vld [vmem:[#allocation2 + $0x62] sm:$0xff] }
  0xcf   :  { %723 = vst.msk [vmem:[#allocation3 + $0xc0] sm:$0xff] %vm698_vm3, %v555_v42 }
  0xd0   :  { %905 = vrot.lane.b32.xlu0 %v3077_v33, %s6558_s28  ;;  %v561_v43 = vpop.permute.xlu1 %560 }
  0xd1   :  { %726 = vst.msk [vmem:[#allocation3 + $0xd8] sm:$0xff] %vm698_vm3, %v561_v43 }
  0xd2   :  { %v559_v44 = vpop.permute.xlu0 %558  ;;  %2825 = vrot.lane.b32.xlu1 %v6962_v45, %s6563_s12 }
  0xd3   :  { %725 = vst.msk [vmem:[#allocation3 + $0xd0] sm:$0xff] %vm698_vm3, %v559_v44 }
  0xd4   :  { %2442 = vrot.lane.b32.xlu0 %v7033_v1, %s6562_s11  ;;  %v565_v46 = vpop.permute.xlu1 %564 }
  0xd5   :  { %728 = vst.msk [vmem:[#allocation3 + $0xe8] sm:$0xff] %vm698_vm3, %v565_v46  ;;  %v2700_v46 = vld [vmem:[#allocation2 + $0xb1] sm:$0xff] }
  0xd6   :  { %v563_v47 = vpop.permute.xlu0 %562  ;;  %1673 = vrot.lane.b32.xlu1 %v6962_v45, %s6560_s30  ;;  %v3079_v45 = vld [vmem:[#allocation2 + $0x6a] sm:$0xff] }
  0xd7   :  { %727 = vst.msk [vmem:[#allocation3 + $0xe0] sm:$0xff] %vm698_vm3, %v563_v47 }
  0xd8   :  { %1290 = vrot.lane.b32.xlu0 %v7033_v1, %s6559_s29  ;;  %v569_v48 = vpop.permute.xlu1 %568 }
  0xd9   :  { %730 = vst.msk [vmem:[#allocation3 + $0xf8] sm:$0xff] %vm698_vm3, %v569_v48 }
  0xda   :  { %v567_v24 = vpop.permute.xlu0 %566  ;;  %3210 = vrot.lane.b32.xlu1 %v3078_v3, %s6564_s18 }
  0xdb   :  { %729 = vst.msk [vmem:[#allocation3 + $0xf0] sm:$0xff] %vm698_vm3, %v567_v24 }
  0xdc   :  { %2827 = vrot.lane.b32.xlu0 %v6945_v41, %s6563_s12  ;;  %v573_v26 = vpop.permute.xlu1 %572 }
  0xdd   :  { %732 = vst.msk [vmem:[#allocation3 + $0x108] sm:$0xff] %vm698_vm3, %v573_v26 }
  0xde   :  { %v571_v51 = vpop.permute.xlu0 %570  ;;  %2058 = vrot.lane.b32.xlu1 %v3078_v3, %s6561_s10 }
  0xdf   :  { %731 = vst.msk [vmem:[#allocation3 + $0x100] sm:$0xff] %vm698_vm3, %v571_v51 }
  0xe0   :  { %1675 = vrot.lane.b32.xlu0 %v6945_v41, %s6560_s30  ;;  %v577_v1 = vpop.permute.xlu1 %576 }
  0xe1   :  { %734 = vst.msk [vmem:[#allocation3 + $0x118] sm:$0xff] %vm698_vm3, %v577_v1 }
  0xe2   :  { %v575_v52 = vpop.permute.xlu0 %574  ;;  %907 = vrot.lane.b32.xlu1 %v3078_v3, %s6558_s28 }
  0xe3   :  { %733 = vst.msk [vmem:[#allocation3 + $0x110] sm:$0xff] %vm698_vm3, %v575_v52 }
  0xe4   :  { %3212 = vrot.lane.b32.xlu0 %v3079_v45, %s6564_s18  ;;  %v581_v53 = vpop.permute.xlu1 %580 }
  0xe5   :  { %736 = vst.msk [vmem:[#allocation3 + $0x128] sm:$0xff] %vm698_vm3, %v581_v53 }
  0xe6   :  { %v579_v49 = vpop.permute.xlu0 %578  ;;  %2444 = vrot.lane.b32.xlu1 %v7045_v5, %s6562_s11 }
  0xe7   :  { %735 = vst.msk [vmem:[#allocation3 + $0x120] sm:$0xff] %vm698_vm3, %v579_v49 }
  0xe8   :  { %2060 = vrot.lane.b32.xlu0 %v3079_v45, %s6561_s10  ;;  %v585_v41 = vpop.permute.xlu1 %584 }
  0xe9   :  { %738 = vst.msk [vmem:[#allocation3 + $0x138] sm:$0xff] %vm698_vm3, %v585_v41  ;;  %v2701_v41 = vld [vmem:[#allocation2 + $0xc1] sm:$0xff] }
  0xea   :  { %v583_v50 = vpop.permute.xlu0 %582  ;;  %1292 = vrot.lane.b32.xlu1 %v7045_v5, %s6559_s29  ;;  %v3080_v5 = vld [vmem:[#allocation2 + $0x7a] sm:$0xff] }
  0xeb   :  { %737 = vst.msk [vmem:[#allocation3 + $0x130] sm:$0xff] %vm698_vm3, %v583_v50 }
  0xec   :  { %909 = vrot.lane.b32.xlu0 %v3079_v45, %s6558_s28  ;;  %v589_v59 = vpop.permute.xlu1 %588 }
  0xed   :  { %740 = vst.msk [vmem:[#allocation3 + $0x148] sm:$0xff] %vm698_vm3, %v589_v59 }
  0xee   :  { %v587_v29 = vpop.permute.xlu0 %586  ;;  %2829 = vrot.lane.b32.xlu1 %v7003_v55, %s6563_s12 }
  0xef   :  { %739 = vst.msk [vmem:[#allocation3 + $0x140] sm:$0xff] %vm698_vm3, %v587_v29 }
  0xf0   :  { %2446 = vrot.lane.b32.xlu0 %v7037_v4, %s6562_s11  ;;  %v593_v56 = vpop.permute.xlu1 %592 }
  0xf1   :  { %742 = vst.msk [vmem:[#allocation3 + $0x158] sm:$0xff] %vm698_vm3, %v593_v56 }
  0xf2   :  { %v591_v60 = vpop.permute.xlu0 %590  ;;  %1677 = vrot.lane.b32.xlu1 %v7003_v55, %s6560_s30  ;;  %v3081_v55 = vld [vmem:[#allocation2 + $0x82] sm:$0xff] }
  0xf3   :  { %741 = vst.msk [vmem:[#allocation3 + $0x150] sm:$0xff] %vm698_vm3, %v591_v60 }
  0xf4   :  { %1294 = vrot.lane.b32.xlu0 %v7037_v4, %s6559_s29  ;;  %v894_v61 = vpop.permute.xlu1 %893 }
  0xf5   :  { %1085 = vst.msk [vmem:[#allocation3 + $0x8] sm:$0xff] %vm1083_vm7, %v894_v61 }
  0xf6   :  { %v892_v62 = vpop.permute.xlu0 %891  ;;  %3214 = vrot.lane.b32.xlu1 %v3080_v5, %s6564_s18 }
  0xf7   :  { %1084 = vst.msk [vmem:[#allocation3] sm:$0xff] %vm1083_vm7, %v892_v62 }
  0xf8   :  { %2831 = vrot.lane.b32.xlu0 %v7001_v54, %s6563_s12  ;;  %v1279_v11 = vpop.permute.xlu1 %1278 }
  0xf9   :  { %1470 = vst.msk [vmem:[#allocation3 + $0x8] sm:$0xff] %vm1468_vm8, %v1279_v11 }
  0xfa   :  { %v1277_v17 = vpop.permute.xlu0 %1276  ;;  %2062 = vrot.lane.b32.xlu1 %v3080_v5, %s6561_s10 }
  0xfb   :  { %1469 = vst.msk [vmem:[#allocation3] sm:$0xff] %vm1468_vm8, %v1277_v17 }
  0xfc   :  { %1679 = vrot.lane.b32.xlu0 %v7001_v54, %s6560_s30  ;;  %v1664_v4 = vpop.permute.xlu1 %1663 }
  0xfd   :  { %1855 = vst.msk [vmem:[#allocation3 + $0x8] sm:$0xff] %vm1853_vm9, %v1664_v4 }
  0xfe   :  { %v1662_v20 = vpop.permute.xlu0 %1661  ;;  %911 = vrot.lane.b32.xlu1 %v3080_v5, %s6558_s28  ;;  %v2702_v5 = vld [vmem:[#allocation2 + $0xc9] sm:$0xff] }
  0xff   :  { %1854 = vst.msk [vmem:[#allocation3] sm:$0xff] %vm1853_vm9, %v1662_v20 }
 0x100   :  { %3216 = vrot.lane.b32.xlu0 %v3081_v55, %s6564_s18  ;;  %v896_v21 = vpop.permute.xlu1 %895 }
 0x101   :  { %1086 = vst.msk [vmem:[#allocation3 + $0x10] sm:$0xff] %vm1083_vm7, %v896_v21 }
 0x102   :  { %v2047_v22 = vpop.permute.xlu0 %2046  ;;  %2448 = vrot.lane.b32.xlu1 %v7049_v7, %s6562_s11 }
 0x103   :  { %2239 = vst.msk [vmem:[#allocation3] sm:$0xff] %vm2238_vm10, %v2047_v22 }
 0x104   :  { %2064 = vrot.lane.b32.xlu0 %v3081_v55, %s6561_s10  ;;  %v2433_v54 = vpop.permute.xlu1 %2432 }
 0x105   :  { %2625 = vst.msk [vmem:[#allocation3] sm:$0xff] %vm2624_vm11, %v2433_v54 }
 0x106   :  { %v2049_v28 = vpop.permute.xlu0 %2048  ;;  %1296 = vrot.lane.b32.xlu1 %v7049_v7, %s6559_s29  ;;  %v3082_v7 = vld [vmem:[#allocation2 + $0x92] sm:$0xff] }
 0x107   :  { %2240 = vst.msk [vmem:[#allocation3 + $0x8] sm:$0xff] %vm2238_vm10, %v2049_v28 }
 0x108   :  { %913 = vrot.lane.b32.xlu0 %v3081_v55, %s6558_s28  ;;  %v1281_v23 = vpop.permute.xlu1 %1280 }
 0x109   :  { %1471 = vst.msk [vmem:[#allocation3 + $0x10] sm:$0xff] %vm1468_vm8, %v1281_v23  ;;  %v2703_v23 = vld [vmem:[#allocation2 + $0xd9] sm:$0xff] }
 0x10a   :  { %v898_v25 = vpop.permute.xlu0 %897  ;;  %2833 = vrot.lane.b32.xlu1 %v7015_v58, %s6563_s12 }
 0x10b   :  { %1087 = vst.msk [vmem:[#allocation3 + $0x18] sm:$0xff] %vm1083_vm7, %v898_v25 }
 0x10c   :  { %2450 = vrot.lane.b32.xlu0 %v7047_v6, %s6562_s11  ;;  %v2818_v27 = vpop.permute.xlu1 %2817 }
 0x10d   :  { %3010 = vst.msk [vmem:[#allocation3] sm:$0xff] %vm3009_vm12, %v2818_v27 }
 0x10e   :  { %v2435_v31 = vpop.permute.xlu0 %2434  ;;  %1681 = vrot.lane.b32.xlu1 %v7015_v58, %s6560_s30  ;;  %v3083_v58 = vld [vmem:[#allocation2 + $0x9a] sm:$0xff] }
 0x10f   :  { %2626 = vst.msk [vmem:[#allocation3 + $0x8] sm:$0xff] %vm2624_vm11, %v2435_v31 }
 0x110   :  { %1298 = vrot.lane.b32.xlu0 %v7047_v6, %s6559_s29  ;;  %v1666_v32 = vpop.permute.xlu1 %1665 }
 0x111   :  { %1856 = vst.msk [vmem:[#allocation3 + $0x10] sm:$0xff] %vm1853_vm9, %v1666_v32 }
 0x112   :  { %v1283_v0 = vpop.permute.xlu0 %1282  ;;  %3218 = vrot.lane.b32.xlu1 %v3082_v7, %s6564_s18 }
 0x113   :  { %1472 = vst.msk [vmem:[#allocation3 + $0x18] sm:$0xff] %vm1468_vm8, %v1283_v0  ;;  %v2704_v0 = vld [vmem:[#allocation2 + $0xe1] sm:$0xff] }
 0x114   :  { %2835 = vrot.lane.b32.xlu0 %v7013_v57, %s6563_s12  ;;  %v3203_v34 = vpop.permute.xlu1 %3202 }
 0x115   :  { %3395 = vst.msk [vmem:[#allocation3] sm:$0xff] %vm3394_vm13, %v3203_v34 }
 0x116   :  { %v2820_v35 = vpop.permute.xlu0 %2819  ;;  %2066 = vrot.lane.b32.xlu1 %v3082_v7, %s6561_s10 }
 0x117   :  { %3011 = vst.msk [vmem:[#allocation3 + $0x8] sm:$0xff] %vm3009_vm12, %v2820_v35 }
 0x118   :  { %1683 = vrot.lane.b32.xlu0 %v7013_v57, %s6560_s30  ;;  %v2051_v6 = vpop.permute.xlu1 %2050 }
 0x119   :  { %2241 = vst.msk [vmem:[#allocation3 + $0x10] sm:$0xff] %vm2238_vm10, %v2051_v6 }
 0x11a   :  { %v1668_v36 = vpop.permute.xlu0 %1667  ;;  %915 = vrot.lane.b32.xlu1 %v3082_v7, %s6558_s28 }
 0x11b   :  { %1857 = vst.msk [vmem:[#allocation3 + $0x18] sm:$0xff] %vm1853_vm9, %v1668_v36 }
 0x11c   :  { %3220 = vrot.lane.b32.xlu0 %v3083_v58, %s6564_s18  ;;  %v900_v37 = vpop.permute.xlu1 %899  ;;  %v3459_v63 = vld [vmem:[#allocation3] sm:$0xff] }
 0x11d   :  { %1088 = vst.msk [vmem:[#allocation3 + $0x20] sm:$0xff] %vm1083_vm7, %v900_v37  ;;  %6288 = vmatprep.mubr.msk.f32.mxu0 %vm3534_vm14, %v3459_v63 }
 0x11e   :  { %v3205_v33 = vpop.permute.xlu0 %3204  ;;  %2452 = vrot.lane.b32.xlu1 %v7059_v9, %s6562_s11 }
 0x11f   :  { %3396 = vst.msk [vmem:[#allocation3 + $0x8] sm:$0xff] %vm3394_vm13, %v3205_v33 }
 0x120   :  { %2068 = vrot.lane.b32.xlu0 %v3083_v58, %s6561_s10  ;;  %v2437_v57 = vpop.permute.xlu1 %2436 }
 0x121   :  { %2627 = vst.msk [vmem:[#allocation3 + $0x10] sm:$0xff] %vm2624_vm11, %v2437_v57 }
 0x122   :  { %v2053_v38 = vpop.permute.xlu0 %2052  ;;  %1300 = vrot.lane.b32.xlu1 %v7059_v9, %s6559_s29  ;;  %v3084_v9 = vld [vmem:[#allocation2 + $0xaa] sm:$0xff] }
 0x123   :  { %2242 = vst.msk [vmem:[#allocation3 + $0x18] sm:$0xff] %vm2238_vm10, %v2053_v38 }
 0x124   :  { %917 = vrot.lane.b32.xlu0 %v3083_v58, %s6558_s28  ;;  %v1285_v40 = vpop.permute.xlu1 %1284 }
 0x125   :  { %1473 = vst.msk [vmem:[#allocation3 + $0x20] sm:$0xff] %vm1468_vm8, %v1285_v40  ;;  %v2705_v40 = vld [vmem:[#allocation2 + $0xf1] sm:$0xff] }
 0x126   :  { %v902_v30 = vpop.permute.xlu0 %901  ;;  %v3460_v42 = vld [vmem:[#allocation3 + $0x8] sm:$0xff]  ;;  %2837 = vrot.lane.b32.xlu1 %v2699_v39, %s6563_s12 }
 0x127   :  { %1089 = vst.msk [vmem:[#allocation3 + $0x28] sm:$0xff] %vm1083_vm7, %v902_v30  ;;  %6289 = vmatmul.mubr.msk.f32.vlgmr.msra.gmra.mrb[0].mxu0 %vm3534_vm14, %v3460_v42 }
 0x128   :  { %2454 = vrot.lane.b32.xlu0 %v7057_v8, %s6562_s11  ;;  %v2822_v43 = vpop.permute.xlu1 %2821 }
 0x129   :  { %3012 = vst.msk [vmem:[#allocation3 + $0x10] sm:$0xff] %vm3009_vm12, %v2822_v43 }
 0x12a   :  { %v2439_v44 = vpop.permute.xlu0 %2438  ;;  %1685 = vrot.lane.b32.xlu1 %v2699_v39, %s6560_s30 }
 0x12b   :  { %2628 = vst.msk [vmem:[#allocation3 + $0x18] sm:$0xff] %vm2624_vm11, %v2439_v44  ;;  %v163_v44 = vld [vmem:[%s9479_s0 + $0x150] sm:$0xff] }
 0x12c   :  { %1302 = vrot.lane.b32.xlu0 %v7057_v8, %s6559_s29  ;;  %v1670_v47 = vpop.permute.xlu1 %1669  ;;  %v3085_v8 = vld [vmem:[#allocation2 + $0xb2] sm:$0xff]  ;;  %228 = vst.msk [vmem:[#allocation2 + $0x241] sm:$0xff] %vm33_vm0, %v163_v44 }
 0x12d   :  { %1858 = vst.msk [vmem:[#allocation3 + $0x20] sm:$0xff] %vm1853_vm9, %v1670_v47  ;;  %v2706_v47 = vld [vmem:[#allocation2 + $0xf9] sm:$0xff] }
 0x12e   :  { %v1287_v3 = vpop.permute.xlu0 %1286  ;;  %3222 = vrot.lane.b32.xlu1 %v3084_v9, %s6564_s18  ;;  %v2326_v44 = vld [vmem:[#allocation2 + $0x138] sm:$0xff] }
 0x12f   :  { %1474 = vst.msk [vmem:[#allocation3 + $0x28] sm:$0xff] %vm1468_vm8, %v1287_v3 }
 0x130   :  { %2839 = vrot.lane.b32.xlu0 %v2700_v46, %s6563_s12  ;;  %v3207_v48 = vpop.permute.xlu1 %3206 }
 0x131   :  { %3397 = vst.msk [vmem:[#allocation3 + $0x10] sm:$0xff] %vm3394_vm13, %v3207_v48 }
 0x132   :  { %v2824_v24 = vpop.permute.xlu0 %2823  ;;  %2070 = vrot.lane.b32.xlu1 %v3084_v9, %s6561_s10 }
 0x133   :  { %3013 = vst.msk [vmem:[#allocation3 + $0x18] sm:$0xff] %vm3009_vm12, %v2824_v24 }
 0x134   :  { %1687 = vrot.lane.b32.xlu0 %v2700_v46, %s6560_s30  ;;  %v2055_v26 = vpop.permute.xlu1 %2054  ;;  %v3090_v46 = vld [vmem:[#allocation2 + $0xf2] sm:$0xff] }
 0x135   :  { %2243 = vst.msk [vmem:[#allocation3 + $0x20] sm:$0xff] %vm2238_vm10, %v2055_v26  ;;  %v3091_v26 = vld [vmem:[#allocation2 + $0xfa] sm:$0xff] }
 0x136   :  { %v1672_v51 = vpop.permute.xlu0 %1671  ;;  %919 = vrot.lane.b32.xlu1 %v3084_v9, %s6558_s28 }
 0x137   :  { %1859 = vst.msk [vmem:[#allocation3 + $0x28] sm:$0xff] %vm1853_vm9, %v1672_v51 }
 0x138   :  { %3224 = vrot.lane.b32.xlu0 %v3085_v8, %s6564_s18  ;;  %v904_v45 = vpop.permute.xlu1 %903  ;;  %v3461_v52 = vld [vmem:[#allocation3 + $0x10] sm:$0xff] }
 0x139   :  { %1090 = vst.msk [vmem:[#allocation3 + $0x30] sm:$0xff] %vm1083_vm7, %v904_v45  ;;  %6291 = vmatprep.mubr.msk.f32.mxu0 %vm3534_vm14, %v3461_v52 }
 0x13a   :  { %v3209_v1 = vpop.permute.xlu0 %3208  ;;  %2456 = vrot.lane.b32.xlu1 %v7069_v12, %s6562_s11 }
 0x13b   :  { %3398 = vst.msk [vmem:[#allocation3 + $0x18] sm:$0xff] %vm3394_vm13, %v3209_v1 }
 0x13c   :  { %2072 = vrot.lane.b32.xlu0 %v3085_v8, %s6561_s10  ;;  %v2441_v53 = vpop.permute.xlu1 %2440 }
 0x13d   :  { %2629 = vst.msk [vmem:[#allocation3 + $0x20] sm:$0xff] %vm2624_vm11, %v2441_v53 }
 0x13e   :  { %v2057_v49 = vpop.permute.xlu0 %2056  ;;  %1304 = vrot.lane.b32.xlu1 %v7069_v12, %s6559_s29  ;;  %v3086_v12 = vld [vmem:[#allocation2 + $0xc2] sm:$0xff] }
 0x13f   :  { %2244 = vst.msk [vmem:[#allocation3 + $0x28] sm:$0xff] %vm2238_vm10, %v2057_v49 }
 0x140   :  { %921 = vrot.lane.b32.xlu0 %v3085_v8, %s6558_s28  ;;  %v1289_v50 = vpop.permute.xlu1 %1288 }
 0x141   :  { %1475 = vst.msk [vmem:[#allocation3 + $0x30] sm:$0xff] %vm1468_vm8, %v1289_v50  ;;  %v165_v50 = vld [vmem:[%s9479_s0 + $0x160] sm:$0xff] }
 0x142   :  { %v906_v59 = vpop.permute.xlu0 %905  ;;  %v3462_v29 = vld [vmem:[#allocation3 + $0x18] sm:$0xff]  ;;  %2841 = vrot.lane.b32.xlu1 %v2701_v41, %s6563_s12  ;;  %230 = vst.msk [vmem:[#allocation2 + $0x259] sm:$0xff] %vm33_vm0, %v165_v50 }
 0x143   :  { %1091 = vst.msk [vmem:[#allocation3 + $0x38] sm:$0xff] %vm1083_vm7, %v906_v59  ;;  %6292 = vmatmul.mubr.msk.f32.gmra.mrb[2].mxu0 %vm3534_vm14, %v3462_v29  ;;  %v2707_v59 = vld [vmem:[#allocation2 + $0x109] sm:$0xff] }
 0x144   :  { %2458 = vrot.lane.b32.xlu0 %v7061_v10, %s6562_s11  ;;  %v2826_v56 = vpop.permute.xlu1 %2825 }
 0x145   :  { %3014 = vst.msk [vmem:[#allocation3 + $0x20] sm:$0xff] %vm3009_vm12, %v2826_v56 }
 0x146   :  { %v2443_v60 = vpop.permute.xlu0 %2442  ;;  %1689 = vrot.lane.b32.xlu1 %v2701_v41, %s6560_s30 }
 0x147   :  { %2630 = vst.msk [vmem:[#allocation3 + $0x28] sm:$0xff] %vm2624_vm11, %v2443_v60 }
 0x148   :  { %1306 = vrot.lane.b32.xlu0 %v7061_v10, %s6559_s29  ;;  %v1674_v61 = vpop.permute.xlu1 %1673  ;;  %v3087_v10 = vld [vmem:[#allocation2 + $0xca] sm:$0xff] }
 0x149   :  { %1860 = vst.msk [vmem:[#allocation3 + $0x30] sm:$0xff] %vm1853_vm9, %v1674_v61  ;;  %v166_v61 = vld [vmem:[%s9479_s0 + $0x168] sm:$0xff] }
 0x14a   :  { %v1291_v62 = vpop.permute.xlu0 %1290  ;;  %3226 = vrot.lane.b32.xlu1 %v3086_v12, %s6564_s18  ;;  %231 = vst.msk [vmem:[#allocation2 + $0x261] sm:$0xff] %vm33_vm0, %v166_v61 }
 0x14b   :  { %1476 = vst.msk [vmem:[#allocation3 + $0x38] sm:$0xff] %vm1468_vm8, %v1291_v62  ;;  %v3092_v62 = vld [vmem:[#allocation2 + $0x10a] sm:$0xff] }
 0x14c   :  { %2843 = vrot.lane.b32.xlu0 %v2702_v5, %s6563_s12  ;;  %v3211_v11 = vpop.permute.xlu1 %3210 }
 0x14d   :  { %3399 = vst.msk [vmem:[#allocation3 + $0x20] sm:$0xff] %vm3394_vm13, %v3211_v11  ;;  %v2708_v11 = vld [vmem:[#allocation2 + $0x111] sm:$0xff] }
 0x14e   :  { %v2828_v17 = vpop.permute.xlu0 %2827  ;;  %2074 = vrot.lane.b32.xlu1 %v3086_v12, %s6561_s10 }
 0x14f   :  { %3015 = vst.msk [vmem:[#allocation3 + $0x28] sm:$0xff] %vm3009_vm12, %v2828_v17 }
 0x150   :  { %1691 = vrot.lane.b32.xlu0 %v2702_v5, %s6560_s30  ;;  %v2059_v55 = vpop.permute.xlu1 %2058  ;;  %v7523_v5 = vld [vmem:[#allocation2 + $0x258] sm:$0xff] }
 0x151   :  { %2245 = vst.msk [vmem:[#allocation3 + $0x30] sm:$0xff] %vm2238_vm10, %v2059_v55 }
 0x152   :  { %v1676_v4 = vpop.permute.xlu0 %1675  ;;  %923 = vrot.lane.b32.xlu1 %v3086_v12, %s6558_s28  ;;  %360 = vst.msk [vmem:[#allocation3 + $0x170] sm:$0xff] %vm33_vm0, %v7523_v5 }
 0x153   :  { %1861 = vst.msk [vmem:[#allocation3 + $0x38] sm:$0xff] %vm1853_vm9, %v1676_v4  ;;  %v7539_v4 = vld [vmem:[#allocation2 + $0x260] sm:$0xff] }
 0x154   :  { %3228 = vrot.lane.b32.xlu0 %v3087_v10, %s6564_s18  ;;  %v908_v20 = vpop.permute.xlu1 %907  ;;  %v3463_v22 = vld [vmem:[#allocation3 + $0x20] sm:$0xff]  ;;  %361 = vst.msk [vmem:[#allocation3 + $0x178] sm:$0xff] %vm33_vm0, %v7539_v4 }
 0x155   :  { %1092 = vst.msk [vmem:[#allocation3 + $0x40] sm:$0xff] %vm1083_vm7, %v908_v20  ;;  %6294 = vmatprep.mubr.msk.f32.mxu0 %vm3534_vm14, %v3463_v22  ;;  %v151_v20 = vld [vmem:[%s9479_s0 + $0xf0] sm:$0xff] }
 0x156   :  { %v3213_v21 = vpop.permute.xlu0 %3212  ;;  %2460 = vrot.lane.b32.xlu1 %v7079_v14, %s6562_s11  ;;  %216 = vst.msk [vmem:[#allocation2 + $0x181] sm:$0xff] %vm33_vm0, %v151_v20 }
 0x157   :  { %3400 = vst.msk [vmem:[#allocation3 + $0x28] sm:$0xff] %vm3394_vm13, %v3213_v21  ;;  %v3093_v21 = vld [vmem:[#allocation2 + $0x112] sm:$0xff] }
 0x158   :  { %2076 = vrot.lane.b32.xlu0 %v3087_v10, %s6561_s10  ;;  %v2445_v54 = vpop.permute.xlu1 %2444 }
 0x159   :  { %2631 = vst.msk [vmem:[#allocation3 + $0x30] sm:$0xff] %vm2624_vm11, %v2445_v54 }
 0x15a   :  { %v2061_v28 = vpop.permute.xlu0 %2060  ;;  %1308 = vrot.lane.b32.xlu1 %v7079_v14, %s6559_s29  ;;  %v3088_v14 = vld [vmem:[#allocation2 + $0xda] sm:$0xff] }
 0x15b   :  { %2246 = vst.msk [vmem:[#allocation3 + $0x38] sm:$0xff] %vm2238_vm10, %v2061_v28  ;;  %v2324_v28 = vld [vmem:[#allocation2 + $0x120] sm:$0xff] }
 0x15c   :  { %925 = vrot.lane.b32.xlu0 %v3087_v10, %s6558_s28  ;;  %v1293_v25 = vpop.permute.xlu1 %1292 }
 0x15d   :  { %1477 = vst.msk [vmem:[#allocation3 + $0x40] sm:$0xff] %vm1468_vm8, %v1293_v25 }
 0x15e   :  { %v910_v27 = vpop.permute.xlu0 %909  ;;  %v3464_v31 = vld [vmem:[#allocation3 + $0x28] sm:$0xff]  ;;  %2845 = vrot.lane.b32.xlu1 %v2703_v23, %s6563_s12 }
 0x15f   :  { %1093 = vst.msk [vmem:[#allocation3 + $0x48] sm:$0xff] %vm1083_vm7, %v910_v27  ;;  %6295 = vmatmul.mubr.msk.f32.gmra.mrb[4].mxu0 %vm3534_vm14, %v3464_v31 }
 0x160   :  { %2462 = vrot.lane.b32.xlu0 %v7071_v13, %s6562_s11  ;;  %v2830_v7 = vpop.permute.xlu1 %2829 }
 0x161   :  { %3016 = vst.msk [vmem:[#allocation3 + $0x30] sm:$0xff] %vm3009_vm12, %v2830_v7 }
 0x162   :  { %v2447_v32 = vpop.permute.xlu0 %2446  ;;  %1693 = vrot.lane.b32.xlu1 %v2703_v23, %s6560_s30 }
 0x163   :  { %2632 = vst.msk [vmem:[#allocation3 + $0x38] sm:$0xff] %vm2624_vm11, %v2447_v32  ;;  %v152_v32 = vld [vmem:[%s9479_s0 + $0xf8] sm:$0xff] }
 0x164   :  { %1310 = vrot.lane.b32.xlu0 %v7071_v13, %s6559_s29  ;;  %v1678_v34 = vpop.permute.xlu1 %1677  ;;  %v3089_v13 = vld [vmem:[#allocation2 + $0xe2] sm:$0xff]  ;;  %217 = vst.msk [vmem:[#allocation2 + $0x189] sm:$0xff] %vm33_vm0, %v152_v32 }
 0x165   :  { %1862 = vst.msk [vmem:[#allocation3 + $0x40] sm:$0xff] %vm1853_vm9, %v1678_v34 }
 0x166   :  { %v1295_v35 = vpop.permute.xlu0 %1294  ;;  %3230 = vrot.lane.b32.xlu1 %v3088_v14, %s6564_s18 }
 0x167   :  { %1478 = vst.msk [vmem:[#allocation3 + $0x48] sm:$0xff] %vm1468_vm8, %v1295_v35 }
 0x168   :  { %2847 = vrot.lane.b32.xlu0 %v2704_v0, %s6563_s12  ;;  %v3215_v58 = vpop.permute.xlu1 %3214 }
 0x169   :  { %3401 = vst.msk [vmem:[#allocation3 + $0x30] sm:$0xff] %vm3394_vm13, %v3215_v58 }
 0x16a   :  { %v2832_v6 = vpop.permute.xlu0 %2831  ;;  %2078 = vrot.lane.b32.xlu1 %v3088_v14, %s6561_s10 }
 0x16b   :  { %3017 = vst.msk [vmem:[#allocation3 + $0x38] sm:$0xff] %vm3009_vm12, %v2832_v6 }
 0x16c   :  { %1695 = vrot.lane.b32.xlu0 %v2704_v0, %s6560_s30  ;;  %v2063_v36 = vpop.permute.xlu1 %2062  ;;  %v2325_v0 = vld [vmem:[#allocation2 + $0x128] sm:$0xff] }
 0x16d   :  { %2247 = vst.msk [vmem:[#allocation3 + $0x40] sm:$0xff] %vm2238_vm10, %v2063_v36  ;;  %v3094_v36 = vld [vmem:[#allocation2 + $0x122] sm:$0xff] }
 0x16e   :  { %v1680_v37 = vpop.permute.xlu0 %1679  ;;  %927 = vrot.lane.b32.xlu1 %v3088_v14, %s6558_s28  ;;  %v2709_v14 = vld [vmem:[#allocation2 + $0x121] sm:$0xff] }
 0x16f   :  { %1863 = vst.msk [vmem:[#allocation3 + $0x48] sm:$0xff] %vm1853_vm9, %v1680_v37  ;;  %v2710_v37 = vld [vmem:[#allocation2 + $0x129] sm:$0xff] }
 0x170   :  { %3232 = vrot.lane.b32.xlu0 %v3089_v13, %s6564_s18  ;;  %v912_v33 = vpop.permute.xlu1 %911  ;;  %v3465_v57 = vld [vmem:[#allocation3 + $0x30] sm:$0xff] }
 0x171   :  { %1094 = vst.msk [vmem:[#allocation3 + $0x50] sm:$0xff] %vm1083_vm7, %v912_v33  ;;  %6297 = vmatprep.mubr.msk.f32.mxu0 %vm3534_vm14, %v3465_v57  ;;  %v167_v57 = vld [vmem:[%s9479_s0 + $0x170] sm:$0xff] }
 0x172   :  { %v3217_v63 = vpop.permute.xlu0 %3216  ;;  %2464 = vrot.lane.b32.xlu1 %v7083_v16, %s6562_s11  ;;  %232 = vst.msk [vmem:[#allocation2 + $0x271] sm:$0xff] %vm33_vm0, %v167_v57 }
 0x173   :  { %3402 = vst.msk [vmem:[#allocation3 + $0x38] sm:$0xff] %vm3394_vm13, %v3217_v63 }
 0x174   :  { %2080 = vrot.lane.b32.xlu0 %v3089_v13, %s6561_s10  ;;  %v2449_v38 = vpop.permute.xlu1 %2448 }
 0x175   :  { %2633 = vst.msk [vmem:[#allocation3 + $0x40] sm:$0xff] %vm2624_vm11, %v2449_v38 }
 0x176   :  { %v2065_v39 = vpop.permute.xlu0 %2064  ;;  %1312 = vrot.lane.b32.xlu1 %v7083_v16, %s6559_s29 }
 0x177   :  { %2248 = vst.msk [vmem:[#allocation3 + $0x48] sm:$0xff] %vm2238_vm10, %v2065_v39 }
 0x178   :  { %929 = vrot.lane.b32.xlu0 %v3089_v13, %s6558_s28  ;;  %v1297_v30 = vpop.permute.xlu1 %1296 }
 0x179   :  { %1479 = vst.msk [vmem:[#allocation3 + $0x50] sm:$0xff] %vm1468_vm8, %v1297_v30 }
 0x17a   :  { %v914_v42 = vpop.permute.xlu0 %913  ;;  %v3466_v43 = vld [vmem:[#allocation3 + $0x38] sm:$0xff]  ;;  %2849 = vrot.lane.b32.xlu1 %v2705_v40, %s6563_s12 }
 0x17b   :  { %1095 = vst.msk [vmem:[#allocation3 + $0x58] sm:$0xff] %vm1083_vm7, %v914_v42  ;;  %6298 = vmatmul.mubr.msk.f32.gmra.mrb[6].mxu0 %vm3534_vm14, %v3466_v43  ;;  %v7661_v43 = vld [vmem:[#allocation2 + $0x270] sm:$0xff] }
 0x17c   :  { %2466 = vrot.lane.b32.xlu0 %v7081_v15, %s6562_s11  ;;  %v2834_v16 = vpop.permute.xlu1 %2833  ;;  %362 = vst.msk [vmem:[#allocation3 + $0x180] sm:$0xff] %vm33_vm0, %v7661_v43 }
 0x17d   :  { %3018 = vst.msk [vmem:[#allocation3 + $0x40] sm:$0xff] %vm3009_vm12, %v2834_v16 }
 0x17e   :  { %v2451_v9 = vpop.permute.xlu0 %2450  ;;  %1697 = vrot.lane.b32.xlu1 %v2705_v40, %s6560_s30  ;;  %v3095_v40 = vld [vmem:[#allocation2 + $0x12a] sm:$0xff] }
 0x17f   :  { %2634 = vst.msk [vmem:[#allocation3 + $0x48] sm:$0xff] %vm2624_vm11, %v2451_v9 }
 0x180   :  { %1314 = vrot.lane.b32.xlu0 %v7081_v15, %s6559_s29  ;;  %v1682_v3 = vpop.permute.xlu1 %1681  ;;  %v164_v15 = vld [vmem:[%s9479_s0 + $0x158] sm:$0xff] }
 0x181   :  { %1864 = vst.msk [vmem:[#allocation3 + $0x50] sm:$0xff] %vm1853_vm9, %v1682_v3 }
 0x182   :  { %v1299_v48 = vpop.permute.xlu0 %1298  ;;  %3234 = vrot.lane.b32.xlu1 %v3090_v46, %s6564_s18  ;;  %229 = vst.msk [vmem:[#allocation2 + $0x249] sm:$0xff] %vm33_vm0, %v164_v15  ;;  %v2711_v15 = vld [vmem:[#allocation2 + $0x139] sm:$0xff] }
 0x183   :  { %1480 = vst.msk [vmem:[#allocation3 + $0x58] sm:$0xff] %vm1468_vm8, %v1299_v48  ;;  %v168_v48 = vld [vmem:[%s9479_s0 + $0x178] sm:$0xff] }
 0x184   :  { %2851 = vrot.lane.b32.xlu0 %v2706_v47, %s6563_s12  ;;  %v3219_v24 = vpop.permute.xlu1 %3218  ;;  %233 = vst.msk [vmem:[#allocation2 + $0x279] sm:$0xff] %vm33_vm0, %v168_v48 }
 0x185   :  { %3403 = vst.msk [vmem:[#allocation3 + $0x40] sm:$0xff] %vm3394_vm13, %v3219_v24  ;;  %v2327_v24 = vld [vmem:[#allocation2 + $0x140] sm:$0xff] }
 0x186   :  { %v2836_v8 = vpop.permute.xlu0 %2835  ;;  %2082 = vrot.lane.b32.xlu1 %v3090_v46, %s6561_s10 }
 0x187   :  { %3019 = vst.msk [vmem:[#allocation3 + $0x48] sm:$0xff] %vm3009_vm12, %v2836_v8 }
 0x188   :  { %1699 = vrot.lane.b32.xlu0 %v2706_v47, %s6560_s30  ;;  %v2067_v51 = vpop.permute.xlu1 %2066 }
 0x189   :  { %2249 = vst.msk [vmem:[#allocation3 + $0x50] sm:$0xff] %vm2238_vm10, %v2067_v51 }
 0x18a   :  { %v1684_v45 = vpop.permute.xlu0 %1683  ;;  %931 = vrot.lane.b32.xlu1 %v3090_v46, %s6558_s28 }
 0x18b   :  { %1865 = vst.msk [vmem:[#allocation3 + $0x58] sm:$0xff] %vm1853_vm9, %v1684_v45 }
 0x18c   :  { %3236 = vrot.lane.b32.xlu0 %v3091_v26, %s6564_s18  ;;  %v916_v1 = vpop.permute.xlu1 %915  ;;  %v3467_v53 = vld [vmem:[#allocation3 + $0x40] sm:$0xff] }
 0x18d   :  { %1096 = vst.msk [vmem:[#allocation3 + $0x60] sm:$0xff] %vm1083_vm7, %v916_v1  ;;  %6300 = vmatprep.mubr.msk.f32.mxu0 %vm3534_vm14, %v3467_v53  ;;  %v3096_v53 = vld [vmem:[#allocation2 + $0x13a] sm:$0xff] }
 0x18e   :  { %v3221_v52 = vpop.permute.xlu0 %3220  ;;  %2468 = vrot.lane.b32.xlu1 %v7095_v19, %s6562_s11 }
 0x18f   :  { %3404 = vst.msk [vmem:[#allocation3 + $0x48] sm:$0xff] %vm3394_vm13, %v3221_v52  ;;  %v7687_v52 = vld [vmem:[#allocation2 + $0x278] sm:$0xff] }
 0x190   :  { %2084 = vrot.lane.b32.xlu0 %v3091_v26, %s6561_s10  ;;  %v2453_v49 = vpop.permute.xlu1 %2452  ;;  %363 = vst.msk [vmem:[#allocation3 + $0x188] sm:$0xff] %vm33_vm0, %v7687_v52 }
 0x191   :  { %2635 = vst.msk [vmem:[#allocation3 + $0x50] sm:$0xff] %vm2624_vm11, %v2453_v49  ;;  %v2712_v49 = vld [vmem:[#allocation2 + $0x141] sm:$0xff] }
 0x192   :  { %v2069_v41 = vpop.permute.xlu0 %2068  ;;  %1316 = vrot.lane.b32.xlu1 %v7095_v19, %s6559_s29 }
 0x193   :  { %2250 = vst.msk [vmem:[#allocation3 + $0x58] sm:$0xff] %vm2238_vm10, %v2069_v41 }
 0x194   :  { %933 = vrot.lane.b32.xlu0 %v3091_v26, %s6558_s28  ;;  %v1301_v29 = vpop.permute.xlu1 %1300 }
 0x195   :  { %1481 = vst.msk [vmem:[#allocation3 + $0x60] sm:$0xff] %vm1468_vm8, %v1301_v29 }
 0x196   :  { %v918_v56 = vpop.permute.xlu0 %917  ;;  %v3468_v60 = vld [vmem:[#allocation3 + $0x48] sm:$0xff]  ;;  %2853 = vrot.lane.b32.xlu1 %v2707_v59, %s6563_s12 }
 0x197   :  { %1097 = vst.msk [vmem:[#allocation3 + $0x68] sm:$0xff] %vm1083_vm7, %v918_v56  ;;  %6301 = vmatmul.mubr.msk.f32.gmra.mrb[8].mxu0 %vm3534_vm14, %v3468_v60  ;;  %v3097_v56 = vld [vmem:[#allocation2 + $0x142] sm:$0xff] }
 0x198   :  { %2470 = vrot.lane.b32.xlu0 %v7091_v18, %s6562_s11  ;;  %v2838_v19 = vpop.permute.xlu1 %2837 }
 0x199   :  { %3020 = vst.msk [vmem:[#allocation3 + $0x50] sm:$0xff] %vm3009_vm12, %v2838_v19 }
 0x19a   :  { %v2455_v12 = vpop.permute.xlu0 %2454  ;;  %1701 = vrot.lane.b32.xlu1 %v2707_v59, %s6560_s30 }
 0x19b   :  { %2636 = vst.msk [vmem:[#allocation3 + $0x58] sm:$0xff] %vm2624_vm11, %v2455_v12  ;;  %v2328_v12 = vld [vmem:[#allocation2 + $0x150] sm:$0xff] }
 0x19c   :  { %1318 = vrot.lane.b32.xlu0 %v7091_v18, %s6559_s29  ;;  %v1686_v17 = vpop.permute.xlu1 %1685 }
 0x19d   :  { %1866 = vst.msk [vmem:[#allocation3 + $0x60] sm:$0xff] %vm1853_vm9, %v1686_v17 }
 0x19e   :  { %v1303_v10 = vpop.permute.xlu0 %1302  ;;  %3238 = vrot.lane.b32.xlu1 %v3092_v62, %s6564_s18 }
 0x19f   :  { %1482 = vst.msk [vmem:[#allocation3 + $0x68] sm:$0xff] %vm1468_vm8, %v1303_v10 }
 0x1a0   :  { %2855 = vrot.lane.b32.xlu0 %v2708_v11, %s6563_s12  ;;  %v3223_v18 = vpop.permute.xlu1 %3222 }
 0x1a1   :  { %3405 = vst.msk [vmem:[#allocation3 + $0x50] sm:$0xff] %vm3394_vm13, %v3223_v18  ;;  %v2713_v18 = vld [vmem:[#allocation2 + $0x151] sm:$0xff] }
 0x1a2   :  { %v2840_v55 = vpop.permute.xlu0 %2839  ;;  %2086 = vrot.lane.b32.xlu1 %v3092_v62, %s6561_s10 }
 0x1a3   :  { %3021 = vst.msk [vmem:[#allocation3 + $0x58] sm:$0xff] %vm3009_vm12, %v2840_v55  ;;  %v2329_v55 = vld [vmem:[#allocation2 + $0x158] sm:$0xff] }
 0x1a4   :  { %1703 = vrot.lane.b32.xlu0 %v2708_v11, %s6560_s30  ;;  %v2071_v22 = vpop.permute.xlu1 %2070 }
 0x1a5   :  { %2251 = vst.msk [vmem:[#allocation3 + $0x60] sm:$0xff] %vm2238_vm10, %v2071_v22 }
 0x1a6   :  { %v1688_v54 = vpop.permute.xlu0 %1687  ;;  %935 = vrot.lane.b32.xlu1 %v3092_v62, %s6558_s28 }
 0x1a7   :  { %1867 = vst.msk [vmem:[#allocation3 + $0x68] sm:$0xff] %vm1853_vm9, %v1688_v54 }
 0x1a8   :  { %3240 = vrot.lane.b32.xlu0 %v3093_v21, %s6564_s18  ;;  %v920_v23 = vpop.permute.xlu1 %919  ;;  %v3469_v27 = vld [vmem:[#allocation3 + $0x50] sm:$0xff] }
 0x1a9   :  { %1098 = vst.msk [vmem:[#allocation3 + $0x70] sm:$0xff] %vm1083_vm7, %v920_v23  ;;  %6303 = vmatprep.mubr.msk.f32.mxu0 %vm3534_vm14, %v3469_v27  ;;  %v3098_v23 = vld [vmem:[#allocation2 + $0x152] sm:$0xff] }
 0x1aa   :  { %v3225_v25 = vpop.permute.xlu0 %3224  ;;  %2472 = vrot.lane.b32.xlu1 %v2324_v28, %s6562_s11 }
 0x1ab   :  { %3406 = vst.msk [vmem:[#allocation3 + $0x58] sm:$0xff] %vm3394_vm13, %v3225_v25  ;;  %v2714_v25 = vld [vmem:[#allocation2 + $0x159] sm:$0xff] }
 0x1ac   :  { %2088 = vrot.lane.b32.xlu0 %v3093_v21, %s6561_s10  ;;  %v2457_v31 = vpop.permute.xlu1 %2456 }
 0x1ad   :  { %2637 = vst.msk [vmem:[#allocation3 + $0x60] sm:$0xff] %vm2624_vm11, %v2457_v31 }
 0x1ae   :  { %v2073_v7 = vpop.permute.xlu0 %2072  ;;  %1320 = vrot.lane.b32.xlu1 %v2324_v28, %s6559_s29 }
 0x1af   :  { %2252 = vst.msk [vmem:[#allocation3 + $0x68] sm:$0xff] %vm2238_vm10, %v2073_v7 }
 0x1b0   :  { %937 = vrot.lane.b32.xlu0 %v3093_v21, %s6558_s28  ;;  %v1305_v34 = vpop.permute.xlu1 %1304 }
 0x1b1   :  { %1483 = vst.msk [vmem:[#allocation3 + $0x70] sm:$0xff] %vm1468_vm8, %v1305_v34  ;;  %v3099_v34 = vld [vmem:[#allocation2 + $0x15a] sm:$0xff] }
 0x1b2   :  { %v922_v35 = vpop.permute.xlu0 %921  ;;  %v3470_v58 = vld [vmem:[#allocation3 + $0x58] sm:$0xff]  ;;  %2857 = vrot.lane.b32.xlu1 %v2709_v14, %s6563_s12 }
 0x1b3   :  { %1099 = vst.msk [vmem:[#allocation3 + $0x78] sm:$0xff] %vm1083_vm7, %v922_v35  ;;  %6304 = vmatmul.mubr.msk.f32.gmra.mrb[10].mxu0 %vm3534_vm14, %v3470_v58 }
 0x1b4   :  { %2474 = vrot.lane.b32.xlu0 %v2325_v0, %s6562_s11  ;;  %v2842_v6 = vpop.permute.xlu1 %2841 }
 0x1b5   :  { %3022 = vst.msk [vmem:[#allocation3 + $0x60] sm:$0xff] %vm3009_vm12, %v2842_v6 }
 0x1b6   :  { %v2459_v13 = vpop.permute.xlu0 %2458  ;;  %1705 = vrot.lane.b32.xlu1 %v2709_v14, %s6560_s30  ;;  %v294_v14 = vld [vmem:[#allocation2 + $0x240] sm:$0xff] }
 0x1b7   :  { %2638 = vst.msk [vmem:[#allocation3 + $0x68] sm:$0xff] %vm2624_vm11, %v2459_v13 }
 0x1b8   :  { %1322 = vrot.lane.b32.xlu0 %v2325_v0, %s6559_s29  ;;  %v1690_v33 = vpop.permute.xlu1 %1689  ;;  %358 = vst.msk [vmem:[#allocation3 + $0x160] sm:$0xff] %vm33_vm0, %v294_v14  ;;  %v169_v0 = vld [vmem:[%s9479_s0 + $0x180] sm:$0xff] }
 0x1b9   :  { %1868 = vst.msk [vmem:[#allocation3 + $0x70] sm:$0xff] %vm1853_vm9, %v1690_v33 }
 0x1ba   :  { %v1307_v63 = vpop.permute.xlu0 %1306  ;;  %3242 = vrot.lane.b32.xlu1 %v3094_v36, %s6564_s18  ;;  %234 = vst.msk [vmem:[#allocation2 + $0x289] sm:$0xff] %vm33_vm0, %v169_v0 }
 0x1bb   :  { %1484 = vst.msk [vmem:[#allocation3 + $0x78] sm:$0xff] %vm1468_vm8, %v1307_v63 }
 0x1bc   :  { %2859 = vrot.lane.b32.xlu0 %v2710_v37, %s6563_s12  ;;  %v3227_v38 = vpop.permute.xlu1 %3226 }
 0x1bd   :  { %3407 = vst.msk [vmem:[#allocation3 + $0x60] sm:$0xff] %vm3394_vm13, %v3227_v38 }
 0x1be   :  { %v2844_v39 = vpop.permute.xlu0 %2843  ;;  %2090 = vrot.lane.b32.xlu1 %v3094_v36, %s6561_s10 }
 0x1bf   :  { %3023 = vst.msk [vmem:[#allocation3 + $0x68] sm:$0xff] %vm3009_vm12, %v2844_v39  ;;  %v422_v39 = vld [vmem:[#allocation2 + $0x241] sm:$0xff] }
 0x1c0   :  { %1707 = vrot.lane.b32.xlu0 %v2710_v37, %s6560_s30  ;;  %v2075_v30 = vpop.permute.xlu1 %2074  ;;  %v2330_v37 = vld [vmem:[#allocation2 + $0x168] sm:$0xff] }
 0x1c1   :  { %2253 = vst.msk [vmem:[#allocation3 + $0x70] sm:$0xff] %vm2238_vm10, %v2075_v30  ;;  %v7744_v38 = vld [vmem:[#allocation2 + $0x288] sm:$0xff] }
 0x1c2   :  { %v1692_v42 = vpop.permute.xlu0 %1691  ;;  %939 = vrot.lane.b32.xlu1 %v3094_v36, %s6558_s28  ;;  %v295_v36 = vld [vmem:[#allocation2 + $0x248] sm:$0xff]  ;;  %364 = vst.msk [vmem:[#allocation3 + $0x190] sm:$0xff] %vm33_vm0, %v7744_v38 }
 0x1c3   :  { %1869 = vst.msk [vmem:[#allocation3 + $0x78] sm:$0xff] %vm1853_vm9, %v1692_v42  ;;  %v2331_v42 = vld [vmem:[#allocation2 + $0x170] sm:$0xff] }
 0x1c4   :  { %3244 = vrot.lane.b32.xlu0 %v3095_v40, %s6564_s18  ;;  %v924_v16 = vpop.permute.xlu1 %923  ;;  %v3471_v46 = vld [vmem:[#allocation3 + $0x60] sm:$0xff]  ;;  %359 = vst.msk [vmem:[#allocation3 + $0x168] sm:$0xff] %vm33_vm0, %v295_v36 }
 0x1c5   :  { %1100 = vst.msk [vmem:[#allocation3 + $0x80] sm:$0xff] %vm1083_vm7, %v924_v16  ;;  %6306 = vmatprep.mubr.msk.f32.mxu0 %vm3534_vm14, %v3471_v46  ;;  %v170_v46 = vld [vmem:[%s9479_s0 + $0x188] sm:$0xff] }
 0x1c6   :  { %v3229_v9 = vpop.permute.xlu0 %3228  ;;  %2476 = vrot.lane.b32.xlu1 %v2326_v44, %s6562_s11  ;;  %235 = vst.msk [vmem:[#allocation2 + $0x291] sm:$0xff] %vm33_vm0, %v170_v46  ;;  %v171_v46 = vld [vmem:[%s9479_s0 + $0x190] sm:$0xff] }
 0x1c7   :  { %3408 = vst.msk [vmem:[#allocation3 + $0x68] sm:$0xff] %vm3394_vm13, %v3229_v9 }
 0x1c8   :  { %2092 = vrot.lane.b32.xlu0 %v3095_v40, %s6561_s10  ;;  %v2461_v47 = vpop.permute.xlu1 %2460  ;;  %236 = vst.msk [vmem:[#allocation2 + $0x2a1] sm:$0xff] %vm33_vm0, %v171_v46  ;;  %v3118_v46 = vld [vmem:[#allocation2 + $0x272] sm:$0xff] }
 0x1c9   :  { %2639 = vst.msk [vmem:[#allocation3 + $0x70] sm:$0xff] %vm2624_vm11, %v2461_v47  ;;  %v423_v47 = vld [vmem:[#allocation2 + $0x249] sm:$0xff] }
 0x1ca   :  { %v2077_v3 = vpop.permute.xlu0 %2076  ;;  %1324 = vrot.lane.b32.xlu1 %v2326_v44, %s6559_s29 }
 0x1cb   :  { %2254 = vst.msk [vmem:[#allocation3 + $0x78] sm:$0xff] %vm2238_vm10, %v2077_v3  ;;  %v2715_v3 = vld [vmem:[#allocation2 + $0x169] sm:$0xff] }
 0x1cc   :  { %941 = vrot.lane.b32.xlu0 %v3095_v40, %s6558_s28  ;;  %v1309_v8 = vpop.permute.xlu1 %1308 }
 0x1cd   :  { %1485 = vst.msk [vmem:[#allocation3 + $0x80] sm:$0xff] %vm1468_vm8, %v1309_v8 }
 0x1ce   :  { %v926_v26 = vpop.permute.xlu0 %925  ;;  %v3472_v51 = vld [vmem:[#allocation3 + $0x68] sm:$0xff]  ;;  %2861 = vrot.lane.b32.xlu1 %v2711_v15, %s6563_s12 }
 0x1cf   :  { %1101 = vst.msk [vmem:[#allocation3 + $0x88] sm:$0xff] %vm1083_vm7, %v926_v26  ;;  %6307 = vmatmul.mubr.msk.f32.gmra.mrb[12].mxu0 %vm3534_vm14, %v3472_v51  ;;  %v7769_v51 = vld [vmem:[#allocation2 + $0x290] sm:$0xff] }
 0x1d0   :  { %2478 = vrot.lane.b32.xlu0 %v2327_v24, %s6562_s11  ;;  %v2846_v45 = vpop.permute.xlu1 %2845  ;;  %365 = vst.msk [vmem:[#allocation3 + $0x198] sm:$0xff] %vm33_vm0, %v7769_v51 }
 0x1d1   :  { %3024 = vst.msk [vmem:[#allocation3 + $0x70] sm:$0xff] %vm3009_vm12, %v2846_v45  ;;  %v7774_v45 = vld [vmem:[%s9481_s2] ss:$0 sm:$0xff] }
 0x1d2   :  { %v2463_v1 = vpop.permute.xlu0 %2462  ;;  %1709 = vrot.lane.b32.xlu1 %v2711_v15, %s6560_s30 }
 0x1d3   :  { %2640 = vst.msk [vmem:[#allocation3 + $0x78] sm:$0xff] %vm2624_vm11, %v2463_v1  ;;  %v2716_v1 = vld [vmem:[#allocation2 + $0x171] sm:$0xff] }
 0x1d4   :  { %1326 = vrot.lane.b32.xlu0 %v2327_v24, %s6559_s29  ;;  %v1694_v41 = vpop.permute.xlu1 %1693  ;;  %v807_v24 = vld [vmem:[#allocation2 + $0x242] sm:$0xff] }
 0x1d5   :  { %1870 = vst.msk [vmem:[#allocation3 + $0x80] sm:$0xff] %vm1853_vm9, %v1694_v41 }
 0x1d6   :  { %v1311_v50 = vpop.permute.xlu0 %1310  ;;  %3246 = vrot.lane.b32.xlu1 %v3096_v53, %s6564_s18 }
 0x1d7   :  { %1486 = vst.msk [vmem:[#allocation3 + $0x88] sm:$0xff] %vm1468_vm8, %v1311_v50 }
 0x1d8   :  { %2863 = vrot.lane.b32.xlu0 %v2712_v49, %s6563_s12  ;;  %v3231_v59 = vpop.permute.xlu1 %3230 }
 0x1d9   :  { %3409 = vst.msk [vmem:[#allocation3 + $0x70] sm:$0xff] %vm3394_vm13, %v3231_v59  ;;  %v808_v59 = vld [vmem:[#allocation2 + $0x24a] sm:$0xff] }
 0x1da   :  { %v2848_v29 = vpop.permute.xlu0 %2847  ;;  %2094 = vrot.lane.b32.xlu1 %v3096_v53, %s6561_s10 }
 0x1db   :  { %3025 = vst.msk [vmem:[#allocation3 + $0x78] sm:$0xff] %vm3009_vm12, %v2848_v29  ;;  %v3100_v29 = vld [vmem:[#allocation2 + $0x16a] sm:$0xff] }
 0x1dc   :  { %1711 = vrot.lane.b32.xlu0 %v2712_v49, %s6560_s30  ;;  %v2079_v60 = vpop.permute.xlu1 %2078 }
 0x1dd   :  { %2255 = vst.msk [vmem:[#allocation3 + $0x80] sm:$0xff] %vm2238_vm10, %v2079_v60 }
 0x1de   :  { %v1696_v19 = vpop.permute.xlu0 %1695  ;;  %943 = vrot.lane.b32.xlu1 %v3096_v53, %s6558_s28 }
 0x1df   :  { %1871 = vst.msk [vmem:[#allocation3 + $0x88] sm:$0xff] %vm1853_vm9, %v1696_v19 }
 0x1e0   :  { %3248 = vrot.lane.b32.xlu0 %v3097_v56, %s6564_s18  ;;  %v928_v61 = vpop.permute.xlu1 %927  ;;  %v3473_v11 = vld [vmem:[#allocation3 + $0x70] sm:$0xff] }
 0x1e1   :  { %1102 = vst.msk [vmem:[#allocation3 + $0x90] sm:$0xff] %vm1083_vm7, %v928_v61  ;;  %6309 = vmatprep.mubr.msk.f32.mxu0 %vm3534_vm14, %v3473_v11 }
 0x1e2   :  { %v3233_v62 = vpop.permute.xlu0 %3232  ;;  %2480 = vrot.lane.b32.xlu1 %v2328_v12, %s6562_s11 }
 0x1e3   :  { %3410 = vst.msk [vmem:[#allocation3 + $0x78] sm:$0xff] %vm3394_vm13, %v3233_v62 }
 0x1e4   :  { %2096 = vrot.lane.b32.xlu0 %v3097_v56, %s6561_s10  ;;  %v2465_v17 = vpop.permute.xlu1 %2464 }
 0x1e5   :  { %2641 = vst.msk [vmem:[#allocation3 + $0x80] sm:$0xff] %vm2624_vm11, %v2465_v17 }
 0x1e6   :  { %v2081_v10 = vpop.permute.xlu0 %2080  ;;  %1328 = vrot.lane.b32.xlu1 %v2328_v12, %s6559_s29 }
 0x1e7   :  { %2256 = vst.msk [vmem:[#allocation3 + $0x88] sm:$0xff] %vm2238_vm10, %v2081_v10 }
 0x1e8   :  { %945 = vrot.lane.b32.xlu0 %v3097_v56, %s6558_s28  ;;  %v1313_v20 = vpop.permute.xlu1 %1312 }
 0x1e9   :  { %1487 = vst.msk [vmem:[#allocation3 + $0x90] sm:$0xff] %vm1468_vm8, %v1313_v20 }
 0x1ea   :  { %v930_v21 = vpop.permute.xlu0 %929  ;;  %v3474_v22 = vld [vmem:[#allocation3 + $0x78] sm:$0xff]  ;;  %2865 = vrot.lane.b32.xlu1 %v2713_v18, %s6563_s12 }
 0x1eb   :  { %1103 = vst.msk [vmem:[#allocation3 + $0x98] sm:$0xff] %vm1083_vm7, %v930_v21  ;;  %6310 = vmatmul.mubr.msk.f32.gmra.mrb[14].mxu0 %vm3534_vm14, %v3474_v22 }
 0x1ec   :  { %2482 = vrot.lane.b32.xlu0 %v2329_v55, %s6562_s11  ;;  %v2850_v54 = vpop.permute.xlu1 %2849 }
 0x1ed   :  { %3026 = vst.msk [vmem:[#allocation3 + $0x80] sm:$0xff] %vm3009_vm12, %v2850_v54 }
 0x1ee   :  { %v2467_v28 = vpop.permute.xlu0 %2466  ;;  %1713 = vrot.lane.b32.xlu1 %v2713_v18, %s6560_s30 }
 0x1ef   :  { %2642 = vst.msk [vmem:[#allocation3 + $0x88] sm:$0xff] %vm2624_vm11, %v2467_v28 }
 0x1f0   :  { %1330 = vrot.lane.b32.xlu0 %v2329_v55, %s6559_s29  ;;  %v1698_v27 = vpop.permute.xlu1 %1697 }
 0x1f1   :  { %1872 = vst.msk [vmem:[#allocation3 + $0x90] sm:$0xff] %vm1853_vm9, %v1698_v27  ;;  %v3101_v27 = vld [vmem:[#allocation2 + $0x172] sm:$0xff] }
 0x1f2   :  { %v1315_v31 = vpop.permute.xlu0 %1314  ;;  %3250 = vrot.lane.b32.xlu1 %v3098_v23, %s6564_s18 }
 0x1f3   :  { %1488 = vst.msk [vmem:[#allocation3 + $0x98] sm:$0xff] %vm1468_vm8, %v1315_v31 }
 0x1f4   :  { %2867 = vrot.lane.b32.xlu0 %v2714_v25, %s6563_s12  ;;  %v3235_v7 = vpop.permute.xlu1 %3234 }
 0x1f5   :  { %3411 = vst.msk [vmem:[#allocation3 + $0x80] sm:$0xff] %vm3394_vm13, %v3235_v7 }
 0x1f6   :  { %v2852_v32 = vpop.permute.xlu0 %2851  ;;  %2098 = vrot.lane.b32.xlu1 %v3098_v23, %s6561_s10 }
 0x1f7   :  { %3027 = vst.msk [vmem:[#allocation3 + $0x88] sm:$0xff] %vm3009_vm12, %v2852_v32 }
 0x1f8   :  { %1715 = vrot.lane.b32.xlu0 %v2714_v25, %s6560_s30  ;;  %v2083_v35 = vpop.permute.xlu1 %2082 }
 0x1f9   :  { %2257 = vst.msk [vmem:[#allocation3 + $0x90] sm:$0xff] %vm2238_vm10, %v2083_v35 }
 0x1fa   :  { %v1700_v58 = vpop.permute.xlu0 %1699  ;;  %v6290_v6 = vpop.f32.mrb[0].mxu0  ;;  %947 = vrot.lane.b32.xlu1 %v3098_v23, %s6558_s28 }
 0x1fb   :  { %1873 = vst.msk [vmem:[#allocation3 + $0x98] sm:$0xff] %vm1853_vm9, %v1700_v58  ;;  %v3797_v13 = vpop.f32.mrb[1].mxu0  ;;  %v3803_v41 = vadd.f32 %v6290_v6, %v7774_v45 }
 0x1fc   :  { %3252 = vrot.lane.b32.xlu0 %v3099_v34, %s6564_s18  ;;  %v932_v33 = vpop.permute.xlu1 %931  ;;  %v3475_v57 = vld [vmem:[#allocation3 + $0x80] sm:$0xff]  ;;  %v3798_v50 = vadd.f32 %v7774_v45, %v3797_v13 }
 0x1fd   :  { %1104 = vst.msk [vmem:[#allocation3 + $0xa0] sm:$0xff] %vm1083_vm7, %v932_v33  ;;  %6312 = vmatprep.mubr.msk.f32.mxu0 %vm3534_vm14, %v3475_v57  ;;  %v4117_v12 = vmax.f32 %v3803_v41, 0.0 }
 0x1fe   :  { %v3237_v63 = vpop.permute.xlu0 %3236  ;;  %2484 = vrot.lane.b32.xlu1 %v2330_v37, %s6562_s11  ;;  %v4116_v11 = vmax.f32 %v3798_v50, 0.0  ;;  %v1963_v50 = vld [vmem:[#allocation2 + $0x262] sm:$0xff] }
 0x1ff   :  { %3412 = vst.msk [vmem:[#allocation3 + $0x88] sm:$0xff] %vm3394_vm13, %v3237_v63  ;;  %v4184_v22 = vsel %vm4180_vm15, %v4117_v12, -inf }
 0x200   :  { %2100 = vrot.lane.b32.xlu0 %v3099_v34, %s6561_s10  ;;  %v2469_v40 = vpop.permute.xlu1 %2468  ;;  %v4181_v28 = vsel %vm4180_vm15, %v4116_v11, -inf }
 0x201   :  { %2643 = vst.msk [vmem:[#allocation3 + $0x90] sm:$0xff] %vm2624_vm11, %v2469_v40  ;;  %v1578_v40 = vld [vmem:[#allocation2 + $0x261] sm:$0xff] }
 0x202   :  { %v2085_v30 = vpop.permute.xlu0 %2084  ;;  %949 = vrot.lane.b32.xlu1 %v3099_v34, %s6558_s28  ;;  %v1577_v34 = vld [vmem:[#allocation2 + $0x259] sm:$0xff] }
 0x203   :  { %2258 = vst.msk [vmem:[#allocation3 + $0x98] sm:$0xff] %vm2238_vm10, %v2085_v30 }
 0x204   :  { %594 = vrot.lane.b32.xlu0 %v422_v39, %s6557_s13  ;;  %v1317_v44 = vpop.permute.xlu1 %1316  ;;  %v1962_v39 = vld [vmem:[#allocation2 + $0x25a] sm:$0xff] }
 0x205   :  { %1489 = vst.msk [vmem:[#allocation3 + $0xa0] sm:$0xff] %vm1468_vm8, %v1317_v44 }
 0x206   :  { %v934_v16 = vpop.permute.xlu0 %933  ;;  %v3476_v9 = vld [vmem:[#allocation3 + $0x88] sm:$0xff]  ;;  %2486 = vrot.lane.b32.xlu1 %v2331_v42, %s6562_s11 }
 0x207   :  { %1105 = vst.msk [vmem:[#allocation3 + $0xa8] sm:$0xff] %vm1083_vm7, %v934_v16  ;;  %6313 = vmatmul.mubr.msk.f32.gmra.mrb[16].mxu0 %vm3534_vm14, %v3476_v9 }
 0x208   :  { %1332 = vrot.lane.b32.xlu0 %v2330_v37, %s6559_s29  ;;  %v2854_v48 = vpop.permute.xlu1 %2853  ;;  %v2332_v37 = vld [vmem:[#allocation2 + $0x180] sm:$0xff] }
 0x209   :  { %3028 = vst.msk [vmem:[#allocation3 + $0x90] sm:$0xff] %vm3009_vm12, %v2854_v48 }
 0x20a   :  { %v2471_v15 = vpop.permute.xlu0 %2470  ;;  %596 = vrot.lane.b32.xlu1 %v423_v47, %s6557_s13  ;;  %v2717_v47 = vld [vmem:[#allocation2 + $0x181] sm:$0xff] }
 0x20b   :  { %2644 = vst.msk [vmem:[#allocation3 + $0x98] sm:$0xff] %vm2624_vm11, %v2471_v15 }
 0x20c   :  { %2869 = vrot.lane.b32.xlu0 %v2715_v3, %s6563_s12  ;;  %v1702_v8 = vpop.permute.xlu1 %1701 }
 0x20d   :  { %1874 = vst.msk [vmem:[#allocation3 + $0xa0] sm:$0xff] %vm1853_vm9, %v1702_v8 }
 0x20e   :  { %v1319_v26 = vpop.permute.xlu0 %1318  ;;  %1334 = vrot.lane.b32.xlu1 %v2331_v42, %s6559_s29 }
 0x20f   :  { %1490 = vst.msk [vmem:[#allocation3 + $0xa8] sm:$0xff] %vm1468_vm8, %v1319_v26 }
 0x210   :  { %979 = vrot.lane.b32.xlu0 %v807_v24, %s6558_s28  ;;  %v3239_v53 = vpop.permute.xlu1 %3238 }
 0x211   :  { %3413 = vst.msk [vmem:[#allocation3 + $0x90] sm:$0xff] %vm3394_vm13, %v3239_v53 }
 0x212   :  { %v2856_v49 = vpop.permute.xlu0 %2855  ;;  %2871 = vrot.lane.b32.xlu1 %v2716_v1, %s6563_s12 }
 0x213   :  { %3029 = vst.msk [vmem:[#allocation3 + $0x98] sm:$0xff] %vm3009_vm12, %v2856_v49 }
 0x214   :  { %1717 = vrot.lane.b32.xlu0 %v2715_v3, %s6560_s30  ;;  %v2087_v56 = vpop.permute.xlu1 %2086  ;;  %v2333_v3 = vld [vmem:[#allocation2 + $0x188] sm:$0xff] }
 0x215   :  { %2259 = vst.msk [vmem:[#allocation3 + $0xa0] sm:$0xff] %vm2238_vm10, %v2087_v56  ;;  %v172_v56 = vld [vmem:[%s9479_s0 + $0x198] sm:$0xff] }
 0x216   :  { %v1704_v60 = vpop.permute.xlu0 %1703  ;;  %v6293_v19 = vpop.f32.mrb[2].mxu0  ;;  %981 = vrot.lane.b32.xlu1 %v808_v59, %s6558_s28  ;;  %237 = vst.msk [vmem:[#allocation2 + $0x2a9] sm:$0xff] %vm33_vm0, %v172_v56 }
 0x217   :  { %1875 = vst.msk [vmem:[#allocation3 + $0xa8] sm:$0xff] %vm1853_vm9, %v1704_v60  ;;  %v3813_v61 = vadd.f32 %v6293_v19, %v7774_v45  ;;  %v3807_v62 = vpop.f32.mrb[3].mxu0  ;;  %v3102_v60 = vld [vmem:[#allocation2 + $0x182] sm:$0xff] }
 0x218   :  { %3254 = vrot.lane.b32.xlu0 %v3100_v29, %s6564_s18  ;;  %v3808_v17 = vadd.f32 %v7774_v45, %v3807_v62  ;;  %v936_v18 = vpop.permute.xlu1 %935  ;;  %v3477_v20 = vld [vmem:[#allocation3 + $0x90] sm:$0xff] }
 0x219   :  { %v4119_v10 = vmax.f32 %v3813_v61, 0.0  ;;  %1106 = vst.msk [vmem:[#allocation3 + $0xb0] sm:$0xff] %vm1083_vm7, %v936_v18  ;;  %6315 = vmatprep.mubr.msk.f32.mxu0 %vm3534_vm14, %v3477_v20  ;;  %v2718_v19 = vld [vmem:[#allocation2 + $0x189] sm:$0xff] }
 0x21a   :  { %v3241_v55 = vpop.permute.xlu0 %3240  ;;  %v4118_v21 = vmax.f32 %v3808_v17, 0.0  ;;  %1719 = vrot.lane.b32.xlu1 %v2716_v1, %s6560_s30  ;;  %v7846_v1 = vld [vmem:[#allocation2 + $0x2a0] sm:$0xff] }
 0x21b   :  { %3414 = vst.msk [vmem:[#allocation3 + $0x98] sm:$0xff] %vm3394_vm13, %v3241_v55  ;;  %v4185_v54 = vsel %vm4180_vm15, %v4119_v10, -inf }
 0x21c   :  { %1364 = vrot.lane.b32.xlu0 %v7523_v5, %s6559_s29  ;;  %v4186_v23 = vmax.f32 %v4184_v22, %v4185_v54  ;;  %v4182_v25 = vsel %vm4180_vm15, %v4118_v21, -inf  ;;  %v2473_v7 = vpop.permute.xlu1 %2472  ;;  %366 = vst.msk [vmem:[#allocation3 + $0x1a0] sm:$0xff] %vm33_vm0, %v7846_v1 }
 0x21d   :  { %v4183_v31 = vmax.f32 %v4181_v28, %v4182_v25  ;;  %2645 = vst.msk [vmem:[#allocation3 + $0xa0] sm:$0xff] %vm2624_vm11, %v2473_v7  ;;  %v7874_v10 = vld [vmem:[#allocation2 + $0x2a8] sm:$0xff]  ;;  %v2733_v25 = vld [vmem:[#allocation2 + $0x271] sm:$0xff] }
 0x21e   :  { %v2089_v32 = vpop.permute.xlu0 %2088  ;;  %4278 = vst.msk [vmem:[#allocation4 + $0x8] sm:$0xff] %vm4180_vm15, %v4186_v23  ;;  %3256 = vrot.lane.b32.xlu1 %v3101_v27, %s6564_s18 }
 0x21f   :  { %2260 = vst.msk [vmem:[#allocation3 + $0xa8] sm:$0xff] %vm2238_vm10, %v2089_v32 }
 0x220   :  { %4277 = vst.msk [vmem:[#allocation4] sm:$0xff] %vm4180_vm15, %v4183_v31  ;;  %2102 = vrot.lane.b32.xlu0 %v3100_v29, %s6561_s10  ;;  %v1321_v5 = vpop.permute.xlu1 %1320 }
 0x221   :  { %1491 = vst.msk [vmem:[#allocation3 + $0xb0] sm:$0xff] %vm1468_vm8, %v1321_v5 }
 0x222   :  { %v938_v14 = vpop.permute.xlu0 %937  ;;  %v3478_v0 = vld [vmem:[#allocation3 + $0x98] sm:$0xff]  ;;  %1366 = vrot.lane.b32.xlu1 %v7539_v4, %s6559_s29  ;;  %367 = vst.msk [vmem:[#allocation3 + $0x1a8] sm:$0xff] %vm33_vm0, %v7874_v10 }
 0x223   :  { %1107 = vst.msk [vmem:[#allocation3 + $0xb8] sm:$0xff] %vm1083_vm7, %v938_v14  ;;  %6316 = vmatmul.mubr.msk.f32.gmra.mrb[18].mxu0 %vm3534_vm14, %v3478_v0 }
 0x224   :  { %951 = vrot.lane.b32.xlu0 %v3100_v29, %s6558_s28  ;;  %v2858_v35 = vpop.permute.xlu1 %2857 }
 0x225   :  { %3030 = vst.msk [vmem:[#allocation3 + $0xa0] sm:$0xff] %vm3009_vm12, %v2858_v35 }
 0x226   :  { %v2475_v58 = vpop.permute.xlu0 %2474  ;;  %2104 = vrot.lane.b32.xlu1 %v3101_v27, %s6561_s10 }
 0x227   :  { %v4309_v6 = vld [vmem:[#allocation4] ss:$2 sm:$0xff]  ;;  %v4341_v13 = vld [vmem:[#allocation4 + $0x1] ss:$2 sm:$0xff]  ;;  %2646 = vst.msk [vmem:[#allocation3 + $0xa8] sm:$0xff] %vm2624_vm11, %v2475_v58 }
 0x228   :  { %1749 = vrot.lane.b32.xlu0 %v1577_v34, %s6560_s30  ;;  %v4372_v36 = vmax.f32 %v4309_v6, %v4341_v13  ;;  %v1706_v33 = vpop.permute.xlu1 %1705  ;;  %v795_v6 = vld [vmem:[#allocation2 + $0x1b2] sm:$0xff]  ;;  %v3103_v13 = vld [vmem:[#allocation2 + $0x18a] sm:$0xff] }
 0x229   :  { %1876 = vst.msk [vmem:[#allocation3 + $0xb0] sm:$0xff] %vm1853_vm9, %v1706_v33 }
 0x22a   :  { %v1323_v63 = vpop.permute.xlu0 %1322  ;;  %4440 = vst.msk [vmem:[#allocation5 + $0x11] sm:$0xff] %vm4180_vm15, %v4372_v36  ;;  %598 = vrot.lane.b32.xlu1 %v1577_v34, %s6557_s13 }
 0x22b   :  { %1492 = vst.msk [vmem:[#allocation3 + $0xb8] sm:$0xff] %vm1468_vm8, %v1323_v63 }
 0x22c   :  { %2488 = vrot.lane.b32.xlu0 %v2332_v37, %s6562_s11  ;;  %v3243_v4 = vpop.permute.xlu1 %3242 }
 0x22d   :  { %3415 = vst.msk [vmem:[#allocation3 + $0xa0] sm:$0xff] %vm3394_vm13, %v3243_v4 }
 0x22e   :  { %v2860_v57 = vpop.permute.xlu0 %2859  ;;  %1336 = vrot.lane.b32.xlu1 %v2332_v37, %s6559_s29 }
 0x22f   :  { %3031 = vst.msk [vmem:[#allocation3 + $0xa8] sm:$0xff] %vm3009_vm12, %v2860_v57 }
 0x230   :  { %953 = vrot.lane.b32.xlu0 %v3101_v27, %s6558_s28  ;;  %v2091_v42 = vpop.permute.xlu1 %2090 }
 0x231   :  { %v7825_v30 = vld [vmem:[#allocation5 + $0x10] sm:$0xff]  ;;  %2261 = vst.msk [vmem:[#allocation3 + $0xb0] sm:$0xff] %vm2238_vm10, %v2091_v42 }
 0x232   :  { %v1708_v44 = vpop.permute.xlu0 %1707  ;;  %4473 = vst.msk [vmem:[#allocation6 + $0x8] sm:$0xff] %vm4180_vm15, %v7825_v30  ;;  %v6296_v16 = vpop.f32.mrb[4].mxu0  ;;  %2134 = vrot.lane.b32.xlu1 %v1962_v39, %s6561_s10 }
 0x233   :  { %1877 = vst.msk [vmem:[#allocation3 + $0xb8] sm:$0xff] %vm1853_vm9, %v1708_v44  ;;  %v3817_v9 = vpop.f32.mrb[5].mxu0  ;;  %v3823_v17 = vadd.f32 %v6296_v16, %v7774_v45 }
 0x234   :  { %1751 = vrot.lane.b32.xlu0 %v1578_v40, %s6560_s30  ;;  %v940_v48 = vpop.permute.xlu1 %939  ;;  %v3479_v24 = vld [vmem:[#allocation3 + $0xa0] sm:$0xff]  ;;  %v3818_v18 = vadd.f32 %v7774_v45, %v3817_v9 }
 0x235   :  { %1108 = vst.msk [vmem:[#allocation3 + $0xc0] sm:$0xff] %vm1083_vm7, %v940_v48  ;;  %6318 = vmatprep.mubr.msk.f32.mxu0 %vm3534_vm14, %v3479_v24  ;;  %v4121_v22 = vmax.f32 %v3823_v17, 0.0 }
 0x236   :  { %v3245_v15 = vpop.permute.xlu0 %3244  ;;  %2873 = vrot.lane.b32.xlu1 %v2717_v47, %s6563_s12  ;;  %v4120_v28 = vmax.f32 %v3818_v18, 0.0 }
 0x237   :  { %3416 = vst.msk [vmem:[#allocation3 + $0xa8] sm:$0xff] %vm3394_vm13, %v3245_v15  ;;  %v4190_v14 = vsel %vm4180_vm15, %v4121_v22, -inf  ;;  %v1181_v22 = vld [vmem:[#allocation2 + $0x1d0] sm:$0xff] }
 0x238   :  { %2490 = vrot.lane.b32.xlu0 %v2333_v3, %s6562_s11  ;;  %v2477_v8 = vpop.permute.xlu1 %2476  ;;  %v4187_v34 = vsel %vm4180_vm15, %v4120_v28, -inf }
 0x239   :  { %2647 = vst.msk [vmem:[#allocation3 + $0xb0] sm:$0xff] %vm2624_vm11, %v2477_v8  ;;  %v1180_v8 = vld [vmem:[#allocation2 + $0x1c8] sm:$0xff] }
 0x23a   :  { %v2093_v26 = vpop.permute.xlu0 %2092  ;;  %983 = vrot.lane.b32.xlu1 %v1962_v39, %s6558_s28  ;;  %v2334_v39 = vld [vmem:[#allocation2 + $0x198] sm:$0xff] }
 0x23b   :  { %2262 = vst.msk [vmem:[#allocation3 + $0xb8] sm:$0xff] %vm2238_vm10, %v2093_v26 }
 0x23c   :  { %600 = vrot.lane.b32.xlu0 %v1578_v40, %s6557_s13  ;;  %v1325_v53 = vpop.permute.xlu1 %1324 }
 0x23d   :  { %1493 = vst.msk [vmem:[#allocation3 + $0xc0] sm:$0xff] %vm1468_vm8, %v1325_v53 }
 0x23e   :  { %v942_v49 = vpop.permute.xlu0 %941  ;;  %v3480_v41 = vld [vmem:[#allocation3 + $0xa8] sm:$0xff]  ;;  %1721 = vrot.lane.b32.xlu1 %v2717_v47, %s6560_s30  ;;  %v2734_v47 = vld [vmem:[#allocation2 + $0x279] sm:$0xff] }
 0x23f   :  { %1109 = vst.msk [vmem:[#allocation3 + $0xc8] sm:$0xff] %vm1083_vm7, %v942_v49  ;;  %6319 = vmatmul.mubr.msk.f32.gmra.mrb[20].mxu0 %vm3534_vm14, %v3480_v41 }
 0x240   :  { %1338 = vrot.lane.b32.xlu0 %v2333_v3, %s6559_s29  ;;  %v2862_v59 = vpop.permute.xlu1 %2861 }
 0x241   :  { %3032 = vst.msk [vmem:[#allocation3 + $0xb0] sm:$0xff] %vm3009_vm12, %v2862_v59  ;;  %v2335_v59 = vld [vmem:[#allocation2 + $0x1a0] sm:$0xff] }
 0x242   :  { %v2479_v29 = vpop.permute.xlu0 %2478  ;;  %2520 = vrot.lane.b32.xlu1 %v7661_v43, %s6562_s11 }
 0x243   :  { %2648 = vst.msk [vmem:[#allocation3 + $0xb8] sm:$0xff] %vm2624_vm11, %v2479_v29 }
 0x244   :  { %2136 = vrot.lane.b32.xlu0 %v1963_v50, %s6561_s10  ;;  %v1710_v12 = vpop.permute.xlu1 %1709 }
 0x245   :  { %1878 = vst.msk [vmem:[#allocation3 + $0xc0] sm:$0xff] %vm1853_vm9, %v1710_v12  ;;  %v3119_v12 = vld [vmem:[#allocation2 + $0x27a] sm:$0xff] }
 0x246   :  { %v1327_v61 = vpop.permute.xlu0 %1326  ;;  %3258 = vrot.lane.b32.xlu1 %v3102_v60, %s6564_s18 }
 0x247   :  { %1494 = vst.msk [vmem:[#allocation3 + $0xc8] sm:$0xff] %vm1468_vm8, %v1327_v61  ;;  %v2719_v61 = vld [vmem:[#allocation2 + $0x199] sm:$0xff] }
 0x248   :  { %2875 = vrot.lane.b32.xlu0 %v2718_v19, %s6563_s12  ;;  %v3247_v62 = vpop.permute.xlu1 %3246 }
 0x249   :  { %3417 = vst.msk [vmem:[#allocation3 + $0xb0] sm:$0xff] %vm3394_vm13, %v3247_v62 }
 0x24a   :  { %v2864_v11 = vpop.permute.xlu0 %2863  ;;  %1368 = vrot.lane.b32.xlu1 %v7661_v43, %s6559_s29 }
 0x24b   :  { %3033 = vst.msk [vmem:[#allocation3 + $0xb8] sm:$0xff] %vm3009_vm12, %v2864_v11 }
 0x24c   :  { %985 = vrot.lane.b32.xlu0 %v1963_v50, %s6558_s28  ;;  %v2095_v55 = vpop.permute.xlu1 %2094 }
 0x24d   :  { %2263 = vst.msk [vmem:[#allocation3 + $0xc0] sm:$0xff] %vm2238_vm10, %v2095_v55 }
 0x24e   :  { %v1712_v20 = vpop.permute.xlu0 %1711  ;;  %v6299_v21 = vpop.f32.mrb[6].mxu0  ;;  %2106 = vrot.lane.b32.xlu1 %v3102_v60, %s6561_s10 }
 0x24f   :  { %1879 = vst.msk [vmem:[#allocation3 + $0xc8] sm:$0xff] %vm1853_vm9, %v1712_v20  ;;  %v3833_v54 = vadd.f32 %v6299_v21, %v7774_v45  ;;  %v3827_v43 = vpop.f32.mrb[7].mxu0  ;;  %v1565_v21 = vld [vmem:[#allocation2 + $0x1c9] sm:$0xff] }
 0x250   :  { %1723 = vrot.lane.b32.xlu0 %v2718_v19, %s6560_s30  ;;  %v3828_v23 = vadd.f32 %v7774_v45, %v3827_v43  ;;  %v944_v31 = vpop.permute.xlu1 %943  ;;  %v3481_v32 = vld [vmem:[#allocation3 + $0xb0] sm:$0xff]  ;;  %v173_v19 = vld [vmem:[%s9479_s0 + $0x1a0] sm:$0xff] }
 0x251   :  { %v4123_v27 = vmax.f32 %v3833_v54, 0.0  ;;  %1110 = vst.msk [vmem:[#allocation3 + $0xd0] sm:$0xff] %vm1083_vm7, %v944_v31  ;;  %6321 = vmatprep.mubr.msk.f32.mxu0 %vm3534_vm14, %v3481_v32  ;;  %v2720_v31 = vld [vmem:[#allocation2 + $0x1a1] sm:$0xff] }
 0x252   :  { %v3249_v7 = vpop.permute.xlu0 %3248  ;;  %v4122_v5 = vmax.f32 %v3828_v23, 0.0  ;;  %2905 = vrot.lane.b32.xlu1 %v2733_v25, %s6563_s12  ;;  %238 = vst.msk [vmem:[#allocation2 + $0x2b9] sm:$0xff] %vm33_vm0, %v173_v19 }
 0x253   :  { %3418 = vst.msk [vmem:[#allocation3 + $0xb8] sm:$0xff] %vm3394_vm13, %v3249_v7  ;;  %v4191_v0 = vsel %vm4180_vm15, %v4123_v27, -inf  ;;  %v3104_v27 = vld [vmem:[#allocation2 + $0x19a] sm:$0xff] }
 0x254   :  { %2522 = vrot.lane.b32.xlu0 %v7687_v52, %s6562_s11  ;;  %v4192_v35 = vmax.f32 %v4190_v14, %v4191_v0  ;;  %v4188_v58 = vsel %vm4180_vm15, %v4122_v5, -inf  ;;  %v2481_v37 = vpop.permute.xlu1 %2480 }
 0x255   :  { %v4189_v36 = vmax.f32 %v4187_v34, %v4188_v58  ;;  %2649 = vst.msk [vmem:[#allocation3 + $0xc0] sm:$0xff] %vm2624_vm11, %v2481_v37 }
 0x256   :  { %v2097_v33 = vpop.permute.xlu0 %2096  ;;  %4280 = vst.msk [vmem:[#allocation4 + $0x18] sm:$0xff] %vm4180_vm15, %v4192_v35  ;;  %955 = vrot.lane.b32.xlu1 %v795_v6, %s6558_s28 }
 0x257   :  { %2264 = vst.msk [vmem:[#allocation3 + $0xc8] sm:$0xff] %vm2238_vm10, %v2097_v33 }
 0x258   :  { %4279 = vst.msk [vmem:[#allocation4 + $0x10] sm:$0xff] %vm4180_vm15, %v4189_v36  ;;  %3260 = vrot.lane.b32.xlu0 %v3103_v13, %s6564_s18  ;;  %v1329_v63 = vpop.permute.xlu1 %1328 }
 0x259   :  { %1495 = vst.msk [vmem:[#allocation3 + $0xd0] sm:$0xff] %vm1468_vm8, %v1329_v63  ;;  %v7946_v20 = vld [vmem:[#allocation2 + $0x2b8] sm:$0xff]  ;;  %v1950_v63 = vld [vmem:[#allocation2 + $0x1ca] sm:$0xff] }
 0x25a   :  { %v946_v4 = vpop.permute.xlu0 %945  ;;  %v3482_v57 = vld [vmem:[#allocation3 + $0xb8] sm:$0xff]  ;;  %1753 = vrot.lane.b32.xlu1 %v2733_v25, %s6560_s30  ;;  %368 = vst.msk [vmem:[#allocation3 + $0x1b0] sm:$0xff] %vm33_vm0, %v7946_v20 }
 0x25b   :  { %1111 = vst.msk [vmem:[#allocation3 + $0xd8] sm:$0xff] %vm1083_vm7, %v946_v4  ;;  %6322 = vmatmul.mubr.msk.f32.gmra.mrb[22].mxu0 %vm3534_vm14, %v3482_v57  ;;  %v1566_v4 = vld [vmem:[#allocation2 + $0x1d1] sm:$0xff] }
 0x25c   :  { %1370 = vrot.lane.b32.xlu0 %v7687_v52, %s6559_s29  ;;  %v2866_v40 = vpop.permute.xlu1 %2865  ;;  %v796_v52 = vld [vmem:[#allocation2 + $0x1ba] sm:$0xff] }
 0x25d   :  { %3034 = vst.msk [vmem:[#allocation3 + $0xc0] sm:$0xff] %vm3009_vm12, %v2866_v40 }
 0x25e   :  { %v2483_v42 = vpop.permute.xlu0 %2482  ;;  %2492 = vrot.lane.b32.xlu1 %v2334_v39, %s6562_s11 }
 0x25f   :  { %v4311_v44 = vld [vmem:[#allocation4 + $0x10] ss:$2 sm:$0xff]  ;;  %v4343_v16 = vld [vmem:[#allocation4 + $0x11] ss:$2 sm:$0xff]  ;;  %2650 = vst.msk [vmem:[#allocation3 + $0xc8] sm:$0xff] %vm2624_vm11, %v2483_v42 }
 0x260   :  { %2108 = vrot.lane.b32.xlu0 %v3103_v13, %s6561_s10  ;;  %v4373_v9 = vmax.f32 %v4311_v44, %v4343_v16  ;;  %v1714_v3 = vpop.permute.xlu1 %1713 }
 0x261   :  { %1880 = vst.msk [vmem:[#allocation3 + $0xd0] sm:$0xff] %vm1853_vm9, %v1714_v3 }
 0x262   :  { %v1331_v48 = vpop.permute.xlu0 %1330  ;;  %4441 = vst.msk [vmem:[#allocation5 + $0x21] sm:$0xff] %vm4180_vm15, %v4373_v9  ;;  %3290 = vrot.lane.b32.xlu1 %v3118_v46, %s6564_s18 }
 0x263   :  { %1496 = vst.msk [vmem:[#allocation3 + $0xd8] sm:$0xff] %vm1468_vm8, %v1331_v48 }
 0x264   :  { %2907 = vrot.lane.b32.xlu0 %v2734_v47, %s6563_s12  ;;  %v3251_v15 = vpop.permute.xlu1 %3250 }
 0x265   :  { %3419 = vst.msk [vmem:[#allocation3 + $0xc0] sm:$0xff] %vm3394_vm13, %v3251_v15  ;;  %v3105_v15 = vld [vmem:[#allocation2 + $0x1a2] sm:$0xff] }
 0x266   :  { %v2868_v24 = vpop.permute.xlu0 %2867  ;;  %957 = vrot.lane.b32.xlu1 %v796_v52, %s6558_s28 }
 0x267   :  { %3035 = vst.msk [vmem:[#allocation3 + $0xc8] sm:$0xff] %vm3009_vm12, %v2868_v24 }
 0x268   :  { %602 = vrot.lane.b32.xlu0 %v2733_v25, %s6557_s13  ;;  %v2099_v53 = vpop.permute.xlu1 %2098  ;;  %v174_v25 = vld [vmem:[%s9479_s0 + $0x1a8] sm:$0xff] }
 0x269   :  { %v7920_v26 = vld [vmem:[#allocation5 + $0x20] sm:$0xff]  ;;  %2265 = vst.msk [vmem:[#allocation3 + $0xd0] sm:$0xff] %vm2238_vm10, %v2099_v53 }
 0x26a   :  { %v1716_v49 = vpop.permute.xlu0 %1715  ;;  %4474 = vst.msk [vmem:[#allocation6 + $0x10] sm:$0xff] %vm4180_vm15, %v7920_v26  ;;  %v6302_v41 = vpop.f32.mrb[8].mxu0  ;;  %1755 = vrot.lane.b32.xlu1 %v2734_v47, %s6560_s30 }
 0x26b   :  { %1881 = vst.msk [vmem:[#allocation3 + $0xd8] sm:$0xff] %vm1853_vm9, %v1716_v49  ;;  %v3837_v50 = vpop.f32.mrb[9].mxu0  ;;  %v3843_v5 = vadd.f32 %v6302_v41, %v7774_v45 }
 0x26c   :  { %1340 = vrot.lane.b32.xlu0 %v1180_v8, %s6559_s29  ;;  %v948_v29 = vpop.permute.xlu1 %947  ;;  %v3483_v60 = vld [vmem:[#allocation3 + $0xc0] sm:$0xff]  ;;  %239 = vst.msk [vmem:[#allocation2 + $0x2c1] sm:$0xff] %vm33_vm0, %v174_v25  ;;  %v3838_v14 = vadd.f32 %v7774_v45, %v3837_v50 }
 0x26d   :  { %1112 = vst.msk [vmem:[#allocation3 + $0xe0] sm:$0xff] %vm1083_vm7, %v948_v29  ;;  %6324 = vmatprep.mubr.msk.f32.mxu0 %vm3534_vm14, %v3483_v60  ;;  %v4125_v58 = vmax.f32 %v3843_v5, 0.0  ;;  %v1951_v60 = vld [vmem:[#allocation2 + $0x1d2] sm:$0xff] }
 0x26e   :  { %v3253_v56 = vpop.permute.xlu0 %3252  ;;  %2494 = vrot.lane.b32.xlu1 %v2335_v59, %s6562_s11  ;;  %v4124_v37 = vmax.f32 %v3838_v14, 0.0 }
 0x26f   :  { %3420 = vst.msk [vmem:[#allocation3 + $0xc8] sm:$0xff] %vm3394_vm13, %v3253_v56  ;;  %v2336_v56 = vld [vmem:[#allocation2 + $0x1e0] sm:$0xff] }
 0x270   :  { %2138 = vrot.lane.b32.xlu0 %v3118_v46, %s6561_s10  ;;  %v2485_v62 = vpop.permute.xlu1 %2484  ;;  %v4193_v16 = vsel %vm4180_vm15, %v4124_v37, -inf }
 0x271   :  { %2651 = vst.msk [vmem:[#allocation3 + $0xd0] sm:$0xff] %vm2624_vm11, %v2485_v62  ;;  %v3120_v62 = vld [vmem:[#allocation2 + $0x28a] sm:$0xff] }
 0x272   :  { %v2101_v11 = vpop.permute.xlu0 %2100  ;;  %3292 = vrot.lane.b32.xlu1 %v3119_v12, %s6564_s18 }
 0x273   :  { %2266 = vst.msk [vmem:[#allocation3 + $0xd8] sm:$0xff] %vm2238_vm10, %v2101_v11  ;;  %v7975_v36 = vld [vmem:[#allocation2 + $0x2c0] sm:$0xff] }
 0x274   :  { %2877 = vrot.lane.b32.xlu0 %v2719_v61, %s6563_s12  ;;  %v950_v17 = vpop.permute.xlu1 %949  ;;  %369 = vst.msk [vmem:[#allocation3 + $0x1b8] sm:$0xff] %vm33_vm0, %v7975_v36 }
 0x275   :  { %1113 = vst.msk [vmem:[#allocation3 + $0xe8] sm:$0xff] %vm1083_vm7, %v950_v17 }
 0x276   :  { %v595_v18 = vpop.permute.xlu0 %594  ;;  %v3484_v55 = vld [vmem:[#allocation3 + $0xc8] sm:$0xff]  ;;  %987 = vrot.lane.b32.xlu1 %v3118_v46, %s6558_s28 }
 0x277   :  { %743 = vst.msk [vmem:[#allocation3 + $0x160] sm:$0xff] %vm698_vm3, %v595_v18  ;;  %6325 = vmatmul.mubr.msk.f32.gmra.mrb[24].mxu0 %vm3534_vm14, %v3484_v55 }
 0x278   :  { %604 = vrot.lane.b32.xlu0 %v2734_v47, %s6557_s13  ;;  %v2487_v54 = vpop.permute.xlu1 %2486  ;;  %v2735_v47 = vld [vmem:[#allocation2 + $0x289] sm:$0xff] }
 0x279   :  { %2652 = vst.msk [vmem:[#allocation3 + $0xd8] sm:$0xff] %vm2624_vm11, %v2487_v54 }
 0x27a   :  { %v1333_v43 = vpop.permute.xlu0 %1332  ;;  %1725 = vrot.lane.b32.xlu1 %v1565_v21, %s6560_s30 }
 0x27b   :  { %1497 = vst.msk [vmem:[#allocation3 + $0xe0] sm:$0xff] %vm1468_vm8, %v1333_v43 }
 0x27c   :  { %1342 = vrot.lane.b32.xlu0 %v1181_v22, %s6559_s29  ;;  %v597_v28 = vpop.permute.xlu1 %596 }
 0x27d   :  { %744 = vst.msk [vmem:[#allocation3 + $0x168] sm:$0xff] %vm698_vm3, %v597_v28 }
 0x27e   :  { %v2870_v23 = vpop.permute.xlu0 %2869  ;;  %2524 = vrot.lane.b32.xlu1 %v7744_v38, %s6562_s11 }
 0x27f   :  { %3036 = vst.msk [vmem:[#allocation3 + $0xd0] sm:$0xff] %vm3009_vm12, %v2870_v23  ;;  %v2337_v23 = vld [vmem:[#allocation2 + $0x1e8] sm:$0xff] }
 0x280   :  { %2140 = vrot.lane.b32.xlu0 %v3119_v12, %s6561_s10  ;;  %v1335_v7 = vpop.permute.xlu1 %1334 }
 0x281   :  { %1498 = vst.msk [vmem:[#allocation3 + $0xe8] sm:$0xff] %vm1468_vm8, %v1335_v7  ;;  %v3121_v7 = vld [vmem:[#allocation2 + $0x292] sm:$0xff] }
 0x282   :  { %v980_v32 = vpop.permute.xlu0 %979  ;;  %3262 = vrot.lane.b32.xlu1 %v3104_v27, %s6564_s18 }
 0x283   :  { %1128 = vst.msk [vmem:[#allocation3 + $0x160] sm:$0xff] %vm1083_vm7, %v980_v32  ;;  %v2721_v32 = vld [vmem:[#allocation2 + $0x1e1] sm:$0xff] }
 0x284   :  { %2879 = vrot.lane.b32.xlu0 %v2720_v31, %s6563_s12  ;;  %v2872_v0 = vpop.permute.xlu1 %2871  ;;  %v175_v31 = vld [vmem:[%s9479_s0 + $0x1b0] sm:$0xff] }
 0x285   :  { %3037 = vst.msk [vmem:[#allocation3 + $0xd8] sm:$0xff] %vm3009_vm12, %v2872_v0 }
 0x286   :  { %v1718_v34 = vpop.permute.xlu0 %1717  ;;  %v6305_v35 = vpop.f32.mrb[10].mxu0  ;;  %1372 = vrot.lane.b32.xlu1 %v7744_v38, %s6559_s29  ;;  %v4196_v38 = vsel %vm4180_vm15, %v4125_v58, -inf  ;;  %240 = vst.msk [vmem:[#allocation2 + $0x2d1] sm:$0xff] %vm33_vm0, %v175_v31 }
 0x287   :  { %1882 = vst.msk [vmem:[#allocation3 + $0xe0] sm:$0xff] %vm1853_vm9, %v1718_v34  ;;  %v3853_v6 = vadd.f32 %v6305_v35, %v7774_v45  ;;  %v3847_v13 = vpop.f32.mrb[11].mxu0 }
 0x288   :  { %989 = vrot.lane.b32.xlu0 %v3119_v12, %s6558_s28  ;;  %v3848_v33 = vadd.f32 %v7774_v45, %v3847_v13  ;;  %v982_v39 = vpop.permute.xlu1 %981 }
 0x289   :  { %v4127_v57 = vmax.f32 %v3853_v6, 0.0  ;;  %1129 = vst.msk [vmem:[#allocation3 + $0x168] sm:$0xff] %vm1083_vm7, %v982_v39  ;;  %v2722_v39 = vld [vmem:[#allocation2 + $0x1e9] sm:$0xff] }
 0x28a   :  { %v3255_v40 = vpop.permute.xlu0 %3254  ;;  %v4126_v42 = vmax.f32 %v3848_v33, 0.0  ;;  %2110 = vrot.lane.b32.xlu1 %v1950_v63, %s6561_s10 }
 0x28b   :  { %3421 = vst.msk [vmem:[#allocation3 + $0xd0] sm:$0xff] %vm3394_vm13, %v3255_v40  ;;  %v4197_v44 = vsel %vm4180_vm15, %v4127_v57, -inf  ;;  %v3106_v57 = vld [vmem:[#allocation2 + $0x1e2] sm:$0xff] }
 0x28c   :  { %1727 = vrot.lane.b32.xlu0 %v1566_v4, %s6560_s30  ;;  %v4198_v9 = vmax.f32 %v4196_v38, %v4197_v44  ;;  %v4194_v46 = vsel %vm4180_vm15, %v4126_v42, -inf  ;;  %v1720_v48 = vpop.permute.xlu1 %1719 }
 0x28d   :  { %v4195_v3 = vmax.f32 %v4193_v16, %v4194_v46  ;;  %1883 = vst.msk [vmem:[#allocation3 + $0xe8] sm:$0xff] %vm1853_vm9, %v1720_v48  ;;  %v8043_v35 = vld [vmem:[#allocation2 + $0x2d0] sm:$0xff] }
 0x28e   :  { %v1365_v52 = vpop.permute.xlu0 %1364  ;;  %4282 = vst.msk [vmem:[#allocation4 + $0x28] sm:$0xff] %vm4180_vm15, %v4198_v9  ;;  %2909 = vrot.lane.b32.xlu1 %v2735_v47, %s6563_s12 }
 0x28f   :  { %1513 = vst.msk [vmem:[#allocation3 + $0x160] sm:$0xff] %vm1468_vm8, %v1365_v52 }
 0x290   :  { %4281 = vst.msk [vmem:[#allocation4 + $0x20] sm:$0xff] %vm4180_vm15, %v4195_v3  ;;  %2526 = vrot.lane.b32.xlu0 %v7769_v51, %s6562_s11  ;;  %v3257_v24 = vpop.permute.xlu1 %3256 }
 0x291   :  { %3422 = vst.msk [vmem:[#allocation3 + $0xd8] sm:$0xff] %vm3394_vm13, %v3257_v24 }
 0x292   :  { %v2103_v8 = vpop.permute.xlu0 %2102  ;;  %v3485_v53 = vld [vmem:[#allocation3 + $0xd0] sm:$0xff]  ;;  %959 = vrot.lane.b32.xlu1 %v1950_v63, %s6558_s28  ;;  %370 = vst.msk [vmem:[#allocation3 + $0x1c0] sm:$0xff] %vm33_vm0, %v8043_v35  ;;  %v176_v63 = vld [vmem:[%s9479_s0 + $0x1b8] sm:$0xff] }
 0x293   :  { %2267 = vst.msk [vmem:[#allocation3 + $0xe0] sm:$0xff] %vm2238_vm10, %v2103_v8  ;;  %6327 = vmatprep.mubr.msk.f32.mxu0 %vm3534_vm14, %v3485_v53 }
 0x294   :  { %3264 = vrot.lane.b32.xlu0 %v3105_v15, %s6564_s18  ;;  %v1367_v49 = vpop.permute.xlu1 %1366  ;;  %241 = vst.msk [vmem:[#allocation2 + $0x2d9] sm:$0xff] %vm33_vm0, %v176_v63  ;;  %v8132_v63 = vld [vmem:[#allocation2 + $0x2aa] sm:$0xff] }
 0x295   :  { %1514 = vst.msk [vmem:[#allocation3 + $0x168] sm:$0xff] %vm1468_vm8, %v1367_v49 }
 0x296   :  { %v952_v41 = vpop.permute.xlu0 %951  ;;  %1757 = vrot.lane.b32.xlu1 %v2735_v47, %s6560_s30 }
 0x297   :  { %v4313_v50 = vld [vmem:[#allocation4 + $0x20] ss:$2 sm:$0xff]  ;;  %v4345_v59 = vld [vmem:[#allocation4 + $0x21] ss:$2 sm:$0xff]  ;;  %1114 = vst.msk [vmem:[#allocation3 + $0xf0] sm:$0xff] %vm1083_vm7, %v952_v41 }
 0x298   :  { %1374 = vrot.lane.b32.xlu0 %v7769_v51, %s6559_s29  ;;  %v4374_v29 = vmax.f32 %v4313_v50, %v4345_v59  ;;  %v2105_v19 = vpop.permute.xlu1 %2104  ;;  %v3486_v61 = vld [vmem:[#allocation3 + $0xd8] sm:$0xff] }
 0x299   :  { %2268 = vst.msk [vmem:[#allocation3 + $0xe8] sm:$0xff] %vm2238_vm10, %v2105_v19  ;;  %6328 = vmatmul.mubr.msk.f32.gmra.mrb[26].mxu0 %vm3534_vm14, %v3486_v61  ;;  %v2736_v51 = vld [vmem:[#allocation2 + $0x291] sm:$0xff] }
 0x29a   :  { %v1750_v12 = vpop.permute.xlu0 %1749  ;;  %4442 = vst.msk [vmem:[#allocation5 + $0x31] sm:$0xff] %vm4180_vm15, %v4374_v29  ;;  %2496 = vrot.lane.b32.xlu1 %v2336_v56, %s6562_s11 }
 0x29b   :  { %1898 = vst.msk [vmem:[#allocation3 + $0x160] sm:$0xff] %vm1853_vm9, %v1750_v12  ;;  %v3107_v12 = vld [vmem:[#allocation2 + $0x1ea] sm:$0xff] }
 0x29c   :  { %2112 = vrot.lane.b32.xlu0 %v1951_v60, %s6561_s10  ;;  %v599_v11 = vpop.permute.xlu1 %598 }
 0x29d   :  { %745 = vst.msk [vmem:[#allocation3 + $0x170] sm:$0xff] %vm698_vm3, %v599_v11 }
 0x29e   :  { %v2489_v17 = vpop.permute.xlu0 %2488  ;;  %3294 = vrot.lane.b32.xlu1 %v3120_v62, %s6564_s18 }
 0x29f   :  { %2653 = vst.msk [vmem:[#allocation3 + $0xe0] sm:$0xff] %vm2624_vm11, %v2489_v17 }
 0x2a0   :  { %2911 = vrot.lane.b32.xlu0 %v2736_v51, %s6563_s12  ;;  %v1337_v55 = vpop.permute.xlu1 %1336 }
 0x2a1   :  { %v8015_v18 = vld [vmem:[#allocation5 + $0x30] sm:$0xff]  ;;  %1499 = vst.msk [vmem:[#allocation3 + $0xf0] sm:$0xff] %vm1468_vm8, %v1337_v55 }
 0x2a2   :  { %v954_v21 = vpop.permute.xlu0 %953  ;;  %4475 = vst.msk [vmem:[#allocation6 + $0x18] sm:$0xff] %vm4180_vm15, %v8015_v18  ;;  %v6308_v22 = vpop.f32.mrb[12].mxu0  ;;  %961 = vrot.lane.b32.xlu1 %v1951_v60, %s6558_s28 }
 0x2a3   :  { %1115 = vst.msk [vmem:[#allocation3 + $0xf8] sm:$0xff] %vm1083_vm7, %v954_v21  ;;  %v3857_v54 = vpop.f32.mrb[13].mxu0  ;;  %v3863_v33 = vadd.f32 %v6308_v22, %v7774_v45 }
 0x2a4   :  { %606 = vrot.lane.b32.xlu0 %v2735_v47, %s6557_s13  ;;  %v2135_v43 = vpop.permute.xlu1 %2134  ;;  %v3858_v4 = vadd.f32 %v7774_v45, %v3857_v54  ;;  %v2338_v54 = vld [vmem:[#allocation2 + $0x1f8] sm:$0xff] }
 0x2a5   :  { %2283 = vst.msk [vmem:[#allocation3 + $0x160] sm:$0xff] %vm2238_vm10, %v2135_v43  ;;  %v4129_v44 = vmax.f32 %v3863_v33, 0.0  ;;  %v177_v33 = vld [vmem:[%s9479_s0 + $0x1c0] sm:$0xff] }
 0x2a6   :  { %v1752_v28 = vpop.permute.xlu0 %1751  ;;  %1759 = vrot.lane.b32.xlu1 %v2736_v51, %s6560_s30  ;;  %v4128_v46 = vmax.f32 %v3858_v4, 0.0  ;;  %v2723_v4 = vld [vmem:[#allocation2 + $0x1f9] sm:$0xff]  ;;  %242 = vst.msk [vmem:[#allocation2 + $0x2e9] sm:$0xff] %vm33_vm0, %v177_v33 }
 0x2a7   :  { %1899 = vst.msk [vmem:[#allocation3 + $0x168] sm:$0xff] %vm1853_vm9, %v1752_v28  ;;  %v4202_v8 = vsel %vm4180_vm15, %v4129_v44, -inf }
 0x2a8   :  { %1344 = vrot.lane.b32.xlu0 %v2336_v56, %s6559_s29  ;;  %v2874_v25 = vpop.permute.xlu1 %2873  ;;  %v4199_v49 = vsel %vm4180_vm15, %v4128_v46, -inf  ;;  %v8154_v46 = vld [vmem:[%s9481_s2] ss:$0 sm:$0xff] }
 0x2a9   :  { %3038 = vst.msk [vmem:[#allocation3 + $0xe0] sm:$0xff] %vm3009_vm12, %v2874_v25  ;;  %v2738_v25 = vld [vmem:[#allocation2 + $0x2a9] sm:$0xff] }
 0x2aa   :  { %v2491_v27 = vpop.permute.xlu0 %2490  ;;  %2498 = vrot.lane.b32.xlu1 %v2337_v23, %s6562_s11 }
 0x2ab   :  { %2654 = vst.msk [vmem:[#allocation3 + $0xe8] sm:$0xff] %vm2624_vm11, %v2491_v27 }
 0x2ac   :  { %2142 = vrot.lane.b32.xlu0 %v3120_v62, %s6561_s10  ;;  %v984_v5 = vpop.permute.xlu1 %983 }
 0x2ad   :  { %1130 = vst.msk [vmem:[#allocation3 + $0x170] sm:$0xff] %vm1083_vm7, %v984_v5  ;;  %v8145_v44 = vld [vmem:[#allocation2 + $0x2e8] sm:$0xff] }
 0x2ae   :  { %v601_v14 = vpop.permute.xlu0 %600  ;;  %3296 = vrot.lane.b32.xlu1 %v3121_v7, %s6564_s18  ;;  %372 = vst.msk [vmem:[#allocation3 + $0x1d0] sm:$0xff] %vm33_vm0, %v8145_v44 }
 0x2af   :  { %746 = vst.msk [vmem:[#allocation3 + $0x178] sm:$0xff] %vm698_vm3, %v601_v14 }
 0x2b0   :  { %2881 = vrot.lane.b32.xlu0 %v2721_v32, %s6563_s12  ;;  %v1722_v0 = vpop.permute.xlu1 %1721 }
 0x2b1   :  { %1884 = vst.msk [vmem:[#allocation3 + $0xf0] sm:$0xff] %vm1853_vm9, %v1722_v0 }
 0x2b2   :  { %v1339_v34 = vpop.permute.xlu0 %1338  ;;  %991 = vrot.lane.b32.xlu1 %v3120_v62, %s6558_s28 }
 0x2b3   :  { %1500 = vst.msk [vmem:[#allocation3 + $0xf8] sm:$0xff] %vm1468_vm8, %v1339_v34 }
 0x2b4   :  { %608 = vrot.lane.b32.xlu0 %v2736_v51, %s6557_s13  ;;  %v2521_v58 = vpop.permute.xlu1 %2520 }
 0x2b5   :  { %2669 = vst.msk [vmem:[#allocation3 + $0x160] sm:$0xff] %vm2624_vm11, %v2521_v58 }
 0x2b6   :  { %v2137_v6 = vpop.permute.xlu0 %2136  ;;  %1729 = vrot.lane.b32.xlu1 %v2721_v32, %s6560_s30 }
 0x2b7   :  { %2284 = vst.msk [vmem:[#allocation3 + $0x168] sm:$0xff] %vm2238_vm10, %v2137_v6  ;;  %v2339_v6 = vld [vmem:[#allocation2 + $0x200] sm:$0xff] }
 0x2b8   :  { %1346 = vrot.lane.b32.xlu0 %v2337_v23, %s6559_s29  ;;  %v3259_v13 = vpop.permute.xlu1 %3258  ;;  %v3122_v23 = vld [vmem:[#allocation2 + $0x2a2] sm:$0xff] }
 0x2b9   :  { %3423 = vst.msk [vmem:[#allocation3 + $0xe0] sm:$0xff] %vm3394_vm13, %v3259_v13 }
 0x2ba   :  { %v2876_v37 = vpop.permute.xlu0 %2875  ;;  %2528 = vrot.lane.b32.xlu1 %v7846_v1, %s6562_s11 }
 0x2bb   :  { %3039 = vst.msk [vmem:[#allocation3 + $0xe8] sm:$0xff] %vm3009_vm12, %v2876_v37 }
 0x2bc   :  { %2144 = vrot.lane.b32.xlu0 %v3121_v7, %s6561_s10  ;;  %v1369_v40 = vpop.permute.xlu1 %1368 }
 0x2bd   :  { %1515 = vst.msk [vmem:[#allocation3 + $0x170] sm:$0xff] %vm1468_vm8, %v1369_v40 }
 0x2be   :  { %v986_v42 = vpop.permute.xlu0 %985  ;;  %v6311_v38 = vpop.f32.mrb[14].mxu0  ;;  %3266 = vrot.lane.b32.xlu1 %v3106_v57, %s6564_s18 }
 0x2bf   :  { %1131 = vst.msk [vmem:[#allocation3 + $0x178] sm:$0xff] %vm1083_vm7, %v986_v42  ;;  %v3873_v16 = vadd.f32 %v6311_v38, %v7774_v45  ;;  %v3867_v9 = vpop.f32.mrb[15].mxu0 }
 0x2c0   :  { %2883 = vrot.lane.b32.xlu0 %v2722_v39, %s6563_s12  ;;  %v3868_v47 = vadd.f32 %v7774_v45, %v3867_v9  ;;  %v2107_v48 = vpop.permute.xlu1 %2106  ;;  %v3487_v15 = vld [vmem:[#allocation3 + $0xe0] sm:$0xff]  ;;  %v8076_v45 = vld [vmem:[#allocation2 + $0x2d8] sm:$0xff] }
 0x2c1   :  { %v4131_v3 = vmax.f32 %v3873_v16, 0.0  ;;  %2269 = vst.msk [vmem:[#allocation3 + $0xf0] sm:$0xff] %vm2238_vm10, %v2107_v48  ;;  %6330 = vmatprep.mubr.msk.f32.mxu0 %vm3534_vm14, %v3487_v15 }
 0x2c2   :  { %v1724_v52 = vpop.permute.xlu0 %1723  ;;  %v4130_v24 = vmax.f32 %v3868_v47, 0.0  ;;  %1376 = vrot.lane.b32.xlu1 %v7846_v1, %s6559_s29  ;;  %371 = vst.msk [vmem:[#allocation3 + $0x1c8] sm:$0xff] %vm33_vm0, %v8076_v45  ;;  %v2737_v1 = vld [vmem:[#allocation2 + $0x2a1] sm:$0xff] }
 0x2c3   :  { %1885 = vst.msk [vmem:[#allocation3 + $0xf8] sm:$0xff] %vm1853_vm9, %v1724_v52  ;;  %v4203_v53 = vsel %vm4180_vm15, %v4131_v3, -inf }
 0x2c4   :  { %993 = vrot.lane.b32.xlu0 %v3121_v7, %s6558_s28  ;;  %v4204_v41 = vmax.f32 %v4202_v8, %v4203_v53  ;;  %v4200_v50 = vsel %vm4180_vm15, %v4130_v24, -inf  ;;  %v2906_v29 = vpop.permute.xlu1 %2905 }
 0x2c5   :  { %v4201_v59 = vmax.f32 %v4199_v49, %v4200_v50  ;;  %3054 = vst.msk [vmem:[#allocation3 + $0x160] sm:$0xff] %vm3009_vm12, %v2906_v29  ;;  %v178_v49 = vld [vmem:[%s9479_s0 + $0x1c8] sm:$0xff] }
 0x2c6   :  { %v2523_v56 = vpop.permute.xlu0 %2522  ;;  %4284 = vst.msk [vmem:[#allocation4 + $0x38] sm:$0xff] %vm4180_vm15, %v4204_v41  ;;  %2114 = vrot.lane.b32.xlu1 %v3106_v57, %s6561_s10  ;;  %v2724_v29 = vld [vmem:[#allocation2 + $0x201] sm:$0xff] }
 0x2c7   :  { %2670 = vst.msk [vmem:[#allocation3 + $0x168] sm:$0xff] %vm2624_vm11, %v2523_v56 }
 0x2c8   :  { %4283 = vst.msk [vmem:[#allocation4 + $0x30] sm:$0xff] %vm4180_vm15, %v4201_v59  ;;  %1731 = vrot.lane.b32.xlu0 %v2722_v39, %s6560_s30  ;;  %v956_v60 = vpop.permute.xlu1 %955  ;;  %v3108_v59 = vld [vmem:[#allocation2 + $0x1fa] sm:$0xff] }
 0x2c9   :  { %1116 = vst.msk [vmem:[#allocation3 + $0x100] sm:$0xff] %vm1083_vm7, %v956_v60 }
 0x2ca   :  { %v3261_v19 = vpop.permute.xlu0 %3260  ;;  %2913 = vrot.lane.b32.xlu1 %v2737_v1, %s6563_s12  ;;  %243 = vst.msk [vmem:[#allocation2 + $0x2f1] sm:$0xff] %vm33_vm0, %v178_v49 }
 0x2cb   :  { %3424 = vst.msk [vmem:[#allocation3 + $0xe8] sm:$0xff] %vm3394_vm13, %v3261_v19 }
 0x2cc   :  { %2530 = vrot.lane.b32.xlu0 %v7874_v10, %s6562_s11  ;;  %v1754_v61 = vpop.permute.xlu1 %1753 }
 0x2cd   :  { %1900 = vst.msk [vmem:[#allocation3 + $0x170] sm:$0xff] %vm1853_vm9, %v1754_v61 }
 0x2ce   :  { %v1371_v62 = vpop.permute.xlu0 %1370  ;;  %963 = vrot.lane.b32.xlu1 %v3106_v57, %s6558_s28 }
 0x2cf   :  { %v4315_v51 = vld [vmem:[#allocation4 + $0x30] ss:$2 sm:$0xff]  ;;  %v4347_v11 = vld [vmem:[#allocation4 + $0x31] ss:$2 sm:$0xff]  ;;  %1516 = vst.msk [vmem:[#allocation3 + $0x178] sm:$0xff] %vm1468_vm8, %v1371_v62 }
 0x2d0   :  { %3268 = vrot.lane.b32.xlu0 %v3107_v12, %s6564_s18  ;;  %v4375_v17 = vmax.f32 %v4315_v51, %v4347_v11  ;;  %v2493_v55 = vpop.permute.xlu1 %2492 }
 0x2d1   :  { %2655 = vst.msk [vmem:[#allocation3 + $0xf0] sm:$0xff] %vm2624_vm11, %v2493_v55 }
 0x2d2   :  { %v2109_v21 = vpop.permute.xlu0 %2108  ;;  %v3488_v22 = vld [vmem:[#allocation3 + $0xe8] sm:$0xff]  ;;  %4443 = vst.msk [vmem:[#allocation5 + $0x41] sm:$0xff] %vm4180_vm15, %v4375_v17  ;;  %1761 = vrot.lane.b32.xlu1 %v2737_v1, %s6560_s30 }
 0x2d3   :  { %2270 = vst.msk [vmem:[#allocation3 + $0xf8] sm:$0xff] %vm2238_vm10, %v2109_v21  ;;  %6331 = vmatmul.mubr.msk.f32.gmra.mrb[28].mxu0 %vm3534_vm14, %v3488_v22 }
 0x2d4   :  { %1378 = vrot.lane.b32.xlu0 %v7874_v10, %s6559_s29  ;;  %v3291_v43 = vpop.permute.xlu1 %3290 }
 0x2d5   :  { %3439 = vst.msk [vmem:[#allocation3 + $0x160] sm:$0xff] %vm3394_vm13, %v3291_v43 }
 0x2d6   :  { %v2908_v28 = vpop.permute.xlu0 %2907  ;;  %2500 = vrot.lane.b32.xlu1 %v2338_v54, %s6562_s11 }
 0x2d7   :  { %3055 = vst.msk [vmem:[#allocation3 + $0x168] sm:$0xff] %vm3009_vm12, %v2908_v28 }
 0x2d8   :  { %2116 = vrot.lane.b32.xlu0 %v3107_v12, %s6561_s10  ;;  %v958_v31 = vpop.permute.xlu1 %957 }
 0x2d9   :  { %v8108_v27 = vld [vmem:[#allocation5 + $0x40] sm:$0xff]  ;;  %1117 = vst.msk [vmem:[#allocation3 + $0x108] sm:$0xff] %vm1083_vm7, %v958_v31 }
 0x2da   :  { %v603_v7 = vpop.permute.xlu0 %602  ;;  %4476 = vst.msk [vmem:[#allocation6 + $0x20] sm:$0xff] %vm4180_vm15, %v8108_v27  ;;  %v6314_v10 = vpop.f32.mrb[16].mxu0  ;;  %3298 = vrot.lane.b32.xlu1 %v3122_v23, %s6564_s18 }
 0x2db   :  { %747 = vst.msk [vmem:[#allocation3 + $0x180] sm:$0xff] %vm698_vm3, %v603_v7  ;;  %v3877_v32 = vpop.f32.mrb[17].mxu0  ;;  %v3883_v47 = vadd.f32 %v8154_v46, %v6314_v10 }
 0x2dc   :  { %2915 = vrot.lane.b32.xlu0 %v2738_v25, %s6563_s12  ;;  %v1756_v5 = vpop.permute.xlu1 %1755  ;;  %v3503_v0 = vld [vmem:[#allocation3 + $0x160] sm:$0xff]  ;;  %v3878_v3 = vadd.f32 %v8154_v46, %v3877_v32 }
 0x2dd   :  { %1901 = vst.msk [vmem:[#allocation3 + $0x178] sm:$0xff] %vm1853_vm9, %v1756_v5  ;;  %6354 = vmatprep.mubr.msk.f32.mxu1 %vm3534_vm14, %v3503_v0  ;;  %v4133_v24 = vmax.f32 %v3883_v47, 0.0  ;;  %v3109_v32 = vld [vmem:[#allocation2 + $0x202] sm:$0xff] }
 0x2de   :  { %v1341_v14 = vpop.permute.xlu0 %1340  ;;  %965 = vrot.lane.b32.xlu1 %v3107_v12, %s6558_s28  ;;  %v4132_v41 = vmax.f32 %v3878_v3, 0.0  ;;  %v2341_v3 = vld [vmem:[#allocation2 + $0x218] sm:$0xff] }
 0x2df   :  { %1501 = vst.msk [vmem:[#allocation3 + $0x100] sm:$0xff] %vm1468_vm8, %v1341_v14  ;;  %v4208_v12 = vsel %vm4180_vm15, %v4133_v24, -inf  ;;  %v8241_v24 = vld [vmem:[#allocation2 + $0x2c2] sm:$0xff] }
 0x2e0   :  { %610 = vrot.lane.b32.xlu0 %v2737_v1, %s6557_s13  ;;  %v2495_v34 = vpop.permute.xlu1 %2494  ;;  %v4205_v62 = vsel %vm4180_vm15, %v4132_v41, -inf }
 0x2e1   :  { %2656 = vst.msk [vmem:[#allocation3 + $0xf8] sm:$0xff] %vm2624_vm11, %v2495_v34 }
 0x2e2   :  { %v2139_v58 = vpop.permute.xlu0 %2138  ;;  %1763 = vrot.lane.b32.xlu1 %v2738_v25, %s6560_s30 }
 0x2e3   :  { %2285 = vst.msk [vmem:[#allocation3 + $0x170] sm:$0xff] %vm2238_vm10, %v2139_v58 }
 0x2e4   :  { %1348 = vrot.lane.b32.xlu0 %v2338_v54, %s6559_s29  ;;  %v3293_v13 = vpop.permute.xlu1 %3292  ;;  %v8189_v54 = vld [vmem:[#allocation2 + $0x2f0] sm:$0xff] }
 0x2e5   :  { %3440 = vst.msk [vmem:[#allocation3 + $0x168] sm:$0xff] %vm3394_vm13, %v3293_v13 }
 0x2e6   :  { %v2878_v37 = vpop.permute.xlu0 %2877  ;;  %2502 = vrot.lane.b32.xlu1 %v2339_v6, %s6562_s11  ;;  %373 = vst.msk [vmem:[#allocation3 + $0x1d8] sm:$0xff] %vm33_vm0, %v8189_v54 }
 0x2e7   :  { %3040 = vst.msk [vmem:[#allocation3 + $0xf0] sm:$0xff] %vm3009_vm12, %v2878_v37 }
 0x2e8   :  { %2146 = vrot.lane.b32.xlu0 %v3122_v23, %s6561_s10  ;;  %v988_v57 = vpop.permute.xlu1 %987 }
 0x2e9   :  { %1132 = vst.msk [vmem:[#allocation3 + $0x180] sm:$0xff] %vm1083_vm7, %v988_v57  ;;  %v3124_v57 = vld [vmem:[#allocation2 + $0x2ba] sm:$0xff] }
 0x2ea   :  { %v605_v39 = vpop.permute.xlu0 %604  ;;  %3300 = vrot.lane.b32.xlu1 %v8132_v63, %s6564_s18 }
 0x2eb   :  { %748 = vst.msk [vmem:[#allocation3 + $0x188] sm:$0xff] %vm698_vm3, %v605_v39 }
 0x2ec   :  { %2885 = vrot.lane.b32.xlu0 %v2723_v4, %s6563_s12  ;;  %v1726_v40 = vpop.permute.xlu1 %1725  ;;  %v3504_v38 = vld [vmem:[#allocation3 + $0x168] sm:$0xff] }
 0x2ed   :  { %1886 = vst.msk [vmem:[#allocation3 + $0x100] sm:$0xff] %vm1853_vm9, %v1726_v40  ;;  %6355 = vmatmul.mubr.msk.f32.vlgmr.msra.gmra.mrb[0].mxu1 %vm3534_vm14, %v3504_v38 }
 0x2ee   :  { %v1343_v42 = vpop.permute.xlu0 %1342  ;;  %995 = vrot.lane.b32.xlu1 %v3122_v23, %s6558_s28  ;;  %v2739_v23 = vld [vmem:[#allocation2 + $0x2b9] sm:$0xff] }
 0x2ef   :  { %1502 = vst.msk [vmem:[#allocation3 + $0x108] sm:$0xff] %vm1468_vm8, %v1343_v42 }
 0x2f0   :  { %612 = vrot.lane.b32.xlu0 %v2738_v25, %s6557_s13  ;;  %v2525_v16 = vpop.permute.xlu1 %2524 }
 0x2f1   :  { %2671 = vst.msk [vmem:[#allocation3 + $0x170] sm:$0xff] %vm2624_vm11, %v2525_v16 }
 0x2f2   :  { %v2141_v9 = vpop.permute.xlu0 %2140  ;;  %1733 = vrot.lane.b32.xlu1 %v2723_v4, %s6560_s30 }
 0x2f3   :  { %2286 = vst.msk [vmem:[#allocation3 + $0x178] sm:$0xff] %vm2238_vm10, %v2141_v9 }
 0x2f4   :  { %1350 = vrot.lane.b32.xlu0 %v2339_v6, %s6559_s29  ;;  %v3263_v48 = vpop.permute.xlu1 %3262  ;;  %v2340_v6 = vld [vmem:[#allocation2 + $0x210] sm:$0xff] }
 0x2f5   :  { %3425 = vst.msk [vmem:[#allocation3 + $0xf0] sm:$0xff] %vm3394_vm13, %v3263_v48 }
 0x2f6   :  { %v2880_v52 = vpop.permute.xlu0 %2879  ;;  %v6317_v15 = vpop.f32.mrb[18].mxu0  ;;  %2532 = vrot.lane.b32.xlu1 %v7946_v20, %s6562_s11 }
 0x2f7   :  { %3041 = vst.msk [vmem:[#allocation3 + $0xf8] sm:$0xff] %vm3009_vm12, %v2880_v52  ;;  %v3893_v8 = vadd.f32 %v8154_v46, %v6317_v15  ;;  %v3887_v53 = vpop.f32.mrb[19].mxu0  ;;  %v179_v15 = vld [vmem:[%s9479_s0 + $0x1d0] sm:$0xff] }
 0x2f8   :  { %2148 = vrot.lane.b32.xlu0 %v8132_v63, %s6561_s10  ;;  %v3888_v50 = vadd.f32 %v8154_v46, %v3887_v53  ;;  %v1373_v1 = vpop.permute.xlu1 %1372  ;;  %244 = vst.msk [vmem:[#allocation2 + $0x301] sm:$0xff] %vm33_vm0, %v179_v15 }
 0x2f9   :  { %v4135_v56 = vmax.f32 %v3893_v8, 0.0  ;;  %1517 = vst.msk [vmem:[#allocation3 + $0x180] sm:$0xff] %vm1468_vm8, %v1373_v1  ;;  %v2725_v8 = vld [vmem:[#allocation2 + $0x211] sm:$0xff] }
 0x2fa   :  { %v990_v60 = vpop.permute.xlu0 %989  ;;  %v4134_v19 = vmax.f32 %v3888_v50, 0.0  ;;  %3270 = vrot.lane.b32.xlu1 %v3108_v59, %s6564_s18 }
 0x2fb   :  { %1133 = vst.msk [vmem:[#allocation3 + $0x188] sm:$0xff] %vm1083_vm7, %v990_v60  ;;  %v4209_v61 = vsel %vm4180_vm15, %v4135_v56, -inf }
 0x2fc   :  { %2887 = vrot.lane.b32.xlu0 %v2724_v29, %s6563_s12  ;;  %v4210_v51 = vmax.f32 %v4208_v12, %v4209_v61  ;;  %v4206_v11 = vsel %vm4180_vm15, %v4134_v19, -inf  ;;  %v2111_v55 = vpop.permute.xlu1 %2110  ;;  %v3489_v22 = vld [vmem:[#allocation3 + $0xf0] sm:$0xff] }
 0x2fd   :  { %v4207_v17 = vmax.f32 %v4205_v62, %v4206_v11  ;;  %2271 = vst.msk [vmem:[#allocation3 + $0x100] sm:$0xff] %vm2238_vm10, %v2111_v55  ;;  %6333 = vmatprep.mubr.msk.f32.mxu0 %vm3534_vm14, %v3489_v22 }
 0x2fe   :  { %v1728_v21 = vpop.permute.xlu0 %1727  ;;  %4286 = vst.msk [vmem:[#allocation4 + $0x48] sm:$0xff] %vm4180_vm15, %v4210_v51  ;;  %1380 = vrot.lane.b32.xlu1 %v7946_v20, %s6559_s29 }
 0x2ff   :  { %1887 = vst.msk [vmem:[#allocation3 + $0x108] sm:$0xff] %vm1853_vm9, %v1728_v21  ;;  %v8255_v56 = vld [vmem:[#allocation2 + $0x300] sm:$0xff] }
 0x300   :  { %4285 = vst.msk [vmem:[#allocation4 + $0x40] sm:$0xff] %vm4180_vm15, %v4207_v17  ;;  %997 = vrot.lane.b32.xlu0 %v8132_v63, %s6558_s28  ;;  %v2910_v43 = vpop.permute.xlu1 %2909 }
 0x301   :  { %3056 = vst.msk [vmem:[#allocation3 + $0x170] sm:$0xff] %vm3009_vm12, %v2910_v43 }
 0x302   :  { %v2527_v28 = vpop.permute.xlu0 %2526  ;;  %2118 = vrot.lane.b32.xlu1 %v3108_v59, %s6561_s10  ;;  %374 = vst.msk [vmem:[#allocation3 + $0x1e0] sm:$0xff] %vm33_vm0, %v8255_v56 }
 0x303   :  { %2672 = vst.msk [vmem:[#allocation3 + $0x178] sm:$0xff] %vm2624_vm11, %v2527_v28 }
 0x304   :  { %1735 = vrot.lane.b32.xlu0 %v2724_v29, %s6560_s30  ;;  %v960_v20 = vpop.permute.xlu1 %959 }
 0x305   :  { %1118 = vst.msk [vmem:[#allocation3 + $0x110] sm:$0xff] %vm1083_vm7, %v960_v20  ;;  %v180_v20 = vld [vmem:[%s9479_s0 + $0x1d8] sm:$0xff] }
 0x306   :  { %v3265_v25 = vpop.permute.xlu0 %3264  ;;  %2917 = vrot.lane.b32.xlu1 %v2739_v23, %s6563_s12  ;;  %245 = vst.msk [vmem:[#allocation2 + $0x309] sm:$0xff] %vm33_vm0, %v180_v20 }
 0x307   :  { %v4317_v31 = vld [vmem:[#allocation4 + $0x40] ss:$2 sm:$0xff]  ;;  %v4349_v7 = vld [vmem:[#allocation4 + $0x41] ss:$2 sm:$0xff]  ;;  %3426 = vst.msk [vmem:[#allocation3 + $0xf8] sm:$0xff] %vm3394_vm13, %v3265_v25 }
 0x308   :  { %2534 = vrot.lane.b32.xlu0 %v7975_v36, %s6562_s11  ;;  %v4376_v10 = vmax.f32 %v4317_v31, %v4349_v7  ;;  %v1758_v5 = vpop.permute.xlu1 %1757 }
 0x309   :  { %1902 = vst.msk [vmem:[#allocation3 + $0x180] sm:$0xff] %vm1853_vm9, %v1758_v5 }
 0x30a   :  { %v1375_v14 = vpop.permute.xlu0 %1374  ;;  %4444 = vst.msk [vmem:[#allocation5 + $0x51] sm:$0xff] %vm4180_vm15, %v4376_v10  ;;  %967 = vrot.lane.b32.xlu1 %v3108_v59, %s6558_s28  ;;  %v3110_v10 = vld [vmem:[#allocation2 + $0x212] sm:$0xff] }
 0x30b   :  { %1518 = vst.msk [vmem:[#allocation3 + $0x188] sm:$0xff] %vm1468_vm8, %v1375_v14 }
 0x30c   :  { %3272 = vrot.lane.b32.xlu0 %v3109_v32, %s6564_s18  ;;  %v2497_v0 = vpop.permute.xlu1 %2496 }
 0x30d   :  { %2657 = vst.msk [vmem:[#allocation3 + $0x100] sm:$0xff] %vm2624_vm11, %v2497_v0 }
 0x30e   :  { %v2113_v34 = vpop.permute.xlu0 %2112  ;;  %v3490_v58 = vld [vmem:[#allocation3 + $0xf8] sm:$0xff]  ;;  %1765 = vrot.lane.b32.xlu1 %v2739_v23, %s6560_s30 }
 0x30f   :  { %2272 = vst.msk [vmem:[#allocation3 + $0x108] sm:$0xff] %vm2238_vm10, %v2113_v34  ;;  %6334 = vmatmul.mubr.msk.f32.gmra.mrb[30].mxu0 %vm3534_vm14, %v3490_v58 }
 0x310   :  { %1382 = vrot.lane.b32.xlu0 %v7975_v36, %s6559_s29  ;;  %v3295_v37 = vpop.permute.xlu1 %3294  ;;  %v2740_v36 = vld [vmem:[#allocation2 + $0x2c1] sm:$0xff] }
 0x311   :  { %v8213_v13 = vld [vmem:[#allocation5 + $0x50] sm:$0xff]  ;;  %3441 = vst.msk [vmem:[#allocation3 + $0x170] sm:$0xff] %vm3394_vm13, %v3295_v37  ;;  %v8293_v37 = vld [vmem:[#allocation2 + $0x308] sm:$0xff] }
 0x312   :  { %v2912_v33 = vpop.permute.xlu0 %2911  ;;  %4477 = vst.msk [vmem:[#allocation6 + $0x28] sm:$0xff] %vm4180_vm15, %v8213_v13  ;;  %v6320_v63 = vpop.f32.mrb[20].mxu0  ;;  %2504 = vrot.lane.b32.xlu1 %v2340_v6, %s6562_s11 }
 0x313   :  { %3057 = vst.msk [vmem:[#allocation3 + $0x178] sm:$0xff] %vm3009_vm12, %v2912_v33  ;;  %v3897_v4 = vpop.f32.mrb[21].mxu0  ;;  %v3903_v29 = vadd.f32 %v8154_v46, %v6320_v63 }
 0x314   :  { %2120 = vrot.lane.b32.xlu0 %v3109_v32, %s6561_s10  ;;  %v962_v39 = vpop.permute.xlu1 %961  ;;  %v3898_v1 = vadd.f32 %v8154_v46, %v3897_v4  ;;  %375 = vst.msk [vmem:[#allocation3 + $0x1e8] sm:$0xff] %vm33_vm0, %v8293_v37 }
 0x315   :  { %1119 = vst.msk [vmem:[#allocation3 + $0x118] sm:$0xff] %vm1083_vm7, %v962_v39  ;;  %v4137_v61 = vmax.f32 %v3903_v29, 0.0 }
 0x316   :  { %v607_v40 = vpop.permute.xlu0 %606  ;;  %3302 = vrot.lane.b32.xlu1 %v3124_v57, %s6564_s18  ;;  %v4136_v11 = vmax.f32 %v3898_v1, 0.0 }
 0x317   :  { %749 = vst.msk [vmem:[#allocation3 + $0x190] sm:$0xff] %vm698_vm3, %v607_v40  ;;  %v4214_v28 = vsel %vm4180_vm15, %v4137_v61, -inf  ;;  %v2343_v61 = vld [vmem:[#allocation2 + $0x230] sm:$0xff] }
 0x318   :  { %2919 = vrot.lane.b32.xlu0 %v2740_v36, %s6563_s12  ;;  %v1760_v42 = vpop.permute.xlu1 %1759  ;;  %v3505_v16 = vld [vmem:[#allocation3 + $0x170] sm:$0xff]  ;;  %v4211_v25 = vsel %vm4180_vm15, %v4136_v11, -inf }
 0x319   :  { %1903 = vst.msk [vmem:[#allocation3 + $0x188] sm:$0xff] %vm1853_vm9, %v1760_v42  ;;  %6357 = vmatprep.mubr.msk.f32.mxu1 %vm3534_vm14, %v3505_v16  ;;  %v3111_v42 = vld [vmem:[#allocation2 + $0x21a] sm:$0xff] }
 0x31a   :  { %v1345_v38 = vpop.permute.xlu0 %1344  ;;  %969 = vrot.lane.b32.xlu1 %v3109_v32, %s6558_s28  ;;  %v2726_v32 = vld [vmem:[#allocation2 + $0x219] sm:$0xff] }
 0x31b   :  { %1503 = vst.msk [vmem:[#allocation3 + $0x110] sm:$0xff] %vm1468_vm8, %v1345_v38 }
 0x31c   :  { %614 = vrot.lane.b32.xlu0 %v2739_v23, %s6557_s13  ;;  %v2499_v9 = vpop.permute.xlu1 %2498 }
 0x31d   :  { %2658 = vst.msk [vmem:[#allocation3 + $0x108] sm:$0xff] %vm2624_vm11, %v2499_v9 }
 0x31e   :  { %v2143_v47 = vpop.permute.xlu0 %2142  ;;  %1767 = vrot.lane.b32.xlu1 %v2740_v36, %s6560_s30 }
 0x31f   :  { %2287 = vst.msk [vmem:[#allocation3 + $0x180] sm:$0xff] %vm2238_vm10, %v2143_v47 }
 0x320   :  { %1352 = vrot.lane.b32.xlu0 %v2340_v6, %s6559_s29  ;;  %v3297_v48 = vpop.permute.xlu1 %3296 }
 0x321   :  { %3442 = vst.msk [vmem:[#allocation3 + $0x178] sm:$0xff] %vm3394_vm13, %v3297_v48 }
 0x322   :  { %v2882_v52 = vpop.permute.xlu0 %2881  ;;  %2506 = vrot.lane.b32.xlu1 %v2341_v3, %s6562_s11 }
 0x323   :  { %3042 = vst.msk [vmem:[#allocation3 + $0x100] sm:$0xff] %vm3009_vm12, %v2882_v52 }
 0x324   :  { %2150 = vrot.lane.b32.xlu0 %v3124_v57, %s6561_s10  ;;  %v992_v53 = vpop.permute.xlu1 %991 }
 0x325   :  { %1134 = vst.msk [vmem:[#allocation3 + $0x190] sm:$0xff] %vm1083_vm7, %v992_v53 }
 0x326   :  { %v609_v49 = vpop.permute.xlu0 %608  ;;  %3304 = vrot.lane.b32.xlu1 %v8241_v24, %s6564_s18 }
 0x327   :  { %750 = vst.msk [vmem:[#allocation3 + $0x198] sm:$0xff] %vm698_vm3, %v609_v49  ;;  %v3126_v49 = vld [vmem:[#allocation2 + $0x2d2] sm:$0xff] }
 0x328   :  { %2889 = vrot.lane.b32.xlu0 %v2725_v8, %s6563_s12  ;;  %v1730_v41 = vpop.permute.xlu1 %1729  ;;  %v3506_v59 = vld [vmem:[#allocation3 + $0x178] sm:$0xff] }
 0x329   :  { %1888 = vst.msk [vmem:[#allocation3 + $0x110] sm:$0xff] %vm1853_vm9, %v1730_v41  ;;  %6358 = vmatmul.mubr.msk.f32.gmra.mrb[2].mxu1 %vm3534_vm14, %v3506_v59  ;;  %v2742_v41 = vld [vmem:[#allocation2 + $0x2d9] sm:$0xff] }
 0x32a   :  { %v1347_v50 = vpop.permute.xlu0 %1346  ;;  %999 = vrot.lane.b32.xlu1 %v3124_v57, %s6558_s28 }
 0x32b   :  { %1504 = vst.msk [vmem:[#allocation3 + $0x118] sm:$0xff] %vm1468_vm8, %v1347_v50 }
 0x32c   :  { %616 = vrot.lane.b32.xlu0 %v2740_v36, %s6557_s13  ;;  %v2529_v60 = vpop.permute.xlu1 %2528  ;;  %v2741_v36 = vld [vmem:[#allocation2 + $0x2d1] sm:$0xff] }
 0x32d   :  { %2673 = vst.msk [vmem:[#allocation3 + $0x180] sm:$0xff] %vm2624_vm11, %v2529_v60  ;;  %v181_v60 = vld [vmem:[%s9479_s0 + $0x1e0] sm:$0xff] }
 0x32e   :  { %v2145_v19 = vpop.permute.xlu0 %2144  ;;  %v6323_v12 = vpop.f32.mrb[22].mxu0  ;;  %1737 = vrot.lane.b32.xlu1 %v2725_v8, %s6560_s30  ;;  %246 = vst.msk [vmem:[#allocation2 + $0x319] sm:$0xff] %vm33_vm0, %v181_v60 }
 0x32f   :  { %2288 = vst.msk [vmem:[#allocation3 + $0x188] sm:$0xff] %vm2238_vm10, %v2145_v19  ;;  %v3913_v62 = vadd.f32 %v8154_v46, %v6323_v12  ;;  %v3907_v51 = vpop.f32.mrb[23].mxu0 }
 0x330   :  { %1354 = vrot.lane.b32.xlu0 %v2341_v3, %s6559_s29  ;;  %v3908_v17 = vadd.f32 %v8154_v46, %v3907_v51  ;;  %v3267_v21 = vpop.permute.xlu1 %3266 }
 0x331   :  { %v4139_v55 = vmax.f32 %v3913_v62, 0.0  ;;  %3427 = vst.msk [vmem:[#allocation3 + $0x100] sm:$0xff] %vm3394_vm13, %v3267_v21  ;;  %v2727_v21 = vld [vmem:[#allocation2 + $0x229] sm:$0xff] }
 0x332   :  { %v2884_v22 = vpop.permute.xlu0 %2883  ;;  %v4138_v43 = vmax.f32 %v3908_v17, 0.0  ;;  %2536 = vrot.lane.b32.xlu1 %v8043_v35, %s6562_s11  ;;  %v182_v17 = vld [vmem:[%s9479_s0 + $0x1e8] sm:$0xff] }
 0x333   :  { %3043 = vst.msk [vmem:[#allocation3 + $0x108] sm:$0xff] %vm3009_vm12, %v2884_v22  ;;  %v4215_v23 = vsel %vm4180_vm15, %v4139_v55, -inf  ;;  %v8355_v55 = vld [vmem:[#allocation2 + $0x2da] sm:$0xff] }
 0x334   :  { %2152 = vrot.lane.b32.xlu0 %v8241_v24, %s6561_s10  ;;  %v4216_v31 = vmax.f32 %v4214_v28, %v4215_v23  ;;  %v4212_v7 = vsel %vm4180_vm15, %v4138_v43, -inf  ;;  %v1377_v14 = vpop.permute.xlu1 %1376  ;;  %247 = vst.msk [vmem:[#allocation2 + $0x321] sm:$0xff] %vm33_vm0, %v182_v17 }
 0x335   :  { %v4213_v5 = vmax.f32 %v4211_v25, %v4212_v7  ;;  %1519 = vst.msk [vmem:[#allocation3 + $0x190] sm:$0xff] %vm1468_vm8, %v1377_v14  ;;  %v8350_v11 = vld [vmem:[#allocation2 + $0x318] sm:$0xff] }
 0x336   :  { %v994_v0 = vpop.permute.xlu0 %993  ;;  %4288 = vst.msk [vmem:[#allocation4 + $0x58] sm:$0xff] %vm4180_vm15, %v4216_v31  ;;  %3274 = vrot.lane.b32.xlu1 %v3110_v10, %s6564_s18 }
 0x337   :  { %1135 = vst.msk [vmem:[#allocation3 + $0x198] sm:$0xff] %vm1083_vm7, %v994_v0 }
 0x338   :  { %4287 = vst.msk [vmem:[#allocation4 + $0x50] sm:$0xff] %vm4180_vm15, %v4213_v5  ;;  %2891 = vrot.lane.b32.xlu0 %v2726_v32, %s6563_s12  ;;  %v2115_v34 = vpop.permute.xlu1 %2114  ;;  %v3491_v6 = vld [vmem:[#allocation3 + $0x100] sm:$0xff] }
 0x339   :  { %2273 = vst.msk [vmem:[#allocation3 + $0x110] sm:$0xff] %vm2238_vm10, %v2115_v34  ;;  %6336 = vmatprep.mubr.msk.f32.mxu0 %vm3534_vm14, %v3491_v6 }
 0x33a   :  { %v1732_v58 = vpop.permute.xlu0 %1731  ;;  %1384 = vrot.lane.b32.xlu1 %v8043_v35, %s6559_s29  ;;  %376 = vst.msk [vmem:[#allocation3 + $0x1f0] sm:$0xff] %vm33_vm0, %v8350_v11 }
 0x33b   :  { %1889 = vst.msk [vmem:[#allocation3 + $0x118] sm:$0xff] %vm1853_vm9, %v1732_v58  ;;  %v8370_v25 = vld [vmem:[#allocation2 + $0x320] sm:$0xff] }
 0x33c   :  { %1001 = vrot.lane.b32.xlu0 %v8241_v24, %s6558_s28  ;;  %v2914_v33 = vpop.permute.xlu1 %2913  ;;  %v2342_v24 = vld [vmem:[#allocation2 + $0x228] sm:$0xff]  ;;  %377 = vst.msk [vmem:[#allocation3 + $0x1f8] sm:$0xff] %vm33_vm0, %v8370_v25 }
 0x33d   :  { %3058 = vst.msk [vmem:[#allocation3 + $0x180] sm:$0xff] %vm3009_vm12, %v2914_v33 }
 0x33e   :  { %v2531_v63 = vpop.permute.xlu0 %2530  ;;  %2122 = vrot.lane.b32.xlu1 %v3110_v10, %s6561_s10 }
 0x33f   :  { %v4319_v4 = vld [vmem:[#allocation4 + $0x50] ss:$2 sm:$0xff]  ;;  %v4351_v57 = vld [vmem:[#allocation4 + $0x51] ss:$2 sm:$0xff]  ;;  %2674 = vst.msk [vmem:[#allocation3 + $0x188] sm:$0xff] %vm2624_vm11, %v2531_v63 }
 0x340   :  { %1739 = vrot.lane.b32.xlu0 %v2726_v32, %s6560_s30  ;;  %v4377_v35 = vmax.f32 %v4319_v4, %v4351_v57  ;;  %v964_v39 = vpop.permute.xlu1 %963  ;;  %v3112_v4 = vld [vmem:[#allocation2 + $0x22a] sm:$0xff] }
 0x341   :  { %1120 = vst.msk [vmem:[#allocation3 + $0x120] sm:$0xff] %vm1083_vm7, %v964_v39  ;;  %v2728_v57 = vld [vmem:[#allocation2 + $0x231] sm:$0xff] }
 0x342   :  { %v3269_v40 = vpop.permute.xlu0 %3268  ;;  %4445 = vst.msk [vmem:[#allocation5 + $0x61] sm:$0xff] %vm4180_vm15, %v4377_v35  ;;  %2921 = vrot.lane.b32.xlu1 %v2741_v36, %s6563_s12 }
 0x343   :  { %3428 = vst.msk [vmem:[#allocation3 + $0x108] sm:$0xff] %vm3394_vm13, %v3269_v40 }
 0x344   :  { %2538 = vrot.lane.b32.xlu0 %v8076_v45, %s6562_s11  ;;  %v1762_v38 = vpop.permute.xlu1 %1761 }
 0x345   :  { %1904 = vst.msk [vmem:[#allocation3 + $0x190] sm:$0xff] %vm1853_vm9, %v1762_v38 }
 0x346   :  { %v1379_v16 = vpop.permute.xlu0 %1378  ;;  %971 = vrot.lane.b32.xlu1 %v3110_v10, %s6558_s28 }
 0x347   :  { %1520 = vst.msk [vmem:[#allocation3 + $0x198] sm:$0xff] %vm1468_vm8, %v1379_v16 }
 0x348   :  { %3276 = vrot.lane.b32.xlu0 %v3111_v42, %s6564_s18  ;;  %v2501_v47 = vpop.permute.xlu1 %2500 }
 0x349   :  { %v8311_v9 = vld [vmem:[#allocation5 + $0x60] sm:$0xff]  ;;  %2659 = vst.msk [vmem:[#allocation3 + $0x110] sm:$0xff] %vm2624_vm11, %v2501_v47 }
 0x34a   :  { %v2117_v3 = vpop.permute.xlu0 %2116  ;;  %v3492_v48 = vld [vmem:[#allocation3 + $0x108] sm:$0xff]  ;;  %4478 = vst.msk [vmem:[#allocation6 + $0x30] sm:$0xff] %vm4180_vm15, %v8311_v9  ;;  %v8317_v52 = vpop.f32.mrb[24].mxu0  ;;  %1769 = vrot.lane.b32.xlu1 %v2741_v36, %s6560_s30 }
 0x34b   :  { %2274 = vst.msk [vmem:[#allocation3 + $0x118] sm:$0xff] %vm2238_vm10, %v2117_v3  ;;  %6337 = vmatmul.mubr.msk.f32.gmra.mrb[32].mxu0 %vm3534_vm14, %v3492_v48  ;;  %v8323_v15 = vpop.f32.mrb[25].mxu0  ;;  %v3923_v10 = vadd.f32 %v8154_v46, %v8317_v52 }
 0x34c   :  { %1386 = vrot.lane.b32.xlu0 %v8076_v45, %s6559_s29  ;;  %v3299_v8 = vpop.permute.xlu1 %3298  ;;  %v3918_v32 = vadd.f32 %v8154_v46, %v8323_v15 }
 0x34d   :  { %3443 = vst.msk [vmem:[#allocation3 + $0x180] sm:$0xff] %vm3394_vm13, %v3299_v8  ;;  %v4141_v34 = vmax.f32 %v3923_v10, 0.0 }
 0x34e   :  { %v2916_v53 = vpop.permute.xlu0 %2915  ;;  %2508 = vrot.lane.b32.xlu1 %v2342_v24, %s6562_s11  ;;  %v4140_v33 = vmax.f32 %v3918_v32, 0.0  ;;  %v2345_v32 = vld [vmem:[#allocation2 + $0x248] sm:$0xff] }
 0x34f   :  { %3059 = vst.msk [vmem:[#allocation3 + $0x188] sm:$0xff] %vm3009_vm12, %v2916_v53  ;;  %v183_v53 = vld [vmem:[%s9479_s0 + $0x1f0] sm:$0xff] }
 0x350   :  { %2124 = vrot.lane.b32.xlu0 %v3111_v42, %s6561_s10  ;;  %v966_v50 = vpop.permute.xlu1 %965  ;;  %248 = vst.msk [vmem:[#allocation2 + $0x331] sm:$0xff] %vm33_vm0, %v183_v53 }
 0x351   :  { %1121 = vst.msk [vmem:[#allocation3 + $0x128] sm:$0xff] %vm1083_vm7, %v966_v50 }
 0x352   :  { %v611_v59 = vpop.permute.xlu0 %610  ;;  %3306 = vrot.lane.b32.xlu1 %v3126_v49, %s6564_s18 }
 0x353   :  { %751 = vst.msk [vmem:[#allocation3 + $0x1a0] sm:$0xff] %vm698_vm3, %v611_v59 }
 0x354   :  { %2923 = vrot.lane.b32.xlu0 %v2742_v41, %s6563_s12  ;;  %v1764_v45 = vpop.permute.xlu1 %1763  ;;  %v3507_v1 = vld [vmem:[#allocation3 + $0x180] sm:$0xff] }
 0x355   :  { %1905 = vst.msk [vmem:[#allocation3 + $0x198] sm:$0xff] %vm1853_vm9, %v1764_v45  ;;  %6360 = vmatprep.mubr.msk.f32.mxu1 %vm3534_vm14, %v3507_v1 }
 0x356   :  { %v1349_v29 = vpop.permute.xlu0 %1348  ;;  %973 = vrot.lane.b32.xlu1 %v3111_v42, %s6558_s28  ;;  %v4220_v42 = vsel %vm4180_vm15, %v4141_v34, -inf  ;;  %v2729_v34 = vld [vmem:[#allocation2 + $0x241] sm:$0xff] }
 0x357   :  { %1505 = vst.msk [vmem:[#allocation3 + $0x120] sm:$0xff] %vm1468_vm8, %v1349_v29  ;;  %v3113_v29 = vld [vmem:[#allocation2 + $0x232] sm:$0xff] }
 0x358   :  { %618 = vrot.lane.b32.xlu0 %v2741_v36, %s6557_s13  ;;  %v2503_v19 = vpop.permute.xlu1 %2502 }
 0x359   :  { %2660 = vst.msk [vmem:[#allocation3 + $0x118] sm:$0xff] %vm2624_vm11, %v2503_v19  ;;  %v184_v19 = vld [vmem:[%s9479_s0 + $0x1f8] sm:$0xff] }
 0x35a   :  { %v2147_v12 = vpop.permute.xlu0 %2146  ;;  %1771 = vrot.lane.b32.xlu1 %v2742_v41, %s6560_s30  ;;  %249 = vst.msk [vmem:[#allocation2 + $0x339] sm:$0xff] %vm33_vm0, %v184_v19  ;;  %vm4389_vm0 = vcmask 58368  }
 0x35b   :  { %2289 = vst.msk [vmem:[#allocation3 + $0x190] sm:$0xff] %vm2238_vm10, %v2147_v12 }
 0x35c   :  { %1356 = vrot.lane.b32.xlu0 %v2342_v24, %s6559_s29  ;;  %v3301_v62 = vpop.permute.xlu1 %3300  ;;  %4390 = vst.msk [vmem:[#allocation5 + $0x8] sm:$0x3] %vm4389_vm0, %v6556_v2  ;;  %4392 = vst.msk [vmem:[#allocation5 + $0xa8] sm:$0x3] %vm4389_vm0, %v6556_v2 }
 0x35d   :  { %3444 = vst.msk [vmem:[#allocation3 + $0x188] sm:$0xff] %vm3394_vm13, %v3301_v62 }
 0x35e   :  { %v2886_v51 = vpop.permute.xlu0 %2885  ;;  %2510 = vrot.lane.b32.xlu1 %v2343_v61, %s6562_s11  ;;  %4395 = vst.msk [vmem:[#allocation5 + $0x98] sm:$0x3] %vm4389_vm0, %v6556_v2  ;;  %4397 = vst.msk [vmem:[#allocation5 + $0x138] sm:$0x3] %vm4389_vm0, %v6556_v2  ;;  %vm5621_vm0 = vcmask 255104  }
 0x35f   :  { %3044 = vst.msk [vmem:[#allocation3 + $0x110] sm:$0xff] %vm3009_vm12, %v2886_v51  ;;  %v2344_v51 = vld [vmem:[#allocation2 + $0x240] sm:$0xff] }
 0x360   :  { %2154 = vrot.lane.b32.xlu0 %v3126_v49, %s6561_s10  ;;  %v996_v22 = vpop.permute.xlu1 %995  ;;  %4419 = vst.msk [vmem:[#allocation5 + $0x9] sm:$0x1] %vm4398_vm1, %v6556_v2  ;;  %4428 = vst.msk [vmem:[#allocation5 + $0x99] sm:$0x1] %vm4398_vm1, %v6556_v2 }
 0x361   :  { %1136 = vst.msk [vmem:[#allocation3 + $0x1a0] sm:$0xff] %vm1083_vm7, %v996_v22  ;;  %v3128_v22 = vld [vmem:[#allocation2 + $0x2ea] sm:$0xff] }
 0x362   :  { %v613_v43 = vpop.permute.xlu0 %612  ;;  %3308 = vrot.lane.b32.xlu1 %v8355_v55, %s6564_s18  ;;  %4429 = vst.msk [vmem:[#allocation5 + $0xa9] sm:$0x1] %vm4398_vm1, %v6556_v2  ;;  %4438 = vst.msk [vmem:[#allocation5 + $0x139] sm:$0x1] %vm4398_vm1, %v6556_v2  ;;  %vm5609_vm1 = vcmask 123904  }
 0x363   :  { %752 = vst.msk [vmem:[#allocation3 + $0x1a8] sm:$0xff] %vm698_vm3, %v613_v43  ;;  %v2744_v43 = vld [vmem:[#allocation2 + $0x2f1] sm:$0xff] }
 0x364   :  { %2893 = vrot.lane.b32.xlu0 %v2727_v21, %s6563_s12  ;;  %v1734_v28 = vpop.permute.xlu1 %1733  ;;  %v3508_v20 = vld [vmem:[#allocation3 + $0x188] sm:$0xff] }
 0x365   :  { %1890 = vst.msk [vmem:[#allocation3 + $0x120] sm:$0xff] %vm1853_vm9, %v1734_v28  ;;  %6361 = vmatmul.mubr.msk.f32.gmra.mrb[4].mxu1 %vm3534_vm14, %v3508_v20 }
 0x366   :  { %v1351_v23 = vpop.permute.xlu0 %1350  ;;  %1003 = vrot.lane.b32.xlu1 %v3126_v49, %s6558_s28  ;;  %v2743_v49 = vld [vmem:[#allocation2 + $0x2e9] sm:$0xff] }
 0x367   :  { %1506 = vst.msk [vmem:[#allocation3 + $0x128] sm:$0xff] %vm1468_vm8, %v1351_v23 }
 0x368   :  { %620 = vrot.lane.b32.xlu0 %v2742_v41, %s6557_s13  ;;  %v2533_v31 = vpop.permute.xlu1 %2532 }
 0x369   :  { %2675 = vst.msk [vmem:[#allocation3 + $0x190] sm:$0xff] %vm2624_vm11, %v2533_v31 }
 0x36a   :  { %v2149_v7 = vpop.permute.xlu0 %2148  ;;  %1741 = vrot.lane.b32.xlu1 %v2727_v21, %s6560_s30 }
 0x36b   :  { %2290 = vst.msk [vmem:[#allocation3 + $0x198] sm:$0xff] %vm2238_vm10, %v2149_v7 }
 0x36c   :  { %1358 = vrot.lane.b32.xlu0 %v2343_v61, %s6559_s29  ;;  %v3271_v5 = vpop.permute.xlu1 %3270  ;;  %v6329_v0 = vpop.f32.mrb[26].mxu0 }
 0x36d   :  { %3429 = vst.msk [vmem:[#allocation3 + $0x110] sm:$0xff] %vm3394_vm13, %v3271_v5  ;;  %v3933_v58 = vadd.f32 %v8154_v46, %v6329_v0  ;;  %v3927_v6 = vpop.f32.mrb[27].mxu0  ;;  %v3129_v0 = vld [vmem:[#allocation2 + $0x2f2] sm:$0xff] }
 0x36e   :  { %v2888_v14 = vpop.permute.xlu0 %2887  ;;  %2540 = vrot.lane.b32.xlu1 %v8145_v44, %s6562_s11  ;;  %v3928_v63 = vadd.f32 %v8154_v46, %v3927_v6  ;;  %v4217_v46 = vsel %vm4180_vm15, %v4140_v33, -inf }
 0x36f   :  { %3045 = vst.msk [vmem:[#allocation3 + $0x118] sm:$0xff] %vm3009_vm12, %v2888_v14  ;;  %v4143_v35 = vmax.f32 %v3933_v58, 0.0 }
 0x370   :  { %2156 = vrot.lane.b32.xlu0 %v8355_v55, %s6561_s10  ;;  %v1381_v36 = vpop.permute.xlu1 %1380  ;;  %v4142_v40 = vmax.f32 %v3928_v63, 0.0 }
 0x371   :  { %1521 = vst.msk [vmem:[#allocation3 + $0x1a0] sm:$0xff] %vm1468_vm8, %v1381_v36  ;;  %v4221_v38 = vsel %vm4180_vm15, %v4143_v35, -inf }
 0x372   :  { %v998_v39 = vpop.permute.xlu0 %997  ;;  %3278 = vrot.lane.b32.xlu1 %v3112_v4, %s6564_s18  ;;  %v4222_v16 = vmax.f32 %v4220_v42, %v4221_v38  ;;  %v4218_v47 = vsel %vm4180_vm15, %v4142_v40, -inf  ;;  %v3114_v38 = vld [vmem:[#allocation2 + $0x242] sm:$0xff] }
 0x373   :  { %1137 = vst.msk [vmem:[#allocation3 + $0x1a8] sm:$0xff] %vm1083_vm7, %v998_v39  ;;  %v4219_v3 = vmax.f32 %v4217_v46, %v4218_v47  ;;  %v2730_v46 = vld [vmem:[#allocation2 + $0x249] sm:$0xff] }
 0x374   :  { %2895 = vrot.lane.b32.xlu0 %v2728_v57, %s6563_s12  ;;  %v2119_v48 = vpop.permute.xlu1 %2118  ;;  %v3493_v15 = vld [vmem:[#allocation3 + $0x110] sm:$0xff]  ;;  %4290 = vst.msk [vmem:[#allocation4 + $0x68] sm:$0xff] %vm4180_vm15, %v4222_v16 }
 0x375   :  { %2275 = vst.msk [vmem:[#allocation3 + $0x120] sm:$0xff] %vm2238_vm10, %v2119_v48  ;;  %6339 = vmatprep.mubr.msk.f32.mxu0 %vm3534_vm14, %v3493_v15 }
 0x376   :  { %v1736_v52 = vpop.permute.xlu0 %1735  ;;  %4289 = vst.msk [vmem:[#allocation4 + $0x60] sm:$0xff] %vm4180_vm15, %v4219_v3  ;;  %1388 = vrot.lane.b32.xlu1 %v8145_v44, %s6559_s29 }
 0x377   :  { %1891 = vst.msk [vmem:[#allocation3 + $0x128] sm:$0xff] %vm1853_vm9, %v1736_v52 }
 0x378   :  { %1005 = vrot.lane.b32.xlu0 %v8355_v55, %s6558_s28  ;;  %v2918_v24 = vpop.permute.xlu1 %2917 }
 0x379   :  { %3060 = vst.msk [vmem:[#allocation3 + $0x190] sm:$0xff] %vm3009_vm12, %v2918_v24 }
 0x37a   :  { %v2535_v8 = vpop.permute.xlu0 %2534  ;;  %2126 = vrot.lane.b32.xlu1 %v3112_v4, %s6561_s10 }
 0x37b   :  { %2676 = vst.msk [vmem:[#allocation3 + $0x198] sm:$0xff] %vm2624_vm11, %v2535_v8  ;;  %v2745_v8 = vld [vmem:[#allocation2 + $0x301] sm:$0xff] }
 0x37c   :  { %1743 = vrot.lane.b32.xlu0 %v2728_v57, %s6560_s30  ;;  %v968_v44 = vpop.permute.xlu1 %967 }
 0x37d   :  { %v4321_v50 = vld [vmem:[#allocation4 + $0x60] ss:$2 sm:$0xff]  ;;  %v4353_v59 = vld [vmem:[#allocation4 + $0x61] ss:$2 sm:$0xff]  ;;  %1122 = vst.msk [vmem:[#allocation3 + $0x130] sm:$0xff] %vm1083_vm7, %v968_v44 }
 0x37e   :  { %v3273_v41 = vpop.permute.xlu0 %3272  ;;  %2925 = vrot.lane.b32.xlu1 %v2743_v49, %s6563_s12  ;;  %v4378_v45 = vmax.f32 %v4321_v50, %v4353_v59 }
 0x37f   :  { %3430 = vst.msk [vmem:[#allocation3 + $0x118] sm:$0xff] %vm3394_vm13, %v3273_v41 }
 0x380   :  { %2542 = vrot.lane.b32.xlu0 %v8189_v54, %s6562_s11  ;;  %v1766_v1 = vpop.permute.xlu1 %1765  ;;  %4446 = vst.msk [vmem:[#allocation5 + $0x71] sm:$0xff] %vm4180_vm15, %v4378_v45 }
 0x381   :  { %1906 = vst.msk [vmem:[#allocation3 + $0x1a0] sm:$0xff] %vm1853_vm9, %v1766_v1 }
 0x382   :  { %v1383_v60 = vpop.permute.xlu0 %1382  ;;  %975 = vrot.lane.b32.xlu1 %v3112_v4, %s6558_s28 }
 0x383   :  { %1522 = vst.msk [vmem:[#allocation3 + $0x1a8] sm:$0xff] %vm1468_vm8, %v1383_v60  ;;  %v2346_v60 = vld [vmem:[#allocation2 + $0x258] sm:$0xff] }
 0x384   :  { %3280 = vrot.lane.b32.xlu0 %v3113_v29, %s6564_s18  ;;  %v2505_v12 = vpop.permute.xlu1 %2504 }
 0x385   :  { %2661 = vst.msk [vmem:[#allocation3 + $0x120] sm:$0xff] %vm2624_vm11, %v2505_v12 }
 0x386   :  { %v2121_v61 = vpop.permute.xlu0 %2120  ;;  %v3494_v62 = vld [vmem:[#allocation3 + $0x118] sm:$0xff]  ;;  %1773 = vrot.lane.b32.xlu1 %v2743_v49, %s6560_s30 }
 0x387   :  { %2276 = vst.msk [vmem:[#allocation3 + $0x128] sm:$0xff] %vm2238_vm10, %v2121_v61  ;;  %6340 = vmatmul.mubr.msk.f32.gmra.mrb[34].mxu0 %vm3534_vm14, %v3494_v62  ;;  %v8435_v17 = vld [vmem:[#allocation5 + $0x70] sm:$0xff]  ;;  %v3130_v61 = vld [vmem:[#allocation2 + $0x302] sm:$0xff] }
 0x388   :  { %1390 = vrot.lane.b32.xlu0 %v8189_v54, %s6559_s29  ;;  %v3303_v55 = vpop.permute.xlu1 %3302  ;;  %4479 = vst.msk [vmem:[#allocation6 + $0x38] sm:$0xff] %vm4180_vm15, %v8435_v17 }
 0x389   :  { %3445 = vst.msk [vmem:[#allocation3 + $0x190] sm:$0xff] %vm3394_vm13, %v3303_v55 }
 0x38a   :  { %v2920_v21 = vpop.permute.xlu0 %2919  ;;  %2512 = vrot.lane.b32.xlu1 %v2344_v51, %s6562_s11 }
 0x38b   :  { %3061 = vst.msk [vmem:[#allocation3 + $0x198] sm:$0xff] %vm3009_vm12, %v2920_v21 }
 0x38c   :  { %2128 = vrot.lane.b32.xlu0 %v3113_v29, %s6561_s10  ;;  %v970_v28 = vpop.permute.xlu1 %969 }
 0x38d   :  { %1123 = vst.msk [vmem:[#allocation3 + $0x138] sm:$0xff] %vm1083_vm7, %v970_v28  ;;  %v2347_v28 = vld [vmem:[#allocation2 + $0x260] sm:$0xff] }
 0x38e   :  { %v615_v54 = vpop.permute.xlu0 %614  ;;  %3310 = vrot.lane.b32.xlu1 %v3128_v22, %s6564_s18 }
 0x38f   :  { %753 = vst.msk [vmem:[#allocation3 + $0x1b0] sm:$0xff] %vm698_vm3, %v615_v54 }
 0x390   :  { %2927 = vrot.lane.b32.xlu0 %v2744_v43, %s6563_s12  ;;  %v1768_v23 = vpop.permute.xlu1 %1767  ;;  %v3509_v31 = vld [vmem:[#allocation3 + $0x190] sm:$0xff] }
 0x391   :  { %1907 = vst.msk [vmem:[#allocation3 + $0x1a8] sm:$0xff] %vm1853_vm9, %v1768_v23  ;;  %6363 = vmatprep.mubr.msk.f32.mxu1 %vm3534_vm14, %v3509_v31 }
 0x392   :  { %v1353_v20 = vpop.permute.xlu0 %1352  ;;  %977 = vrot.lane.b32.xlu1 %v3113_v29, %s6558_s28 }
 0x393   :  { %1507 = vst.msk [vmem:[#allocation3 + $0x130] sm:$0xff] %vm1468_vm8, %v1353_v20  ;;  %v3131_v20 = vld [vmem:[#allocation2 + $0x30a] sm:$0xff] }
 0x394   :  { %622 = vrot.lane.b32.xlu0 %v2743_v49, %s6557_s13  ;;  %v2507_v7 = vpop.permute.xlu1 %2506 }
 0x395   :  { %2662 = vst.msk [vmem:[#allocation3 + $0x128] sm:$0xff] %vm2624_vm11, %v2507_v7 }
 0x396   :  { %v2151_v10 = vpop.permute.xlu0 %2150  ;;  %1775 = vrot.lane.b32.xlu1 %v2744_v43, %s6560_s30 }
 0x397   :  { %2291 = vst.msk [vmem:[#allocation3 + $0x1a0] sm:$0xff] %vm2238_vm10, %v2151_v10 }
 0x398   :  { %1360 = vrot.lane.b32.xlu0 %v2344_v51, %s6559_s29  ;;  %v3305_v5 = vpop.permute.xlu1 %3304 }
 0x399   :  { %3446 = vst.msk [vmem:[#allocation3 + $0x198] sm:$0xff] %vm3394_vm13, %v3305_v5  ;;  %v2732_v5 = vld [vmem:[#allocation2 + $0x261] sm:$0xff] }
 0x39a   :  { %v2890_v14 = vpop.permute.xlu0 %2889  ;;  %2514 = vrot.lane.b32.xlu1 %v2345_v32, %s6562_s11 }
 0x39b   :  { %3046 = vst.msk [vmem:[#allocation3 + $0x120] sm:$0xff] %vm3009_vm12, %v2890_v14 }
 0x39c   :  { %2158 = vrot.lane.b32.xlu0 %v3128_v22, %s6561_s10  ;;  %v1000_v58 = vpop.permute.xlu1 %999 }
 0x39d   :  { %1138 = vst.msk [vmem:[#allocation3 + $0x1b0] sm:$0xff] %vm1083_vm7, %v1000_v58 }
 0x39e   :  { %v617_v6 = vpop.permute.xlu0 %616  ;;  %3312 = vrot.lane.b32.xlu1 %v3129_v0, %s6564_s18 }
 0x39f   :  { %754 = vst.msk [vmem:[#allocation3 + $0x1b8] sm:$0xff] %vm698_vm3, %v617_v6 }
 0x3a0   :  { %2897 = vrot.lane.b32.xlu0 %v2729_v34, %s6563_s12  ;;  %v1738_v33 = vpop.permute.xlu1 %1737  ;;  %v3510_v4 = vld [vmem:[#allocation3 + $0x198] sm:$0xff] }
 0x3a1   :  { %1892 = vst.msk [vmem:[#allocation3 + $0x130] sm:$0xff] %vm1853_vm9, %v1738_v33  ;;  %6364 = vmatmul.mubr.msk.f32.gmra.mrb[6].mxu1 %vm3534_vm14, %v3510_v4 }
 0x3a2   :  { %v1355_v63 = vpop.permute.xlu0 %1354  ;;  %1007 = vrot.lane.b32.xlu1 %v3128_v22, %s6558_s28 }
 0x3a3   :  { %1508 = vst.msk [vmem:[#allocation3 + $0x138] sm:$0xff] %vm1468_vm8, %v1355_v63  ;;  %v3116_v63 = vld [vmem:[#allocation2 + $0x25a] sm:$0xff] }
 0x3a4   :  { %624 = vrot.lane.b32.xlu0 %v2744_v43, %s6557_s13  ;;  %v2537_v57 = vpop.permute.xlu1 %2536  ;;  %v2731_v43 = vld [vmem:[#allocation2 + $0x259] sm:$0xff] }
 0x3a5   :  { %2677 = vst.msk [vmem:[#allocation3 + $0x1a0] sm:$0xff] %vm2624_vm11, %v2537_v57 }
 0x3a6   :  { %v2153_v35 = vpop.permute.xlu0 %2152  ;;  %v8483_v36 = vpop.f32.mrb[28].mxu0  ;;  %1745 = vrot.lane.b32.xlu1 %v2729_v34, %s6560_s30  ;;  %v8555_v34 = vld [vmem:[%s9481_s2] ss:$0 sm:$0xff] }
 0x3a7   :  { %2292 = vst.msk [vmem:[#allocation3 + $0x1a8] sm:$0xff] %vm2238_vm10, %v2153_v35  ;;  %v8487_v39 = vpop.f32.mrb[29].mxu0  ;;  %v3943_v58 = vadd.f32 %v8555_v34, %v8483_v36 }
 0x3a8   :  { %1362 = vrot.lane.b32.xlu0 %v2345_v32, %s6559_s29  ;;  %v3275_v40 = vpop.permute.xlu1 %3274  ;;  %v3938_v33 = vadd.f32 %v8555_v34, %v8487_v39 }
 0x3a9   :  { %3431 = vst.msk [vmem:[#allocation3 + $0x120] sm:$0xff] %vm3394_vm13, %v3275_v40  ;;  %v4145_v35 = vmax.f32 %v3943_v58, 0.0 }
 0x3aa   :  { %v2892_v42 = vpop.permute.xlu0 %2891  ;;  %2544 = vrot.lane.b32.xlu1 %v8255_v56, %s6562_s11 }
 0x3ab   :  { %3047 = vst.msk [vmem:[#allocation3 + $0x128] sm:$0xff] %vm3009_vm12, %v2892_v42 }
 0x3ac   :  { %2160 = vrot.lane.b32.xlu0 %v3129_v0, %s6561_s10  ;;  %v1385_v16 = vpop.permute.xlu1 %1384 }
 0x3ad   :  { %1523 = vst.msk [vmem:[#allocation3 + $0x1b0] sm:$0xff] %vm1468_vm8, %v1385_v16 }
 0x3ae   :  { %v1002_v47 = vpop.permute.xlu0 %1001  ;;  %3282 = vrot.lane.b32.xlu1 %v3114_v38, %s6564_s18 }
 0x3af   :  { %1139 = vst.msk [vmem:[#allocation3 + $0x1b8] sm:$0xff] %vm1083_vm7, %v1002_v47 }
 0x3b0   :  { %2899 = vrot.lane.b32.xlu0 %v2730_v46, %s6563_s12  ;;  %v2123_v3 = vpop.permute.xlu1 %2122  ;;  %v3495_v52 = vld [vmem:[#allocation3 + $0x120] sm:$0xff] }
 0x3b1   :  { %2277 = vst.msk [vmem:[#allocation3 + $0x130] sm:$0xff] %vm2238_vm10, %v2123_v3  ;;  %6342 = vmatprep.mubr.msk.f32.mxu0 %vm3534_vm14, %v3495_v52  ;;  %v4226_v3 = vsel %vm4180_vm15, %v4145_v35, -inf }
 0x3b2   :  { %v1740_v48 = vpop.permute.xlu0 %1739  ;;  %1392 = vrot.lane.b32.xlu1 %v8255_v56, %s6559_s29  ;;  %v3115_v56 = vld [vmem:[#allocation2 + $0x24a] sm:$0xff] }
 0x3b3   :  { %1893 = vst.msk [vmem:[#allocation3 + $0x138] sm:$0xff] %vm1853_vm9, %v1740_v48 }
 0x3b4   :  { %1009 = vrot.lane.b32.xlu0 %v3129_v0, %s6558_s28  ;;  %v2922_v15 = vpop.permute.xlu1 %2921 }
 0x3b5   :  { %3062 = vst.msk [vmem:[#allocation3 + $0x1a0] sm:$0xff] %vm3009_vm12, %v2922_v15 }
 0x3b6   :  { %v2539_v24 = vpop.permute.xlu0 %2538  ;;  %2130 = vrot.lane.b32.xlu1 %v3114_v38, %s6561_s10  ;;  %v4144_v38 = vmax.f32 %v3938_v33, 0.0 }
 0x3b7   :  { %2678 = vst.msk [vmem:[#allocation3 + $0x1a8] sm:$0xff] %vm2624_vm11, %v2539_v24 }
 0x3b8   :  { %1747 = vrot.lane.b32.xlu0 %v2730_v46, %s6560_s30  ;;  %v972_v53 = vpop.permute.xlu1 %971  ;;  %v4223_v15 = vsel %vm4180_vm15, %v4144_v38, -inf  ;;  %v2749_v38 = vld [vmem:[#allocation2 + $0x331] sm:$0xff] }
 0x3b9   :  { %1124 = vst.msk [vmem:[#allocation3 + $0x140] sm:$0xff] %vm1083_vm7, %v972_v53 }
 0x3ba   :  { %v3277_v49 = vpop.permute.xlu0 %3276  ;;  %2929 = vrot.lane.b32.xlu1 %v2745_v8, %s6563_s12 }
 0x3bb   :  { %3432 = vst.msk [vmem:[#allocation3 + $0x128] sm:$0xff] %vm3394_vm13, %v3277_v49  ;;  %v3117_v49 = vld [vmem:[#allocation2 + $0x262] sm:$0xff] }
 0x3bc   :  { %2546 = vrot.lane.b32.xlu0 %v8293_v37, %s6562_s11  ;;  %v1770_v44 = vpop.permute.xlu1 %1769 }
 0x3bd   :  { %1908 = vst.msk [vmem:[#allocation3 + $0x1b0] sm:$0xff] %vm1853_vm9, %v1770_v44 }
 0x3be   :  { %v1387_v41 = vpop.permute.xlu0 %1386  ;;  %1394 = vrot.lane.b32.xlu1 %v8293_v37, %s6559_s29  ;;  %v2746_v37 = vld [vmem:[#allocation2 + $0x309] sm:$0xff] }
 0x3bf   :  { %1524 = vst.msk [vmem:[#allocation3 + $0x1b8] sm:$0xff] %vm1468_vm8, %v1387_v41 }
 0x3c0   :  { %3284 = vrot.lane.b32.xlu0 %v3115_v56, %s6564_s18  ;;  %v2509_v50 = vpop.permute.xlu1 %2508  ;;  %v8518_v59 = vpop.f32.mrb[0].mxu1 }
 0x3c1   :  { %2663 = vst.msk [vmem:[#allocation3 + $0x130] sm:$0xff] %vm2624_vm11, %v2509_v50  ;;  %v8521_v1 = vpop.f32.mrb[1].mxu1 }
 0x3c2   :  { %v3496_v45 = vld [vmem:[#allocation3 + $0x128] sm:$0xff]  ;;  %v2125_v29 = vpop.permute.xlu0 %2124  ;;  %2132 = vrot.lane.b32.xlu1 %v3115_v56, %s6561_s10  ;;  %v2747_v56 = vld [vmem:[#allocation2 + $0x319] sm:$0xff] }
 0x3c3   :  { %6343 = vmatmul.mubr.msk.f32.gmra.mrb[36].mxu0 %vm3534_vm14, %v3496_v45  ;;  %2278 = vst.msk [vmem:[#allocation3 + $0x138] sm:$0xff] %vm2238_vm10, %v2125_v29  ;;  %v3132_v29 = vld [vmem:[#allocation2 + $0x31a] sm:$0xff] }
 0x3c4   :  { %1777 = vrot.lane.b32.xlu0 %v2745_v8, %s6560_s30  ;;  %v3307_v19 = vpop.permute.xlu1 %3306 }
 0x3c5   :  { %3447 = vst.msk [vmem:[#allocation3 + $0x1a0] sm:$0xff] %vm3394_vm13, %v3307_v19 }
 0x3c6   :  { %v2924_v12 = vpop.permute.xlu0 %2923  ;;  %2931 = vrot.lane.b32.xlu1 %v2746_v37, %s6563_s12 }
 0x3c7   :  { %3063 = vst.msk [vmem:[#allocation3 + $0x1a8] sm:$0xff] %vm3009_vm12, %v2924_v12 }
 0x3c8   :  { %2516 = vrot.lane.b32.xlu0 %v2346_v60, %s6562_s11  ;;  %v974_v62 = vpop.permute.xlu1 %973 }
 0x3c9   :  { %1125 = vst.msk [vmem:[#allocation3 + $0x148] sm:$0xff] %vm1083_vm7, %v974_v62 }
 0x3ca   :  { %v619_v51 = vpop.permute.xlu0 %618  ;;  %626 = vrot.lane.b32.xlu1 %v2745_v8, %s6557_s13 }
 0x3cb   :  { %755 = vst.msk [vmem:[#allocation3 + $0x1c0] sm:$0xff] %vm698_vm3, %v619_v51 }
 0x3cc   :  { %3314 = vrot.lane.b32.xlu0 %v3130_v61, %s6564_s18  ;;  %v1772_v55 = vpop.permute.xlu1 %1771  ;;  %v3511_v21 = vld [vmem:[#allocation3 + $0x1a0] sm:$0xff] }
 0x3cd   :  { %1909 = vst.msk [vmem:[#allocation3 + $0x1b8] sm:$0xff] %vm1853_vm9, %v1772_v55  ;;  %6366 = vmatprep.mubr.msk.f32.mxu1 %vm3534_vm14, %v3511_v21  ;;  %v3133_v55 = vld [vmem:[#allocation2 + $0x322] sm:$0xff] }
 0x3ce   :  { %v1357_v22 = vpop.permute.xlu0 %1356  ;;  %2162 = vrot.lane.b32.xlu1 %v3130_v61, %s6561_s10 }
 0x3cf   :  { %1509 = vst.msk [vmem:[#allocation3 + $0x140] sm:$0xff] %vm1468_vm8, %v1357_v22  ;;  %v4023_v22 = vadd.f32 %v8555_v34, %v8518_v59 }
 0x3d0   :  { %1779 = vrot.lane.b32.xlu0 %v2746_v37, %s6560_s30  ;;  %v2511_v54 = vpop.permute.xlu1 %2510 }
 0x3d1   :  { %2664 = vst.msk [vmem:[#allocation3 + $0x138] sm:$0xff] %vm2624_vm11, %v2511_v54 }
 0x3d2   :  { %v2155_v23 = vpop.permute.xlu0 %2154  ;;  %2901 = vrot.lane.b32.xlu1 %v2731_v43, %s6563_s12 }
 0x3d3   :  { %2293 = vst.msk [vmem:[#allocation3 + $0x1b0] sm:$0xff] %vm2238_vm10, %v2155_v23 }
 0x3d4   :  { %2518 = vrot.lane.b32.xlu0 %v2347_v28, %s6562_s11  ;;  %v3309_v31 = vpop.permute.xlu1 %3308  ;;  %v4018_v28 = vadd.f32 %v8555_v34, %v8521_v1 }
 0x3d5   :  { %3448 = vst.msk [vmem:[#allocation3 + $0x1a8] sm:$0xff] %vm3394_vm13, %v3309_v31 }
 0x3d6   :  { %v2894_v7 = vpop.permute.xlu0 %2893  ;;  %628 = vrot.lane.b32.xlu1 %v2746_v37, %s6557_s13  ;;  %v2748_v37 = vld [vmem:[#allocation2 + $0x321] sm:$0xff] }
 0x3d7   :  { %3048 = vst.msk [vmem:[#allocation3 + $0x130] sm:$0xff] %vm3009_vm12, %v2894_v7 }
 0x3d8   :  { %3316 = vrot.lane.b32.xlu0 %v3131_v20, %s6564_s18  ;;  %v1004_v10 = vpop.permute.xlu1 %1003 }
 0x3d9   :  { %1140 = vst.msk [vmem:[#allocation3 + $0x1c0] sm:$0xff] %vm1083_vm7, %v1004_v10 }
 0x3da   :  { %v621_v32 = vpop.permute.xlu0 %620  ;;  %2164 = vrot.lane.b32.xlu1 %v3131_v20, %s6561_s10 }
 0x3db   :  { %756 = vst.msk [vmem:[#allocation3 + $0x1c8] sm:$0xff] %vm698_vm3, %v621_v32  ;;  %v4160_v32 = vmax.f32 %v4018_v28, 0.0  ;;  %v3137_v28 = vld [vmem:[#allocation2 + $0x352] sm:$0xff] }
 0x3dc   :  { %1011 = vrot.lane.b32.xlu0 %v3130_v61, %s6558_s28  ;;  %v1742_v14 = vpop.permute.xlu1 %1741  ;;  %v3512_v0 = vld [vmem:[#allocation3 + $0x1a8] sm:$0xff] }
 0x3dd   :  { %1894 = vst.msk [vmem:[#allocation3 + $0x140] sm:$0xff] %vm1853_vm9, %v1742_v14  ;;  %6367 = vmatmul.mubr.msk.f32.gmra.mrb[8].mxu1 %vm3534_vm14, %v3512_v0  ;;  %v2364_v14 = vld [vmem:[#allocation2 + $0x330] sm:$0xff] }
 0x3de   :  { %v1359_v6 = vpop.permute.xlu0 %1358  ;;  %2903 = vrot.lane.b32.xlu1 %v2732_v5, %s6563_s12 }
 0x3df   :  { %1510 = vst.msk [vmem:[#allocation3 + $0x148] sm:$0xff] %vm1468_vm8, %v1359_v6 }
 0x3e0   :  { %2548 = vrot.lane.b32.xlu0 %v8350_v11, %s6562_s11  ;;  %v2541_v4 = vpop.permute.xlu1 %2540 }
 0x3e1   :  { %2679 = vst.msk [vmem:[#allocation3 + $0x1b0] sm:$0xff] %vm2624_vm11, %v2541_v4  ;;  %v4247_v4 = vsel %vm4180_vm15, %v4160_v32, -inf  ;;  %v4489_v32 = vld [vmem:[#allocation5 + $0x11] sm:$0xff] }
 0x3e2   :  { %v6335_v57 = vpop.f32.mrb[30].mxu0  ;;  %v2157_v36 = vpop.permute.xlu0 %2156  ;;  %1013 = vrot.lane.b32.xlu1 %v3131_v20, %s6558_s28  ;;  %v4161_v20 = vmax.f32 %v4023_v22, 0.0  ;;  %v2751_v22 = vld [vmem:[#allocation2 + $0x349] sm:$0xff] }
 0x3e3   :  { %v3953_v40 = vadd.f32 %v8555_v34, %v6335_v57  ;;  %v3947_v42 = vpop.f32.mrb[31].mxu0  ;;  %2294 = vst.msk [vmem:[#allocation3 + $0x1b8] sm:$0xff] %vm2238_vm10, %v2157_v36 }
 0x3e4   :  { %v3948_v39 = vadd.f32 %v8555_v34, %v3947_v42  ;;  %3286 = vrot.lane.b32.xlu0 %v3116_v63, %s6564_s18  ;;  %v3279_v47 = vpop.permute.xlu1 %3278  ;;  %v4250_v6 = vsel %vm4180_vm15, %v4161_v20, -inf }
 0x3e5   :  { %v4147_v46 = vmax.f32 %v3953_v40, 0.0  ;;  %3433 = vst.msk [vmem:[#allocation3 + $0x130] sm:$0xff] %vm3394_vm13, %v3279_v47 }
 0x3e6   :  { %v4146_v16 = vmax.f32 %v3948_v39, 0.0  ;;  %v2896_v52 = vpop.permute.xlu0 %2895  ;;  %2550 = vrot.lane.b32.xlu1 %v8370_v25, %s6562_s11 }
 0x3e7   :  { %v4227_v48 = vsel %vm4180_vm15, %v4147_v46, -inf  ;;  %3049 = vst.msk [vmem:[#allocation3 + $0x138] sm:$0xff] %vm3009_vm12, %v2896_v52 }
 0x3e8   :  { %v4228_v24 = vmax.f32 %v4226_v3, %v4227_v48  ;;  %v4224_v8 = vsel %vm4180_vm15, %v4146_v16, -inf  ;;  %1396 = vrot.lane.b32.xlu0 %v8350_v11, %s6559_s29  ;;  %v1389_v44 = vpop.permute.xlu1 %1388  ;;  %v2365_v16 = vld [vmem:[#allocation2 + $0x338] sm:$0xff] }
 0x3e9   :  { %v4225_v53 = vmax.f32 %v4223_v15, %v4224_v8  ;;  %1525 = vst.msk [vmem:[#allocation3 + $0x1c0] sm:$0xff] %vm1468_vm8, %v1389_v44  ;;  %v3134_v8 = vld [vmem:[#allocation2 + $0x332] sm:$0xff] }
 0x3ea   :  { %4292 = vst.msk [vmem:[#allocation4 + $0x78] sm:$0xff] %vm4180_vm15, %v4228_v24  ;;  %v1006_v41 = vpop.permute.xlu0 %1005  ;;  %3288 = vrot.lane.b32.xlu1 %v3117_v49, %s6564_s18  ;;  %v2750_v49 = vld [vmem:[#allocation2 + $0x339] sm:$0xff] }
 0x3eb   :  { %4291 = vst.msk [vmem:[#allocation4 + $0x70] sm:$0xff] %vm4180_vm15, %v4225_v53 }
 0x3ec   :  { %1141 = vst.msk [vmem:[#allocation3 + $0x1c8] sm:$0xff] %vm1083_vm7, %v1006_v41  ;;  %2933 = vrot.lane.b32.xlu0 %v2747_v56, %s6563_s12  ;;  %v2127_v50 = vpop.permute.xlu1 %2126  ;;  %v3497_v45 = vld [vmem:[#allocation3 + $0x130] sm:$0xff] }
 0x3ed   :  { %2279 = vst.msk [vmem:[#allocation3 + $0x140] sm:$0xff] %vm2238_vm10, %v2127_v50  ;;  %6345 = vmatprep.mubr.msk.f32.mxu0 %vm3534_vm14, %v3497_v45  ;;  %v1981_v45 = vld [vmem:[#allocation2 + $0x33a] sm:$0xff] }
 0x3ee   :  { %v1744_v11 = vpop.permute.xlu0 %1743  ;;  %1781 = vrot.lane.b32.xlu1 %v2747_v56, %s6560_s30 }
 0x3ef   :  { %1895 = vst.msk [vmem:[#allocation3 + $0x148] sm:$0xff] %vm1853_vm9, %v1744_v11 }
 0x3f0   :  { %1398 = vrot.lane.b32.xlu0 %v8370_v25, %s6559_s29  ;;  %v2926_v12 = vpop.permute.xlu1 %2925 }
 0x3f1   :  { %3064 = vst.msk [vmem:[#allocation3 + $0x1b0] sm:$0xff] %vm3009_vm12, %v2926_v12 }
 0x3f2   :  { %v4323_v60 = vld [vmem:[#allocation4 + $0x70] ss:$2 sm:$0xff]  ;;  %v4355_v19 = vld [vmem:[#allocation4 + $0x71] ss:$2 sm:$0xff]  ;;  %v2543_v61 = vpop.permute.xlu0 %2542  ;;  %3318 = vrot.lane.b32.xlu1 %v3132_v29, %s6564_s18 }
 0x3f3   :  { %v4379_v62 = vmax.f32 %v4323_v60, %v4355_v19  ;;  %2680 = vst.msk [vmem:[#allocation3 + $0x1b8] sm:$0xff] %vm2624_vm11, %v2543_v61  ;;  %v2367_v60 = vld [vmem:[#allocation2 + $0x350] sm:$0xff]  ;;  %v4456_v19 = vld [vmem:[#allocation5] sm:$0xff]  ;;  %v2366_v61 = vld [vmem:[#allocation2 + $0x348] sm:$0xff] }
 0x3f4   :  { %2935 = vrot.lane.b32.xlu0 %v2748_v37, %s6563_s12  ;;  %v976_v51 = vpop.permute.xlu1 %975  ;;  %4472 = vst.msk [vmem:[#allocation6] sm:$0xff] %vm4180_vm15, %v4456_v19  ;;  %v5287_v19 = vld [vmem:[%s9482_s3 + $0x30] sm:$0xff] }
 0x3f5   :  { %4447 = vst.msk [vmem:[#allocation5 + $0x81] sm:$0xff] %vm4180_vm15, %v4379_v62 }
 0x3f6   :  { %1126 = vst.msk [vmem:[#allocation3 + $0x150] sm:$0xff] %vm1083_vm7, %v976_v51  ;;  %v3281_v25 = vpop.permute.xlu0 %3280  ;;  %1783 = vrot.lane.b32.xlu1 %v2748_v37, %s6560_s30 }
 0x3f7   :  { %3434 = vst.msk [vmem:[#allocation3 + $0x138] sm:$0xff] %vm3394_vm13, %v3281_v25 }
 0x3f8   :  { %630 = vrot.lane.b32.xlu0 %v2747_v56, %s6557_s13  ;;  %v1774_v21 = vpop.permute.xlu1 %1773 }
 0x3f9   :  { %1910 = vst.msk [vmem:[#allocation3 + $0x1c0] sm:$0xff] %vm1853_vm9, %v1774_v21 }
 0x3fa   :  { %v1391_v43 = vpop.permute.xlu0 %1390  ;;  %3320 = vrot.lane.b32.xlu1 %v3133_v55, %s6564_s18 }
 0x3fb   :  { %1526 = vst.msk [vmem:[#allocation3 + $0x1c8] sm:$0xff] %vm1468_vm8, %v1391_v43 }
 0x3fc   :  { %2166 = vrot.lane.b32.xlu0 %v3132_v29, %s6561_s10  ;;  %v2513_v54 = vpop.permute.xlu1 %2512  ;;  %v6359_v23 = vpop.f32.mrb[2].mxu1 }
 0x3fd   :  { %2665 = vst.msk [vmem:[#allocation3 + $0x140] sm:$0xff] %vm2624_vm11, %v2513_v54  ;;  %v4033_v31 = vadd.f32 %v8555_v34, %v6359_v23  ;;  %v4027_v10 = vpop.f32.mrb[3].mxu1  ;;  %v3136_v23 = vld [vmem:[#allocation2 + $0x34a] sm:$0xff] }
 0x3fe   :  { %v2129_v59 = vpop.permute.xlu0 %2128  ;;  %v3498_v7 = vld [vmem:[#allocation3 + $0x138] sm:$0xff]  ;;  %v4028_v1 = vadd.f32 %v8555_v34, %v4027_v10  ;;  %1015 = vrot.lane.b32.xlu1 %v3132_v29, %s6558_s28 }
 0x3ff   :  { %2280 = vst.msk [vmem:[#allocation3 + $0x148] sm:$0xff] %vm2238_vm10, %v2129_v59  ;;  %6346 = vmatmul.mubr.msk.f32.gmra.mrb[38].mxu0 %vm3534_vm14, %v3498_v7  ;;  %v4163_v5 = vmax.f32 %v4033_v31, 0.0  ;;  %v4488_v7 = vld [vmem:[#allocation5 + $0x1] sm:$0xff] }
 0x400   :  { %632 = vrot.lane.b32.xlu0 %v2748_v37, %s6557_s13  ;;  %v4162_v0 = vmax.f32 %v4028_v1, 0.0  ;;  %v3311_v58 = vpop.permute.xlu1 %3310  ;;  %s6566_s13 = smov 8  }
 0x401   :  { %v4251_v33 = vsel %vm4180_vm15, %v4163_v5, -inf  ;;  %3449 = vst.msk [vmem:[#allocation3 + $0x1b0] sm:$0xff] %vm3394_vm13, %v3311_v58  ;;  %v4585_v5 = vld [vmem:[#allocation5 + $0x2] sm:$0xff] }
 0x402   :  { %v2928_v63 = vpop.permute.xlu0 %2927  ;;  %v4252_v57 = vmax.f32 %v4250_v6, %v4251_v33  ;;  %v4248_v35 = vsel %vm4180_vm15, %v4162_v0, -inf  ;;  %2552 = vrot.lane.b32.xlu1 %v2364_v14, %s6562_s11  ;;  %v4586_v0 = vld [vmem:[#allocation5 + $0x12] sm:$0xff] }
 0x403   :  { %3065 = vst.msk [vmem:[#allocation3 + $0x1b8] sm:$0xff] %vm3009_vm12, %v2928_v63  ;;  %v4249_v36 = vmax.f32 %v4247_v4, %v4248_v35  ;;  %v4490_v4 = vld [vmem:[#allocation5 + $0x21] sm:$0xff] }
 0x404   :  { %2168 = vrot.lane.b32.xlu0 %v3133_v55, %s6561_s10  ;;  %4300 = vst.msk [vmem:[#allocation4 + $0xb8] sm:$0xff] %vm4180_vm15, %v4252_v57  ;;  %v978_v40 = vpop.permute.xlu1 %977 }
 0x405   :  { %4299 = vst.msk [vmem:[#allocation4 + $0xb0] sm:$0xff] %vm4180_vm15, %v4249_v36 }
 0x406   :  { %1127 = vst.msk [vmem:[#allocation3 + $0x158] sm:$0xff] %vm1083_vm7, %v978_v40  ;;  %v623_v42 = vpop.permute.xlu0 %622  ;;  %1400 = vrot.lane.b32.xlu1 %v2364_v14, %s6559_s29 }
 0x407   :  { %757 = vst.msk [vmem:[#allocation3 + $0x1d0] sm:$0xff] %vm698_vm3, %v623_v42 }
 0x408   :  { %1017 = vrot.lane.b32.xlu0 %v3133_v55, %s6558_s28  ;;  %v1776_v39 = vpop.permute.xlu1 %1775  ;;  %v3513_v46 = vld [vmem:[#allocation3 + $0x1b0] sm:$0xff]  ;;  %s6567_s28 = smov 16  }
 0x409   :  { %1911 = vst.msk [vmem:[#allocation3 + $0x1c8] sm:$0xff] %vm1853_vm9, %v1776_v39  ;;  %6369 = vmatprep.mubr.msk.f32.mxu1 %vm3534_vm14, %v3513_v46  ;;  %v2752_v55 = vld [vmem:[#allocation2 + $0x351] sm:$0xff]  ;;  %v4587_v39 = vld [vmem:[#allocation5 + $0x22] sm:$0xff] }
 0x40a   :  { %v1361_v47 = vpop.permute.xlu0 %1360  ;;  %2937 = vrot.lane.b32.xlu1 %v2749_v38, %s6563_s12  ;;  %v4491_v46 = vld [vmem:[#allocation5 + $0x31] sm:$0xff] }
 0x40b   :  { %1511 = vst.msk [vmem:[#allocation3 + $0x150] sm:$0xff] %vm1468_vm8, %v1361_v47 }
 0x40c   :  { %2554 = vrot.lane.b32.xlu0 %v2365_v16, %s6562_s11  ;;  %v4331_v3 = vld [vmem:[#allocation4 + $0xb0] ss:$2 sm:$0xff]  ;;  %v4363_v48 = vld [vmem:[#allocation4 + $0xb1] ss:$2 sm:$0xff]  ;;  %v2515_v52 = vpop.permute.xlu1 %2514 }
 0x40d   :  { %2666 = vst.msk [vmem:[#allocation3 + $0x148] sm:$0xff] %vm2624_vm11, %v2515_v52  ;;  %v4383_v24 = vmax.f32 %v4331_v3, %v4363_v48  ;;  %v5281_v3 = vld [vmem:[%s9482_s3] sm:$0xff]  ;;  %v5282_v48 = vld [vmem:[%s9482_s3 + $0x8] sm:$0xff] }
 0x40e   :  { %v2159_v15 = vpop.permute.xlu0 %2158  ;;  %1785 = vrot.lane.b32.xlu1 %v2749_v38, %s6560_s30  ;;  %v6447_v52 = vpack.c.bf16 %v5282_v48, %v5281_v3  ;;  %v4590_v3 = vld [vmem:[#allocation5 + $0x52] sm:$0xff] }
 0x40f   :  { %2295 = vst.msk [vmem:[#allocation3 + $0x1c0] sm:$0xff] %vm2238_vm10, %v2159_v15 }
 0x410   :  { %1402 = vrot.lane.b32.xlu0 %v2365_v16, %s6559_s29  ;;  %4451 = vst.msk [vmem:[#allocation5 + $0xe1] sm:$0xff] %vm4180_vm15, %v4383_v24  ;;  %v3313_v53 = vpop.permute.xlu1 %3312  ;;  %s6568_s29 = smov 32   ;;  %6448 = vmatprep.subr.bf16.mxu1 %v6447_v52 }
 0x411   :  { %3450 = vst.msk [vmem:[#allocation3 + $0x1b8] sm:$0xff] %vm3394_vm13, %v3313_v53  ;;  %6450 = vmatpush3.bf16.msra.mxu1 %v6447_v52  ;;  %v5283_v53 = vld [vmem:[%s9482_s3 + $0x10] sm:$0xff] }
 0x412   :  { %v2898_v56 = vpop.permute.xlu0 %2897  ;;  %3322 = vrot.lane.b32.xlu1 %v3134_v8, %s6564_s18 }
 0x413   :  { %3050 = vst.msk [vmem:[#allocation3 + $0x140] sm:$0xff] %vm3009_vm12, %v2898_v56 }
 0x414   :  { %2939 = vrot.lane.b32.xlu0 %v2750_v49, %s6563_s12  ;;  %v1008_v44 = vpop.permute.xlu1 %1007 }
 0x415   :  { %1142 = vst.msk [vmem:[#allocation3 + $0x1d0] sm:$0xff] %vm1083_vm7, %v1008_v44 }
 0x416   :  { %v625_v41 = vpop.permute.xlu0 %624  ;;  %2170 = vrot.lane.b32.xlu1 %v3134_v8, %s6561_s10 }
 0x417   :  { %758 = vst.msk [vmem:[#allocation3 + $0x1d8] sm:$0xff] %vm698_vm3, %v625_v41  ;;  %v8650_v50 = vld [vmem:[#allocation5 + $0xe0] sm:$0xff] }
 0x418   :  { %1787 = vrot.lane.b32.xlu0 %v2750_v49, %s6560_s30  ;;  %4484 = vst.msk [vmem:[#allocation6 + $0x60] sm:$0xff] %vm4180_vm15, %v8650_v50  ;;  %v1746_v11 = vpop.permute.xlu1 %1745  ;;  %v3514_v29 = vld [vmem:[#allocation3 + $0x1b8] sm:$0xff]  ;;  %s6569_s30 = smov 40  }
 0x419   :  { %1896 = vst.msk [vmem:[#allocation3 + $0x150] sm:$0xff] %vm1853_vm9, %v1746_v11  ;;  %6370 = vmatmul.mubr.msk.f32.gmra.mrb[10].mxu1 %vm3534_vm14, %v3514_v29  ;;  %v5284_v49 = vld [vmem:[%s9482_s3 + $0x18] sm:$0xff]  ;;  %v5286_v11 = vld [vmem:[%s9482_s3 + $0x28] sm:$0xff] }
 0x41a   :  { %v1363_v37 = vpop.permute.xlu0 %1362  ;;  %2172 = vrot.lane.b32.xlu1 %v1981_v45, %s6561_s10  ;;  %v6451_v56 = vpack.c.bf16 %v5284_v49, %v5283_v53  ;;  %s6572_s10 = smov 64  }
 0x41b   :  { %1512 = vst.msk [vmem:[#allocation3 + $0x158] sm:$0xff] %vm1468_vm8, %v1363_v37 }
 0x41c   :  { %3324 = vrot.lane.b32.xlu0 %v1981_v45, %s6564_s18  ;;  %v2545_v12 = vpop.permute.xlu1 %2544  ;;  %6452 = vmatprep.subr.bf16.mxu1 %v6451_v56  ;;  %v5285_v45 = vld [vmem:[%s9482_s3 + $0x20] sm:$0xff] }
 0x41d   :  { %2681 = vst.msk [vmem:[#allocation3 + $0x1c0] sm:$0xff] %vm2624_vm11, %v2545_v12  ;;  %6454 = vmatpush3.bf16.msra.mxu1 %v6451_v56  ;;  %v6455_v29 = vpack.c.bf16 %v5286_v11, %v5285_v45  ;;  %v5288_v12 = vld [vmem:[%s9482_s3 + $0x38] sm:$0xff] }
 0x41e   :  { %v8660_v62 = vpop.f32.mrb[32].mxu0  ;;  %v2161_v51 = vpop.permute.xlu0 %2160  ;;  %2558 = vrot.lane.b32.xlu1 %v2367_v60, %s6562_s11 }
 0x41f   :  { %v8664_v25 = vpop.f32.mrb[33].mxu0  ;;  %2296 = vst.msk [vmem:[#allocation3 + $0x1c8] sm:$0xff] %vm2238_vm10, %v2161_v51  ;;  %6456 = vmatprep.subr.bf16.mxu1 %v6455_v29 }
 0x420   :  { %2556 = vrot.lane.b32.xlu0 %v2366_v61, %s6562_s11  ;;  %v3283_v21 = vpop.permute.xlu1 %3282  ;;  %v6459_v61 = vpack.c.bf16 %v5288_v12, %v5287_v19  ;;  %v4494_v19 = vld [vmem:[#allocation5 + $0x61] sm:$0xff] }
 0x421   :  { %3435 = vst.msk [vmem:[#allocation3 + $0x140] sm:$0xff] %vm3394_vm13, %v3283_v21  ;;  %6458 = vmatpush3.bf16.msra.mxu1 %v6455_v29  ;;  %v5289_v21 = vld [vmem:[%s9482_s3 + $0x40] sm:$0xff] }
 0x422   :  { %v2900_v43 = vpop.permute.xlu0 %2899  ;;  %2943 = vrot.lane.b32.xlu1 %v2752_v55, %s6563_s12  ;;  %6460 = vmatprep.subr.bf16.mxu1 %v6459_v61 }
 0x423   :  { %3051 = vst.msk [vmem:[#allocation3 + $0x148] sm:$0xff] %vm3009_vm12, %v2900_v43  ;;  %v3963_v43 = vadd.f32 %v8555_v34, %v8660_v62 }
 0x424   :  { %2941 = vrot.lane.b32.xlu0 %v2751_v22, %s6563_s12  ;;  %v1393_v54 = vpop.permute.xlu1 %1392 }
 0x425   :  { %1527 = vst.msk [vmem:[#allocation3 + $0x1d0] sm:$0xff] %vm1468_vm8, %v1393_v54  ;;  %6462 = vmatpush3.bf16.msra.mxu1 %v6459_v61  ;;  %v4492_v54 = vld [vmem:[#allocation5 + $0x41] sm:$0xff] }
 0x426   :  { %v1010_v20 = vpop.permute.xlu0 %1009  ;;  %3328 = vrot.lane.b32.xlu1 %v3137_v28, %s6564_s18  ;;  %6400 = vmatprep.subr.mxu1 %v5289_v21 }
 0x427   :  { %1143 = vst.msk [vmem:[#allocation3 + $0x1d8] sm:$0xff] %vm1083_vm7, %v1010_v20 }
 0x428   :  { %3326 = vrot.lane.b32.xlu0 %v3136_v23, %s6564_s18  ;;  %v2131_v31 = vpop.permute.xlu1 %2130  ;;  %v3499_v59 = vld [vmem:[#allocation3 + $0x140] sm:$0xff]  ;;  %v3958_v23 = vadd.f32 %v8555_v34, %v8664_v25 }
 0x429   :  { %2281 = vst.msk [vmem:[#allocation3 + $0x150] sm:$0xff] %vm2238_vm10, %v2131_v31  ;;  %6348 = vmatprep.mubr.msk.f32.mxu0 %vm3534_vm14, %v3499_v59  ;;  %6401 = vmatpush3.msra.mxu1 %v5289_v21  ;;  %v4149_v59 = vmax.f32 %v3963_v43, 0.0 }
 0x42a   :  { %v1748_v10 = vpop.permute.xlu0 %1747  ;;  %4522 = vrot.lane.b32.xlu1 %v4489_v32, %s6566_s13 }
 0x42b   :  { %1897 = vst.msk [vmem:[#allocation3 + $0x158] sm:$0xff] %vm1853_vm9, %v1748_v10 }
 0x42c   :  { %4520 = vrot.lane.b32.xlu0 %v4488_v7, %s6566_s13  ;;  %v2930_v1 = vpop.permute.xlu1 %2929 }
 0x42d   :  { %3066 = vst.msk [vmem:[#allocation3 + $0x1c0] sm:$0xff] %vm3009_vm12, %v2930_v1 }
 0x42e   :  { %v2547_v14 = vpop.permute.xlu0 %2546  ;;  %4619 = vrot.lane.b32.xlu1 %v4586_v0, %s6567_s28 }
 0x42f   :  { %2682 = vst.msk [vmem:[#allocation3 + $0x1c8] sm:$0xff] %vm2624_vm11, %v2547_v14 }
 0x430   :  { %4617 = vrot.lane.b32.xlu0 %v4585_v5, %s6567_s28  ;;  %v1395_v58 = vpop.permute.xlu1 %1394 }
 0x431   :  { %1528 = vst.msk [vmem:[#allocation3 + $0x1d8] sm:$0xff] %vm1468_vm8, %v1395_v58 }
 0x432   :  { %v3285_v6 = vpop.permute.xlu0 %3284  ;;  %4716 = vrot.lane.b32.xlu1 %v7920_v26, %s6564_s18 }
 0x433   :  { %3436 = vst.msk [vmem:[#allocation3 + $0x148] sm:$0xff] %vm3394_vm13, %v3285_v6 }
 0x434   :  { %4714 = vrot.lane.b32.xlu0 %v7825_v30, %s6564_s18  ;;  %v2133_v33 = vpop.permute.xlu1 %2132 }
 0x435   :  { %2282 = vst.msk [vmem:[#allocation3 + $0x158] sm:$0xff] %vm2238_vm10, %v2133_v33  ;;  %v4589_v33 = vld [vmem:[#allocation5 + $0x42] sm:$0xff] }
 0x436   :  { %v1778_v63 = vpop.permute.xlu0 %1777  ;;  %4524 = vrot.lane.b32.xlu1 %v4490_v4, %s6566_s13 }
 0x437   :  { %1912 = vst.msk [vmem:[#allocation3 + $0x1d0] sm:$0xff] %vm1853_vm9, %v1778_v63 }
 0x438   :  { %4811 = vrot.lane.b32.xlu0 %v4489_v32, %s6568_s29  ;;  %v2932_v57 = vpop.permute.xlu1 %2931  ;;  %v8696_v35 = vpop.f32.mrb[4].mxu1  ;;  %v4148_v32 = vmax.f32 %v3958_v23, 0.0 }
 0x439   :  { %3067 = vst.msk [vmem:[#allocation3 + $0x1c8] sm:$0xff] %vm3009_vm12, %v2932_v57  ;;  %v8699_v40 = vpop.f32.mrb[5].mxu1 }
 0x43a   :  { %v2517_v36 = vpop.permute.xlu0 %2516  ;;  %v3500_v30 = vld [vmem:[#allocation3 + $0x148] sm:$0xff]  ;;  %4908 = vrot.lane.b32.xlu1 %v4586_v0, %s6569_s30  ;;  %v4232_v0 = vsel %vm4180_vm15, %v4149_v59, -inf }
 0x43b   :  { %2667 = vst.msk [vmem:[#allocation3 + $0x150] sm:$0xff] %vm2624_vm11, %v2517_v36  ;;  %6349 = vmatmul.mubr.msk.f32.gmra.mrb[40].mxu0 %vm3534_vm14, %v3500_v30  ;;  %v4493_v30 = vld [vmem:[#allocation5 + $0x51] sm:$0xff]  ;;  %v4591_v59 = vld [vmem:[#allocation5 + $0x62] sm:$0xff] }
 0x43c   :  { %4813 = vrot.lane.b32.xlu0 %v4490_v4, %s6568_s29  ;;  %v627_v42 = vpop.permute.xlu1 %626 }
 0x43d   :  { %759 = vst.msk [vmem:[#allocation3 + $0x1e0] sm:$0xff] %vm698_vm3, %v627_v42 }
 0x43e   :  { %v3315_v38 = vpop.permute.xlu0 %3314  ;;  %4621 = vrot.lane.b32.xlu1 %v4587_v39, %s6567_s28 }
 0x43f   :  { %3451 = vst.msk [vmem:[#allocation3 + $0x1c0] sm:$0xff] %vm3394_vm13, %v3315_v38 }
 0x440   :  { %4526 = vrot.lane.b32.xlu0 %v4491_v46, %s6566_s13  ;;  %v2163_v16 = vpop.permute.xlu1 %2162 }
 0x441   :  { %2297 = vst.msk [vmem:[#allocation3 + $0x1d0] sm:$0xff] %vm2238_vm10, %v2163_v16 }
 0x442   :  { %v1780_v47 = vpop.permute.xlu0 %1779  ;;  %5006 = vrot.lane.b32.xlu1 %v7920_v26, %s6570_s21  ;;  %v4588_v26 = vld [vmem:[#allocation5 + $0x32] sm:$0xff] }
 0x443   :  { %1913 = vst.msk [vmem:[#allocation3 + $0x1d8] sm:$0xff] %vm1853_vm9, %v1780_v47 }
 0x444   :  { %4910 = vrot.lane.b32.xlu0 %v4587_v39, %s6569_s30  ;;  %v2902_v15 = vpop.permute.xlu1 %2901 }
 0x445   :  { %3052 = vst.msk [vmem:[#allocation3 + $0x150] sm:$0xff] %vm3009_vm12, %v2902_v15 }
 0x446   :  { %v2519_v24 = vpop.permute.xlu0 %2518  ;;  %v3515_v8 = vld [vmem:[#allocation3 + $0x1c0] sm:$0xff]  ;;  %4718 = vrot.lane.b32.xlu1 %v8015_v18, %s6564_s18 }
 0x447   :  { %2668 = vst.msk [vmem:[#allocation3 + $0x158] sm:$0xff] %vm2624_vm11, %v2519_v24  ;;  %6372 = vmatprep.mubr.msk.f32.mxu1 %vm3534_vm14, %v3515_v8 }
 0x448   :  { %4623 = vrot.lane.b32.xlu0 %v4588_v26, %s6567_s28  ;;  %v629_v44 = vpop.permute.xlu1 %628 }
 0x449   :  { %760 = vst.msk [vmem:[#allocation3 + $0x1e8] sm:$0xff] %vm698_vm3, %v629_v44  ;;  %v4038_v44 = vadd.f32 %v8555_v34, %v8699_v40 }
 0x44a   :  { %v3317_v41 = vpop.permute.xlu0 %3316  ;;  %5103 = vrot.lane.b32.xlu1 %v4490_v4, %s6571_s15  ;;  %v4229_v4 = vsel %vm4180_vm15, %v4148_v32, -inf }
 0x44b   :  { %3452 = vst.msk [vmem:[#allocation3 + $0x1c8] sm:$0xff] %vm3394_vm13, %v3317_v41  ;;  %v4164_v12 = vmax.f32 %v4038_v44, 0.0 }
 0x44c   :  { %5008 = vrot.lane.b32.xlu0 %v8015_v18, %s6570_s21  ;;  %v2165_v37 = vpop.permute.xlu1 %2164 }
 0x44d   :  { %2298 = vst.msk [vmem:[#allocation3 + $0x1d8] sm:$0xff] %vm2238_vm10, %v2165_v37 }
 0x44e   :  { %v1012_v60 = vpop.permute.xlu0 %1011  ;;  %4815 = vrot.lane.b32.xlu1 %v4491_v46, %s6568_s29 }
 0x44f   :  { %1144 = vst.msk [vmem:[#allocation3 + $0x1e0] sm:$0xff] %vm1083_vm7, %v1012_v60 }
 0x450   :  { %4720 = vrot.lane.b32.xlu0 %v8108_v27, %s6564_s18  ;;  %v2904_v18 = vpop.permute.xlu1 %2903 }
 0x451   :  { %3053 = vst.msk [vmem:[#allocation3 + $0x158] sm:$0xff] %vm3009_vm12, %v2904_v18 }
 0x452   :  { %v2549_v51 = vpop.permute.xlu0 %2548  ;;  %v3516_v55 = vld [vmem:[#allocation3 + $0x1c8] sm:$0xff]  ;;  %5200 = vrot.lane.b32.xlu1 %v4587_v39, %s6572_s10 }
 0x453   :  { %2683 = vst.msk [vmem:[#allocation3 + $0x1d0] sm:$0xff] %vm2624_vm11, %v2549_v51  ;;  %6373 = vmatmul.mubr.msk.f32.gmra.mrb[12].mxu1 %vm3534_vm14, %v3516_v55 }
 0x454   :  { %5105 = vrot.lane.b32.xlu0 %v4491_v46, %s6571_s15  ;;  %v1014_v22 = vpop.permute.xlu1 %1013 }
 0x455   :  { %1145 = vst.msk [vmem:[#allocation3 + $0x1e8] sm:$0xff] %vm1083_vm7, %v1014_v22 }
 0x456   :  { %v3287_v28 = vpop.permute.xlu0 %3286  ;;  %4817 = vrot.lane.b32.xlu1 %v4492_v54, %s6568_s29 }
 0x457   :  { %3437 = vst.msk [vmem:[#allocation3 + $0x150] sm:$0xff] %vm3394_vm13, %v3287_v28  ;;  %v4253_v28 = vsel %vm4180_vm15, %v4164_v12, -inf }
 0x458   :  { %4528 = vrot.lane.b32.xlu0 %v4492_v54, %s6566_s13  ;;  %v2551_v20 = vpop.permute.xlu1 %2550 }
 0x459   :  { %2684 = vst.msk [vmem:[#allocation3 + $0x1d8] sm:$0xff] %vm2624_vm11, %v2551_v20 }
 0x45a   :  { %v6341_v31 = vpop.f32.mrb[34].mxu0  ;;  %v1397_v62 = vpop.permute.xlu0 %1396  ;;  %5202 = vrot.lane.b32.xlu1 %v4588_v26, %s6572_s10 }
 0x45b   :  { %v3973_v7 = vadd.f32 %v8555_v34, %v6341_v31  ;;  %v3967_v10 = vpop.f32.mrb[35].mxu0  ;;  %1529 = vst.msk [vmem:[#allocation3 + $0x1e0] sm:$0xff] %vm1468_vm8, %v1397_v62  ;;  %v4495_v62 = vld [vmem:[#allocation5 + $0x71] sm:$0xff] }
 0x45c   :  { %v3968_v25 = vadd.f32 %v8555_v34, %v3967_v10  ;;  %4912 = vrot.lane.b32.xlu0 %v4588_v26, %s6569_s30  ;;  %v3289_v14 = vpop.permute.xlu1 %3288 }
 0x45d   :  { %v4151_v1 = vmax.f32 %v3973_v7, 0.0  ;;  %3438 = vst.msk [vmem:[#allocation3 + $0x158] sm:$0xff] %vm3394_vm13, %v3289_v14 }
 0x45e   :  { %v4150_v5 = vmax.f32 %v3968_v25, 0.0  ;;  %v2934_v6 = vpop.permute.xlu0 %2933  ;;  %v3501_v63 = vld [vmem:[#allocation3 + $0x150] sm:$0xff]  ;;  %4625 = vrot.lane.b32.xlu1 %v4589_v33, %s6567_s28 }
 0x45f   :  { %v4233_v58 = vsel %vm4180_vm15, %v4151_v1, -inf  ;;  %3068 = vst.msk [vmem:[#allocation3 + $0x1d0] sm:$0xff] %vm3009_vm12, %v2934_v6  ;;  %6351 = vmatprep.mubr.msk.f32.mxu0 %vm3534_vm14, %v3501_v63 }
 0x460   :  { %v4234_v57 = vmax.f32 %v4232_v0, %v4233_v58  ;;  %v4230_v36 = vsel %vm4180_vm15, %v4150_v5, -inf  ;;  %4530 = vrot.lane.b32.xlu0 %v4493_v30, %s6566_s13  ;;  %v1782_v38 = vpop.permute.xlu1 %1781  ;;  %v4592_v0 = vld [vmem:[#allocation5 + $0x72] sm:$0xff]  ;;  %v4464_v58 = vld [vmem:[#allocation5 + $0xa0] sm:$0xff] }
 0x461   :  { %v4231_v42 = vmax.f32 %v4229_v4, %v4230_v36  ;;  %1914 = vst.msk [vmem:[#allocation3 + $0x1e0] sm:$0xff] %vm1853_vm9, %v1782_v38  ;;  %v4496_v38 = vld [vmem:[#allocation5 + $0xa1] sm:$0xff] }
 0x462   :  { %4294 = vst.msk [vmem:[#allocation4 + $0x88] sm:$0xff] %vm4180_vm15, %v4234_v57  ;;  %v1399_v39 = vpop.permute.xlu0 %1398  ;;  %5010 = vrot.lane.b32.xlu1 %v8108_v27, %s6570_s21  ;;  %4480 = vst.msk [vmem:[#allocation6 + $0x40] sm:$0xff] %vm4180_vm15, %v4464_v58  ;;  %v4689_v57 = vld [vmem:[#allocation5 + $0x80] sm:$0xff] }
 0x463   :  { %4293 = vst.msk [vmem:[#allocation4 + $0x80] sm:$0xff] %vm4180_vm15, %v4231_v42 }
 0x464   :  { %1530 = vst.msk [vmem:[#allocation3 + $0x1e8] sm:$0xff] %vm1468_vm8, %v1399_v39  ;;  %4914 = vrot.lane.b32.xlu0 %v4589_v33, %s6569_s30  ;;  %v3319_v46 = vpop.permute.xlu1 %3318  ;;  %v3502_v16 = vld [vmem:[#allocation3 + $0x158] sm:$0xff] }
 0x465   :  { %3453 = vst.msk [vmem:[#allocation3 + $0x1d0] sm:$0xff] %vm3394_vm13, %v3319_v46  ;;  %6352 = vmatmul.mubr.msk.f32.gmra.mrb[42].mxu0 %vm3534_vm14, %v3502_v16  ;;  %v4786_v16 = vld [vmem:[#allocation5 + $0x81] sm:$0xff] }
 0x466   :  { %v2936_v47 = vpop.permute.xlu0 %2935  ;;  %4722 = vrot.lane.b32.xlu1 %v8213_v13, %s6564_s18 }
 0x467   :  { %3069 = vst.msk [vmem:[#allocation3 + $0x1d8] sm:$0xff] %vm3009_vm12, %v2936_v47 }
 0x468   :  { %4627 = vrot.lane.b32.xlu0 %v4590_v3, %s6567_s28  ;;  %v1784_v27 = vpop.permute.xlu1 %1783 }
 0x469   :  { %1915 = vst.msk [vmem:[#allocation3 + $0x1e8] sm:$0xff] %vm1853_vm9, %v1784_v27  ;;  %v4593_v27 = vld [vmem:[#allocation5 + $0xa2] sm:$0xff] }
 0x46a   :  { %v4325_v48 = vld [vmem:[#allocation4 + $0x80] ss:$2 sm:$0xff]  ;;  %v4357_v52 = vld [vmem:[#allocation4 + $0x81] ss:$2 sm:$0xff]  ;;  %v631_v15 = vpop.permute.xlu0 %630  ;;  %5107 = vrot.lane.b32.xlu1 %v4492_v54, %s6571_s15 }
 0x46b   :  { %v4380_v24 = vmax.f32 %v4325_v48, %v4357_v52  ;;  %761 = vst.msk [vmem:[#allocation3 + $0x1f0] sm:$0xff] %vm698_vm3, %v631_v15 }
 0x46c   :  { %5012 = vrot.lane.b32.xlu0 %v8213_v13, %s6570_s21  ;;  %v3321_v8 = vpop.permute.xlu1 %3320  ;;  %v3517_v53 = vld [vmem:[#allocation3 + $0x1d0] sm:$0xff]  ;;  %v4043_v13 = vadd.f32 %v8555_v34, %v8696_v35 }
 0x46d   :  { %4448 = vst.msk [vmem:[#allocation5 + $0xb1] sm:$0xff] %vm4180_vm15, %v4380_v24  ;;  %6375 = vmatprep.mubr.msk.f32.mxu1 %vm3534_vm14, %v3517_v53 }
 0x46e   :  { %3454 = vst.msk [vmem:[#allocation3 + $0x1d8] sm:$0xff] %vm3394_vm13, %v3321_v8  ;;  %v2167_v49 = vpop.permute.xlu0 %2166  ;;  %4819 = vrot.lane.b32.xlu1 %v4493_v30, %s6568_s29  ;;  %v4165_v29 = vmax.f32 %v4043_v13, 0.0 }
 0x46f   :  { %2299 = vst.msk [vmem:[#allocation3 + $0x1e0] sm:$0xff] %vm2238_vm10, %v2167_v49 }
 0x470   :  { %4724 = vrot.lane.b32.xlu0 %v8311_v9, %s6564_s18  ;;  %v1016_v26 = vpop.permute.xlu1 %1015  ;;  %v4256_v21 = vsel %vm4180_vm15, %v4165_v29, -inf  ;;  %v4981_v29 = vld [vmem:[#allocation5 + $0x90] sm:$0xff] }
 0x471   :  { %1146 = vst.msk [vmem:[#allocation3 + $0x1f0] sm:$0xff] %vm1083_vm7, %v1016_v26 }
 0x472   :  { %v633_v56 = vpop.permute.xlu0 %632  ;;  %5204 = vrot.lane.b32.xlu1 %v4589_v33, %s6572_s10 }
 0x473   :  { %762 = vst.msk [vmem:[#allocation3 + $0x1f8] sm:$0xff] %vm698_vm3, %v633_v56  ;;  %vm4665_vm3 = vcmask 195712   ;;  %v4883_v56 = vld [vmem:[#allocation5 + $0x82] sm:$0xff] }
 0x474   :  { %v8817_v41 = vld [vmem:[#allocation5 + $0xb0] sm:$0xff]  ;;  %5109 = vrot.lane.b32.xlu0 %v4493_v30, %s6571_s15  ;;  %v2553_v45 = vpop.permute.xlu1 %2552  ;;  %v6365_v11 = vpop.f32.mrb[6].mxu1 }
 0x475   :  { %4481 = vst.msk [vmem:[#allocation6 + $0x48] sm:$0xff] %vm4180_vm15, %v8817_v41  ;;  %v3518_v35 = vld [vmem:[#allocation3 + $0x1d8] sm:$0xff]  ;;  %v4053_v37 = vadd.f32 %v8555_v34, %v6365_v11  ;;  %v4047_v60 = vpop.f32.mrb[7].mxu1 }
 0x476   :  { %2685 = vst.msk [vmem:[#allocation3 + $0x1e0] sm:$0xff] %vm2624_vm11, %v2553_v45  ;;  %v2169_v40 = vpop.permute.xlu0 %2168  ;;  %6376 = vmatmul.mubr.msk.f32.gmra.mrb[14].mxu1 %vm3534_vm14, %v3518_v35  ;;  %v4048_v61 = vadd.f32 %v8555_v34, %v4047_v60  ;;  %4821 = vrot.lane.b32.xlu1 %v4494_v19, %s6568_s29  ;;  %v4497_v8 = vld [vmem:[#allocation5 + $0xb1] sm:$0xff] }
 0x477   :  { %2300 = vst.msk [vmem:[#allocation3 + $0x1e8] sm:$0xff] %vm2238_vm10, %v2169_v40  ;;  %v4167_v18 = vmax.f32 %v4053_v37, 0.0  ;;  %v8898_v11 = vld [vmem:[#allocation5 + $0xb2] sm:$0xff] }
 0x478   :  { %4532 = vrot.lane.b32.xlu0 %v4494_v19, %s6566_s13  ;;  %v4166_v51 = vmax.f32 %v4048_v61, 0.0  ;;  %v1401_v55 = vpop.permute.xlu1 %1400 }
 0x479   :  { %v4257_v22 = vsel %vm4180_vm15, %v4167_v18, -inf  ;;  %1531 = vst.msk [vmem:[#allocation3 + $0x1f0] sm:$0xff] %vm1468_vm8, %v1401_v55 }
 0x47a   :  { %v1018_v43 = vpop.permute.xlu0 %1017  ;;  %v4258_v54 = vmax.f32 %v4256_v21, %v4257_v22  ;;  %v4254_v23 = vsel %vm4180_vm15, %v4166_v51, -inf  ;;  %5206 = vrot.lane.b32.xlu1 %v4590_v3, %s6572_s10 }
 0x47b   :  { %1147 = vst.msk [vmem:[#allocation3 + $0x1f8] sm:$0xff] %vm1083_vm7, %v1018_v43  ;;  %v4255_v34 = vmax.f32 %v4253_v28, %v4254_v23  ;;  %vm5054_vm7 = vcmask 458112  }
 0x47c   :  { %4916 = vrot.lane.b32.xlu0 %v4590_v3, %s6569_s30  ;;  %4302 = vst.msk [vmem:[#allocation4 + $0xc8] sm:$0xff] %vm4180_vm15, %v4258_v54  ;;  %v2938_v20 = vpop.permute.xlu1 %2937 }
 0x47d   :  { %4301 = vst.msk [vmem:[#allocation4 + $0xc0] sm:$0xff] %vm4180_vm15, %v4255_v34 }
 0x47e   :  { %3070 = vst.msk [vmem:[#allocation3 + $0x1e0] sm:$0xff] %vm3009_vm12, %v2938_v20  ;;  %v2555_v31 = vpop.permute.xlu0 %2554  ;;  %4629 = vrot.lane.b32.xlu1 %v4591_v59, %s6567_s28 }
 0x47f   :  { %2686 = vst.msk [vmem:[#allocation3 + $0x1e8] sm:$0xff] %vm2624_vm11, %v2555_v31 }
 0x480   :  { %4534 = vrot.lane.b32.xlu0 %v4495_v62, %s6566_s13  ;;  %v1786_v7 = vpop.permute.xlu1 %1785 }
 0x481   :  { %1916 = vst.msk [vmem:[#allocation3 + $0x1f0] sm:$0xff] %vm1853_vm9, %v1786_v7 }
 0x482   :  { %v1403_v10 = vpop.permute.xlu0 %1402  ;;  %5014 = vrot.lane.b32.xlu1 %v8311_v9, %s6570_s21 }
 0x483   :  { %1532 = vst.msk [vmem:[#allocation3 + $0x1f8] sm:$0xff] %vm1468_vm8, %v1403_v10  ;;  %vm5151_vm8 = vcmask 523712   ;;  %v8935_v10 = vld [vmem:[%s9481_s2] ss:$0 sm:$0xff] }
 0x484   :  { %4918 = vrot.lane.b32.xlu0 %v4591_v59, %s6569_s30  ;;  %v4333_v32 = vld [vmem:[#allocation4 + $0xc0] ss:$2 sm:$0xff]  ;;  %v4365_v25 = vld [vmem:[#allocation4 + $0xc1] ss:$2 sm:$0xff]  ;;  %v3323_v1 = vpop.permute.xlu1 %3322 }
 0x485   :  { %3455 = vst.msk [vmem:[#allocation3 + $0x1e0] sm:$0xff] %vm3394_vm13, %v3323_v1  ;;  %v4384_v14 = vmax.f32 %v4333_v32, %v4365_v25 }
 0x486   :  { %v2940_v5 = vpop.permute.xlu0 %2939  ;;  %4726 = vrot.lane.b32.xlu1 %v8435_v17, %s6564_s18 }
 0x487   :  { %3071 = vst.msk [vmem:[#allocation3 + $0x1e8] sm:$0xff] %vm3009_vm12, %v2940_v5 }
 0x488   :  { %4631 = vrot.lane.b32.xlu0 %v4592_v0, %s6567_s28  ;;  %4452 = vst.msk [vmem:[#allocation5 + $0xf1] sm:$0xff] %vm4180_vm15, %v4384_v14  ;;  %v2171_v9 = vpop.permute.xlu1 %2170 }
 0x489   :  { %2301 = vst.msk [vmem:[#allocation3 + $0x1f0] sm:$0xff] %vm2238_vm10, %v2171_v9 }
 0x48a   :  { %v1788_v6 = vpop.permute.xlu0 %1787  ;;  %5111 = vrot.lane.b32.xlu1 %v4494_v19, %s6571_s15 }
 0x48b   :  { %1917 = vst.msk [vmem:[#allocation3 + $0x1f8] sm:$0xff] %vm1853_vm9, %v1788_v6  ;;  %vm5248_vm9 = vcmask 589312  }
 0x48c   :  { %5016 = vrot.lane.b32.xlu0 %v8435_v17, %s6570_s21  ;;  %v2173_v33 = vpop.permute.xlu1 %2172  ;;  %v3519_v63 = vld [vmem:[#allocation3 + $0x1e0] sm:$0xff] }
 0x48d   :  { %2302 = vst.msk [vmem:[#allocation3 + $0x1f8] sm:$0xff] %vm2238_vm10, %v2173_v33  ;;  %6378 = vmatprep.mubr.msk.f32.mxu1 %vm3534_vm14, %v3519_v63  ;;  %vm5297_vm10 = vcmask 588800  }
 0x48e   :  { %v3325_v4 = vpop.permute.xlu0 %3324  ;;  %4823 = vrot.lane.b32.xlu1 %v4495_v62, %s6568_s29 }
 0x48f   :  { %3456 = vst.msk [vmem:[#allocation3 + $0x1e8] sm:$0xff] %vm3394_vm13, %v3325_v4  ;;  %v8864_v36 = vld [vmem:[#allocation5 + $0xf0] sm:$0xff] }
 0x490   :  { %4728 = vrot.lane.b32.xlu0 %v4689_v57, %s6564_s18  ;;  %4485 = vst.msk [vmem:[#allocation6 + $0x68] sm:$0xff] %vm4180_vm15, %v8864_v36  ;;  %v2559_v17 = vpop.permute.xlu1 %2558 }
 0x491   :  { %2688 = vst.msk [vmem:[#allocation3 + $0x1f8] sm:$0xff] %vm2624_vm11, %v2559_v17 }
 0x492   :  { %v2557_v30 = vpop.permute.xlu0 %2556  ;;  %5208 = vrot.lane.b32.xlu1 %v4591_v59, %s6572_s10 }
 0x493   :  { %2687 = vst.msk [vmem:[#allocation3 + $0x1f0] sm:$0xff] %vm2624_vm11, %v2557_v30  ;;  %vm5507_vm11 = vcmask 130048  }
 0x494   :  { %5113 = vrot.lane.b32.xlu0 %v4495_v62, %s6571_s15  ;;  %v2944_v42 = vpop.permute.xlu1 %2943 }
 0x495   :  { %3073 = vst.msk [vmem:[#allocation3 + $0x1f8] sm:$0xff] %vm3009_vm12, %v2944_v42 }
 0x496   :  { %v8873_v39 = vpop.f32.mrb[36].mxu0  ;;  %v2942_v46 = vpop.permute.xlu0 %2941  ;;  %v3520_v3 = vld [vmem:[#allocation3 + $0x1e8] sm:$0xff]  ;;  %4825 = vrot.lane.b32.xlu1 %v4786_v16, %s6568_s29 }
 0x497   :  { %v8876_v47 = vpop.f32.mrb[37].mxu0  ;;  %3072 = vst.msk [vmem:[#allocation3 + $0x1f0] sm:$0xff] %vm3009_vm12, %v2942_v46  ;;  %6379 = vmatmul.mubr.msk.f32.gmra.mrb[16].mxu1 %vm3534_vm14, %v3520_v3  ;;  %v3983_v32 = vadd.f32 %v8935_v10, %v8873_v39  ;;  %vm5600_vm12 = vcmask 1041409  }
 0x498   :  { %4536 = vrot.lane.b32.xlu0 %v4496_v38, %s6566_s13  ;;  %v3329_v48 = vpop.permute.xlu1 %3328  ;;  %v3978_v25 = vadd.f32 %v8935_v10, %v8876_v47 }
 0x499   :  { %3458 = vst.msk [vmem:[#allocation3 + $0x1f8] sm:$0xff] %vm3394_vm13, %v3329_v48 }
 0x49a   :  { %v3327_v52 = vpop.permute.xlu0 %3326  ;;  %5210 = vrot.lane.b32.xlu1 %v4592_v0, %s6572_s10  ;;  %v4152_v6 = vmax.f32 %v3978_v25, 0.0 }
 0x49b   :  { %3457 = vst.msk [vmem:[#allocation3 + $0x1f0] sm:$0xff] %vm3394_vm13, %v3327_v52  ;;  %vm5602_vm13 = vcmask 1043459  }
 0x49c   :  { %4920 = vrot.lane.b32.xlu0 %v4592_v0, %s6569_s30  ;;  %v4523_v15 = vpop.permute.xlu1 %4522  ;;  %v4153_v0 = vmax.f32 %v3983_v32, 0.0  ;;  %v4235_v39 = vsel %vm4180_vm15, %v4152_v6, -inf }
 0x49d   :  { %4570 = vst.msk [vmem:[#allocation6 + $0x8] sm:$0xff] %vm4568_vm2, %v4523_v15 }
 0x49e   :  { %v4521_v24 = vpop.permute.xlu0 %4520  ;;  %4633 = vrot.lane.b32.xlu1 %v4593_v27, %s6567_s28  ;;  %v4238_v42 = vsel %vm4180_vm15, %v4153_v0, -inf }
 0x49f   :  { %4569 = vst.msk [vmem:[#allocation6] sm:$0xff] %vm4568_vm2, %v4521_v24 }
 0x4a0   :  { %4538 = vrot.lane.b32.xlu0 %v4497_v8, %s6566_s13  ;;  %v4620_v53 = vpop.permute.xlu1 %4619  ;;  %v3522_v49 = vld [vmem:[#allocation3 + $0x1f8] sm:$0xff] }
 0x4a1   :  { %4667 = vst.msk [vmem:[#allocation6 + $0x8] sm:$0xff] %vm4665_vm3, %v4620_v53 }
 0x4a2   :  { %v4618_v26 = vpop.permute.xlu0 %4617  ;;  %v3521_v13 = vld [vmem:[#allocation3 + $0x1f0] sm:$0xff]  ;;  %5018 = vrot.lane.b32.xlu1 %v4689_v57, %s6570_s21 }
 0x4a3   :  { %4666 = vst.msk [vmem:[#allocation6] sm:$0xff] %vm4665_vm3, %v4618_v26  ;;  %6381 = vmatprep.mubr.msk.f32.mxu1 %vm3534_vm14, %v3521_v13 }
 0x4a4   :  { %4922 = vrot.lane.b32.xlu0 %v4883_v56, %s6569_s30  ;;  %6382 = vmatmul.mubr.msk.f32.gmra.mrb[18].mxu1 %vm3534_vm14, %v3522_v49  ;;  %v4717_v44 = vpop.permute.xlu1 %4716  ;;  %vm5604_vm14 = vcmask 1045509  }
 0x4a5   :  { %4764 = vst.msk [vmem:[#allocation6 + $0x8] sm:$0xff] %vm4762_vm4, %v4717_v44 }
 0x4a6   :  { %v4715_v45 = vpop.permute.xlu0 %4714  ;;  %4730 = vrot.lane.b32.xlu1 %v8817_v41, %s6564_s18 }
 0x4a7   :  { %4763 = vst.msk [vmem:[#allocation6] sm:$0xff] %vm4762_vm4, %v4715_v45 }
 0x4a8   :  { %4635 = vrot.lane.b32.xlu0 %v8898_v11, %s6567_s28  ;;  %v4525_v35 = vpop.permute.xlu1 %4524 }
 0x4a9   :  { %4571 = vst.msk [vmem:[#allocation6 + $0x10] sm:$0xff] %vm4568_vm2, %v4525_v35 }
 0x4aa   :  { %v4812_v37 = vpop.permute.xlu0 %4811  ;;  %5115 = vrot.lane.b32.xlu1 %v4786_v16, %s6571_s15 }
 0x4ab   :  { %4860 = vst.msk [vmem:[#allocation6] sm:$0xff] %vm4859_vm5, %v4812_v37 }
 0x4ac   :  { %5020 = vrot.lane.b32.xlu0 %v4981_v29, %s6570_s21  ;;  %v4909_v40 = vpop.permute.xlu1 %4908 }
 0x4ad   :  { %4957 = vst.msk [vmem:[#allocation6] sm:$0xff] %vm4956_vm6, %v4909_v40 }
 0x4ae   :  { %v4814_v60 = vpop.permute.xlu0 %4813  ;;  %4827 = vrot.lane.b32.xlu1 %v4497_v8, %s6568_s29 }
 0x4af   :  { %4861 = vst.msk [vmem:[#allocation6 + $0x8] sm:$0xff] %vm4859_vm5, %v4814_v60 }
 0x4b0   :  { %v8911_v41 = vpop.f32.mrb[8].mxu1  ;;  %v4622_v19 = vpop.permute.xlu1 %4621 }
 0x4b1   :  { %4668 = vst.msk [vmem:[#allocation6 + $0x10] sm:$0xff] %vm4665_vm3, %v4622_v19  ;;  %v8914_v61 = vpop.f32.mrb[9].mxu1  ;;  %v4063_v44 = vadd.f32 %v8935_v10, %v8911_v41 }
 0x4b2   :  { %v4527_v12 = vpop.permute.xlu0 %4526  ;;  %5212 = vrot.lane.b32.xlu1 %v4883_v56, %s6572_s10  ;;  %v4058_v35 = vadd.f32 %v8935_v10, %v8914_v61 }
 0x4b3   :  { %4572 = vst.msk [vmem:[#allocation6 + $0x18] sm:$0xff] %vm4568_vm2, %v4527_v12  ;;  %v4169_v41 = vmax.f32 %v4063_v44, 0.0 }
 0x4b4   :  { %v5007_v18 = vpop.permute.xlu1 %5006 }
 0x4b5   :  { %5055 = vst.msk [vmem:[#allocation6] sm:$0xff] %vm5054_vm7, %v5007_v18 }
 0x4b6   :  { %v4911_v51 = vpop.permute.xlu0 %4910 }
 0x4b7   :  { %4958 = vst.msk [vmem:[#allocation6 + $0x8] sm:$0xff] %vm4956_vm6, %v4911_v51  ;;  %v5078_v51 = vld [vmem:[#allocation5 + $0x91] sm:$0xff] }
 0x4b8   :  { %v4719_v55 = vpop.permute.xlu1 %4718 }
 0x4b9   :  { %4765 = vst.msk [vmem:[#allocation6 + $0x10] sm:$0xff] %vm4762_vm4, %v4719_v55  ;;  %v5175_v55 = vld [vmem:[#allocation5 + $0x92] sm:$0xff] }
 0x4ba   :  { %v4624_v21 = vpop.permute.xlu0 %4623 }
 0x4bb   :  { %4669 = vst.msk [vmem:[#allocation6 + $0x18] sm:$0xff] %vm4665_vm3, %v4624_v21  ;;  %v4168_v21 = vmax.f32 %v4058_v35, 0.0 }
 0x4bc   :  { %v5104_v22 = vpop.permute.xlu1 %5103 }
 0x4bd   :  { %5152 = vst.msk [vmem:[#allocation6] sm:$0xff] %vm5151_vm8, %v5104_v22 }
 0x4be   :  { %v5009_v43 = vpop.permute.xlu0 %5008 }
 0x4bf   :  { %5056 = vst.msk [vmem:[#allocation6 + $0x8] sm:$0xff] %vm5054_vm7, %v5009_v43 }
 0x4c0   :  { %v4816_v28 = vpop.permute.xlu1 %4815 }
 0x4c1   :  { %4862 = vst.msk [vmem:[#allocation6 + $0x10] sm:$0xff] %vm4859_vm5, %v4816_v28 }
 0x4c2   :  { %v4721_v54 = vpop.permute.xlu0 %4720 }
 0x4c3   :  { %4766 = vst.msk [vmem:[#allocation6 + $0x18] sm:$0xff] %vm4762_vm4, %v4721_v54 }
 0x4c4   :  { %v5201_v23 = vpop.permute.xlu1 %5200 }
 0x4c5   :  { %5249 = vst.msk [vmem:[#allocation6] sm:$0xff] %vm5248_vm9, %v5201_v23  ;;  %v4262_v23 = vsel %vm4180_vm15, %v4169_v41, -inf }
 0x4c6   :  { %v5106_v34 = vpop.permute.xlu0 %5105 }
 0x4c7   :  { %5153 = vst.msk [vmem:[#allocation6 + $0x8] sm:$0xff] %vm5151_vm8, %v5106_v34 }
 0x4c8   :  { %v4818_v20 = vpop.permute.xlu1 %4817 }
 0x4c9   :  { %4863 = vst.msk [vmem:[#allocation6 + $0x18] sm:$0xff] %vm4859_vm5, %v4818_v20 }
 0x4ca   :  { %v4529_v31 = vpop.permute.xlu0 %4528 }
 0x4cb   :  { %4573 = vst.msk [vmem:[#allocation6 + $0x20] sm:$0xff] %vm4568_vm2, %v4529_v31  ;;  %v4259_v31 = vsel %vm4180_vm15, %v4168_v21, -inf }
 0x4cc   :  { %v5203_v59 = vpop.permute.xlu1 %5202  ;;  %v5265_v62 = vld [vmem:[#allocation6] sm:$0xff] }
 0x4cd   :  { %5250 = vst.msk [vmem:[#allocation6 + $0x8] sm:$0xff] %vm5248_vm9, %v5203_v59  ;;  %6402 = vmatprep.mubr.msk.f32.mxu1 %vm5297_vm10, %v5265_v62 }
 0x4ce   :  { %v4913_v7 = vpop.permute.xlu0 %4912 }
 0x4cf   :  { %4959 = vst.msk [vmem:[#allocation6 + $0x10] sm:$0xff] %vm4956_vm6, %v4913_v7 }
 0x4d0   :  { %v4626_v1 = vpop.permute.xlu1 %4625 }
 0x4d1   :  { %4670 = vst.msk [vmem:[#allocation6 + $0x20] sm:$0xff] %vm4665_vm3, %v4626_v1 }
 0x4d2   :  { %v6347_v5 = vpop.f32.mrb[38].mxu0  ;;  %v4531_v14 = vpop.permute.xlu0 %4530 }
 0x4d3   :  { %v3993_v58 = vadd.f32 %v8935_v10, %v6347_v5  ;;  %4574 = vst.msk [vmem:[#allocation6 + $0x28] sm:$0xff] %vm4568_vm2, %v4531_v14  ;;  %v3987_v9 = vpop.f32.mrb[39].mxu0 }
 0x4d4   :  { %v3988_v33 = vadd.f32 %v8935_v10, %v3987_v9  ;;  %v5011_v4 = vpop.permute.xlu1 %5010  ;;  %v5266_v57 = vld [vmem:[#allocation6 + $0x8] sm:$0xff] }
 0x4d5   :  { %v4155_v63 = vmax.f32 %v3993_v58, 0.0  ;;  %5057 = vst.msk [vmem:[#allocation6 + $0x10] sm:$0xff] %vm5054_vm7, %v5011_v4  ;;  %6403 = vmatmul.mubr.msk.f32.vlgmr.msra.gmra.mrb[20].mxu1 %vm5297_vm10, %v5266_v57 }
 0x4d6   :  { %v4154_v17 = vmax.f32 %v3988_v33, 0.0  ;;  %v4915_v30 = vpop.permute.xlu0 %4914 }
 0x4d7   :  { %v4239_v38 = vsel %vm4180_vm15, %v4155_v63, -inf  ;;  %4960 = vst.msk [vmem:[#allocation6 + $0x18] sm:$0xff] %vm4956_vm6, %v4915_v30 }
 0x4d8   :  { %v4240_v46 = vmax.f32 %v4238_v42, %v4239_v38  ;;  %v4236_v16 = vsel %vm4180_vm15, %v4154_v17, -inf  ;;  %v4723_v3 = vpop.permute.xlu1 %4722 }
 0x4d9   :  { %v4237_v47 = vmax.f32 %v4235_v39, %v4236_v16  ;;  %4767 = vst.msk [vmem:[#allocation6 + $0x20] sm:$0xff] %vm4762_vm4, %v4723_v3 }
 0x4da   :  { %4296 = vst.msk [vmem:[#allocation4 + $0x98] sm:$0xff] %vm4180_vm15, %v4240_v46  ;;  %v4628_v48 = vpop.permute.xlu0 %4627 }
 0x4db   :  { %4295 = vst.msk [vmem:[#allocation4 + $0x90] sm:$0xff] %vm4180_vm15, %v4237_v47 }
 0x4dc   :  { %4671 = vst.msk [vmem:[#allocation6 + $0x28] sm:$0xff] %vm4665_vm3, %v4628_v48  ;;  %v5108_v52 = vpop.permute.xlu1 %5107 }
 0x4dd   :  { %5154 = vst.msk [vmem:[#allocation6 + $0x10] sm:$0xff] %vm5151_vm8, %v5108_v52 }
 0x4de   :  { %v5013_v27 = vpop.permute.xlu0 %5012 }
 0x4df   :  { %5058 = vst.msk [vmem:[#allocation6 + $0x18] sm:$0xff] %vm5054_vm7, %v5013_v27 }
 0x4e0   :  { %v4820_v15 = vpop.permute.xlu1 %4819 }
 0x4e1   :  { %4864 = vst.msk [vmem:[#allocation6 + $0x20] sm:$0xff] %vm4859_vm5, %v4820_v15 }
 0x4e2   :  { %v4327_v24 = vld [vmem:[#allocation4 + $0x90] ss:$2 sm:$0xff]  ;;  %v4359_v8 = vld [vmem:[#allocation4 + $0x91] ss:$2 sm:$0xff]  ;;  %v4725_v53 = vpop.permute.xlu0 %4724 }
 0x4e3   :  { %4768 = vst.msk [vmem:[#allocation6 + $0x28] sm:$0xff] %vm4762_vm4, %v4725_v53  ;;  %v4381_v49 = vmax.f32 %v4327_v24, %v4359_v8 }
 0x4e4   :  { %v5205_v26 = vpop.permute.xlu1 %5204 }
 0x4e5   :  { %4449 = vst.msk [vmem:[#allocation5 + $0xc1] sm:$0xff] %vm4180_vm15, %v4381_v49 }
 0x4e6   :  { %v5110_v13 = vpop.permute.xlu0 %5109  ;;  %5251 = vst.msk [vmem:[#allocation6 + $0x10] sm:$0xff] %vm5248_vm9, %v5205_v26 }
 0x4e7   :  { %5155 = vst.msk [vmem:[#allocation6 + $0x18] sm:$0xff] %vm5151_vm8, %v5110_v13 }
 0x4e8   :  { %v4822_v56 = vpop.permute.xlu1 %4821 }
 0x4e9   :  { %4865 = vst.msk [vmem:[#allocation6 + $0x28] sm:$0xff] %vm4859_vm5, %v4822_v56 }
 0x4ea   :  { %v4533_v45 = vpop.permute.xlu0 %4532 }
 0x4eb   :  { %4575 = vst.msk [vmem:[#allocation6 + $0x30] sm:$0xff] %vm4568_vm2, %v4533_v45 }
 0x4ec   :  { %v4691_v29 = vld [vmem:[#allocation5 + $0xc0] sm:$0xff]  ;;  %v6371_v40 = vpop.f32.mrb[10].mxu1  ;;  %v5207_v60 = vpop.permute.xlu1 %5206 }
 0x4ed   :  { %v8970_v37 = vld [vmem:[#allocation5 + $0xc1] sm:$0xff]  ;;  %4732 = vrot.lane.b32.xlu0 %v4691_v29, %s6564_s18  ;;  %v5267_v19 = vld [vmem:[#allocation6 + $0x10] sm:$0xff]  ;;  %4482 = vst.msk [vmem:[#allocation6 + $0x50] sm:$0xff] %vm4180_vm15, %v4691_v29  ;;  %v4073_v12 = vadd.f32 %v8935_v10, %v6371_v40  ;;  %v4067_v61 = vpop.f32.mrb[11].mxu1 }
 0x4ee   :  { %4829 = vrot.lane.b32.xlu1 %v8970_v37, %s6568_s29  ;;  %v4917_v18 = vpop.permute.xlu0 %4916  ;;  %5252 = vst.msk [vmem:[#allocation6 + $0x18] sm:$0xff] %vm5248_vm9, %v5207_v60  ;;  %6405 = vmatprep.mubr.msk.f32.mxu1 %vm5297_vm10, %v5267_v19  ;;  %v4068_v22 = vadd.f32 %v8935_v10, %v4067_v61  ;;  %v8989_v32 = vld [vmem:[#allocation5 + $0xc2] sm:$0xff] }
 0x4ef   :  { %4961 = vst.msk [vmem:[#allocation6 + $0x20] sm:$0xff] %vm4956_vm6, %v4917_v18  ;;  %v4171_v43 = vmax.f32 %v4073_v12, 0.0 }
 0x4f0   :  { %v4170_v28 = vmax.f32 %v4068_v22, 0.0  ;;  %v4630_v54 = vpop.permute.xlu1 %4629 }
 0x4f1   :  { %5117 = vrot.lane.b32.xlu0 %v5078_v51, %s6571_s15  ;;  %v4263_v34 = vsel %vm4180_vm15, %v4171_v43, -inf  ;;  %4672 = vst.msk [vmem:[#allocation6 + $0x30] sm:$0xff] %vm4665_vm3, %v4630_v54 }
 0x4f2   :  { %5214 = vrot.lane.b32.xlu1 %v5175_v55, %s6572_s10  ;;  %v4535_v20 = vpop.permute.xlu0 %4534  ;;  %v4264_v59 = vmax.f32 %v4262_v23, %v4263_v34  ;;  %v4260_v62 = vsel %vm4180_vm15, %v4170_v28, -inf }
 0x4f3   :  { %4576 = vst.msk [vmem:[#allocation6 + $0x38] sm:$0xff] %vm4568_vm2, %v4535_v20  ;;  %v4261_v7 = vmax.f32 %v4259_v31, %v4260_v62 }
 0x4f4   :  { %4304 = vst.msk [vmem:[#allocation4 + $0xd8] sm:$0xff] %vm4180_vm15, %v4264_v59  ;;  %v5015_v25 = vpop.permute.xlu1 %5014 }
 0x4f5   :  { %4540 = vrot.lane.b32.xlu0 %v8970_v37, %s6566_s13  ;;  %v5268_v1 = vld [vmem:[#allocation6 + $0x18] sm:$0xff]  ;;  %4303 = vst.msk [vmem:[#allocation4 + $0xd0] sm:$0xff] %vm4180_vm15, %v4261_v7 }
 0x4f6   :  { %4637 = vrot.lane.b32.xlu1 %v8989_v32, %s6567_s28  ;;  %v4919_v5 = vpop.permute.xlu0 %4918  ;;  %5059 = vst.msk [vmem:[#allocation6 + $0x20] sm:$0xff] %vm5054_vm7, %v5015_v25  ;;  %6406 = vmatmul.mubr.msk.f32.gmra.mrb[22].mxu1 %vm5297_vm10, %v5268_v1 }
 0x4f7   :  { %4962 = vst.msk [vmem:[#allocation6 + $0x28] sm:$0xff] %vm4956_vm6, %v4919_v5 }
 0x4f8   :  { %v4727_v14 = vpop.permute.xlu1 %4726 }
 0x4f9   :  { %4924 = vrot.lane.b32.xlu0 %v8898_v11, %s6569_s30  ;;  %4769 = vst.msk [vmem:[#allocation6 + $0x30] sm:$0xff] %vm4762_vm4, %v4727_v14 }
 0x4fa   :  { %5022 = vrot.lane.b32.xlu1 %v4691_v29, %s6570_s21  ;;  %v4632_v0 = vpop.permute.xlu0 %4631 }
 0x4fb   :  { %4673 = vst.msk [vmem:[#allocation6 + $0x38] sm:$0xff] %vm4665_vm3, %v4632_v0 }
 0x4fc   :  { %v4335_v58 = vld [vmem:[#allocation4 + $0xd0] ss:$2 sm:$0xff]  ;;  %v4367_v9 = vld [vmem:[#allocation4 + $0xd1] ss:$2 sm:$0xff]  ;;  %v5112_v6 = vpop.permute.xlu1 %5111 }
 0x4fd   :  { %5156 = vst.msk [vmem:[#allocation6 + $0x20] sm:$0xff] %vm5151_vm8, %v5112_v6  ;;  %v4385_v63 = vmax.f32 %v4335_v58, %v4367_v9 }
 0x4fe   :  { %v5017_v33 = vpop.permute.xlu0 %5016 }
 0x4ff   :  { %5060 = vst.msk [vmem:[#allocation6 + $0x28] sm:$0xff] %vm5054_vm7, %v5017_v33 }
 0x500   :  { %4453 = vst.msk [vmem:[#allocation5 + $0x101] sm:$0xff] %vm4180_vm15, %v4385_v63  ;;  %v4824_v11 = vpop.permute.xlu1 %4823 }
 0x501   :  { %4866 = vst.msk [vmem:[#allocation6 + $0x30] sm:$0xff] %vm4859_vm5, %v4824_v11 }
 0x502   :  { %v4729_v4 = vpop.permute.xlu0 %4728 }
 0x503   :  { %4770 = vst.msk [vmem:[#allocation6 + $0x38] sm:$0xff] %vm4762_vm4, %v4729_v4 }
 0x504   :  { %v5209_v57 = vpop.permute.xlu1 %5208 }
 0x505   :  { %5253 = vst.msk [vmem:[#allocation6 + $0x20] sm:$0xff] %vm5248_vm9, %v5209_v57 }
 0x506   :  { %v5114_v17 = vpop.permute.xlu0 %5113 }
 0x507   :  { %5157 = vst.msk [vmem:[#allocation6 + $0x28] sm:$0xff] %vm5151_vm8, %v5114_v17  ;;  %v9012_v30 = vld [vmem:[#allocation5 + $0x100] sm:$0xff] }
 0x508   :  { %4486 = vst.msk [vmem:[#allocation6 + $0x70] sm:$0xff] %vm4180_vm15, %v9012_v30  ;;  %v4826_v42 = vpop.permute.xlu1 %4825 }
 0x509   :  { %4867 = vst.msk [vmem:[#allocation6 + $0x38] sm:$0xff] %vm4859_vm5, %v4826_v42 }
 0x50a   :  { %v4537_v38 = vpop.permute.xlu0 %4536 }
 0x50b   :  { %4577 = vst.msk [vmem:[#allocation6 + $0x40] sm:$0xff] %vm4568_vm2, %v4537_v38 }
 0x50c   :  { %v5211_v39 = vpop.permute.xlu1 %5210  ;;  %v5269_v46 = vld [vmem:[#allocation6 + $0x20] sm:$0xff] }
 0x50d   :  { %5254 = vst.msk [vmem:[#allocation6 + $0x28] sm:$0xff] %vm5248_vm9, %v5211_v39  ;;  %6408 = vmatprep.mubr.msk.f32.mxu1 %vm5297_vm10, %v5269_v46 }
 0x50e   :  { %v4921_v16 = vpop.permute.xlu0 %4920  ;;  %v6350_v47 = vpop.f32.mrb[40].mxu0 }
 0x50f   :  { %4963 = vst.msk [vmem:[#allocation6 + $0x30] sm:$0xff] %vm4956_vm6, %v4921_v16  ;;  %v3997_v3 = vpop.f32.mrb[41].mxu0  ;;  %v4003_v29 = vadd.f32 %v8935_v10, %v6350_v47 }
 0x510   :  { %v4634_v48 = vpop.permute.xlu1 %4633  ;;  %v3998_v40 = vadd.f32 %v8935_v10, %v3997_v3 }
 0x511   :  { %4674 = vst.msk [vmem:[#allocation6 + $0x40] sm:$0xff] %vm4665_vm3, %v4634_v48  ;;  %v4157_v19 = vmax.f32 %v4003_v29, 0.0 }
 0x512   :  { %v4539_v52 = vpop.permute.xlu0 %4538  ;;  %v4156_v18 = vmax.f32 %v3998_v40, 0.0 }
 0x513   :  { %4578 = vst.msk [vmem:[#allocation6 + $0x48] sm:$0xff] %vm4568_vm2, %v4539_v52  ;;  %v4244_v21 = vsel %vm4180_vm15, %v4157_v19, -inf  ;;  %v4790_v52 = vld [vmem:[#allocation5 + $0xe1] sm:$0xff] }
 0x514   :  { %v5019_v27 = vpop.permute.xlu1 %5018  ;;  %v5270_v15 = vld [vmem:[#allocation6 + $0x28] sm:$0xff]  ;;  %v4241_v43 = vsel %vm4180_vm15, %v4156_v18, -inf }
 0x515   :  { %5061 = vst.msk [vmem:[#allocation6 + $0x30] sm:$0xff] %vm5054_vm7, %v5019_v27  ;;  %6409 = vmatmul.mubr.msk.f32.gmra.mrb[24].mxu1 %vm5297_vm10, %v5270_v15 }
 0x516   :  { %v4923_v24 = vpop.permute.xlu0 %4922 }
 0x517   :  { %4964 = vst.msk [vmem:[#allocation6 + $0x38] sm:$0xff] %vm4956_vm6, %v4923_v24 }
 0x518   :  { %v4731_v8 = vpop.permute.xlu1 %4730 }
 0x519   :  { %4771 = vst.msk [vmem:[#allocation6 + $0x40] sm:$0xff] %vm4762_vm4, %v4731_v8 }
 0x51a   :  { %v4636_v53 = vpop.permute.xlu0 %4635 }
 0x51b   :  { %4675 = vst.msk [vmem:[#allocation6 + $0x48] sm:$0xff] %vm4665_vm3, %v4636_v53 }
 0x51c   :  { %v5116_v49 = vpop.permute.xlu1 %5115 }
 0x51d   :  { %5158 = vst.msk [vmem:[#allocation6 + $0x30] sm:$0xff] %vm5151_vm8, %v5116_v49  ;;  %v4597_v49 = vld [vmem:[#allocation5 + $0xe2] sm:$0xff] }
 0x51e   :  { %v5021_v26 = vpop.permute.xlu0 %5020 }
 0x51f   :  { %5062 = vst.msk [vmem:[#allocation6 + $0x38] sm:$0xff] %vm5054_vm7, %v5021_v26 }
 0x520   :  { %v4828_v13 = vpop.permute.xlu1 %4827 }
 0x521   :  { %4868 = vst.msk [vmem:[#allocation6 + $0x40] sm:$0xff] %vm4859_vm5, %v4828_v13 }
 0x524   :  { %v5213_v56 = vpop.permute.xlu1 %5212 }
 0x525   :  { %5255 = vst.msk [vmem:[#allocation6 + $0x30] sm:$0xff] %vm5248_vm9, %v5213_v56 }
 0x526   :  { %v6374_v44 = vpop.f32.mrb[12].mxu1 }
 0x527   :  { %v4077_v45 = vpop.f32.mrb[13].mxu1  ;;  %v4083_v34 = vadd.f32 %v8935_v10, %v6374_v44  ;;  %v4501_v44 = vld [vmem:[#allocation5 + $0xf1] sm:$0xff] }
 0x528   :  { %v4078_v20 = vadd.f32 %v8935_v10, %v4077_v45 }
 0x529   :  { %v4173_v7 = vmax.f32 %v4083_v34, 0.0  ;;  %v4599_v34 = vld [vmem:[#allocation5 + $0x102] sm:$0xff] }
 0x52a   :  { %v4172_v14 = vmax.f32 %v4078_v20, 0.0 }
 0x52b   :  { %v4268_v6 = vsel %vm4180_vm15, %v4173_v7, -inf  ;;  %v4989_v7 = vld [vmem:[#allocation5 + $0x130] sm:$0xff] }
 0x52c   :  { %v5271_v35 = vld [vmem:[#allocation6 + $0x30] sm:$0xff]  ;;  %v4265_v63 = vsel %vm4180_vm15, %v4172_v14, -inf }
 0x52d   :  { %6411 = vmatprep.mubr.msk.f32.mxu1 %vm5297_vm10, %v5271_v35 }
 0x538   :  { %v6353_v60 = vpop.f32.mrb[42].mxu0 }
 0x539   :  { %v4013_v41 = vadd.f32 %v8935_v10, %v6353_v60  ;;  %v4007_v12 = vpop.f32.mrb[43].mxu0 }
 0x53a   :  { %v4008_v61 = vadd.f32 %v8935_v10, %v4007_v12 }
 0x53b   :  { %v4159_v51 = vmax.f32 %v4013_v41, 0.0 }
 0x53c   :  { %v4158_v55 = vmax.f32 %v4008_v61, 0.0 }
 0x53d   :  { %v4245_v22 = vsel %vm4180_vm15, %v4159_v51, -inf  ;;  %v4598_v51 = vld [vmem:[#allocation5 + $0xf2] sm:$0xff] }
 0x53e   :  { %v4246_v28 = vmax.f32 %v4244_v21, %v4245_v22  ;;  %v4242_v54 = vsel %vm4180_vm15, %v4158_v55, -inf }
 0x53f   :  { %v4243_v23 = vmax.f32 %v4241_v43, %v4242_v54 }
 0x540   :  { %4298 = vst.msk [vmem:[#allocation4 + $0xa8] sm:$0xff] %vm4180_vm15, %v4246_v28 }
 0x541   :  { %4297 = vst.msk [vmem:[#allocation4 + $0xa0] sm:$0xff] %vm4180_vm15, %v4243_v23 }
 0x548   :  { %v4329_v31 = vld [vmem:[#allocation4 + $0xa0] ss:$2 sm:$0xff]  ;;  %v4361_v59 = vld [vmem:[#allocation4 + $0xa1] ss:$2 sm:$0xff] }
 0x549   :  { %v6377_v62 = vpop.f32.mrb[14].mxu1  ;;  %v4382_v5 = vmax.f32 %v4329_v31, %v4361_v59  ;;  %v9136_v59 = vld [vmem:[%s9483_s4] ss:$0 sm:$0xff]  ;;  %s6574_s4 = smov 80  }
 0x54a   :  { %v4093_v25 = vadd.f32 %v8935_v10, %v6377_v62  ;;  %v4087_v1 = vpop.f32.mrb[15].mxu1 }
 0x54b   :  { %v4088_v0 = vadd.f32 %v8935_v10, %v4087_v1  ;;  %4450 = vst.msk [vmem:[#allocation5 + $0xd1] sm:$0xff] %vm4180_vm15, %v4382_v5 }
 0x54c   :  { %v4175_v58 = vmax.f32 %v4093_v25, 0.0 }
 0x54d   :  { %v4174_v9 = vmax.f32 %v4088_v0, 0.0 }
 0x54e   :  { %v4269_v33 = vsel %vm4180_vm15, %v4175_v58, -inf }
 0x54f   :  { %v4270_v11 = vmax.f32 %v4268_v6, %v4269_v33  ;;  %v4266_v4 = vsel %vm4180_vm15, %v4174_v9, -inf  ;;  %v5086_v9 = vld [vmem:[#allocation5 + $0x131] sm:$0xff] }
 0x550   :  { %v4267_v57 = vmax.f32 %v4265_v63, %v4266_v4 }
 0x551   :  { %4306 = vst.msk [vmem:[#allocation4 + $0xe8] sm:$0xff] %vm4180_vm15, %v4270_v11  ;;  %v5183_v11 = vld [vmem:[#allocation5 + $0x132] sm:$0xff] }
 0x552   :  { %4305 = vst.msk [vmem:[#allocation4 + $0xe0] sm:$0xff] %vm4180_vm15, %v4267_v57  ;;  %v4499_v17 = vld [vmem:[#allocation5 + $0xd1] sm:$0xff] }
 0x553   :  { %v4692_v42 = vld [vmem:[#allocation5 + $0xd0] sm:$0xff]  ;;  %4542 = vrot.lane.b32.xlu0 %v4499_v17, %s6566_s13 }
 0x554   :  { %4734 = vrot.lane.b32.xlu1 %v4692_v42, %s6564_s18  ;;  %4483 = vst.msk [vmem:[#allocation6 + $0x58] sm:$0xff] %vm4180_vm15, %v4692_v42  ;;  %v4596_v16 = vld [vmem:[#allocation5 + $0xd2] sm:$0xff] }
 0x557   :  { %4926 = vrot.lane.b32.xlu0 %v8989_v32, %s6569_s30 }
 0x558   :  { %5119 = vrot.lane.b32.xlu1 %v8970_v37, %s6571_s15 }
 0x559   :  { %v4337_v38 = vld [vmem:[#allocation4 + $0xe0] ss:$2 sm:$0xff]  ;;  %v4369_v39 = vld [vmem:[#allocation4 + $0xe1] ss:$2 sm:$0xff] }
 0x55a   :  { %v4386_v46 = vmax.f32 %v4337_v38, %v4369_v39 }
 0x55b   :  { %4639 = vrot.lane.b32.xlu0 %v4596_v16, %s6567_s28 }
 0x55c   :  { %4831 = vrot.lane.b32.xlu1 %v4499_v17, %s6568_s29  ;;  %4454 = vst.msk [vmem:[#allocation5 + $0x111] sm:$0xff] %vm4180_vm15, %v4386_v46 }
 0x55f   :  { %v4733_v47 = vpop.permute.xlu0 %4732  ;;  %5024 = vrot.lane.b32.xlu0 %v4692_v42, %s6570_s21 }
 0x560   :  { %v4830_v3 = vpop.permute.xlu1 %4829  ;;  %4772 = vst.msk [vmem:[#allocation6 + $0x48] sm:$0xff] %vm4762_vm4, %v4733_v47  ;;  %5216 = vrot.lane.b32.xlu1 %v8989_v32, %s6572_s10 }
 0x561   :  { %4869 = vst.msk [vmem:[#allocation6 + $0x48] sm:$0xff] %vm4859_vm5, %v4830_v3 }
 0x563   :  { %v5118_v37 = vpop.permute.xlu0 %5117  ;;  %v9069_v27 = vld [vmem:[#allocation5 + $0x110] sm:$0xff]  ;;  %4736 = vrot.lane.b32.xlu0 %v8650_v50, %s6564_s18 }
 0x564   :  { %v5215_v48 = vpop.permute.xlu1 %5214  ;;  %5159 = vst.msk [vmem:[#allocation6 + $0x38] sm:$0xff] %vm5151_vm8, %v5118_v37  ;;  %4833 = vrot.lane.b32.xlu1 %v4790_v52, %s6568_s29  ;;  %v4600_v20 = vld [vmem:[#allocation5 + $0x112] sm:$0xff] }
 0x565   :  { %4487 = vst.msk [vmem:[#allocation6 + $0x78] sm:$0xff] %vm4180_vm15, %v9069_v27 }
 0x566   :  { %5256 = vst.msk [vmem:[#allocation6 + $0x38] sm:$0xff] %vm5248_vm9, %v5215_v48 }
 0x567   :  { %v4541_v32 = vpop.permute.xlu0 %4540  ;;  %5121 = vrot.lane.b32.xlu0 %v4499_v17, %s6571_s15 }
 0x568   :  { %v4638_v15 = vpop.permute.xlu1 %4637  ;;  %4579 = vst.msk [vmem:[#allocation6 + $0x50] sm:$0xff] %vm4568_vm2, %v4541_v32  ;;  %5218 = vrot.lane.b32.xlu1 %v4596_v16, %s6572_s10 }
 0x569   :  { %4676 = vst.msk [vmem:[#allocation6 + $0x50] sm:$0xff] %vm4665_vm3, %v4638_v15 }
 0x56a   :  { %v6380_v24 = vpop.f32.mrb[16].mxu1 }
 0x56b   :  { %v4925_v8 = vpop.permute.xlu0 %4924  ;;  %4544 = vrot.lane.b32.xlu0 %v4790_v52, %s6566_s13  ;;  %v4097_v26 = vpop.f32.mrb[17].mxu1  ;;  %v4103_v56 = vadd.f32 %v8935_v10, %v6380_v24 }
 0x56c   :  { %v5023_v53 = vpop.permute.xlu1 %5022  ;;  %4965 = vst.msk [vmem:[#allocation6 + $0x40] sm:$0xff] %vm4956_vm6, %v4925_v8  ;;  %4641 = vrot.lane.b32.xlu1 %v4597_v49, %s6567_s28  ;;  %v4098_v45 = vadd.f32 %v8935_v10, %v4097_v26 }
 0x56d   :  { %v5272_v13 = vld [vmem:[#allocation6 + $0x38] sm:$0xff]  ;;  %5063 = vst.msk [vmem:[#allocation6 + $0x40] sm:$0xff] %vm5054_vm7, %v5023_v53  ;;  %v4177_v35 = vmax.f32 %v4103_v56, 0.0 }
 0x56e   :  { %6412 = vmatmul.mubr.msk.f32.gmra.mrb[26].mxu1 %vm5297_vm10, %v5272_v13  ;;  %v4176_v29 = vmax.f32 %v4098_v45, 0.0 }
 0x56f   :  { %4928 = vrot.lane.b32.xlu0 %v4596_v16, %s6569_s30  ;;  %v4274_v41 = vsel %vm4180_vm15, %v4177_v35, -inf }
 0x570   :  { %5026 = vrot.lane.b32.xlu1 %v8650_v50, %s6570_s21  ;;  %v4271_v18 = vsel %vm4180_vm15, %v4176_v29, -inf }
 0x573   :  { %4546 = vrot.lane.b32.xlu0 %v4501_v44, %s6566_s13 }
 0x574   :  { %4738 = vrot.lane.b32.xlu1 %v8864_v36, %s6564_s18 }
 0x577   :  { %v6383_v40 = vpop.f32.mrb[18].mxu1  ;;  %4930 = vrot.lane.b32.xlu0 %v4597_v49, %s6569_s30 }
 0x578   :  { %5123 = vrot.lane.b32.xlu1 %v4790_v52, %s6571_s15  ;;  %v4113_v60 = vadd.f32 %v8935_v10, %v6383_v40  ;;  %v4107_v50 = vpop.f32.mrb[19].mxu1 }
 0x579   :  { %v4108_v19 = vadd.f32 %v8935_v10, %v4107_v50  ;;  %v4792_v10 = vld [vmem:[#allocation5 + $0x101] sm:$0xff] }
 0x57a   :  { %v4179_v12 = vmax.f32 %v4113_v60, 0.0 }
 0x57b   :  { %v4178_v61 = vmax.f32 %v4108_v19, 0.0  ;;  %4643 = vrot.lane.b32.xlu0 %v4598_v51, %s6567_s28 }
 0x57c   :  { %v4275_v55 = vsel %vm4180_vm15, %v4179_v12, -inf  ;;  %4835 = vrot.lane.b32.xlu1 %v4501_v44, %s6568_s29 }
 0x57d   :  { %v4276_v21 = vmax.f32 %v4274_v41, %v4275_v55  ;;  %v4272_v22 = vsel %vm4180_vm15, %v4178_v61, -inf }
 0x57e   :  { %v4273_v43 = vmax.f32 %v4271_v18, %v4272_v22 }
 0x57f   :  { %4308 = vst.msk [vmem:[#allocation4 + $0xf8] sm:$0xff] %vm4180_vm15, %v4276_v21  ;;  %5028 = vrot.lane.b32.xlu0 %v8864_v36, %s6570_s21  ;;  %v4503_v36 = vld [vmem:[#allocation5 + $0x111] sm:$0xff] }
 0x580   :  { %4307 = vst.msk [vmem:[#allocation4 + $0xf0] sm:$0xff] %vm4180_vm15, %v4273_v43  ;;  %5220 = vrot.lane.b32.xlu1 %v4597_v49, %s6572_s10 }
 0x583   :  { %4740 = vrot.lane.b32.xlu0 %v9012_v30, %s6564_s18 }
 0x584   :  { %4837 = vrot.lane.b32.xlu1 %v4792_v10, %s6568_s29 }
 0x587   :  { %v4339_v28 = vld [vmem:[#allocation4 + $0xf0] ss:$2 sm:$0xff]  ;;  %v4371_v54 = vld [vmem:[#allocation4 + $0xf1] ss:$2 sm:$0xff]  ;;  %5125 = vrot.lane.b32.xlu0 %v4501_v44, %s6571_s15 }
 0x588   :  { %5222 = vrot.lane.b32.xlu1 %v4598_v51, %s6572_s10  ;;  %v4387_v23 = vmax.f32 %v4339_v28, %v4371_v54 }
 0x58a   :  { %4455 = vst.msk [vmem:[#allocation5 + $0x121] sm:$0xff] %vm4180_vm15, %v4387_v23  ;;  %vm5606_vm15 = vcmask 1047559  }
 0x58b   :  { %4548 = vrot.lane.b32.xlu0 %v4792_v10, %s6566_s13 }
 0x58c   :  { %4645 = vrot.lane.b32.xlu1 %v4599_v34, %s6567_s28 }
 0x58f   :  { %4932 = vrot.lane.b32.xlu0 %v4598_v51, %s6569_s30 }
 0x590   :  { %5030 = vrot.lane.b32.xlu1 %v9012_v30, %s6570_s21 }
 0x591   :  { %v4697_v30 = vld [vmem:[#allocation5 + $0x120] sm:$0xff] }
 0x592   :  { %v4891_v31 = vld [vmem:[#allocation5 + $0x122] sm:$0xff] }
 0x593   :  { %4550 = vrot.lane.b32.xlu0 %v4503_v36, %s6566_s13  ;;  %v4794_v14 = vld [vmem:[#allocation5 + $0x121] sm:$0xff] }
 0x594   :  { %4742 = vrot.lane.b32.xlu1 %v9069_v27, %s6564_s18 }
 0x597   :  { %4934 = vrot.lane.b32.xlu0 %v4599_v34, %s6569_s30 }
 0x598   :  { %5127 = vrot.lane.b32.xlu1 %v4792_v10, %s6571_s15 }
 0x59b   :  { %4647 = vrot.lane.b32.xlu0 %v4600_v20, %s6567_s28 }
 0x59c   :  { %4839 = vrot.lane.b32.xlu1 %v4503_v36, %s6568_s29 }
 0x59f   :  { %5032 = vrot.lane.b32.xlu0 %v9069_v27, %s6570_s21 }
 0x5a0   :  { %5224 = vrot.lane.b32.xlu1 %v4599_v34, %s6572_s10 }
 0x5a3   :  { %4744 = vrot.lane.b32.xlu0 %v4697_v30, %s6564_s18  ;;  %s6575_s18 = smov 96  }
 0x5a4   :  { %4936 = vrot.lane.b32.xlu1 %v4600_v20, %s6569_s30 }
 0x5a7   :  { %5129 = vrot.lane.b32.xlu0 %v4503_v36, %s6571_s15 }
 0x5a8   :  { %4938 = vrot.lane.b32.xlu1 %v4891_v31, %s6569_s30  ;;  %v6404_v62 = vpop.f32.mrb[20].mxu1  ;;  %s6576_s30 = smov 112  }
 0x5a9   :  { %v5418_v25 = vadd.f32 %v6404_v62, %v9136_v59  ;;  %v5412_v1 = vpop.f32.mrb[21].mxu1 }
 0x5aa   :  { %v5413_v5 = vadd.f32 %v9136_v59, %v5412_v1 }
 0x5ab   :  { %v5492_v0 = vmax.f32 %v5418_v25, 0.0  ;;  %4841 = vrot.lane.b32.xlu0 %v4794_v14, %s6568_s29 }
 0x5ac   :  { %5036 = vrot.lane.b32.xlu1 %v4989_v7, %s6570_s21  ;;  %v5491_v58 = vmax.f32 %v5413_v5, 0.0 }
 0x5ad   :  { %v5509_v6 = vsel %vm5507_vm11, %v5492_v0, -inf }
 0x5ae   :  { %v5508_v33 = vsel %vm5507_vm11, %v5491_v58, -inf }
 0x5af   :  { %v5510_v63 = vmax.f32 %v5508_v33, %v5509_v6  ;;  %5226 = vrot.lane.b32.xlu0 %v4600_v20, %s6572_s10 }
 0x5b0   :  { %5133 = vrot.lane.b32.xlu1 %v5086_v9, %s6571_s15 }
 0x5b1   :  { %5532 = vst.msk [vmem:[#allocation7] sm:$0xff] %vm5507_vm11, %v5510_v63 }
 0x5b3   :  { %5034 = vrot.lane.b32.xlu0 %v4697_v30, %s6570_s21 }
 0x5b4   :  { %5230 = vrot.lane.b32.xlu1 %v5183_v11, %s6572_s10 }
 0x5b7   :  { %5131 = vrot.lane.b32.xlu0 %v4794_v14, %s6571_s15 }
 0x5bb   :  { %5228 = vrot.lane.b32.xlu0 %v4891_v31, %s6572_s10 }
 0x5c5   :  { %v4543_v4 = vpop.permute.xlu0 %4542 }
 0x5c6   :  { %v4735_v57 = vpop.permute.xlu1 %4734  ;;  %4580 = vst.msk [vmem:[#allocation6 + $0x58] sm:$0xff] %vm4568_vm2, %v4543_v4 }
 0x5c7   :  { %4773 = vst.msk [vmem:[#allocation6 + $0x50] sm:$0xff] %vm4762_vm4, %v4735_v57 }
 0x5c9   :  { %v6407_v17 = vpop.f32.mrb[22].mxu1  ;;  %v4927_v38 = vpop.permute.xlu0 %4926 }
 0x5ca   :  { %v5428_v42 = vadd.f32 %v6407_v17, %v9136_v59  ;;  %v5120_v39 = vpop.permute.xlu1 %5119  ;;  %4966 = vst.msk [vmem:[#allocation6 + $0x48] sm:$0xff] %vm4956_vm6, %v4927_v38  ;;  %v5422_v46 = vpop.f32.mrb[23].mxu1 }
 0x5cb   :  { %5160 = vst.msk [vmem:[#allocation6 + $0x40] sm:$0xff] %vm5151_vm8, %v5120_v39  ;;  %v5423_v47 = vadd.f32 %v9136_v59, %v5422_v46 }
 0x5cc   :  { %v5494_v16 = vmax.f32 %v5428_v42, 0.0 }
 0x5cd   :  { %v5493_v37 = vmax.f32 %v5423_v47, 0.0  ;;  %v4640_v48 = vpop.permute.xlu0 %4639 }
 0x5ce   :  { %v5512_v3 = vsel %vm5507_vm11, %v5494_v16, -inf  ;;  %v4832_v52 = vpop.permute.xlu1 %4831  ;;  %4677 = vst.msk [vmem:[#allocation6 + $0x58] sm:$0xff] %vm4665_vm3, %v4640_v48 }
 0x5cf   :  { %4870 = vst.msk [vmem:[#allocation6 + $0x50] sm:$0xff] %vm4859_vm5, %v4832_v52  ;;  %v5511_v27 = vsel %vm5507_vm11, %v5493_v37, -inf }
 0x5d0   :  { %v5513_v32 = vmax.f32 %v5511_v27, %v5512_v3 }
 0x5d1   :  { %v5025_v15 = vpop.permute.xlu0 %5024 }
 0x5d2   :  { %v5217_v24 = vpop.permute.xlu1 %5216  ;;  %5533 = vst.msk [vmem:[#allocation7 + $0x8] sm:$0xff] %vm5507_vm11, %v5513_v32 }
 0x5d3   :  { %5064 = vst.msk [vmem:[#allocation6 + $0x48] sm:$0xff] %vm5054_vm7, %v5025_v15 }
 0x5d4   :  { %5257 = vst.msk [vmem:[#allocation6 + $0x40] sm:$0xff] %vm5248_vm9, %v5217_v24 }
 0x5d5   :  { %v4737_v8 = vpop.permute.xlu0 %4736 }
 0x5d6   :  { %v4834_v53 = vpop.permute.xlu1 %4833  ;;  %4774 = vst.msk [vmem:[#allocation6 + $0x58] sm:$0xff] %vm4762_vm4, %v4737_v8 }
 0x5d7   :  { %4871 = vst.msk [vmem:[#allocation6 + $0x58] sm:$0xff] %vm4859_vm5, %v4834_v53 }
 0x5d9   :  { %v5122_v49 = vpop.permute.xlu0 %5121 }
 0x5da   :  { %v5219_v26 = vpop.permute.xlu1 %5218  ;;  %5161 = vst.msk [vmem:[#allocation6 + $0x48] sm:$0xff] %vm5151_vm8, %v5122_v49 }
 0x5db   :  { %v5273_v13 = vld [vmem:[#allocation6 + $0x40] sm:$0xff]  ;;  %5258 = vst.msk [vmem:[#allocation6 + $0x48] sm:$0xff] %vm5248_vm9, %v5219_v26 }
 0x5dc   :  { %6414 = vmatprep.mubr.msk.f32.mxu1 %vm5297_vm10, %v5273_v13 }
 0x5dd   :  { %v4545_v56 = vpop.permute.xlu0 %4544 }
 0x5de   :  { %v4642_v44 = vpop.permute.xlu1 %4641  ;;  %4581 = vst.msk [vmem:[#allocation6 + $0x60] sm:$0xff] %vm4568_vm2, %v4545_v56 }
 0x5df   :  { %4678 = vst.msk [vmem:[#allocation6 + $0x60] sm:$0xff] %vm4665_vm3, %v4642_v44 }
 0x5e1   :  { %v4929_v45 = vpop.permute.xlu0 %4928 }
 0x5e2   :  { %v5027_v35 = vpop.permute.xlu1 %5026  ;;  %4967 = vst.msk [vmem:[#allocation6 + $0x50] sm:$0xff] %vm4956_vm6, %v4929_v45  ;;  %v5274_v29 = vld [vmem:[#allocation6 + $0x48] sm:$0xff] }
 0x5e3   :  { %5065 = vst.msk [vmem:[#allocation6 + $0x50] sm:$0xff] %vm5054_vm7, %v5027_v35  ;;  %6415 = vmatmul.mubr.msk.f32.gmra.mrb[28].mxu1 %vm5297_vm10, %v5274_v29  ;;  %v6573_v29 = vmov 1983009808  }
 0x5e5   :  { %v4547_v40 = vpop.permute.xlu0 %4546 }
 0x5e6   :  { %v4739_v60 = vpop.permute.xlu1 %4738  ;;  %4582 = vst.msk [vmem:[#allocation6 + $0x68] sm:$0xff] %vm4568_vm2, %v4547_v40  ;;  %v5582_v40 = vunpack.c.l.s4 %v6573_v29 }
 0x5e7   :  { %4775 = vst.msk [vmem:[#allocation6 + $0x60] sm:$0xff] %vm4762_vm4, %v4739_v60  ;;  %v5584_v60 = vlaneseq }
 0x5e8   :  { %v6410_v50 = vpop.f32.mrb[24].mxu1 }
 0x5e9   :  { %v5438_v19 = vadd.f32 %v6410_v50, %v9136_v59  ;;  %v4931_v41 = vpop.permute.xlu0 %4930  ;;  %v5432_v18 = vpop.f32.mrb[25].mxu1 }
 0x5ea   :  { %v5124_v12 = vpop.permute.xlu1 %5123  ;;  %4968 = vst.msk [vmem:[#allocation6 + $0x58] sm:$0xff] %vm4956_vm6, %v4931_v41  ;;  %v5433_v51 = vadd.f32 %v9136_v59, %v5432_v18 }
 0x5eb   :  { %5162 = vst.msk [vmem:[#allocation6 + $0x50] sm:$0xff] %vm5151_vm8, %v5124_v12  ;;  %v5496_v61 = vmax.f32 %v5438_v19, 0.0 }
 0x5ec   :  { %v5495_v21 = vmax.f32 %v5433_v51, 0.0  ;;  %v5583_v51 = vunpack.c.0.s8 %v5582_v40 }
 0x5ed   :  { %v5515_v55 = vsel %vm5507_vm11, %v5496_v61, -inf  ;;  %v4644_v22 = vpop.permute.xlu0 %4643  ;;  %v5540_v61 = vld [vmem:[#allocation7] ss:$2 sm:$0xf] }
 0x5ee   :  { %v4836_v43 = vpop.permute.xlu1 %4835  ;;  %4679 = vst.msk [vmem:[#allocation6 + $0x68] sm:$0xff] %vm4665_vm3, %v4644_v22  ;;  %v5514_v10 = vsel %vm5507_vm11, %v5495_v21, -inf  ;;  %v5556_v22 = vld [vmem:[#allocation7 + $0x1] ss:$2 sm:$0xf] }
 0x5ef   :  { %4872 = vst.msk [vmem:[#allocation6 + $0x60] sm:$0xff] %vm4859_vm5, %v4836_v43  ;;  %v5516_v28 = vmax.f32 %v5514_v10, %v5515_v55  ;;  %v5585_v55 = vshrl.u32 %v5584_v60, 7 }
 0x5f1   :  { %v5029_v54 = vpop.permute.xlu0 %5028  ;;  %5534 = vst.msk [vmem:[#allocation7 + $0x10] sm:$0xff] %vm5507_vm11, %v5516_v28  ;;  %v5571_v28 = vmax.f32 %v5540_v61, %v5556_v22 }
 0x5f2   :  { %v5221_v23 = vpop.permute.xlu1 %5220  ;;  %5066 = vst.msk [vmem:[#allocation6 + $0x58] sm:$0xff] %vm5054_vm7, %v5029_v54  ;;  %v9232_v54 = vsub.s32 %v5583_v51, %v5585_v55 }
 0x5f3   :  { %5259 = vst.msk [vmem:[#allocation6 + $0x50] sm:$0xff] %vm5248_vm9, %v5221_v23 }
 0x5f4   :  { %v5587_v23 = vrot.slane %v5571_v28, %v9232_v54 }
 0x5f5   :  { %v4741_v34 = vpop.permute.xlu0 %4740 }
 0x5f6   :  { %v4838_v36 = vpop.permute.xlu1 %4837  ;;  %4776 = vst.msk [vmem:[#allocation6 + $0x68] sm:$0xff] %vm4762_vm4, %v4741_v34 }
 0x5f7   :  { %4873 = vst.msk [vmem:[#allocation6 + $0x68] sm:$0xff] %vm4859_vm5, %v4838_v36 }
 0x5f9   :  { %v5126_v20 = vpop.permute.xlu0 %5125 }
 0x5fa   :  { %v5223_v30 = vpop.permute.xlu1 %5222  ;;  %v5275_v31 = vld [vmem:[#allocation6 + $0x50] sm:$0xff]  ;;  %5163 = vst.msk [vmem:[#allocation6 + $0x58] sm:$0xff] %vm5151_vm8, %v5126_v20  ;;  %v5623_v20 = vcombine.high %v5587_v23, %v5587_v23 }
 0x5fb   :  { %6417 = vmatprep.mubr.msk.f32.mxu1 %vm5297_vm10, %v5275_v31  ;;  %5260 = vst.msk [vmem:[#allocation6 + $0x58] sm:$0xff] %vm5248_vm9, %v5223_v30 }
 0x5fd   :  { %v4549_v62 = vpop.permute.xlu0 %4548 }
 0x5fe   :  { %v4646_v7 = vpop.permute.xlu1 %4645  ;;  %4583 = vst.msk [vmem:[#allocation6 + $0x70] sm:$0xff] %vm4568_vm2, %v4549_v62  ;;  %v5611_v62 = vrot.slane %v5587_v23, 1 }
 0x5ff   :  { %4680 = vst.msk [vmem:[#allocation6 + $0x70] sm:$0xff] %vm4665_vm3, %v4646_v7  ;;  %v5637_v7 = vrot.slane %v5623_v20, 1 }
 0x601   :  { %v4933_v25 = vpop.permute.xlu0 %4932 }
 0x602   :  { %v5031_v1 = vpop.permute.xlu1 %5030  ;;  %4969 = vst.msk [vmem:[#allocation6 + $0x60] sm:$0xff] %vm4956_vm6, %v4933_v25  ;;  %v5276_v5 = vld [vmem:[#allocation6 + $0x58] sm:$0xff] }
 0x603   :  { %5067 = vst.msk [vmem:[#allocation6 + $0x60] sm:$0xff] %vm5054_vm7, %v5031_v1  ;;  %6418 = vmatmul.mubr.msk.f32.gmra.mrb[30].mxu1 %vm5297_vm10, %v5276_v5 }
 0x605   :  { %v4551_v14 = vpop.permute.xlu0 %4550 }
 0x606   :  { %v4743_v0 = vpop.permute.xlu1 %4742  ;;  %4584 = vst.msk [vmem:[#allocation6 + $0x78] sm:$0xff] %vm4568_vm2, %v4551_v14  ;;  %vm5635_vm2 = vcmask 386304  }
 0x607   :  { %4777 = vst.msk [vmem:[#allocation6 + $0x70] sm:$0xff] %vm4762_vm4, %v4743_v0 }
 0x609   :  { %v4935_v58 = vpop.permute.xlu0 %4934 }
 0x60a   :  { %v5128_v9 = vpop.permute.xlu1 %5127  ;;  %4970 = vst.msk [vmem:[#allocation6 + $0x68] sm:$0xff] %vm4956_vm6, %v4935_v58 }
 0x60b   :  { %5164 = vst.msk [vmem:[#allocation6 + $0x60] sm:$0xff] %vm5151_vm8, %v5128_v9 }
 0x60d   :  { %v4648_v6 = vpop.permute.xlu0 %4647 }
 0x60e   :  { %v4840_v33 = vpop.permute.xlu1 %4839  ;;  %4681 = vst.msk [vmem:[#allocation6 + $0x78] sm:$0xff] %vm4665_vm3, %v4648_v6  ;;  %vm5647_vm3 = vcmask 517504  }
 0x60f   :  { %4874 = vst.msk [vmem:[#allocation6 + $0x70] sm:$0xff] %vm4859_vm5, %v4840_v33 }
 0x611   :  { %v5033_v63 = vpop.permute.xlu0 %5032 }
 0x612   :  { %v5225_v11 = vpop.permute.xlu1 %5224  ;;  %5068 = vst.msk [vmem:[#allocation6 + $0x68] sm:$0xff] %vm5054_vm7, %v5033_v63 }
 0x613   :  { %5261 = vst.msk [vmem:[#allocation6 + $0x60] sm:$0xff] %vm5248_vm9, %v5225_v11 }
 0x615   :  { %v4745_v4 = vpop.permute.xlu0 %4744 }
 0x616   :  { %v4937_v57 = vpop.permute.xlu1 %4936  ;;  %4778 = vst.msk [vmem:[#allocation6 + $0x78] sm:$0xff] %vm4762_vm4, %v4745_v4  ;;  %vm5675_vm4 = vcmask 648704  }
 0x617   :  { %4971 = vst.msk [vmem:[#allocation6 + $0x70] sm:$0xff] %vm4956_vm6, %v4937_v57 }
 0x619   :  { %v5130_v17 = vpop.permute.xlu0 %5129 }
 0x61a   :  { %v4939_v42 = vpop.permute.xlu1 %4938  ;;  %v5277_v38 = vld [vmem:[#allocation6 + $0x60] sm:$0xff]  ;;  %5165 = vst.msk [vmem:[#allocation6 + $0x68] sm:$0xff] %vm5151_vm8, %v5130_v17 }
 0x61b   :  { %6420 = vmatprep.mubr.msk.f32.mxu1 %vm5297_vm10, %v5277_v38 }
 0x61d   :  { %v4842_v39 = vpop.permute.xlu0 %4841 }
 0x61e   :  { %v5037_v46 = vpop.permute.xlu1 %5036  ;;  %4875 = vst.msk [vmem:[#allocation6 + $0x78] sm:$0xff] %vm4859_vm5, %v4842_v39  ;;  %vm5687_vm5 = vcmask 779904  }
 0x61f   :  { %4972 = vst.msk [vmem:[#allocation6 + $0x78] sm:$0xff] %vm4956_vm6, %v4939_v42  ;;  %vm5701_vm6 = vcmask 911104  }
 0x620   :  { %5070 = vst.msk [vmem:[#allocation6 + $0x78] sm:$0xff] %vm5054_vm7, %v5037_v46 }
 0x621   :  { %v5227_v16 = vpop.permute.xlu0 %5226 }
 0x622   :  { %v5134_v47 = vpop.permute.xlu1 %5133  ;;  %5262 = vst.msk [vmem:[#allocation6 + $0x68] sm:$0xff] %vm5248_vm9, %v5227_v16 }
 0x623   :  { %5167 = vst.msk [vmem:[#allocation6 + $0x78] sm:$0xff] %vm5151_vm8, %v5134_v47 }
 0x625   :  { %v5035_v3 = vpop.permute.xlu0 %5034 }
 0x626   :  { %v5231_v37 = vpop.permute.xlu1 %5230  ;;  %5069 = vst.msk [vmem:[#allocation6 + $0x70] sm:$0xff] %vm5054_vm7, %v5035_v3  ;;  %vm5713_vm7 = vcmask 1042304  }
 0x627   :  { %5264 = vst.msk [vmem:[#allocation6 + $0x78] sm:$0xff] %vm5248_vm9, %v5231_v37 }
 0x629   :  { %v5132_v48 = vpop.permute.xlu0 %5131  ;;  %v5278_v52 = vld [vmem:[#allocation6 + $0x68] sm:$0xff] }
 0x62a   :  { %5166 = vst.msk [vmem:[#allocation6 + $0x70] sm:$0xff] %vm5151_vm8, %v5132_v48  ;;  %6421 = vmatmul.mubr.msk.f32.gmra.mrb[32].mxu1 %vm5297_vm10, %v5278_v52  ;;  %vm6578_vm8 = vmmov 0  }
 0x62d   :  { %v5229_v27 = vpop.permute.xlu0 %5228 }
 0x62e   :  { %5263 = vst.msk [vmem:[#allocation6 + $0x70] sm:$0xff] %vm5248_vm9, %v5229_v27  ;;  %v5280_v32 = vld [vmem:[#allocation6 + $0x78] sm:$0xff]  ;;  %vm5970_vm9 = vcmask 261120  }
 0x635   :  { %v5279_v15 = vld [vmem:[#allocation6 + $0x70] sm:$0xff] }
 0x636   :  { %6423 = vmatprep.mubr.msk.f32.mxu1 %vm5297_vm10, %v5279_v15 }
 0x637   :  { %6424 = vmatmul.mubr.msk.f32.gmra.mrb[34].mxu1 %vm5297_vm10, %v5280_v32  ;;  %vm6044_vm10 = vcmask 254976  }
 0x641   :  { %v6413_v24 = vpop.f32.mrb[26].mxu1 }
 0x642   :  { %v5448_v8 = vadd.f32 %v6413_v24, %v9136_v59  ;;  %v5442_v53 = vpop.f32.mrb[27].mxu1 }
 0x643   :  { %v5443_v49 = vadd.f32 %v9136_v59, %v5442_v53  ;;  %v5558_v53 = vld [vmem:[#allocation7 + $0x9] ss:$2 sm:$0xf] }
 0x644   :  { %v5498_v26 = vmax.f32 %v5448_v8, 0.0  ;;  %v5542_v8 = vld [vmem:[#allocation7 + $0x8] ss:$2 sm:$0xf] }
 0x645   :  { %v5497_v13 = vmax.f32 %v5443_v49, 0.0  ;;  %v5572_v49 = vmax.f32 %v5542_v8, %v5558_v53 }
 0x646   :  { %v5518_v56 = vsel %vm5507_vm11, %v5498_v26, -inf }
 0x647   :  { %v5517_v44 = vsel %vm5507_vm11, %v5497_v13, -inf  ;;  %v5657_v26 = vrot.slane %v5572_v49, %v9232_v54 }
 0x648   :  { %v5519_v45 = vmax.f32 %v5517_v44, %v5518_v56 }
 0x64a   :  { %5535 = vst.msk [vmem:[#allocation7 + $0x18] sm:$0xff] %vm5507_vm11, %v5519_v45 }
 0x651   :  { %v5546_v49 = vld [vmem:[#allocation7 + $0x18] ss:$2 sm:$0xf] }
 0x6b6   :  { %v6416_v35 = vpop.f32.mrb[28].mxu1 }
 0x6b7   :  { %v5458_v50 = vadd.f32 %v6416_v35, %v9136_v59  ;;  %v5452_v19 = vpop.f32.mrb[29].mxu1  ;;  %v5677_v35 = vrot.slane %v5657_v26, 1 }
 0x6b8   :  { %v5453_v41 = vadd.f32 %v9136_v59, %v5452_v19  ;;  %v5689_v19 = vcombine.high %v5657_v26, %v5657_v26 }
 0x6b9   :  { %v5500_v12 = vmax.f32 %v5458_v50, 0.0 }
 0x6ba   :  { %v5499_v18 = vmax.f32 %v5453_v41, 0.0  ;;  %v5703_v22 = vrot.slane %v5689_v19, 1 }
 0x6bb   :  { %v5521_v21 = vsel %vm5507_vm11, %v5500_v12, -inf }
 0x6bc   :  { %v5520_v43 = vsel %vm5507_vm11, %v5499_v18, -inf }
 0x6bd   :  { %v5522_v10 = vmax.f32 %v5520_v43, %v5521_v21 }
 0x6bf   :  { %5536 = vst.msk [vmem:[#allocation7 + $0x20] sm:$0xff] %vm5507_vm11, %v5522_v10 }
 0x6c6   :  { %v5548_v34 = vld [vmem:[#allocation7 + $0x20] ss:$2 sm:$0xf]  ;;  %v5564_v36 = vld [vmem:[#allocation7 + $0x21] ss:$2 sm:$0xf] }
 0x6c7   :  { %v5575_v30 = vmax.f32 %v5548_v34, %v5564_v36 }
 0x6c9   :  { %v5594_v31 = vrot.slane %v5575_v30, %v9232_v54 }
 0x6cb   :  { %v5614_v25 = vsel %vm5600_vm12, %v5594_v31, %v5611_v62  ;;  %v5624_v1 = vcombine.high %v5594_v31, %v5594_v31  ;;  %v5599_v5 = vrot.slane %v5594_v31, 7 }
 0x6cc   :  { %v5615_v14 = vsel %vm5602_vm13, %v5594_v31, %v5614_v25 }
 0x6cd   :  { %v5616_v0 = vsel %vm5604_vm14, %v5594_v31, %v5615_v14  ;;  %v5627_v58 = vrot.slane %v5624_v1, 7  ;;  %v5640_v9 = vsel %vm5600_vm12, %v5624_v1, %v5637_v7  ;;  %v5601_v6 = vsel %vm5600_vm12, %v5599_v5, %v5587_v23 }
 0x6ce   :  { %v5617_v33 = vsel %vm5606_vm15, %v5594_v31, %v5616_v0  ;;  %v5603_v63 = vsel %vm5602_vm13, %v5599_v5, %v5601_v6  ;;  %v5641_v17 = vsel %vm5602_vm13, %v5624_v1, %v5640_v9  ;;  %v5544_v0 = vld [vmem:[#allocation7 + $0x10] ss:$2 sm:$0xf]  ;;  %v5560_v9 = vld [vmem:[#allocation7 + $0x11] ss:$2 sm:$0xf] }
 0x6cf   :  { %5618 = vrot.lane.b32.xlu0 %v5617_v33, %s6567_s28  ;;  %v5628_v11 = vsel %vm5600_vm12, %v5627_v58, %v5623_v20  ;;  %v5605_v4 = vsel %vm5604_vm14, %v5599_v5, %v5603_v63  ;;  %v5642_v46 = vsel %vm5604_vm14, %v5624_v1, %v5641_v17  ;;  %v5573_v33 = vmax.f32 %v5544_v0, %v5560_v9  ;;  %v5845_v9 = vld [vmem:[%s9484_s5 + $0x38] sm:$0xff] }
 0x6d0   :  { %v5629_v57 = vsel %vm5602_vm13, %v5627_v58, %v5628_v11  ;;  %v5607_v42 = vsel %vm5606_vm15, %v5599_v5, %v5605_v4  ;;  %v5643_v47 = vsel %vm5606_vm15, %v5624_v1, %v5642_v46 }
 0x6d1   :  { %v5630_v38 = vsel %vm5604_vm14, %v5627_v58, %v5629_v57  ;;  %5610 = vst.msk [vmem:[#allocation8] sm:$0x3] %vm5609_vm1, %v5607_v42  ;;  %v5723_v11 = vrot.slane %v5573_v33, %v9232_v54 }
 0x6d2   :  { %v5631_v39 = vsel %vm5606_vm15, %v5627_v58, %v5630_v38 }
 0x6d3   :  { %5632 = vrot.lane.b32.xlu0 %v5631_v39, %s6568_s29 }
 0x6d6   :  { %v6419_v16 = vpop.f32.mrb[30].mxu1 }
 0x6d7   :  { %v5468_v3 = vadd.f32 %v6419_v16, %v9136_v59  ;;  %v5462_v37 = vpop.f32.mrb[31].mxu1  ;;  %5644 = vrot.lane.b32.xlu0 %v5643_v47, %s6570_s21  ;;  %v5751_v16 = vcombine.high %v5723_v11, %v5723_v11  ;;  %v5854_v47 = vld [vmem:[%s9484_s5 + $0x80] sm:$0xff] }
 0x6d8   :  { %v5463_v48 = vadd.f32 %v9136_v59, %v5462_v37 }
 0x6d9   :  { %v5502_v52 = vmax.f32 %v5468_v3, 0.0  ;;  %v5855_v3 = vld [vmem:[%s9484_s5 + $0x88] sm:$0xff] }
 0x6da   :  { %v5501_v27 = vmax.f32 %v5463_v48, 0.0 }
 0x6db   :  { %v5524_v32 = vsel %vm5507_vm11, %v5502_v52, -inf  ;;  %v6463_v52 = vpack.c.bf16 %v5855_v3, %v5854_v47  ;;  %v5847_v47 = vld [vmem:[%s9484_s5 + $0x48] sm:$0xff] }
 0x6dc   :  { %v5523_v15 = vsel %vm5507_vm11, %v5501_v27, -inf  ;;  %v5839_v27 = vld [vmem:[%s9484_s5 + $0x8] sm:$0xff] }
 0x6dd   :  { %v5525_v24 = vmax.f32 %v5523_v15, %v5524_v32  ;;  %v5740_v15 = vrot.slane %v5723_v11, 1  ;;  %6464 = vmatprep.subr.bf16.mxu1 %v6463_v52 }
 0x6df   :  { %5537 = vst.msk [vmem:[#allocation7 + $0x28] sm:$0xff] %vm5507_vm11, %v5525_v24 }
 0x6e6   :  { %v5550_v13 = vld [vmem:[#allocation7 + $0x28] ss:$2 sm:$0xf]  ;;  %v5566_v56 = vld [vmem:[#allocation7 + $0x29] ss:$2 sm:$0xf] }
 0x6e7   :  { %v5576_v44 = vmax.f32 %v5550_v13, %v5566_v56  ;;  %v5764_v13 = vrot.slane %v5751_v16, 1  ;;  %v5856_v56 = vld [vmem:[%s9484_s5 + $0x90] sm:$0xff] }
 0x6e9   :  { %v5664_v45 = vrot.slane %v5576_v44, %v9232_v54  ;;  %v5857_v44 = vld [vmem:[%s9484_s5 + $0x98] sm:$0xff] }
 0x6eb   :  { %v5667_v29 = vrot.slane %v5664_v45, 7  ;;  %v5680_v40 = vsel %vm5600_vm12, %v5664_v45, %v5677_v35  ;;  %v5690_v60 = vcombine.high %v5664_v45, %v5664_v45 }
 0x6ec   :  { %v5681_v18 = vsel %vm5602_vm13, %v5664_v45, %v5680_v40 }
 0x6ed   :  { %v5668_v50 = vsel %vm5600_vm12, %v5667_v29, %v5657_v26  ;;  %v5693_v41 = vrot.slane %v5690_v60, 7  ;;  %v5682_v21 = vsel %vm5604_vm14, %v5664_v45, %v5681_v18  ;;  %v5706_v10 = vsel %vm5600_vm12, %v5690_v60, %v5703_v22  ;;  %v5562_v26 = vld [vmem:[#allocation7 + $0x19] ss:$2 sm:$0xf] }
 0x6ee   :  { %v5669_v12 = vsel %vm5602_vm13, %v5667_v29, %v5668_v50  ;;  %v5683_v28 = vsel %vm5606_vm15, %v5664_v45, %v5682_v21  ;;  %v5707_v34 = vsel %vm5602_vm13, %v5690_v60, %v5706_v10  ;;  %v5840_v45 = vld [vmem:[%s9484_s5 + $0x10] sm:$0xff]  ;;  %v5841_v50 = vld [vmem:[%s9484_s5 + $0x18] sm:$0xff]  ;;  %v5574_v18 = vmax.f32 %v5546_v49, %v5562_v26  ;;  %v5843_v21 = vld [vmem:[%s9484_s5 + $0x28] sm:$0xff] }
 0x6ef   :  { %v5670_v61 = vsel %vm5604_vm14, %v5667_v29, %v5669_v12  ;;  %v5694_v51 = vsel %vm5600_vm12, %v5693_v41, %v5689_v19  ;;  %v5708_v20 = vsel %vm5604_vm14, %v5690_v60, %v5707_v34  ;;  %v5858_v19 = vld [vmem:[%s9484_s5 + $0xa0] sm:$0xff] }
 0x6f0   :  { %v5671_v55 = vsel %vm5606_vm15, %v5667_v29, %v5670_v61  ;;  %v5695_v43 = vsel %vm5602_vm13, %v5693_v41, %v5694_v51  ;;  %v5709_v30 = vsel %vm5606_vm15, %v5690_v60, %v5708_v20  ;;  %v6467_v60 = vpack.c.bf16 %v5857_v44, %v5856_v56 }
 0x6f1   :  { %5672 = vrot.lane.b32.xlu0 %v5671_v55, %s6572_s10  ;;  %v5696_v23 = vsel %vm5604_vm14, %v5693_v41, %v5695_v43  ;;  %v6469_v61 = vpack.c.bf16 %v5841_v50, %v5840_v45  ;;  %v5842_v55 = vld [vmem:[%s9484_s5 + $0x20] sm:$0xff]  ;;  %v5783_v0 = vrot.slane %v5574_v18, %v9232_v54  ;;  %v5868_v18 = vld [vmem:[%s9484_s5 + $0xf0] sm:$0xff] }
 0x6f2   :  { %v5697_v36 = vsel %vm5606_vm15, %v5693_v41, %v5696_v23  ;;  %v5859_v41 = vld [vmem:[%s9484_s5 + $0xa8] sm:$0xff] }
 0x6f3   :  { %v6471_v51 = vpack.c.bf16 %v5859_v41, %v5858_v19 }
 0x6f5   :  { %5684 = vrot.lane.b32.xlu0 %v5683_v28, %s6574_s4 }
 0x6f9   :  { %5698 = vrot.lane.b32.xlu0 %v5697_v36, %s6575_s18  ;;  %v6473_v36 = vpack.c.bf16 %v5843_v21, %v5842_v55 }
 0x6fd   :  { %v6422_v31 = vpop.f32.mrb[32].mxu1  ;;  %5710 = vrot.lane.b32.xlu0 %v5709_v30, %s6576_s30 }
 0x6fe   :  { %v5478_v62 = vadd.f32 %v6422_v31, %v9136_v59  ;;  %v5472_v7 = vpop.f32.mrb[33].mxu1 }
 0x6ff   :  { %v5473_v25 = vadd.f32 %v9136_v59, %v5472_v7 }
 0x700   :  { %v5504_v1 = vmax.f32 %v5478_v62, 0.0 }
 0x701   :  { %v5503_v5 = vmax.f32 %v5473_v25, 0.0  ;;  %v5860_v25 = vld [vmem:[%s9484_s5 + $0xb0] sm:$0xff] }
 0x702   :  { %v5527_v14 = vsel %vm5507_vm11, %v5504_v1, -inf  ;;  %v5861_v1 = vld [vmem:[%s9484_s5 + $0xb8] sm:$0xff] }
 0x703   :  { %v5526_v58 = vsel %vm5507_vm11, %v5503_v5, -inf  ;;  %v5844_v5 = vld [vmem:[%s9484_s5 + $0x30] sm:$0xff] }
 0x704   :  { %v5528_v6 = vmax.f32 %v5526_v58, %v5527_v14  ;;  %v6475_v58 = vpack.c.bf16 %v5861_v1, %v5860_v25 }
 0x706   :  { %5538 = vst.msk [vmem:[#allocation7 + $0x30] sm:$0xff] %vm5507_vm11, %v5528_v6 }
 0x70a   :  { %v6425_v63 = vpop.f32.mrb[34].mxu1 }
 0x70b   :  { %v5488_v4 = vadd.f32 %v6425_v63, %v9136_v59  ;;  %v5482_v57 = vpop.f32.mrb[35].mxu1 }
 0x70c   :  { %v5483_v17 = vadd.f32 %v9136_v59, %v5482_v57  ;;  %v5838_v59 = vld [vmem:[%s9484_s5] sm:$0xff] }
 0x70d   :  { %v5506_v42 = vmax.f32 %v5488_v4, 0.0  ;;  %v5552_v38 = vld [vmem:[#allocation7 + $0x30] ss:$2 sm:$0xf]  ;;  %v6465_v24 = vpack.c.bf16 %v5839_v27, %v5838_v59  ;;  %v5865_v27 = vld [vmem:[%s9484_s5 + $0xd8] sm:$0xff] }
 0x70e   :  { %v5505_v39 = vmax.f32 %v5483_v17, 0.0  ;;  %v5568_v46 = vld [vmem:[#allocation7 + $0x31] ss:$2 sm:$0xf]  ;;  %v5862_v17 = vld [vmem:[%s9484_s5 + $0xc0] sm:$0xff] }
 0x70f   :  { %v5530_v37 = vsel %vm5507_vm11, %v5506_v42, -inf  ;;  %v5577_v48 = vmax.f32 %v5552_v38, %v5568_v46  ;;  %6466 = vmatpush3.bf16.msra.mxu1 %v6465_v24  ;;  %v5863_v42 = vld [vmem:[%s9484_s5 + $0xc8] sm:$0xff]  ;;  %v5846_v38 = vld [vmem:[%s9484_s5 + $0x40] sm:$0xff]  ;;  %v5802_v46 = vrot.slane %v5783_v0, 1  ;;  %v5813_v24 = vcombine.high %v5783_v0, %v5783_v0 }
 0x710   :  { %v5529_v32 = vsel %vm5507_vm11, %v5505_v39, -inf  ;;  %6468 = vmatprep.subr.bf16.mxu1 %v6467_v60  ;;  %v5850_v60 = vld [vmem:[%s9484_s5 + $0x60] sm:$0xff] }
 0x711   :  { %v5531_v8 = vmax.f32 %v5529_v32, %v5530_v37  ;;  %v5730_v53 = vrot.slane %v5577_v48, %v9232_v54  ;;  %v6481_v37 = vpack.c.bf16 %v5847_v47, %v5846_v38  ;;  %v5848_v32 = vld [vmem:[%s9484_s5 + $0x50] sm:$0xff]  ;;  %v5826_v19 = vrot.slane %v5813_v24, 1  ;;  %v5960_v38 = vld [vmem:[%s9486_s7 + $0x8] sm:$0xff]  ;;  %v5962_v47 = vld [vmem:[%s9486_s7 + $0x18] sm:$0xff] }
 0x713   :  { %5539 = vst.msk [vmem:[#allocation7 + $0x38] sm:$0xff] %vm5507_vm11, %v5531_v8  ;;  %v5743_v35 = vsel %vm5600_vm12, %v5730_v53, %v5740_v15  ;;  %v5752_v29 = vcombine.high %v5730_v53, %v5730_v53  ;;  %v5733_v40 = vrot.slane %v5730_v53, 7  ;;  %6470 = vmatpush3.bf16.msra.mxu1 %v6469_v61  ;;  %v5869_v61 = vld [vmem:[%s9484_s5 + $0xf8] sm:$0xff] }
 0x714   :  { %v5744_v12 = vsel %vm5602_vm13, %v5730_v53, %v5743_v35  ;;  %6472 = vmatprep.subr.bf16.mxu1 %v6471_v51 }
 0x715   :  { %v5745_v22 = vsel %vm5604_vm14, %v5730_v53, %v5744_v12  ;;  %v5755_v43 = vrot.slane %v5752_v29, 7  ;;  %v5767_v10 = vsel %vm5600_vm12, %v5752_v29, %v5764_v13  ;;  %v5734_v28 = vsel %vm5600_vm12, %v5733_v40, %v5723_v11  ;;  %v5851_v12 = vld [vmem:[%s9484_s5 + $0x68] sm:$0xff] }
 0x716   :  { %v5746_v23 = vsel %vm5606_vm15, %v5730_v53, %v5745_v22  ;;  %v5735_v34 = vsel %vm5602_vm13, %v5733_v40, %v5734_v28  ;;  %v5768_v62 = vsel %vm5602_vm13, %v5752_v29, %v5767_v10  ;;  %v6477_v11 = vpack.c.bf16 %v5845_v9, %v5844_v5  ;;  %v5849_v53 = vld [vmem:[%s9484_s5 + $0x58] sm:$0xff] }
 0x717   :  { %5747 = vrot.lane.b32.xlu1 %v5746_v23, %s6567_s28  ;;  %v5756_v20 = vsel %vm5600_vm12, %v5755_v43, %v5751_v16  ;;  %v5736_v30 = vsel %vm5604_vm14, %v5733_v40, %v5735_v34  ;;  %6474 = vmatpush3.bf16.msra.mxu1 %v6473_v36  ;;  %v5769_v4 = vsel %vm5604_vm14, %v5752_v29, %v5768_v62  ;;  %v5853_v10 = vld [vmem:[%s9484_s5 + $0x78] sm:$0xff] }
 0x718   :  { %v5757_v31 = vsel %vm5602_vm13, %v5755_v43, %v5756_v20  ;;  %v5737_v7 = vsel %vm5606_vm15, %v5733_v40, %v5736_v30  ;;  %6476 = vmatprep.subr.bf16.mxu1 %v6475_v58  ;;  %v6479_v16 = vpack.c.bf16 %v5863_v42, %v5862_v17  ;;  %v5770_v3 = vsel %vm5606_vm15, %v5752_v29, %v5769_v4  ;;  %v5866_v29 = vld [vmem:[%s9484_s5 + $0xe0] sm:$0xff]  ;;  %v5867_v40 = vld [vmem:[%s9484_s5 + $0xe8] sm:$0xff] }
 0x719   :  { %v5758_v14 = vsel %vm5604_vm14, %v5755_v43, %v5757_v31  ;;  %5739 = vst.msk [vmem:[#allocation8 + $0x2] sm:$0x3] %vm5609_vm1, %v5737_v7  ;;  %v6485_v45 = vpack.c.bf16 %v5849_v53, %v5848_v32  ;;  %v6487_v41 = vpack.c.bf16 %v5867_v40, %v5866_v29  ;;  %v6489_v55 = vpack.c.bf16 %v5851_v12, %v5850_v60  ;;  %v5959_v42 = vld [vmem:[%s9486_s7] sm:$0xff] }
 0x71a   :  { %v5759_v6 = vsel %vm5606_vm15, %v5755_v43, %v5758_v14  ;;  %v5554_v33 = vld [vmem:[#allocation7 + $0x38] ss:$2 sm:$0xf]  ;;  %v5570_v63 = vld [vmem:[#allocation7 + $0x39] ss:$2 sm:$0xf]  ;;  %v6491_v22 = vpack.c.bf16 %v5869_v61, %v5868_v18 }
 0x71b   :  { %5760 = vrot.lane.b32.xlu1 %v5759_v6, %s6568_s29  ;;  %v5578_v57 = vmax.f32 %v5554_v33, %v5570_v63  ;;  %6478 = vmatpush3.bf16.msra.mxu1 %v6477_v11  ;;  %v5852_v43 = vld [vmem:[%s9484_s5 + $0x70] sm:$0xff]  ;;  %v6145_v32 = vld [vmem:[%s9487_s8] ss:$0 sm:$0xff] }
 0x71c   :  { %6480 = vmatprep.subr.bf16.mxu1 %v6479_v16  ;;  %v6493_v36 = vpack.c.bf16 %v5853_v10, %v5852_v43  ;;  %v5961_v16 = vld [vmem:[%s9486_s7 + $0x10] sm:$0xff]  ;;  %s6579_s7 = smov [#allocation9]  }
 0x71d   :  { %v5790_v39 = vrot.slane %v5578_v57, %v9232_v54  ;;  %v5864_v54 = vld [vmem:[%s9484_s5 + $0xd0] sm:$0xff]  ;;  %s6052_s15 = sshll.u32 %s6579_s7, 4  ;;  %s6053_s15 = int_to_ptr.vmem [resolvable:$true] %s6052_s15 }
 0x71e   :  { %v6483_v13 = vpack.c.bf16 %v5865_v27, %v5864_v54  ;;  %s6532_s28 = scalar_lea.vmem %s6053_s15, 32  ;;  %p6537_p1 = scmp.lt.s32.totalorder %s6053_s15, %s6053_s15 }
 0x71f   :  { %5771 = vrot.lane.b32.xlu1 %v5770_v3, %s6570_s21  ;;  %v5793_v48 = vrot.slane %v5790_v39, 7  ;;  %v5805_v52 = vsel %vm5600_vm12, %v5790_v39, %v5802_v46  ;;  %v5814_v59 = vcombine.high %v5790_v39, %v5790_v39  ;;  %6482 = vmatpush3.bf16.msra.mxu1 %v6481_v37  ;;  %v6496_v46 = vpack.c.bf16 %v5960_v38, %v5959_v42  ;;  %p6533_p0 = scmp.ne.s32.totalorder %s6053_s15, %s6532_s28  ;;  %p6538_p2 = scmp.lt.s32.totalorder %s6532_s28, %s6532_s28 }
 0x720   :  { %v5806_v26 = vsel %vm5602_vm13, %v5790_v39, %v5805_v52  ;;  %6484 = vmatprep.subr.bf16.mxu1 %v6483_v13  ;;  %v6499_v3 = vpack.c.bf16 %v5962_v47, %v5961_v16 }
 0x721   :  { %v5794_v15 = vsel %vm5600_vm12, %v5793_v48, %v5783_v0  ;;  %v5817_v8 = vrot.slane %v5814_v59, 7  ;;  %v5807_v50 = vsel %vm5604_vm14, %v5790_v39, %v5806_v26  ;;  %v5829_v21 = vsel %vm5600_vm12, %v5814_v59, %v5826_v19  ;;  %p6539_p3 = por %p6538_p2, %p6537_p1 }
 0x722   :  { %v5795_v49 = vsel %vm5602_vm13, %v5793_v48, %v5794_v15  ;;  %v5808_v28 = vsel %vm5606_vm15, %v5790_v39, %v5807_v50  ;;  %v5830_v34 = vsel %vm5602_vm13, %v5814_v59, %v5829_v21  ;;  %v6577_v39 = vmov 0.0|0.0  }
 0x723   :  { %v5796_v56 = vsel %vm5604_vm14, %v5793_v48, %v5795_v49  ;;  %v5818_v44 = vsel %vm5600_vm12, %v5817_v8, %v5813_v24  ;;  %6486 = vmatpush3.bf16.msra.mxu1 %v6485_v45  ;;  %v5831_v30 = vsel %vm5604_vm14, %v5814_v59, %v5830_v34  ;;  %p6540_p4 = pnand %p6539_p3, %p6533_p0 }
 0x724   :  { %v5797_v35 = vsel %vm5606_vm15, %v5793_v48, %v5796_v56  ;;  %v5819_v51 = vsel %vm5602_vm13, %v5817_v8, %v5818_v44  ;;  %6488 = vmatprep.subr.bf16.mxu1 %v6487_v41  ;;  %v5832_v31 = vsel %vm5606_vm15, %v5814_v59, %v5831_v30  ;;  %v6143_v48 = vld [vmem:[%s9485_s6] ss:$0 sm:$0xff] }
 0x725   :  { %5798 = vrot.lane.b32.xlu1 %v5797_v35, %s6572_s10  ;;  %v5820_v23 = vsel %vm5604_vm14, %v5817_v8, %v5819_v51 }
 0x726   :  { %v5821_v20 = vsel %vm5606_vm15, %v5817_v8, %v5820_v23 }
 0x727   :  { %6490 = vmatpush3.bf16.msra.mxu1 %v6489_v55 }
 0x728   :  { %6492 = vmatprep.subr.bf16.mxu1 %v6491_v22 }
 0x729   :  { %5809 = vrot.lane.b32.xlu1 %v5808_v28, %s6574_s4 }
 0x72b   :  { %6494 = vmatpush3.bf16.msra.mxu1 %v6493_v36 }
 0x72c   :  { %6495 = vmatprep.subr.bf16.mxu1 %v6577_v39 }
 0x72d   :  { %5822 = vrot.lane.b32.xlu1 %v5821_v20, %s6575_s18 }
 0x731   :  { %5833 = vrot.lane.b32.xlu1 %v5832_v31, %s6576_s30 }
 0x741   :  { %v5619_v62 = vpop.permute.xlu0 %5618 }
 0x742   :  { %5622 = vst.msk [vmem:[#allocation8] sm:$0x3] %vm5621_vm0, %v5619_v62 }
 0x745   :  { %v5633_v7 = vpop.permute.xlu0 %5632 }
 0x746   :  { %5636 = vst.msk [vmem:[#allocation8] sm:$0x3] %vm5635_vm2, %v5633_v7 }
 0x749   :  { %v5645_v25 = vpop.permute.xlu0 %5644 }
 0x74a   :  { %5648 = vst.msk [vmem:[#allocation8] sm:$0x3] %vm5647_vm3, %v5645_v25 }
 0x763   :  { %v5673_v1 = vpop.permute.xlu0 %5672 }
 0x764   :  { %5676 = vst.msk [vmem:[#allocation8] sm:$0x3] %vm5675_vm4, %v5673_v1 }
 0x767   :  { %v5685_v5 = vpop.permute.xlu0 %5684 }
 0x768   :  { %5688 = vst.msk [vmem:[#allocation8] sm:$0x3] %vm5687_vm5, %v5685_v5 }
 0x76b   :  { %v5699_v14 = vpop.permute.xlu0 %5698 }
 0x76c   :  { %5702 = vst.msk [vmem:[#allocation8] sm:$0x3] %vm5701_vm6, %v5699_v14 }
 0x76f   :  { %v5711_v0 = vpop.permute.xlu0 %5710 }
 0x770   :  { %5714 = vst.msk [vmem:[#allocation8] sm:$0x3] %vm5713_vm7, %v5711_v0 }
 0x789   :  { %v5748_v58 = vpop.permute.xlu1 %5747 }
 0x78a   :  { %5750 = vst.msk [vmem:[#allocation8 + $0x2] sm:$0x3] %vm5621_vm0, %v5748_v58 }
 0x78d   :  { %v5761_v9 = vpop.permute.xlu1 %5760 }
 0x78e   :  { %5763 = vst.msk [vmem:[#allocation8 + $0x2] sm:$0x3] %vm5635_vm2, %v5761_v9 }
 0x791   :  { %v5772_v6 = vpop.permute.xlu1 %5771 }
 0x792   :  { %5774 = vst.msk [vmem:[#allocation8 + $0x2] sm:$0x3] %vm5647_vm3, %v5772_v6 }
 0x797   :  { %v5799_v33 = vpop.permute.xlu1 %5798 }
 0x798   :  { %5801 = vst.msk [vmem:[#allocation8 + $0x2] sm:$0x3] %vm5675_vm4, %v5799_v33 }
 0x79b   :  { %v5810_v63 = vpop.permute.xlu1 %5809 }
 0x79c   :  { %5812 = vst.msk [vmem:[#allocation8 + $0x2] sm:$0x3] %vm5687_vm5, %v5810_v63 }
 0x79f   :  { %v5823_v11 = vpop.permute.xlu1 %5822 }
 0x7a0   :  { %5825 = vst.msk [vmem:[#allocation8 + $0x2] sm:$0x3] %vm5701_vm6, %v5823_v11 }
 0x7a3   :  { %v5834_v4 = vpop.permute.xlu1 %5833 }
 0x7a4   :  { %5836 = vst.msk [vmem:[#allocation8 + $0x2] sm:$0x3] %vm5713_vm7, %v5834_v4 }
 0x7ab   :  { %v6144_v57 = vld.sshfl [vmem:[#allocation8] sm:$0x33 pattern:$0x76325410] }
 0x7ac   :  { %v5885_v17 = vcombine.high %v6144_v57, %v6144_v57 }
 0x7ae   :  { %5952 = vmatprep.mubr.f32.mxu1 %v5885_v17 }
 0x7af   :  { %5953 = vmatmul.mubr.f32.vlgmr.msra.gmra.mrb[36].mxu1 %v6144_v57 }
 0x7b0   :  { %6497 = vmatpush3.bf16.msra.mxu1 %v6496_v46  ;;  %6434 = vmatprep.mubr.msk.f32.mxu1 %vm6578_vm8, %v6556_v2 }
 0x7b1   :  { %6498 = vmatprep.subr.bf16.mxu1 %v6577_v39 }
 0x7b4   :  { %6500 = vmatpush3.bf16.msra.mxu1 %v6499_v3 }
 0x882   :  { %v6272_v37 = vpop.f32.mrb[36].mxu1 }
 0x883   :  { %v6273_v52 = vpop.f32.mrb[37].mxu1 }
 0x884   :  { %v6274_v59 = vadd.f32 %v6273_v52, %v6272_v37 }
 0x886   :  { %v5955_v54 = vadd.f32 %v6274_v59, %v6143_v48 }
 0x888   :  { %v5958_v27 = vmax.f32 %v5955_v54, 0.0 }
 0x88a   :  { %6435 = vmatmul.mubr.msk.f32.vlgmr.msra.gmra.mrb[38].mxu1 %vm5970_vm9, %v5958_v27 }
 0x95d   :  { %v6040_v15 = vpop.f32.mrb[38].mxu1 }
 0x95e   :  { %v6041_v2 = vadd.f32 %v6145_v32, %v6040_v15  ;;  %v6436_v24 = vpop.f32.mrb[39].mxu1 }
 0x960   :  { %6045 = vst.msk [vmem:[#allocation9] sm:$0x3] %vm6044_vm10, %v6041_v2 }
 0x961   :  { %6543 = shalt.err (!%p6540_p4)
}
 0x962   :  { %s6544_s17 = scalar_lea.hbm %s9488_s9, 32 }
 0x963   :  { %p6545_p5 = scmp.ne.s32.totalorder %s9488_s9, %s6544_s17  ;;  %p6548_p6 = scmp.lt.u32.totalorder %s6544_s17, %s9488_s9 }
 0x965   :  { %p6550_p7 = pnand %p6548_p6, %p6545_p5 }
 0x967   :  { %6553 = shalt.err (!%p6550_p7)
}
 0x968   :  { %6055 = dma.vmem_to_hbm [thread:$0]  %s6053_s15, 32, %s9488_s9, [#allocation10]  }
 0x969   :  { %6554 = dma.done.wait [#allocation10], 32  }
 0x96a   :  { %6555 = vsyncadd [#allocation10], 4294967264 }
 0x96b   :  { %6059 = vsyncpa [#allocation10], 1 }

</bundles_post_ra>
